<compile_context>
chip_gen: v6e
topology: v6e:2x2x1
jax: 0.10.0
libtpu: 0.0.40
codegen_flags: <defaults>
</compile_context>

<pallas_src>
import functools

import jax
import jax.numpy as jnp
from jax.experimental import pallas as pl
from jax.experimental.pallas import tpu as pltpu

# MXU-native input dtype for GEMMs (accumulation + epilogue stay f32).
MATMUL_DTYPE = jnp.bfloat16

_MM_TM = 512      # matmul row-tile target (multiple of 16 for bf16 sublanes)
_LN_TM = 1024     # channelwise-LN row-tile target (multiple of 8)
_VMEM_GEMM = 32 * 1024 * 1024
_VMEM_BIG = 64 * 1024 * 1024


# ----------------------------------------------------------------------------
# Pallas kernels
# ----------------------------------------------------------------------------
def _mm_kernel(*refs, has_scale, has_shift, has_res, has_mult, act):
    """y = act((a @ w) [* scale] [+ shift] [+ residual]) [* ew_mult]."""
    it = iter(refs)
    a_ref = next(it)
    w_ref = next(it)
    scale_ref = next(it) if has_scale else None
    shift_ref = next(it) if has_shift else None
    res_ref = next(it) if has_res else None
    mult_ref = next(it) if has_mult else None
    pw_ref = next(it) if act == "prelu" else None
    o_ref = next(it)

    y = jnp.dot(a_ref[...], w_ref[...], preferred_element_type=jnp.float32)
    if has_scale:
        y = y * scale_ref[...]
    if has_shift:
        y = y + shift_ref[...]
    if has_res:
        y = y + res_ref[...]
    if act == "relu":
        y = jnp.maximum(y, 0.0)
    elif act == "prelu":
        alpha = pw_ref[0]                      # scalar PReLU slope from SMEM
        y = jnp.where(y > 0.0, y, alpha * y)
    if has_mult:
        y = y * mult_ref[...]
    o_ref[...] = y.astype(o_ref.dtype)


def pallas_matmul(a, w, *, scale=None, shift=None, residual=None, ew_mult=None,
                  prelu=None, act="none"):
    """Row-tiled fused GEMM. a:[M,K], w:[K,N] -> [M,N] float32."""
    M, K = a.shape
    _, N = w.shape
    has_scale = scale is not None
    has_shift = shift is not None
    has_res = residual is not None
    has_mult = ew_mult is not None

    tm = M if M <= _MM_TM else _MM_TM          # full (always legal) or 512-tile
    grid = (pl.cdiv(M, tm),)

    operands = [a.astype(MATMUL_DTYPE), w.astype(MATMUL_DTYPE)]
    in_specs = [pl.BlockSpec((tm, K), lambda i: (i, 0)),
                pl.BlockSpec((K, N), lambda i: (0, 0))]
    if has_scale:
        operands.append(jnp.reshape(scale, (1, N)).astype(jnp.float32))
        in_specs.append(pl.BlockSpec((1, N), lambda i: (0, 0)))
    if has_shift:
        operands.append(jnp.reshape(shift, (1, N)).astype(jnp.float32))
        in_specs.append(pl.BlockSpec((1, N), lambda i: (0, 0)))
    if has_res:
        operands.append(residual.astype(jnp.float32))
        in_specs.append(pl.BlockSpec((tm, N), lambda i: (i, 0)))
    if has_mult:
        operands.append(ew_mult.astype(jnp.float32))
        in_specs.append(pl.BlockSpec((tm, N), lambda i: (i, 0)))
    if act == "prelu":
        operands.append(jnp.reshape(jnp.asarray(prelu, jnp.float32), (1,)))
        in_specs.append(pl.BlockSpec(memory_space=pltpu.MemorySpace.SMEM))

    kernel = functools.partial(_mm_kernel, has_scale=has_scale,
                               has_shift=has_shift, has_res=has_res,
                               has_mult=has_mult, act=act)
    return pl.pallas_call(
        kernel,
        out_shape=jax.ShapeDtypeStruct((M, N), jnp.float32),
        grid=grid,
        in_specs=in_specs,
        out_specs=pl.BlockSpec((tm, N), lambda i: (i, 0)),
        compiler_params=pltpu.CompilerParams(
            dimension_semantics=("parallel",),
            vmem_limit_bytes=_VMEM_GEMM),
    )(*operands)


def _cln_kernel(x_ref, g_ref, b_ref, o_ref, *, eps):
    x = x_ref[...]
    mean = jnp.mean(x, axis=-1, keepdims=True)
    ms = jnp.mean(x * x, axis=-1, keepdims=True)
    inv = jax.lax.rsqrt(ms - mean * mean + eps)
    o_ref[...] = (x - mean) * inv * g_ref[...] + b_ref[...]


def channelwise_layernorm(x, gamma, beta, eps=1e-5):
    """x: [B, T, C] -> LayerNorm over C (torch ChannelwiseLayerNorm)."""
    B, T, C = x.shape
    M = B * T
    tm = M if M <= _LN_TM else _LN_TM
    y = pl.pallas_call(
        functools.partial(_cln_kernel, eps=eps),
        out_shape=jax.ShapeDtypeStruct((M, C), jnp.float32),
        grid=(pl.cdiv(M, tm),),
        in_specs=[pl.BlockSpec((tm, C), lambda i: (i, 0)),
                  pl.BlockSpec((1, C), lambda i: (0, 0)),
                  pl.BlockSpec((1, C), lambda i: (0, 0))],
        out_specs=pl.BlockSpec((tm, C), lambda i: (i, 0)),
        compiler_params=pltpu.CompilerParams(
            dimension_semantics=("parallel",),
            vmem_limit_bytes=_VMEM_GEMM),
    )(x.reshape(M, C).astype(jnp.float32), gamma.reshape(1, C),
      beta.reshape(1, C))
    return y.reshape(B, T, C)


def _gln_kernel(x_ref, g_ref, b_ref, pw_ref, o_ref, *, eps, fuse_prelu, inv_n):
    x = x_ref[0]                               # [T, C]
    if fuse_prelu:
        alpha = pw_ref[0]
        x = jnp.where(x > 0.0, x, alpha * x)
    mean = jnp.sum(x) * inv_n
    ms = jnp.sum(x * x) * inv_n
    inv = jax.lax.rsqrt(ms - mean * mean + eps)
    o_ref[0] = g_ref[...] * (x - mean) * inv + b_ref[...]


def global_layernorm(x, gamma, beta, prelu=None, eps=1e-5):
    """x: [B, T, C]; mean/var over (T, C) per batch; per-channel affine.
       Optionally fuses a preceding scalar PReLU (TCN pattern norm(prelu(y)))."""
    B, T, C = x.shape
    fuse = prelu is not None
    pw = jnp.reshape(jnp.asarray(0.0 if prelu is None else prelu, jnp.float32),
                     (1,))
    # TODO(synk): for very large T on v7x (64 MiB VMEM) switch to a two-pass
    # (accumulate sum/sumsq over T-tiles, then normalize) GLN.
    return pl.pallas_call(
        functools.partial(_gln_kernel, eps=eps, fuse_prelu=fuse,
                          inv_n=1.0 / (T * C)),
        out_shape=jax.ShapeDtypeStruct((B, T, C), jnp.float32),
        grid=(B,),
        in_specs=[
            pl.BlockSpec((1, T, C), lambda b: (b, 0, 0)),
            pl.BlockSpec((1, C), lambda b: (0, 0)),
            pl.BlockSpec((1, C), lambda b: (0, 0)),
            pl.BlockSpec(memory_space=pltpu.MemorySpace.SMEM),
        ],
        out_specs=pl.BlockSpec((1, T, C), lambda b: (b, 0, 0)),
        compiler_params=pltpu.CompilerParams(
            dimension_semantics=("parallel",),
            vmem_limit_bytes=_VMEM_BIG),
    )(x.astype(jnp.float32), gamma.reshape(1, C), beta.reshape(1, C), pw)


def _dwconv_prelu_gln_kernel(x_ref, w_ref, b_ref, pw_ref, g_ref, be_ref, o_ref,
                             *, dilation, T, eps, inv_n):
    """Fused: depthwise conv (k=3, dilation d, 'same' pad) + PReLU + GLN."""
    x = x_ref[0]                               # [T + 2*d, C] (pre-padded)
    d = dilation
    y = (x[0:T, :] * w_ref[0:1, :]
         + x[d:d + T, :] * w_ref[1:2, :]
         + x[2 * d:2 * d + T, :] * w_ref[2:3, :]
         + b_ref[...])
    alpha = pw_ref[0]
    y = jnp.where(y > 0.0, y, alpha * y)
    mean = jnp.sum(y) * inv_n
    ms = jnp.sum(y * y) * inv_n
    inv = jax.lax.rsqrt(ms - mean * mean + eps)
    o_ref[0] = g_ref[...] * (y - mean) * inv + be_ref[...]


def dwconv_prelu_gln(x, w, bias, prelu, gamma, beta, dilation, eps=1e-5):
    """x: [B, T, C] -> GLN(PReLU(depthwise_conv3(x))) in one per-batch kernel."""
    B, T, C = x.shape
    pad = dilation
    xp = jnp.pad(x, ((0, 0), (pad, pad), (0, 0)))
    Tp = T + 2 * pad
    pw = jnp.reshape(jnp.asarray(prelu, jnp.float32), (1,))
    return pl.pallas_call(
        functools.partial(_dwconv_prelu_gln_kernel, dilation=dilation, T=T,
                          eps=eps, inv_n=1.0 / (T * C)),
        out_shape=jax.ShapeDtypeStruct((B, T, C), jnp.float32),
        grid=(B,),
        in_specs=[
            pl.BlockSpec((1, Tp, C), lambda b: (b, 0, 0)),
            pl.BlockSpec((3, C), lambda b: (0, 0)),
            pl.BlockSpec((1, C), lambda b: (0, 0)),
            pl.BlockSpec(memory_space=pltpu.MemorySpace.SMEM),
            pl.BlockSpec((1, C), lambda b: (0, 0)),
            pl.BlockSpec((1, C), lambda b: (0, 0)),
        ],
        out_specs=pl.BlockSpec((1, T, C), lambda b: (b, 0, 0)),
        compiler_params=pltpu.CompilerParams(
            dimension_semantics=("parallel",),
            vmem_limit_bytes=_VMEM_BIG),
    )(xp.astype(jnp.float32), w.astype(jnp.float32), bias.reshape(1, C), pw,
      gamma.reshape(1, C), beta.reshape(1, C))


# ----------------------------------------------------------------------------
# Module building blocks (thin JAX wrappers around the Pallas kernels)
# ----------------------------------------------------------------------------
def conv1x1(x, w, bias=None, scale=None, shift=None, residual=None,
            ew_mult=None, prelu_w=None, act="none"):
    B, T, Cin = x.shape
    Cout = w.shape[1]
    if bias is not None:
        shift = bias
    res = None if residual is None else residual.reshape(B * T, Cout)
    mult = None if ew_mult is None else ew_mult.reshape(B * T, Cout)
    y = pallas_matmul(x.reshape(B * T, Cin), w, scale=scale, shift=shift,
                      residual=res, ew_mult=mult, prelu=prelu_w, act=act)
    return y.reshape(B, T, Cout)


def build_fused_encoder_weights(params):
    """Block-sparse [L3, 3N] weight so one GEMM computes all three encoders."""
    N = params["enc1_w"].shape[1]
    L1 = params["enc1_w"].shape[0]
    L2 = params["enc2_w"].shape[0]
    L3 = params["enc3_w"].shape[0]
    w = jnp.zeros((L3, 3 * N), jnp.float32)
    w = w.at[:L1, 0 * N:1 * N].set(params["enc1_w"])
    w = w.at[:L2, 1 * N:2 * N].set(params["enc2_w"])
    w = w.at[:L3, 2 * N:3 * N].set(params["enc3_w"])
    b = jnp.concatenate([params["enc1_b"], params["enc2_b"], params["enc3_b"]])
    return w, b


def fused_encoders(sig, enc_w, enc_b, L3, stride, T):
    """All 3 strided encoders + ReLU in one GEMM. sig: [B, len] -> [B, T, 3N]."""
    B, slen = sig.shape
    need = (T - 1) * stride + L3
    if need > slen:
        sig = jnp.pad(sig, ((0, 0), (0, need - slen)))
    # TODO(synk): the frame unfold is a plain-JAX gather (done once for all
    # three encoder scales); an in-kernel strided unfold would avoid the
    # duplicated [B, T, L3] frame buffer entirely.
    idx = jnp.arange(T)[:, None] * stride + jnp.arange(L3)[None, :]
    frames = sig[:, idx]                                   # [B, T, L3]
    y = pallas_matmul(frames.reshape(B * T, L3), enc_w, shift=enc_b, act="relu")
    return y.reshape(B, T, -1)


def decoder_convtrans(S, w, bias, L, stride):
    """ConvTranspose1d(N, 1, L, stride). S: [B, T, N] -> [B, (T-1)*stride+L].
       Overlap-add via L//stride dense shifted adds (no scatter)."""
    B, T, N = S.shape
    frames = pallas_matmul(S.reshape(B * T, N), w).reshape(B, T, L)
    out_len = (T - 1) * stride + L
    assert L % stride == 0
    seg_len = T * stride
    out = jnp.zeros((B, out_len), jnp.float32)
    for g in range(L // stride):
        seg = frames[:, :, g * stride:(g + 1) * stride].reshape(B, seg_len)
        out = out + jnp.pad(seg, ((0, 0),
                                  (g * stride, out_len - seg_len - g * stride)))
    return out + bias                          # ConvTranspose bias (scalar)


def tcn_block(x, p, dilation):
    y = conv1x1(x, p["w1"], bias=p["b1"])
    y = global_layernorm(y, p["g1"], p["be1"], prelu=p["p1"])
    y = dwconv_prelu_gln(y, p["dw"], p["db"], p["p2"], p["g2"], p["be2"],
                         dilation)
    y = conv1x1(y, p["ws"], bias=p["bs"], residual=x)       # sconv + residual
    return y


def tcn_block_spk(x, spk_emb, p, dilation):
    B, T, _ = x.shape
    aux = jnp.broadcast_to(spk_emb[:, None, :], (B, T, spk_emb.shape[-1]))
    y = jnp.concatenate([x, aux], axis=-1)
    y = conv1x1(y, p["w1"], bias=p["b1"])
    y = global_layernorm(y, p["g1"], p["be1"], prelu=p["p1"])
    y = dwconv_prelu_gln(y, p["dw"], p["db"], p["p2"], p["g2"], p["be2"],
                         dilation)
    y = conv1x1(y, p["ws"], bias=p["bs"], residual=x)
    return y


def res_block(x, p, downsample):
    # TODO(synk): BatchNorm1d assumed in eval mode; running stats (0, 1) folded
    # into a per-channel affine applied in the matmul epilogue.
    y = conv1x1(x, p["w1"], scale=p["bn1_s"], shift=p["bn1_b"],
                prelu_w=p["p1"], act="prelu")
    res = conv1x1(x, p["wd"]) if downsample else x
    y = conv1x1(y, p["w2"], scale=p["bn2_s"], shift=p["bn2_b"],
                residual=res, prelu_w=p["p2"], act="prelu")
    # MaxPool1d(kernel=3, stride=3), floor mode — tiny, plain JAX glue
    B, T, C = y.shape
    Tp = (T // 3) * 3
    return y[:, :Tp].reshape(B, T // 3, 3, C).max(axis=2)


def spk_encoder(x, p):
    y = channelwise_layernorm(x, p["ln_g"], p["ln_b"])
    y = conv1x1(y, p["proj_w"], bias=p["proj_b"])
    y = res_block(y, p["rb1"], downsample=False)
    y = res_block(y, p["rb2"], downsample=True)
    y = res_block(y, p["rb3"], downsample=False)
    y = conv1x1(y, p["out_w"], bias=p["out_b"])
    return y


# ----------------------------------------------------------------------------
# Full forward pass
# ----------------------------------------------------------------------------
def spex_plus_forward(params, mix, ref, ref_lengths, cfg):
    L1, L2, L3 = cfg["L1"], cfg["L2"], cfg["L3"]
    N = cfg["N"]
    stride = L1 // 2
    xlen1 = mix.shape[-1]
    T = (xlen1 - L1) // stride + 1

    enc_w, enc_b = build_fused_encoder_weights(params)

    # --- mixture encoders (one wide GEMM on L3-length frames) ---
    w_all = fused_encoders(mix, enc_w, enc_b, L3, stride, T)   # [B, T, 3N]
    y = channelwise_layernorm(w_all, params["ln_g"], params["ln_b"])
    y = conv1x1(y, params["proj_w"], bias=params["proj_b"])    # [B, T, O]

    # --- reference / speaker branch ---
    aT = (ref.shape[-1] - L1) // stride + 1
    aux_all = fused_encoders(ref, enc_w, enc_b, L3, stride, aT)
    aux = spk_encoder(aux_all, params["spk"])                  # [B, T', D]
    aux_T = (ref_lengths - L1) // (L1 // 2) + 1
    aux_T = aux_T // 3 // 3 // 3
    spk_emb = jnp.sum(aux, axis=1) / aux_T[:, None].astype(jnp.float32)

    # --- TCN stacks ---
    for sp in params["stacks"]:
        y = tcn_block_spk(y, spk_emb, sp["spk_block"], dilation=1)
        for bi, bp in enumerate(sp["blocks"]):
            y = tcn_block(y, bp, dilation=2 ** (bi + 1))

    # --- masks: one wide GEMM, masking multiply (S = w * m) fused in epilogue
    mask_w = jnp.concatenate([params["m1_w"], params["m2_w"], params["m3_w"]],
                             axis=1)
    mask_b = jnp.concatenate([params["m1_b"], params["m2_b"], params["m3_b"]])
    S_all = conv1x1(y, mask_w, bias=mask_b, act="relu", ew_mult=w_all)
    S1 = S_all[..., 0 * N:1 * N]
    S2 = S_all[..., 1 * N:2 * N]
    S3 = S_all[..., 2 * N:3 * N]

    s1 = decoder_convtrans(S1, params["dec1_w"], params["dec1_b"], L1, stride)
    s2 = decoder_convtrans(S2, params["dec2_w"], params["dec2_b"], L2,
                           stride)[:, :xlen1]
    s3 = decoder_convtrans(S3, params["dec3_w"], params["dec3_b"], L3,
                           stride)[:, :xlen1]
    spk_pred = pallas_matmul(spk_emb, params["pred_w"], shift=params["pred_b"])
    return {"s1": s1, "s2": s2, "s3": s3, "spk_pred": spk_pred}


# ----------------------------------------------------------------------------
# Deterministic parameter initialization
# ----------------------------------------------------------------------------
class KeyGen:
    def __init__(self, key):
        self.key = key

    def __call__(self):
        self.key, sub = jax.random.split(self.key)
        return sub


def nrm(kg, shape, scale=0.1):
    return jax.random.normal(kg(), shape, jnp.float32) * scale


def bn_fold(gamma, beta, mean, var, eps=1e-5):
    s = gamma / jnp.sqrt(var + eps)
    return s, beta - mean * s


def make_tcn_params(kg, in_ch, conv_ch, in_extra=0):
    cin = in_ch + in_extra
    return dict(
        w1=nrm(kg, (cin, conv_ch)), b1=nrm(kg, (conv_ch,)),
        p1=jnp.array(0.25, jnp.float32),
        g1=1.0 + nrm(kg, (conv_ch,), 0.05), be1=nrm(kg, (conv_ch,), 0.05),
        dw=nrm(kg, (3, conv_ch)), db=nrm(kg, (conv_ch,)),
        p2=jnp.array(0.25, jnp.float32),
        g2=1.0 + nrm(kg, (conv_ch,), 0.05), be2=nrm(kg, (conv_ch,), 0.05),
        ws=nrm(kg, (conv_ch, in_ch)), bs=nrm(kg, (in_ch,)),
    )


def make_resblock_params(kg, cin, cout):
    g1, b1 = 1.0 + nrm(kg, (cout,), 0.05), nrm(kg, (cout,), 0.05)
    g2, b2 = 1.0 + nrm(kg, (cout,), 0.05), nrm(kg, (cout,), 0.05)
    s1, sh1 = bn_fold(g1, b1, jnp.zeros((cout,)), jnp.ones((cout,)))
    s2, sh2 = bn_fold(g2, b2, jnp.zeros((cout,)), jnp.ones((cout,)))
    p = dict(w1=nrm(kg, (cin, cout)), w2=nrm(kg, (cout, cout)),
             bn1_s=s1, bn1_b=sh1, bn2_s=s2, bn2_b=sh2,
             p1=jnp.array(0.25, jnp.float32), p2=jnp.array(0.25, jnp.float32))
    if cin != cout:
        p["wd"] = nrm(kg, (cin, cout))
    return p


def init_params(kg, cfg):
    L1, L2, L3 = cfg["L1"], cfg["L2"], cfg["L3"]
    N, O, P, D = cfg["N"], cfg["O"], cfg["P"], cfg["spk_embed_dim"]
    Bblk, nspk = cfg["B"], cfg["num_spks"]
    p = {}
    p["enc1_w"], p["enc1_b"] = nrm(kg, (L1, N)), nrm(kg, (N,))
    p["enc2_w"], p["enc2_b"] = nrm(kg, (L2, N)), nrm(kg, (N,))
    p["enc3_w"], p["enc3_b"] = nrm(kg, (L3, N)), nrm(kg, (N,))
    p["ln_g"], p["ln_b"] = 1.0 + nrm(kg, (3 * N,), 0.05), nrm(kg, (3 * N,), 0.05)
    p["proj_w"], p["proj_b"] = nrm(kg, (3 * N, O)), nrm(kg, (O,))
    stacks = []
    for _ in range(4):
        stacks.append(dict(
            spk_block=make_tcn_params(kg, O, P, in_extra=D),
            blocks=[make_tcn_params(kg, O, P) for _ in range(1, Bblk)],
        ))
    p["stacks"] = stacks
    p["m1_w"], p["m1_b"] = nrm(kg, (O, N)), nrm(kg, (N,))
    p["m2_w"], p["m2_b"] = nrm(kg, (O, N)), nrm(kg, (N,))
    p["m3_w"], p["m3_b"] = nrm(kg, (O, N)), nrm(kg, (N,))
    p["dec1_w"], p["dec1_b"] = nrm(kg, (N, L1)), nrm(kg, (1,))
    p["dec2_w"], p["dec2_b"] = nrm(kg, (N, L2)), nrm(kg, (1,))
    p["dec3_w"], p["dec3_b"] = nrm(kg, (N, L3)), nrm(kg, (1,))
    p["spk"] = dict(
        ln_g=1.0 + nrm(kg, (3 * N,), 0.05), ln_b=nrm(kg, (3 * N,), 0.05),
        proj_w=nrm(kg, (3 * N, O)), proj_b=nrm(kg, (O,)),
        rb1=make_resblock_params(kg, O, O),
        rb2=make_resblock_params(kg, O, P),
        rb3=make_resblock_params(kg, P, P),
        out_w=nrm(kg, (P, D)), out_b=nrm(kg, (D,)),
    )
    p["pred_w"], p["pred_b"] = nrm(kg, (D, nspk)), nrm(kg, (nspk,))
    return p


# ----------------------------------------------------------------------------
if __name__ == "__main__":
    # small but forward-consistent hyperparameters
    cfg = dict(L1=4, L2=8, L3=16, N=64, B=2, O=64, P=128, Q=3,
               num_spks=16, spk_embed_dim=64)

    base_key = jax.random.PRNGKey(0)
    k_param, k_mix, k_ref = jax.random.split(base_key, 3)
    params = init_params(KeyGen(k_param), cfg)

    batch, sig_len = 2, 128
    mix = jax.random.normal(k_mix, (batch, sig_len), jnp.float32)
    ref = jax.random.normal(k_ref, (batch, sig_len), jnp.float32)
    ref_lengths = jnp.array([sig_len, sig_len], jnp.int32)

    fwd = jax.jit(functools.partial(spex_plus_forward, cfg=cfg))
    out = jax.block_until_ready(fwd(params, mix, ref, ref_lengths))

    assert out["s1"].shape == (batch, sig_len)
    assert out["s2"].shape == (batch, sig_len)
    assert out["s3"].shape == (batch, sig_len)
    assert out["spk_pred"].shape == (batch, cfg["num_spks"])
    assert all(bool(jnp.all(jnp.isfinite(v))) for v in out.values())
    print("KERNEL_OK")
</pallas_src>

<mosaic_0001>
module attributes {stable_mosaic.version = 11 : i64} {
  func.func @_cln_kernel(%arg0: i32, %arg1: memref<126x192xf32, #tpu.memory_space<vmem>>, %arg2: memref<1x192xf32, #tpu.memory_space<vmem>>, %arg3: memref<1x192xf32, #tpu.memory_space<vmem>>, %arg4: memref<126x192xf32, #tpu.memory_space<vmem>>) attributes {dimension_semantics = [#tpu.dimension_semantics<parallel>], iteration_bounds = array<i64: 1>, scalar_prefetch = 0 : i64, scratch_operands = 0 : i64, tpu.core_type = #tpu.core_type<tc>, window_params = [{transform_indices = @transform_0, window_bounds = array<i64: 126, 192>}, {pipeline_mode = #tpu.pipeline_mode<synchronous>, transform_indices = @transform_1, window_bounds = array<i64: 1, 192>}, {pipeline_mode = #tpu.pipeline_mode<synchronous>, transform_indices = @transform_2, window_bounds = array<i64: 1, 192>}, {transform_indices = @transform_3, window_bounds = array<i64: 126, 192>}]} {
    %c0 = arith.constant 0 : index
    %c0_0 = arith.constant 0 : index
    %0 = vector.load %arg1[%c0, %c0_0] : memref<126x192xf32, #tpu.memory_space<vmem>>, vector<126x192xf32>
    %cst = arith.constant dense<0.000000e+00> : vector<126xf32>
    %1 = vector.multi_reduction <add>, %0, %cst [1] : vector<126x192xf32> to vector<126xf32>
    %2 = vector.shape_cast %1 : vector<126xf32> to vector<126x1xf32>
    %cst_1 = arith.constant 1.920000e+02 : f32
    %3 = vector.broadcast %cst_1 : f32 to vector<126x1xf32>
    %4 = arith.divf %2, %3 : vector<126x1xf32>
    %5 = arith.mulf %0, %0 : vector<126x192xf32>
    %cst_2 = arith.constant dense<0.000000e+00> : vector<126xf32>
    %6 = vector.multi_reduction <add>, %5, %cst_2 [1] : vector<126x192xf32> to vector<126xf32>
    %7 = vector.shape_cast %6 : vector<126xf32> to vector<126x1xf32>
    %cst_3 = arith.constant 1.920000e+02 : f32
    %8 = vector.broadcast %cst_3 : f32 to vector<126x1xf32>
    %9 = arith.divf %7, %8 : vector<126x1xf32>
    %10 = arith.mulf %4, %4 : vector<126x1xf32>
    %11 = arith.subf %9, %10 : vector<126x1xf32>
    %cst_4 = arith.constant 9.99999974E-6 : f32
    %12 = vector.broadcast %cst_4 : f32 to vector<126x1xf32>
    %13 = arith.addf %11, %12 : vector<126x1xf32>
    %14 = math.rsqrt %13 : vector<126x1xf32>
    %15 = vector.broadcast %4 : vector<126x1xf32> to vector<126x192xf32>
    %16 = arith.subf %0, %15 : vector<126x192xf32>
    %17 = vector.broadcast %14 : vector<126x1xf32> to vector<126x192xf32>
    %18 = arith.mulf %16, %17 : vector<126x192xf32>
    %c0_5 = arith.constant 0 : index
    %c0_6 = arith.constant 0 : index
    %19 = vector.load %arg2[%c0_5, %c0_6] : memref<1x192xf32, #tpu.memory_space<vmem>>, vector<1x192xf32>
    %20 = vector.broadcast %19 : vector<1x192xf32> to vector<126x192xf32>
    %21 = arith.mulf %18, %20 : vector<126x192xf32>
    %c0_7 = arith.constant 0 : index
    %c0_8 = arith.constant 0 : index
    %22 = vector.load %arg3[%c0_7, %c0_8] : memref<1x192xf32, #tpu.memory_space<vmem>>, vector<1x192xf32>
    %23 = vector.broadcast %22 : vector<1x192xf32> to vector<126x192xf32>
    %24 = arith.addf %21, %23 : vector<126x192xf32>
    %c0_9 = arith.constant 0 : index
    %c0_10 = arith.constant 0 : index
    %25 = vector.load %arg4[%c0_9, %c0_10] : memref<126x192xf32, #tpu.memory_space<vmem>>, vector<126x192xf32>
    tpu.vector_store %arg4[%c0_9, %c0_10], %24 {strides = array<i32>} : memref<126x192xf32, #tpu.memory_space<vmem>>, vector<126x192xf32>,
    return
  }
  func.func @transform_0(%arg0: i32) -> (i32, i32) {
    %c0_i32 = arith.constant 0 : i32
    %c0_i32_0 = arith.constant 0 : i32
    return %arg0, %c0_i32 : i32, i32
  }
  func.func @transform_1(%arg0: i32) -> (i32, i32) {
    %c0_i32 = arith.constant 0 : i32
    %c0_i32_0 = arith.constant 0 : i32
    %c0_i32_1 = arith.constant 0 : i32
    return %c0_i32, %c0_i32_0 : i32, i32
  }
  func.func @transform_2(%arg0: i32) -> (i32, i32) {
    %c0_i32 = arith.constant 0 : i32
    %c0_i32_0 = arith.constant 0 : i32
    %c0_i32_1 = arith.constant 0 : i32
    return %c0_i32, %c0_i32_0 : i32, i32
  }
  func.func @transform_3(%arg0: i32) -> (i32, i32) {
    %c0_i32 = arith.constant 0 : i32
    %c0_i32_0 = arith.constant 0 : i32
    return %arg0, %c0_i32 : i32, i32
  }
}

module attributes {stable_mosaic.version = 11 : i64} {
  func.func @_mm_kernel(%arg0: i32, %arg1: memref<126x16xbf16, #tpu.memory_space<vmem>>, %arg2: memref<16x192xbf16, #tpu.memory_space<vmem>>, %arg3: memref<1x192xf32, #tpu.memory_space<vmem>>, %arg4: memref<126x192xf32, #tpu.memory_space<vmem>>) attributes {dimension_semantics = [#tpu.dimension_semantics<parallel>], iteration_bounds = array<i64: 1>, scalar_prefetch = 0 : i64, scratch_operands = 0 : i64, tpu.core_type = #tpu.core_type<tc>, window_params = [{transform_indices = @transform_0, window_bounds = array<i64: 126, 16>}, {pipeline_mode = #tpu.pipeline_mode<synchronous>, transform_indices = @transform_1, window_bounds = array<i64: 16, 192>}, {pipeline_mode = #tpu.pipeline_mode<synchronous>, transform_indices = @transform_2, window_bounds = array<i64: 1, 192>}, {transform_indices = @transform_3, window_bounds = array<i64: 126, 192>}]} {
    %c0 = arith.constant 0 : index
    %c0_0 = arith.constant 0 : index
    %0 = vector.load %arg1[%c0, %c0_0] : memref<126x16xbf16, #tpu.memory_space<vmem>>, vector<126x16xbf16>
    %c0_1 = arith.constant 0 : index
    %c0_2 = arith.constant 0 : index
    %1 = vector.load %arg2[%c0_1, %c0_2] : memref<16x192xbf16, #tpu.memory_space<vmem>>, vector<16x192xbf16>
    %cst = arith.constant dense<0.000000e+00> : vector<126x192xf32>
    %2 = tpu.matmul %0, %1, %cst {dimension_numbers = #tpu.dot_dimension_numbers<[1], [0], [0], [1], [0, 0, 1, 1], [], []>} : vector<126x16xbf16>, vector<16x192xbf16>, vector<126x192xf32> -> vector<126x192xf32>
    %c0_3 = arith.constant 0 : index
    %c0_4 = arith.constant 0 : index
    %3 = vector.load %arg3[%c0_3, %c0_4] : memref<1x192xf32, #tpu.memory_space<vmem>>, vector<1x192xf32>
    %4 = vector.broadcast %3 : vector<1x192xf32> to vector<126x192xf32>
    %5 = arith.addf %2, %4 : vector<126x192xf32>
    %cst_5 = arith.constant 0.000000e+00 : f32
    %6 = vector.broadcast %cst_5 : f32 to vector<126x192xf32>
    %7 = arith.maximumf %5, %6 : vector<126x192xf32>
    %c0_6 = arith.constant 0 : index
    %c0_7 = arith.constant 0 : index
    %8 = vector.load %arg4[%c0_6, %c0_7] : memref<126x192xf32, #tpu.memory_space<vmem>>, vector<126x192xf32>
    tpu.vector_store %arg4[%c0_6, %c0_7], %7 {strides = array<i32>} : memref<126x192xf32, #tpu.memory_space<vmem>>, vector<126x192xf32>,
    return
  }
  func.func @transform_0(%arg0: i32) -> (i32, i32) {
    %c0_i32 = arith.constant 0 : i32
    %c0_i32_0 = arith.constant 0 : i32
    return %arg0, %c0_i32 : i32, i32
  }
  func.func @transform_1(%arg0: i32) -> (i32, i32) {
    %c0_i32 = arith.constant 0 : i32
    %c0_i32_0 = arith.constant 0 : i32
    %c0_i32_1 = arith.constant 0 : i32
    return %c0_i32, %c0_i32_0 : i32, i32
  }
  func.func @transform_2(%arg0: i32) -> (i32, i32) {
    %c0_i32 = arith.constant 0 : i32
    %c0_i32_0 = arith.constant 0 : i32
    %c0_i32_1 = arith.constant 0 : i32
    return %c0_i32, %c0_i32_0 : i32, i32
  }
  func.func @transform_3(%arg0: i32) -> (i32, i32) {
    %c0_i32 = arith.constant 0 : i32
    %c0_i32_0 = arith.constant 0 : i32
    return %arg0, %c0_i32 : i32, i32
  }
}

module attributes {stable_mosaic.version = 11 : i64} {
  func.func @_mm_kernel(%arg0: i32, %arg1: memref<126x192xbf16, #tpu.memory_space<vmem>>, %arg2: memref<192x64xbf16, #tpu.memory_space<vmem>>, %arg3: memref<1x64xf32, #tpu.memory_space<vmem>>, %arg4: memref<126x64xf32, #tpu.memory_space<vmem>>) attributes {dimension_semantics = [#tpu.dimension_semantics<parallel>], iteration_bounds = array<i64: 1>, scalar_prefetch = 0 : i64, scratch_operands = 0 : i64, tpu.core_type = #tpu.core_type<tc>, window_params = [{transform_indices = @transform_0, window_bounds = array<i64: 126, 192>}, {pipeline_mode = #tpu.pipeline_mode<synchronous>, transform_indices = @transform_1, window_bounds = array<i64: 192, 64>}, {pipeline_mode = #tpu.pipeline_mode<synchronous>, transform_indices = @transform_2, window_bounds = array<i64: 1, 64>}, {transform_indices = @transform_3, window_bounds = array<i64: 126, 64>}]} {
    %c0 = arith.constant 0 : index
    %c0_0 = arith.constant 0 : index
    %0 = vector.load %arg1[%c0, %c0_0] : memref<126x192xbf16, #tpu.memory_space<vmem>>, vector<126x192xbf16>
    %c0_1 = arith.constant 0 : index
    %c0_2 = arith.constant 0 : index
    %1 = vector.load %arg2[%c0_1, %c0_2] : memref<192x64xbf16, #tpu.memory_space<vmem>>, vector<192x64xbf16>
    %cst = arith.constant dense<0.000000e+00> : vector<126x64xf32>
    %2 = tpu.matmul %0, %1, %cst {dimension_numbers = #tpu.dot_dimension_numbers<[1], [0], [0], [1], [0, 0, 1, 1], [], []>} : vector<126x192xbf16>, vector<192x64xbf16>, vector<126x64xf32> -> vector<126x64xf32>
    %c0_3 = arith.constant 0 : index
    %c0_4 = arith.constant 0 : index
    %3 = vector.load %arg3[%c0_3, %c0_4] : memref<1x64xf32, #tpu.memory_space<vmem>>, vector<1x64xf32>
    %4 = vector.broadcast %3 : vector<1x64xf32> to vector<126x64xf32>
    %5 = arith.addf %2, %4 : vector<126x64xf32>
    %c0_5 = arith.constant 0 : index
    %c0_6 = arith.constant 0 : index
    %6 = vector.load %arg4[%c0_5, %c0_6] : memref<126x64xf32, #tpu.memory_space<vmem>>, vector<126x64xf32>
    tpu.vector_store %arg4[%c0_5, %c0_6], %5 {strides = array<i32>} : memref<126x64xf32, #tpu.memory_space<vmem>>, vector<126x64xf32>,
    return
  }
  func.func @transform_0(%arg0: i32) -> (i32, i32) {
    %c0_i32 = arith.constant 0 : i32
    %c0_i32_0 = arith.constant 0 : i32
    return %arg0, %c0_i32 : i32, i32
  }
  func.func @transform_1(%arg0: i32) -> (i32, i32) {
    %c0_i32 = arith.constant 0 : i32
    %c0_i32_0 = arith.constant 0 : i32
    %c0_i32_1 = arith.constant 0 : i32
    return %c0_i32, %c0_i32_0 : i32, i32
  }
  func.func @transform_2(%arg0: i32) -> (i32, i32) {
    %c0_i32 = arith.constant 0 : i32
    %c0_i32_0 = arith.constant 0 : i32
    %c0_i32_1 = arith.constant 0 : i32
    return %c0_i32, %c0_i32_0 : i32, i32
  }
  func.func @transform_3(%arg0: i32) -> (i32, i32) {
    %c0_i32 = arith.constant 0 : i32
    %c0_i32_0 = arith.constant 0 : i32
    return %arg0, %c0_i32 : i32, i32
  }
}

module attributes {stable_mosaic.version = 11 : i64} {
  func.func @_mm_kernel(%arg0: i32, %arg1: memref<126x64xbf16, #tpu.memory_space<vmem>>, %arg2: memref<64x64xbf16, #tpu.memory_space<vmem>>, %arg3: memref<1x64xf32, #tpu.memory_space<vmem>>, %arg4: memref<1x64xf32, #tpu.memory_space<vmem>>, %arg5: memref<1xf32, #tpu.memory_space<smem>>, %arg6: memref<126x64xf32, #tpu.memory_space<vmem>>) attributes {dimension_semantics = [#tpu.dimension_semantics<parallel>], iteration_bounds = array<i64: 1>, scalar_prefetch = 0 : i64, scratch_operands = 0 : i64, tpu.core_type = #tpu.core_type<tc>, window_params = [{transform_indices = @transform_0, window_bounds = array<i64: 126, 64>}, {pipeline_mode = #tpu.pipeline_mode<synchronous>, transform_indices = @transform_1, window_bounds = array<i64: 64, 64>}, {pipeline_mode = #tpu.pipeline_mode<synchronous>, transform_indices = @transform_2, window_bounds = array<i64: 1, 64>}, {pipeline_mode = #tpu.pipeline_mode<synchronous>, transform_indices = @transform_3, window_bounds = array<i64: 1, 64>}, {transform_indices = @transform_4, window_bounds = array<i64: 1>}, {transform_indices = @transform_5, window_bounds = array<i64: 126, 64>}]} {
    %c0 = arith.constant 0 : index
    %c0_0 = arith.constant 0 : index
    %0 = vector.load %arg1[%c0, %c0_0] : memref<126x64xbf16, #tpu.memory_space<vmem>>, vector<126x64xbf16>
    %c0_1 = arith.constant 0 : index
    %c0_2 = arith.constant 0 : index
    %1 = vector.load %arg2[%c0_1, %c0_2] : memref<64x64xbf16, #tpu.memory_space<vmem>>, vector<64x64xbf16>
    %cst = arith.constant dense<0.000000e+00> : vector<126x64xf32>
    %2 = tpu.matmul %0, %1, %cst {dimension_numbers = #tpu.dot_dimension_numbers<[1], [0], [0], [1], [0, 0, 1, 1], [], []>} : vector<126x64xbf16>, vector<64x64xbf16>, vector<126x64xf32> -> vector<126x64xf32>
    %c0_3 = arith.constant 0 : index
    %c0_4 = arith.constant 0 : index
    %3 = vector.load %arg3[%c0_3, %c0_4] : memref<1x64xf32, #tpu.memory_space<vmem>>, vector<1x64xf32>
    %4 = vector.broadcast %3 : vector<1x64xf32> to vector<126x64xf32>
    %5 = arith.mulf %2, %4 : vector<126x64xf32>
    %c0_5 = arith.constant 0 : index
    %c0_6 = arith.constant 0 : index
    %6 = vector.load %arg4[%c0_5, %c0_6] : memref<1x64xf32, #tpu.memory_space<vmem>>, vector<1x64xf32>
    %7 = vector.broadcast %6 : vector<1x64xf32> to vector<126x64xf32>
    %8 = arith.addf %5, %7 : vector<126x64xf32>
    %c0_7 = arith.constant 0 : index
    %9 = memref.load %arg5[%c0_7] : memref<1xf32, #tpu.memory_space<smem>>
    %cst_8 = arith.constant 0.000000e+00 : f32
    %10 = vector.broadcast %cst_8 : f32 to vector<126x64xf32>
    %11 = arith.cmpf ogt, %8, %10 : vector<126x64xf32>
    %12 = vector.broadcast %9 : f32 to vector<126x64xf32>
    %13 = arith.mulf %12, %8 : vector<126x64xf32>
    %14 = arith.select %11, %8, %13 : vector<126x64xi1>, vector<126x64xf32>
    %c0_9 = arith.constant 0 : index
    %c0_10 = arith.constant 0 : index
    %15 = vector.load %arg6[%c0_9, %c0_10] : memref<126x64xf32, #tpu.memory_space<vmem>>, vector<126x64xf32>
    tpu.vector_store %arg6[%c0_9, %c0_10], %14 {strides = array<i32>} : memref<126x64xf32, #tpu.memory_space<vmem>>, vector<126x64xf32>,
    return
  }
  func.func @transform_0(%arg0: i32) -> (i32, i32) {
    %c0_i32 = arith.constant 0 : i32
    %c0_i32_0 = arith.constant 0 : i32
    return %arg0, %c0_i32 : i32, i32
  }
  func.func @transform_1(%arg0: i32) -> (i32, i32) {
    %c0_i32 = arith.constant 0 : i32
    %c0_i32_0 = arith.constant 0 : i32
    %c0_i32_1 = arith.constant 0 : i32
    return %c0_i32, %c0_i32_0 : i32, i32
  }
  func.func @transform_2(%arg0: i32) -> (i32, i32) {
    %c0_i32 = arith.constant 0 : i32
    %c0_i32_0 = arith.constant 0 : i32
    %c0_i32_1 = arith.constant 0 : i32
    return %c0_i32, %c0_i32_0 : i32, i32
  }
  func.func @transform_3(%arg0: i32) -> (i32, i32) {
    %c0_i32 = arith.constant 0 : i32
    %c0_i32_0 = arith.constant 0 : i32
    %c0_i32_1 = arith.constant 0 : i32
    return %c0_i32, %c0_i32_0 : i32, i32
  }
  func.func @transform_4(%arg0: i32) -> i32 {
    %c0_i32 = arith.constant 0 : i32
    %c0_i32_0 = arith.constant 0 : i32
    return %c0_i32 : i32
  }
  func.func @transform_5(%arg0: i32) -> (i32, i32) {
    %c0_i32 = arith.constant 0 : i32
    %c0_i32_0 = arith.constant 0 : i32
    return %arg0, %c0_i32 : i32, i32
  }
}

module attributes {stable_mosaic.version = 11 : i64} {
  func.func @_mm_kernel(%arg0: i32, %arg1: memref<126x64xbf16, #tpu.memory_space<vmem>>, %arg2: memref<64x64xbf16, #tpu.memory_space<vmem>>, %arg3: memref<1x64xf32, #tpu.memory_space<vmem>>, %arg4: memref<1x64xf32, #tpu.memory_space<vmem>>, %arg5: memref<126x64xf32, #tpu.memory_space<vmem>>, %arg6: memref<1xf32, #tpu.memory_space<smem>>, %arg7: memref<126x64xf32, #tpu.memory_space<vmem>>) attributes {dimension_semantics = [#tpu.dimension_semantics<parallel>], iteration_bounds = array<i64: 1>, scalar_prefetch = 0 : i64, scratch_operands = 0 : i64, tpu.core_type = #tpu.core_type<tc>, window_params = [{transform_indices = @transform_0, window_bounds = array<i64: 126, 64>}, {pipeline_mode = #tpu.pipeline_mode<synchronous>, transform_indices = @transform_1, window_bounds = array<i64: 64, 64>}, {pipeline_mode = #tpu.pipeline_mode<synchronous>, transform_indices = @transform_2, window_bounds = array<i64: 1, 64>}, {pipeline_mode = #tpu.pipeline_mode<synchronous>, transform_indices = @transform_3, window_bounds = array<i64: 1, 64>}, {transform_indices = @transform_4, window_bounds = array<i64: 126, 64>}, {transform_indices = @transform_5, window_bounds = array<i64: 1>}, {transform_indices = @transform_6, window_bounds = array<i64: 126, 64>}]} {
    %c0 = arith.constant 0 : index
    %c0_0 = arith.constant 0 : index
    %0 = vector.load %arg1[%c0, %c0_0] : memref<126x64xbf16, #tpu.memory_space<vmem>>, vector<126x64xbf16>
    %c0_1 = arith.constant 0 : index
    %c0_2 = arith.constant 0 : index
    %1 = vector.load %arg2[%c0_1, %c0_2] : memref<64x64xbf16, #tpu.memory_space<vmem>>, vector<64x64xbf16>
    %cst = arith.constant dense<0.000000e+00> : vector<126x64xf32>
    %2 = tpu.matmul %0, %1, %cst {dimension_numbers = #tpu.dot_dimension_numbers<[1], [0], [0], [1], [0, 0, 1, 1], [], []>} : vector<126x64xbf16>, vector<64x64xbf16>, vector<126x64xf32> -> vector<126x64xf32>
    %c0_3 = arith.constant 0 : index
    %c0_4 = arith.constant 0 : index
    %3 = vector.load %arg3[%c0_3, %c0_4] : memref<1x64xf32, #tpu.memory_space<vmem>>, vector<1x64xf32>
    %4 = vector.broadcast %3 : vector<1x64xf32> to vector<126x64xf32>
    %5 = arith.mulf %2, %4 : vector<126x64xf32>
    %c0_5 = arith.constant 0 : index
    %c0_6 = arith.constant 0 : index
    %6 = vector.load %arg4[%c0_5, %c0_6] : memref<1x64xf32, #tpu.memory_space<vmem>>, vector<1x64xf32>
    %7 = vector.broadcast %6 : vector<1x64xf32> to vector<126x64xf32>
    %8 = arith.addf %5, %7 : vector<126x64xf32>
    %c0_7 = arith.constant 0 : index
    %c0_8 = arith.constant 0 : index
    %9 = vector.load %arg5[%c0_7, %c0_8] : memref<126x64xf32, #tpu.memory_space<vmem>>, vector<126x64xf32>
    %10 = arith.addf %8, %9 : vector<126x64xf32>
    %c0_9 = arith.constant 0 : index
    %11 = memref.load %arg6[%c0_9] : memref<1xf32, #tpu.memory_space<smem>>
    %cst_10 = arith.constant 0.000000e+00 : f32
    %12 = vector.broadcast %cst_10 : f32 to vector<126x64xf32>
    %13 = arith.cmpf ogt, %10, %12 : vector<126x64xf32>
    %14 = vector.broadcast %11 : f32 to vector<126x64xf32>
    %15 = arith.mulf %14, %10 : vector<126x64xf32>
    %16 = arith.select %13, %10, %15 : vector<126x64xi1>, vector<126x64xf32>
    %c0_11 = arith.constant 0 : index
    %c0_12 = arith.constant 0 : index
    %17 = vector.load %arg7[%c0_11, %c0_12] : memref<126x64xf32, #tpu.memory_space<vmem>>, vector<126x64xf32>
    tpu.vector_store %arg7[%c0_11, %c0_12], %16 {strides = array<i32>} : memref<126x64xf32, #tpu.memory_space<vmem>>, vector<126x64xf32>,
    return
  }
  func.func @transform_0(%arg0: i32) -> (i32, i32) {
    %c0_i32 = arith.constant 0 : i32
    %c0_i32_0 = arith.constant 0 : i32
    return %arg0, %c0_i32 : i32, i32
  }
  func.func @transform_1(%arg0: i32) -> (i32, i32) {
    %c0_i32 = arith.constant 0 : i32
    %c0_i32_0 = arith.constant 0 : i32
    %c0_i32_1 = arith.constant 0 : i32
    return %c0_i32, %c0_i32_0 : i32, i32
  }
  func.func @transform_2(%arg0: i32) -> (i32, i32) {
    %c0_i32 = arith.constant 0 : i32
    %c0_i32_0 = arith.constant 0 : i32
    %c0_i32_1 = arith.constant 0 : i32
    return %c0_i32, %c0_i32_0 : i32, i32
  }
  func.func @transform_3(%arg0: i32) -> (i32, i32) {
    %c0_i32 = arith.constant 0 : i32
    %c0_i32_0 = arith.constant 0 : i32
    %c0_i32_1 = arith.constant 0 : i32
    return %c0_i32, %c0_i32_0 : i32, i32
  }
  func.func @transform_4(%arg0: i32) -> (i32, i32) {
    %c0_i32 = arith.constant 0 : i32
    %c0_i32_0 = arith.constant 0 : i32
    return %arg0, %c0_i32 : i32, i32
  }
  func.func @transform_5(%arg0: i32) -> i32 {
    %c0_i32 = arith.constant 0 : i32
    %c0_i32_0 = arith.constant 0 : i32
    return %c0_i32 : i32
  }
  func.func @transform_6(%arg0: i32) -> (i32, i32) {
    %c0_i32 = arith.constant 0 : i32
    %c0_i32_0 = arith.constant 0 : i32
    return %arg0, %c0_i32 : i32, i32
  }
}

module attributes {stable_mosaic.version = 11 : i64} {
  func.func @_mm_kernel(%arg0: i32, %arg1: memref<42x64xbf16, #tpu.memory_space<vmem>>, %arg2: memref<64x128xbf16, #tpu.memory_space<vmem>>, %arg3: memref<1x128xf32, #tpu.memory_space<vmem>>, %arg4: memref<1x128xf32, #tpu.memory_space<vmem>>, %arg5: memref<1xf32, #tpu.memory_space<smem>>, %arg6: memref<42x128xf32, #tpu.memory_space<vmem>>) attributes {dimension_semantics = [#tpu.dimension_semantics<parallel>], iteration_bounds = array<i64: 1>, scalar_prefetch = 0 : i64, scratch_operands = 0 : i64, tpu.core_type = #tpu.core_type<tc>, window_params = [{transform_indices = @transform_0, window_bounds = array<i64: 42, 64>}, {pipeline_mode = #tpu.pipeline_mode<synchronous>, transform_indices = @transform_1, window_bounds = array<i64: 64, 128>}, {pipeline_mode = #tpu.pipeline_mode<synchronous>, transform_indices = @transform_2, window_bounds = array<i64: 1, 128>}, {pipeline_mode = #tpu.pipeline_mode<synchronous>, transform_indices = @transform_3, window_bounds = array<i64: 1, 128>}, {transform_indices = @transform_4, window_bounds = array<i64: 1>}, {transform_indices = @transform_5, window_bounds = array<i64: 42, 128>}]} {
    %c0 = arith.constant 0 : index
    %c0_0 = arith.constant 0 : index
    %0 = vector.load %arg1[%c0, %c0_0] : memref<42x64xbf16, #tpu.memory_space<vmem>>, vector<42x64xbf16>
    %c0_1 = arith.constant 0 : index
    %c0_2 = arith.constant 0 : index
    %1 = vector.load %arg2[%c0_1, %c0_2] : memref<64x128xbf16, #tpu.memory_space<vmem>>, vector<64x128xbf16>
    %cst = arith.constant dense<0.000000e+00> : vector<42x128xf32>
    %2 = tpu.matmul %0, %1, %cst {dimension_numbers = #tpu.dot_dimension_numbers<[1], [0], [0], [1], [0, 0, 1, 1], [], []>} : vector<42x64xbf16>, vector<64x128xbf16>, vector<42x128xf32> -> vector<42x128xf32>
    %c0_3 = arith.constant 0 : index
    %c0_4 = arith.constant 0 : index
    %3 = vector.load %arg3[%c0_3, %c0_4] : memref<1x128xf32, #tpu.memory_space<vmem>>, vector<1x128xf32>
    %4 = vector.broadcast %3 : vector<1x128xf32> to vector<42x128xf32>
    %5 = arith.mulf %2, %4 : vector<42x128xf32>
    %c0_5 = arith.constant 0 : index
    %c0_6 = arith.constant 0 : index
    %6 = vector.load %arg4[%c0_5, %c0_6] : memref<1x128xf32, #tpu.memory_space<vmem>>, vector<1x128xf32>
    %7 = vector.broadcast %6 : vector<1x128xf32> to vector<42x128xf32>
    %8 = arith.addf %5, %7 : vector<42x128xf32>
    %c0_7 = arith.constant 0 : index
    %9 = memref.load %arg5[%c0_7] : memref<1xf32, #tpu.memory_space<smem>>
    %cst_8 = arith.constant 0.000000e+00 : f32
    %10 = vector.broadcast %cst_8 : f32 to vector<42x128xf32>
    %11 = arith.cmpf ogt, %8, %10 : vector<42x128xf32>
    %12 = vector.broadcast %9 : f32 to vector<42x128xf32>
    %13 = arith.mulf %12, %8 : vector<42x128xf32>
    %14 = arith.select %11, %8, %13 : vector<42x128xi1>, vector<42x128xf32>
    %c0_9 = arith.constant 0 : index
    %c0_10 = arith.constant 0 : index
    %15 = vector.load %arg6[%c0_9, %c0_10] : memref<42x128xf32, #tpu.memory_space<vmem>>, vector<42x128xf32>
    tpu.vector_store %arg6[%c0_9, %c0_10], %14 {strides = array<i32>} : memref<42x128xf32, #tpu.memory_space<vmem>>, vector<42x128xf32>,
    return
  }
  func.func @transform_0(%arg0: i32) -> (i32, i32) {
    %c0_i32 = arith.constant 0 : i32
    %c0_i32_0 = arith.constant 0 : i32
    return %arg0, %c0_i32 : i32, i32
  }
  func.func @transform_1(%arg0: i32) -> (i32, i32) {
    %c0_i32 = arith.constant 0 : i32
    %c0_i32_0 = arith.constant 0 : i32
    %c0_i32_1 = arith.constant 0 : i32
    return %c0_i32, %c0_i32_0 : i32, i32
  }
  func.func @transform_2(%arg0: i32) -> (i32, i32) {
    %c0_i32 = arith.constant 0 : i32
    %c0_i32_0 = arith.constant 0 : i32
    %c0_i32_1 = arith.constant 0 : i32
    return %c0_i32, %c0_i32_0 : i32, i32
  }
  func.func @transform_3(%arg0: i32) -> (i32, i32) {
    %c0_i32 = arith.constant 0 : i32
    %c0_i32_0 = arith.constant 0 : i32
    %c0_i32_1 = arith.constant 0 : i32
    return %c0_i32, %c0_i32_0 : i32, i32
  }
  func.func @transform_4(%arg0: i32) -> i32 {
    %c0_i32 = arith.constant 0 : i32
    %c0_i32_0 = arith.constant 0 : i32
    return %c0_i32 : i32
  }
  func.func @transform_5(%arg0: i32) -> (i32, i32) {
    %c0_i32 = arith.constant 0 : i32
    %c0_i32_0 = arith.constant 0 : i32
    return %arg0, %c0_i32 : i32, i32
  }
}

module attributes {stable_mosaic.version = 11 : i64} {
  func.func @_mm_kernel(%arg0: i32, %arg1: memref<42x128xbf16, #tpu.memory_space<vmem>>, %arg2: memref<128x128xbf16, #tpu.memory_space<vmem>>, %arg3: memref<1x128xf32, #tpu.memory_space<vmem>>, %arg4: memref<1x128xf32, #tpu.memory_space<vmem>>, %arg5: memref<42x128xf32, #tpu.memory_space<vmem>>, %arg6: memref<1xf32, #tpu.memory_space<smem>>, %arg7: memref<42x128xf32, #tpu.memory_space<vmem>>) attributes {dimension_semantics = [#tpu.dimension_semantics<parallel>], iteration_bounds = array<i64: 1>, scalar_prefetch = 0 : i64, scratch_operands = 0 : i64, tpu.core_type = #tpu.core_type<tc>, window_params = [{transform_indices = @transform_0, window_bounds = array<i64: 42, 128>}, {pipeline_mode = #tpu.pipeline_mode<synchronous>, transform_indices = @transform_1, window_bounds = array<i64: 128, 128>}, {pipeline_mode = #tpu.pipeline_mode<synchronous>, transform_indices = @transform_2, window_bounds = array<i64: 1, 128>}, {pipeline_mode = #tpu.pipeline_mode<synchronous>, transform_indices = @transform_3, window_bounds = array<i64: 1, 128>}, {transform_indices = @transform_4, window_bounds = array<i64: 42, 128>}, {transform_indices = @transform_5, window_bounds = array<i64: 1>}, {transform_indices = @transform_6, window_bounds = array<i64: 42, 128>}]} {
    %c0 = arith.constant 0 : index
    %c0_0 = arith.constant 0 : index
    %0 = vector.load %arg1[%c0, %c0_0] : memref<42x128xbf16, #tpu.memory_space<vmem>>, vector<42x128xbf16>
    %c0_1 = arith.constant 0 : index
    %c0_2 = arith.constant 0 : index
    %1 = vector.load %arg2[%c0_1, %c0_2] : memref<128x128xbf16, #tpu.memory_space<vmem>>, vector<128x128xbf16>
    %cst = arith.constant dense<0.000000e+00> : vector<42x128xf32>
    %2 = tpu.matmul %0, %1, %cst {dimension_numbers = #tpu.dot_dimension_numbers<[1], [0], [0], [1], [0, 0, 1, 1], [], []>} : vector<42x128xbf16>, vector<128x128xbf16>, vector<42x128xf32> -> vector<42x128xf32>
    %c0_3 = arith.constant 0 : index
    %c0_4 = arith.constant 0 : index
    %3 = vector.load %arg3[%c0_3, %c0_4] : memref<1x128xf32, #tpu.memory_space<vmem>>, vector<1x128xf32>
    %4 = vector.broadcast %3 : vector<1x128xf32> to vector<42x128xf32>
    %5 = arith.mulf %2, %4 : vector<42x128xf32>
    %c0_5 = arith.constant 0 : index
    %c0_6 = arith.constant 0 : index
    %6 = vector.load %arg4[%c0_5, %c0_6] : memref<1x128xf32, #tpu.memory_space<vmem>>, vector<1x128xf32>
    %7 = vector.broadcast %6 : vector<1x128xf32> to vector<42x128xf32>
    %8 = arith.addf %5, %7 : vector<42x128xf32>
    %c0_7 = arith.constant 0 : index
    %c0_8 = arith.constant 0 : index
    %9 = vector.load %arg5[%c0_7, %c0_8] : memref<42x128xf32, #tpu.memory_space<vmem>>, vector<42x128xf32>
    %10 = arith.addf %8, %9 : vector<42x128xf32>
    %c0_9 = arith.constant 0 : index
    %11 = memref.load %arg6[%c0_9] : memref<1xf32, #tpu.memory_space<smem>>
    %cst_10 = arith.constant 0.000000e+00 : f32
    %12 = vector.broadcast %cst_10 : f32 to vector<42x128xf32>
    %13 = arith.cmpf ogt, %10, %12 : vector<42x128xf32>
    %14 = vector.broadcast %11 : f32 to vector<42x128xf32>
    %15 = arith.mulf %14, %10 : vector<42x128xf32>
    %16 = arith.select %13, %10, %15 : vector<42x128xi1>, vector<42x128xf32>
    %c0_11 = arith.constant 0 : index
    %c0_12 = arith.constant 0 : index
    %17 = vector.load %arg7[%c0_11, %c0_12] : memref<42x128xf32, #tpu.memory_space<vmem>>, vector<42x128xf32>
    tpu.vector_store %arg7[%c0_11, %c0_12], %16 {strides = array<i32>} : memref<42x128xf32, #tpu.memory_space<vmem>>, vector<42x128xf32>,
    return
  }
  func.func @transform_0(%arg0: i32) -> (i32, i32) {
    %c0_i32 = arith.constant 0 : i32
    %c0_i32_0 = arith.constant 0 : i32
    return %arg0, %c0_i32 : i32, i32
  }
  func.func @transform_1(%arg0: i32) -> (i32, i32) {
    %c0_i32 = arith.constant 0 : i32
    %c0_i32_0 = arith.constant 0 : i32
    %c0_i32_1 = arith.constant 0 : i32
    return %c0_i32, %c0_i32_0 : i32, i32
  }
  func.func @transform_2(%arg0: i32) -> (i32, i32) {
    %c0_i32 = arith.constant 0 : i32
    %c0_i32_0 = arith.constant 0 : i32
    %c0_i32_1 = arith.constant 0 : i32
    return %c0_i32, %c0_i32_0 : i32, i32
  }
  func.func @transform_3(%arg0: i32) -> (i32, i32) {
    %c0_i32 = arith.constant 0 : i32
    %c0_i32_0 = arith.constant 0 : i32
    %c0_i32_1 = arith.constant 0 : i32
    return %c0_i32, %c0_i32_0 : i32, i32
  }
  func.func @transform_4(%arg0: i32) -> (i32, i32) {
    %c0_i32 = arith.constant 0 : i32
    %c0_i32_0 = arith.constant 0 : i32
    return %arg0, %c0_i32 : i32, i32
  }
  func.func @transform_5(%arg0: i32) -> i32 {
    %c0_i32 = arith.constant 0 : i32
    %c0_i32_0 = arith.constant 0 : i32
    return %c0_i32 : i32
  }
  func.func @transform_6(%arg0: i32) -> (i32, i32) {
    %c0_i32 = arith.constant 0 : i32
    %c0_i32_0 = arith.constant 0 : i32
    return %arg0, %c0_i32 : i32, i32
  }
}

module attributes {stable_mosaic.version = 11 : i64} {
  func.func @_mm_kernel(%arg0: i32, %arg1: memref<42x64xbf16, #tpu.memory_space<vmem>>, %arg2: memref<64x128xbf16, #tpu.memory_space<vmem>>, %arg3: memref<42x128xf32, #tpu.memory_space<vmem>>) attributes {dimension_semantics = [#tpu.dimension_semantics<parallel>], iteration_bounds = array<i64: 1>, scalar_prefetch = 0 : i64, scratch_operands = 0 : i64, tpu.core_type = #tpu.core_type<tc>, window_params = [{transform_indices = @transform_0, window_bounds = array<i64: 42, 64>}, {pipeline_mode = #tpu.pipeline_mode<synchronous>, transform_indices = @transform_1, window_bounds = array<i64: 64, 128>}, {transform_indices = @transform_2, window_bounds = array<i64: 42, 128>}]} {
    %c0 = arith.constant 0 : index
    %c0_0 = arith.constant 0 : index
    %0 = vector.load %arg1[%c0, %c0_0] : memref<42x64xbf16, #tpu.memory_space<vmem>>, vector<42x64xbf16>
    %c0_1 = arith.constant 0 : index
    %c0_2 = arith.constant 0 : index
    %1 = vector.load %arg2[%c0_1, %c0_2] : memref<64x128xbf16, #tpu.memory_space<vmem>>, vector<64x128xbf16>
    %cst = arith.constant dense<0.000000e+00> : vector<42x128xf32>
    %2 = tpu.matmul %0, %1, %cst {dimension_numbers = #tpu.dot_dimension_numbers<[1], [0], [0], [1], [0, 0, 1, 1], [], []>} : vector<42x64xbf16>, vector<64x128xbf16>, vector<42x128xf32> -> vector<42x128xf32>
    %c0_3 = arith.constant 0 : index
    %c0_4 = arith.constant 0 : index
    %3 = vector.load %arg3[%c0_3, %c0_4] : memref<42x128xf32, #tpu.memory_space<vmem>>, vector<42x128xf32>
    tpu.vector_store %arg3[%c0_3, %c0_4], %2 {strides = array<i32>} : memref<42x128xf32, #tpu.memory_space<vmem>>, vector<42x128xf32>,
    return
  }
  func.func @transform_0(%arg0: i32) -> (i32, i32) {
    %c0_i32 = arith.constant 0 : i32
    %c0_i32_0 = arith.constant 0 : i32
    return %arg0, %c0_i32 : i32, i32
  }
  func.func @transform_1(%arg0: i32) -> (i32, i32) {
    %c0_i32 = arith.constant 0 : i32
    %c0_i32_0 = arith.constant 0 : i32
    %c0_i32_1 = arith.constant 0 : i32
    return %c0_i32, %c0_i32_0 : i32, i32
  }
  func.func @transform_2(%arg0: i32) -> (i32, i32) {
    %c0_i32 = arith.constant 0 : i32
    %c0_i32_0 = arith.constant 0 : i32
    return %arg0, %c0_i32 : i32, i32
  }
}

module attributes {stable_mosaic.version = 11 : i64} {
  func.func @_mm_kernel(%arg0: i32, %arg1: memref<14x128xbf16, #tpu.memory_space<vmem>>, %arg2: memref<128x128xbf16, #tpu.memory_space<vmem>>, %arg3: memref<1x128xf32, #tpu.memory_space<vmem>>, %arg4: memref<1x128xf32, #tpu.memory_space<vmem>>, %arg5: memref<1xf32, #tpu.memory_space<smem>>, %arg6: memref<14x128xf32, #tpu.memory_space<vmem>>) attributes {dimension_semantics = [#tpu.dimension_semantics<parallel>], iteration_bounds = array<i64: 1>, scalar_prefetch = 0 : i64, scratch_operands = 0 : i64, tpu.core_type = #tpu.core_type<tc>, window_params = [{transform_indices = @transform_0, window_bounds = array<i64: 14, 128>}, {pipeline_mode = #tpu.pipeline_mode<synchronous>, transform_indices = @transform_1, window_bounds = array<i64: 128, 128>}, {pipeline_mode = #tpu.pipeline_mode<synchronous>, transform_indices = @transform_2, window_bounds = array<i64: 1, 128>}, {pipeline_mode = #tpu.pipeline_mode<synchronous>, transform_indices = @transform_3, window_bounds = array<i64: 1, 128>}, {transform_indices = @transform_4, window_bounds = array<i64: 1>}, {transform_indices = @transform_5, window_bounds = array<i64: 14, 128>}]} {
    %c0 = arith.constant 0 : index
    %c0_0 = arith.constant 0 : index
    %0 = vector.load %arg1[%c0, %c0_0] : memref<14x128xbf16, #tpu.memory_space<vmem>>, vector<14x128xbf16>
    %c0_1 = arith.constant 0 : index
    %c0_2 = arith.constant 0 : index
    %1 = vector.load %arg2[%c0_1, %c0_2] : memref<128x128xbf16, #tpu.memory_space<vmem>>, vector<128x128xbf16>
    %cst = arith.constant dense<0.000000e+00> : vector<14x128xf32>
    %2 = tpu.matmul %0, %1, %cst {dimension_numbers = #tpu.dot_dimension_numbers<[1], [0], [0], [1], [0, 0, 1, 1], [], []>} : vector<14x128xbf16>, vector<128x128xbf16>, vector<14x128xf32> -> vector<14x128xf32>
    %c0_3 = arith.constant 0 : index
    %c0_4 = arith.constant 0 : index
    %3 = vector.load %arg3[%c0_3, %c0_4] : memref<1x128xf32, #tpu.memory_space<vmem>>, vector<1x128xf32>
    %4 = vector.broadcast %3 : vector<1x128xf32> to vector<14x128xf32>
    %5 = arith.mulf %2, %4 : vector<14x128xf32>
    %c0_5 = arith.constant 0 : index
    %c0_6 = arith.constant 0 : index
    %6 = vector.load %arg4[%c0_5, %c0_6] : memref<1x128xf32, #tpu.memory_space<vmem>>, vector<1x128xf32>
    %7 = vector.broadcast %6 : vector<1x128xf32> to vector<14x128xf32>
    %8 = arith.addf %5, %7 : vector<14x128xf32>
    %c0_7 = arith.constant 0 : index
    %9 = memref.load %arg5[%c0_7] : memref<1xf32, #tpu.memory_space<smem>>
    %cst_8 = arith.constant 0.000000e+00 : f32
    %10 = vector.broadcast %cst_8 : f32 to vector<14x128xf32>
    %11 = arith.cmpf ogt, %8, %10 : vector<14x128xf32>
    %12 = vector.broadcast %9 : f32 to vector<14x128xf32>
    %13 = arith.mulf %12, %8 : vector<14x128xf32>
    %14 = arith.select %11, %8, %13 : vector<14x128xi1>, vector<14x128xf32>
    %c0_9 = arith.constant 0 : index
    %c0_10 = arith.constant 0 : index
    %15 = vector.load %arg6[%c0_9, %c0_10] : memref<14x128xf32, #tpu.memory_space<vmem>>, vector<14x128xf32>
    tpu.vector_store %arg6[%c0_9, %c0_10], %14 {strides = array<i32>} : memref<14x128xf32, #tpu.memory_space<vmem>>, vector<14x128xf32>,
    return
  }
  func.func @transform_0(%arg0: i32) -> (i32, i32) {
    %c0_i32 = arith.constant 0 : i32
    %c0_i32_0 = arith.constant 0 : i32
    return %arg0, %c0_i32 : i32, i32
  }
  func.func @transform_1(%arg0: i32) -> (i32, i32) {
    %c0_i32 = arith.constant 0 : i32
    %c0_i32_0 = arith.constant 0 : i32
    %c0_i32_1 = arith.constant 0 : i32
    return %c0_i32, %c0_i32_0 : i32, i32
  }
  func.func @transform_2(%arg0: i32) -> (i32, i32) {
    %c0_i32 = arith.constant 0 : i32
    %c0_i32_0 = arith.constant 0 : i32
    %c0_i32_1 = arith.constant 0 : i32
    return %c0_i32, %c0_i32_0 : i32, i32
  }
  func.func @transform_3(%arg0: i32) -> (i32, i32) {
    %c0_i32 = arith.constant 0 : i32
    %c0_i32_0 = arith.constant 0 : i32
    %c0_i32_1 = arith.constant 0 : i32
    return %c0_i32, %c0_i32_0 : i32, i32
  }
  func.func @transform_4(%arg0: i32) -> i32 {
    %c0_i32 = arith.constant 0 : i32
    %c0_i32_0 = arith.constant 0 : i32
    return %c0_i32 : i32
  }
  func.func @transform_5(%arg0: i32) -> (i32, i32) {
    %c0_i32 = arith.constant 0 : i32
    %c0_i32_0 = arith.constant 0 : i32
    return %arg0, %c0_i32 : i32, i32
  }
}

module attributes {stable_mosaic.version = 11 : i64} {
  func.func @_mm_kernel(%arg0: i32, %arg1: memref<14x128xbf16, #tpu.memory_space<vmem>>, %arg2: memref<128x128xbf16, #tpu.memory_space<vmem>>, %arg3: memref<1x128xf32, #tpu.memory_space<vmem>>, %arg4: memref<1x128xf32, #tpu.memory_space<vmem>>, %arg5: memref<14x128xf32, #tpu.memory_space<vmem>>, %arg6: memref<1xf32, #tpu.memory_space<smem>>, %arg7: memref<14x128xf32, #tpu.memory_space<vmem>>) attributes {dimension_semantics = [#tpu.dimension_semantics<parallel>], iteration_bounds = array<i64: 1>, scalar_prefetch = 0 : i64, scratch_operands = 0 : i64, tpu.core_type = #tpu.core_type<tc>, window_params = [{transform_indices = @transform_0, window_bounds = array<i64: 14, 128>}, {pipeline_mode = #tpu.pipeline_mode<synchronous>, transform_indices = @transform_1, window_bounds = array<i64: 128, 128>}, {pipeline_mode = #tpu.pipeline_mode<synchronous>, transform_indices = @transform_2, window_bounds = array<i64: 1, 128>}, {pipeline_mode = #tpu.pipeline_mode<synchronous>, transform_indices = @transform_3, window_bounds = array<i64: 1, 128>}, {transform_indices = @transform_4, window_bounds = array<i64: 14, 128>}, {transform_indices = @transform_5, window_bounds = array<i64: 1>}, {transform_indices = @transform_6, window_bounds = array<i64: 14, 128>}]} {
    %c0 = arith.constant 0 : index
    %c0_0 = arith.constant 0 : index
    %0 = vector.load %arg1[%c0, %c0_0] : memref<14x128xbf16, #tpu.memory_space<vmem>>, vector<14x128xbf16>
    %c0_1 = arith.constant 0 : index
    %c0_2 = arith.constant 0 : index
    %1 = vector.load %arg2[%c0_1, %c0_2] : memref<128x128xbf16, #tpu.memory_space<vmem>>, vector<128x128xbf16>
    %cst = arith.constant dense<0.000000e+00> : vector<14x128xf32>
    %2 = tpu.matmul %0, %1, %cst {dimension_numbers = #tpu.dot_dimension_numbers<[1], [0], [0], [1], [0, 0, 1, 1], [], []>} : vector<14x128xbf16>, vector<128x128xbf16>, vector<14x128xf32> -> vector<14x128xf32>
    %c0_3 = arith.constant 0 : index
    %c0_4 = arith.constant 0 : index
    %3 = vector.load %arg3[%c0_3, %c0_4] : memref<1x128xf32, #tpu.memory_space<vmem>>, vector<1x128xf32>
    %4 = vector.broadcast %3 : vector<1x128xf32> to vector<14x128xf32>
    %5 = arith.mulf %2, %4 : vector<14x128xf32>
    %c0_5 = arith.constant 0 : index
    %c0_6 = arith.constant 0 : index
    %6 = vector.load %arg4[%c0_5, %c0_6] : memref<1x128xf32, #tpu.memory_space<vmem>>, vector<1x128xf32>
    %7 = vector.broadcast %6 : vector<1x128xf32> to vector<14x128xf32>
    %8 = arith.addf %5, %7 : vector<14x128xf32>
    %c0_7 = arith.constant 0 : index
    %c0_8 = arith.constant 0 : index
    %9 = vector.load %arg5[%c0_7, %c0_8] : memref<14x128xf32, #tpu.memory_space<vmem>>, vector<14x128xf32>
    %10 = arith.addf %8, %9 : vector<14x128xf32>
    %c0_9 = arith.constant 0 : index
    %11 = memref.load %arg6[%c0_9] : memref<1xf32, #tpu.memory_space<smem>>
    %cst_10 = arith.constant 0.000000e+00 : f32
    %12 = vector.broadcast %cst_10 : f32 to vector<14x128xf32>
    %13 = arith.cmpf ogt, %10, %12 : vector<14x128xf32>
    %14 = vector.broadcast %11 : f32 to vector<14x128xf32>
    %15 = arith.mulf %14, %10 : vector<14x128xf32>
    %16 = arith.select %13, %10, %15 : vector<14x128xi1>, vector<14x128xf32>
    %c0_11 = arith.constant 0 : index
    %c0_12 = arith.constant 0 : index
    %17 = vector.load %arg7[%c0_11, %c0_12] : memref<14x128xf32, #tpu.memory_space<vmem>>, vector<14x128xf32>
    tpu.vector_store %arg7[%c0_11, %c0_12], %16 {strides = array<i32>} : memref<14x128xf32, #tpu.memory_space<vmem>>, vector<14x128xf32>,
    return
  }
  func.func @transform_0(%arg0: i32) -> (i32, i32) {
    %c0_i32 = arith.constant 0 : i32
    %c0_i32_0 = arith.constant 0 : i32
    return %arg0, %c0_i32 : i32, i32
  }
  func.func @transform_1(%arg0: i32) -> (i32, i32) {
    %c0_i32 = arith.constant 0 : i32
    %c0_i32_0 = arith.constant 0 : i32
    %c0_i32_1 = arith.constant 0 : i32
    return %c0_i32, %c0_i32_0 : i32, i32
  }
  func.func @transform_2(%arg0: i32) -> (i32, i32) {
    %c0_i32 = arith.constant 0 : i32
    %c0_i32_0 = arith.constant 0 : i32
    %c0_i32_1 = arith.constant 0 : i32
    return %c0_i32, %c0_i32_0 : i32, i32
  }
  func.func @transform_3(%arg0: i32) -> (i32, i32) {
    %c0_i32 = arith.constant 0 : i32
    %c0_i32_0 = arith.constant 0 : i32
    %c0_i32_1 = arith.constant 0 : i32
    return %c0_i32, %c0_i32_0 : i32, i32
  }
  func.func @transform_4(%arg0: i32) -> (i32, i32) {
    %c0_i32 = arith.constant 0 : i32
    %c0_i32_0 = arith.constant 0 : i32
    return %arg0, %c0_i32 : i32, i32
  }
  func.func @transform_5(%arg0: i32) -> i32 {
    %c0_i32 = arith.constant 0 : i32
    %c0_i32_0 = arith.constant 0 : i32
    return %c0_i32 : i32
  }
  func.func @transform_6(%arg0: i32) -> (i32, i32) {
    %c0_i32 = arith.constant 0 : i32
    %c0_i32_0 = arith.constant 0 : i32
    return %arg0, %c0_i32 : i32, i32
  }
}

module attributes {stable_mosaic.version = 11 : i64} {
  func.func @_mm_kernel(%arg0: i32, %arg1: memref<4x128xbf16, #tpu.memory_space<vmem>>, %arg2: memref<128x64xbf16, #tpu.memory_space<vmem>>, %arg3: memref<1x64xf32, #tpu.memory_space<vmem>>, %arg4: memref<4x64xf32, #tpu.memory_space<vmem>>) attributes {dimension_semantics = [#tpu.dimension_semantics<parallel>], iteration_bounds = array<i64: 1>, scalar_prefetch = 0 : i64, scratch_operands = 0 : i64, tpu.core_type = #tpu.core_type<tc>, window_params = [{transform_indices = @transform_0, window_bounds = array<i64: 4, 128>}, {pipeline_mode = #tpu.pipeline_mode<synchronous>, transform_indices = @transform_1, window_bounds = array<i64: 128, 64>}, {pipeline_mode = #tpu.pipeline_mode<synchronous>, transform_indices = @transform_2, window_bounds = array<i64: 1, 64>}, {transform_indices = @transform_3, window_bounds = array<i64: 4, 64>}]} {
    %c0 = arith.constant 0 : index
    %c0_0 = arith.constant 0 : index
    %0 = vector.load %arg1[%c0, %c0_0] : memref<4x128xbf16, #tpu.memory_space<vmem>>, vector<4x128xbf16>
    %c0_1 = arith.constant 0 : index
    %c0_2 = arith.constant 0 : index
    %1 = vector.load %arg2[%c0_1, %c0_2] : memref<128x64xbf16, #tpu.memory_space<vmem>>, vector<128x64xbf16>
    %cst = arith.constant dense<0.000000e+00> : vector<4x64xf32>
    %2 = tpu.matmul %0, %1, %cst {dimension_numbers = #tpu.dot_dimension_numbers<[1], [0], [0], [1], [0, 0, 1, 1], [], []>} : vector<4x128xbf16>, vector<128x64xbf16>, vector<4x64xf32> -> vector<4x64xf32>
    %c0_3 = arith.constant 0 : index
    %c0_4 = arith.constant 0 : index
    %3 = vector.load %arg3[%c0_3, %c0_4] : memref<1x64xf32, #tpu.memory_space<vmem>>, vector<1x64xf32>
    %4 = vector.broadcast %3 : vector<1x64xf32> to vector<4x64xf32>
    %5 = arith.addf %2, %4 : vector<4x64xf32>
    %c0_5 = arith.constant 0 : index
    %c0_6 = arith.constant 0 : index
    %6 = vector.load %arg4[%c0_5, %c0_6] : memref<4x64xf32, #tpu.memory_space<vmem>>, vector<4x64xf32>
    tpu.vector_store %arg4[%c0_5, %c0_6], %5 {strides = array<i32>} : memref<4x64xf32, #tpu.memory_space<vmem>>, vector<4x64xf32>,
    return
  }
  func.func @transform_0(%arg0: i32) -> (i32, i32) {
    %c0_i32 = arith.constant 0 : i32
    %c0_i32_0 = arith.constant 0 : i32
    return %arg0, %c0_i32 : i32, i32
  }
  func.func @transform_1(%arg0: i32) -> (i32, i32) {
    %c0_i32 = arith.constant 0 : i32
    %c0_i32_0 = arith.constant 0 : i32
    %c0_i32_1 = arith.constant 0 : i32
    return %c0_i32, %c0_i32_0 : i32, i32
  }
  func.func @transform_2(%arg0: i32) -> (i32, i32) {
    %c0_i32 = arith.constant 0 : i32
    %c0_i32_0 = arith.constant 0 : i32
    %c0_i32_1 = arith.constant 0 : i32
    return %c0_i32, %c0_i32_0 : i32, i32
  }
  func.func @transform_3(%arg0: i32) -> (i32, i32) {
    %c0_i32 = arith.constant 0 : i32
    %c0_i32_0 = arith.constant 0 : i32
    return %arg0, %c0_i32 : i32, i32
  }
}

module attributes {stable_mosaic.version = 11 : i64} {
  func.func @_mm_kernel(%arg0: i32, %arg1: memref<126x128xbf16, #tpu.memory_space<vmem>>, %arg2: memref<128x128xbf16, #tpu.memory_space<vmem>>, %arg3: memref<1x128xf32, #tpu.memory_space<vmem>>, %arg4: memref<126x128xf32, #tpu.memory_space<vmem>>) attributes {dimension_semantics = [#tpu.dimension_semantics<parallel>], iteration_bounds = array<i64: 1>, scalar_prefetch = 0 : i64, scratch_operands = 0 : i64, tpu.core_type = #tpu.core_type<tc>, window_params = [{transform_indices = @transform_0, window_bounds = array<i64: 126, 128>}, {pipeline_mode = #tpu.pipeline_mode<synchronous>, transform_indices = @transform_1, window_bounds = array<i64: 128, 128>}, {pipeline_mode = #tpu.pipeline_mode<synchronous>, transform_indices = @transform_2, window_bounds = array<i64: 1, 128>}, {transform_indices = @transform_3, window_bounds = array<i64: 126, 128>}]} {
    %c0 = arith.constant 0 : index
    %c0_0 = arith.constant 0 : index
    %0 = vector.load %arg1[%c0, %c0_0] : memref<126x128xbf16, #tpu.memory_space<vmem>>, vector<126x128xbf16>
    %c0_1 = arith.constant 0 : index
    %c0_2 = arith.constant 0 : index
    %1 = vector.load %arg2[%c0_1, %c0_2] : memref<128x128xbf16, #tpu.memory_space<vmem>>, vector<128x128xbf16>
    %cst = arith.constant dense<0.000000e+00> : vector<126x128xf32>
    %2 = tpu.matmul %0, %1, %cst {dimension_numbers = #tpu.dot_dimension_numbers<[1], [0], [0], [1], [0, 0, 1, 1], [], []>} : vector<126x128xbf16>, vector<128x128xbf16>, vector<126x128xf32> -> vector<126x128xf32>
    %c0_3 = arith.constant 0 : index
    %c0_4 = arith.constant 0 : index
    %3 = vector.load %arg3[%c0_3, %c0_4] : memref<1x128xf32, #tpu.memory_space<vmem>>, vector<1x128xf32>
    %4 = vector.broadcast %3 : vector<1x128xf32> to vector<126x128xf32>
    %5 = arith.addf %2, %4 : vector<126x128xf32>
    %c0_5 = arith.constant 0 : index
    %c0_6 = arith.constant 0 : index
    %6 = vector.load %arg4[%c0_5, %c0_6] : memref<126x128xf32, #tpu.memory_space<vmem>>, vector<126x128xf32>
    tpu.vector_store %arg4[%c0_5, %c0_6], %5 {strides = array<i32>} : memref<126x128xf32, #tpu.memory_space<vmem>>, vector<126x128xf32>,
    return
  }
  func.func @transform_0(%arg0: i32) -> (i32, i32) {
    %c0_i32 = arith.constant 0 : i32
    %c0_i32_0 = arith.constant 0 : i32
    return %arg0, %c0_i32 : i32, i32
  }
  func.func @transform_1(%arg0: i32) -> (i32, i32) {
    %c0_i32 = arith.constant 0 : i32
    %c0_i32_0 = arith.constant 0 : i32
    %c0_i32_1 = arith.constant 0 : i32
    return %c0_i32, %c0_i32_0 : i32, i32
  }
  func.func @transform_2(%arg0: i32) -> (i32, i32) {
    %c0_i32 = arith.constant 0 : i32
    %c0_i32_0 = arith.constant 0 : i32
    %c0_i32_1 = arith.constant 0 : i32
    return %c0_i32, %c0_i32_0 : i32, i32
  }
  func.func @transform_3(%arg0: i32) -> (i32, i32) {
    %c0_i32 = arith.constant 0 : i32
    %c0_i32_0 = arith.constant 0 : i32
    return %arg0, %c0_i32 : i32, i32
  }
}

module attributes {stable_mosaic.version = 11 : i64} {
  func.func @_dwconv_prelu_gln_kernel(%arg0: i32, %arg1: memref<1x65x128xf32, #tpu.memory_space<vmem>>, %arg2: memref<3x128xf32, #tpu.memory_space<vmem>>, %arg3: memref<1x128xf32, #tpu.memory_space<vmem>>, %arg4: memref<1xf32, #tpu.memory_space<smem>>, %arg5: memref<1x128xf32, #tpu.memory_space<vmem>>, %arg6: memref<1x128xf32, #tpu.memory_space<vmem>>, %arg7: memref<1x63x128xf32, #tpu.memory_space<vmem>>) attributes {dimension_semantics = [#tpu.dimension_semantics<parallel>], iteration_bounds = array<i64: 2>, scalar_prefetch = 0 : i64, scratch_operands = 0 : i64, tpu.core_type = #tpu.core_type<tc>, window_params = [{transform_indices = @transform_0, window_bounds = array<i64: 1, 65, 128>}, {pipeline_mode = #tpu.pipeline_mode<synchronous>, transform_indices = @transform_1, window_bounds = array<i64: 3, 128>}, {pipeline_mode = #tpu.pipeline_mode<synchronous>, transform_indices = @transform_2, window_bounds = array<i64: 1, 128>}, {transform_indices = @transform_3, window_bounds = array<i64: 1>}, {pipeline_mode = #tpu.pipeline_mode<synchronous>, transform_indices = @transform_4, window_bounds = array<i64: 1, 128>}, {pipeline_mode = #tpu.pipeline_mode<synchronous>, transform_indices = @transform_5, window_bounds = array<i64: 1, 128>}, {transform_indices = @transform_6, window_bounds = array<i64: 1, 63, 128>}]} {
    %c0 = arith.constant 0 : index
    %c0_0 = arith.constant 0 : index
    %c0_1 = arith.constant 0 : index
    %0 = vector.load %arg1[%c0, %c0_0, %c0_1] : memref<1x65x128xf32, #tpu.memory_space<vmem>>, vector<1x65x128xf32>
    %1 = vector.shape_cast %0 : vector<1x65x128xf32> to vector<65x128xf32>
    %2 = vector.extract_strided_slice %1 {offsets = [0, 0], sizes = [63, 128], strides = [1, 1]} : vector<65x128xf32> to vector<63x128xf32>
    %c0_2 = arith.constant 0 : index
    %c0_3 = arith.constant 0 : index
    %3 = vector.load %arg2[%c0_2, %c0_3] : memref<3x128xf32, #tpu.memory_space<vmem>>, vector<1x128xf32>
    %4 = vector.broadcast %3 : vector<1x128xf32> to vector<63x128xf32>
    %5 = arith.mulf %2, %4 : vector<63x128xf32>
    %6 = vector.extract_strided_slice %1 {offsets = [1, 0], sizes = [63, 128], strides = [1, 1]} : vector<65x128xf32> to vector<63x128xf32>
    %c1 = arith.constant 1 : index
    %c0_4 = arith.constant 0 : index
    %7 = vector.load %arg2[%c1, %c0_4] : memref<3x128xf32, #tpu.memory_space<vmem>>, vector<1x128xf32>
    %8 = vector.broadcast %7 : vector<1x128xf32> to vector<63x128xf32>
    %9 = arith.mulf %6, %8 : vector<63x128xf32>
    %10 = arith.addf %5, %9 : vector<63x128xf32>
    %11 = vector.extract_strided_slice %1 {offsets = [2, 0], sizes = [63, 128], strides = [1, 1]} : vector<65x128xf32> to vector<63x128xf32>
    %c2 = arith.constant 2 : index
    %c0_5 = arith.constant 0 : index
    %12 = vector.load %arg2[%c2, %c0_5] : memref<3x128xf32, #tpu.memory_space<vmem>>, vector<1x128xf32>
    %13 = vector.broadcast %12 : vector<1x128xf32> to vector<63x128xf32>
    %14 = arith.mulf %11, %13 : vector<63x128xf32>
    %15 = arith.addf %10, %14 : vector<63x128xf32>
    %c0_6 = arith.constant 0 : index
    %c0_7 = arith.constant 0 : index
    %16 = vector.load %arg3[%c0_6, %c0_7] : memref<1x128xf32, #tpu.memory_space<vmem>>, vector<1x128xf32>
    %17 = vector.broadcast %16 : vector<1x128xf32> to vector<63x128xf32>
    %18 = arith.addf %15, %17 : vector<63x128xf32>
    %c0_8 = arith.constant 0 : index
    %19 = memref.load %arg4[%c0_8] : memref<1xf32, #tpu.memory_space<smem>>
    %cst = arith.constant 0.000000e+00 : f32
    %20 = vector.broadcast %cst : f32 to vector<63x128xf32>
    %21 = arith.cmpf ogt, %18, %20 : vector<63x128xf32>
    %22 = vector.broadcast %19 : f32 to vector<63x128xf32>
    %23 = arith.mulf %22, %18 : vector<63x128xf32>
    %24 = arith.select %21, %18, %23 : vector<63x128xi1>, vector<63x128xf32>
    %25 = vector.shape_cast %24 : vector<63x128xf32> to vector<1x63x128xf32>
    %cst_9 = arith.constant dense<0.000000e+00> : vector<1xf32>
    %26 = vector.multi_reduction <add>, %25, %cst_9 [1, 2] : vector<1x63x128xf32> to vector<1xf32>
    %27 = vector.shape_cast %26 : vector<1xf32> to vector<1x1x1xf32>
    %28 = vector.extract %27[0, 0, 0] : f32 from vector<1x1x1xf32>
    %cst_10 = arith.constant 1.24007944E-4 : f32
    %29 = arith.mulf %28, %cst_10 : f32
    %30 = arith.mulf %24, %24 : vector<63x128xf32>
    %31 = vector.shape_cast %30 : vector<63x128xf32> to vector<1x63x128xf32>
    %cst_11 = arith.constant dense<0.000000e+00> : vector<1xf32>
    %32 = vector.multi_reduction <add>, %31, %cst_11 [1, 2] : vector<1x63x128xf32> to vector<1xf32>
    %33 = vector.shape_cast %32 : vector<1xf32> to vector<1x1x1xf32>
    %34 = vector.extract %33[0, 0, 0] : f32 from vector<1x1x1xf32>
    %cst_12 = arith.constant 1.24007944E-4 : f32
    %35 = arith.mulf %34, %cst_12 : f32
    %36 = arith.mulf %29, %29 : f32
    %37 = arith.subf %35, %36 : f32
    %cst_13 = arith.constant 9.99999974E-6 : f32
    %38 = arith.addf %37, %cst_13 : f32
    %39 = math.rsqrt %38 : f32
    %c0_14 = arith.constant 0 : index
    %c0_15 = arith.constant 0 : index
    %40 = vector.load %arg5[%c0_14, %c0_15] : memref<1x128xf32, #tpu.memory_space<vmem>>, vector<1x128xf32>
    %41 = vector.broadcast %29 : f32 to vector<63x128xf32>
    %42 = arith.subf %24, %41 : vector<63x128xf32>
    %43 = vector.broadcast %40 : vector<1x128xf32> to vector<63x128xf32>
    %44 = arith.mulf %43, %42 : vector<63x128xf32>
    %45 = vector.broadcast %39 : f32 to vector<63x128xf32>
    %46 = arith.mulf %44, %45 : vector<63x128xf32>
    %c0_16 = arith.constant 0 : index
    %c0_17 = arith.constant 0 : index
    %47 = vector.load %arg6[%c0_16, %c0_17] : memref<1x128xf32, #tpu.memory_space<vmem>>, vector<1x128xf32>
    %48 = vector.broadcast %47 : vector<1x128xf32> to vector<63x128xf32>
    %49 = arith.addf %46, %48 : vector<63x128xf32>
    %c0_18 = arith.constant 0 : index
    %c0_19 = arith.constant 0 : index
    %c0_20 = arith.constant 0 : index
    %50 = vector.load %arg7[%c0_18, %c0_19, %c0_20] : memref<1x63x128xf32, #tpu.memory_space<vmem>>, vector<1x63x128xf32>
    %51 = vector.shape_cast %50 : vector<1x63x128xf32> to vector<63x128xf32>
    %52 = vector.shape_cast %49 : vector<63x128xf32> to vector<1x63x128xf32>
    tpu.vector_store %arg7[%c0_18, %c0_19, %c0_20], %52 {strides = array<i32>} : memref<1x63x128xf32, #tpu.memory_space<vmem>>, vector<1x63x128xf32>,
    return
  }
  func.func @transform_0(%arg0: i32) -> (i32, i32, i32) {
    %c0_i32 = arith.constant 0 : i32
    %c0_i32_0 = arith.constant 0 : i32
    %c0_i32_1 = arith.constant 0 : i32
    return %arg0, %c0_i32, %c0_i32_0 : i32, i32, i32
  }
  func.func @transform_1(%arg0: i32) -> (i32, i32) {
    %c0_i32 = arith.constant 0 : i32
    %c0_i32_0 = arith.constant 0 : i32
    %c0_i32_1 = arith.constant 0 : i32
    return %c0_i32, %c0_i32_0 : i32, i32
  }
  func.func @transform_2(%arg0: i32) -> (i32, i32) {
    %c0_i32 = arith.constant 0 : i32
    %c0_i32_0 = arith.constant 0 : i32
    %c0_i32_1 = arith.constant 0 : i32
    return %c0_i32, %c0_i32_0 : i32, i32
  }
  func.func @transform_3(%arg0: i32) -> i32 {
    %c0_i32 = arith.constant 0 : i32
    %c0_i32_0 = arith.constant 0 : i32
    return %c0_i32 : i32
  }
  func.func @transform_4(%arg0: i32) -> (i32, i32) {
    %c0_i32 = arith.constant 0 : i32
    %c0_i32_0 = arith.constant 0 : i32
    %c0_i32_1 = arith.constant 0 : i32
    return %c0_i32, %c0_i32_0 : i32, i32
  }
  func.func @transform_5(%arg0: i32) -> (i32, i32) {
    %c0_i32 = arith.constant 0 : i32
    %c0_i32_0 = arith.constant 0 : i32
    %c0_i32_1 = arith.constant 0 : i32
    return %c0_i32, %c0_i32_0 : i32, i32
  }
  func.func @transform_6(%arg0: i32) -> (i32, i32, i32) {
    %c0_i32 = arith.constant 0 : i32
    %c0_i32_0 = arith.constant 0 : i32
    %c0_i32_1 = arith.constant 0 : i32
    return %arg0, %c0_i32, %c0_i32_0 : i32, i32, i32
  }
}

module attributes {stable_mosaic.version = 11 : i64} {
  func.func @_gln_kernel(%arg0: i32, %arg1: memref<1x63x128xf32, #tpu.memory_space<vmem>>, %arg2: memref<1x128xf32, #tpu.memory_space<vmem>>, %arg3: memref<1x128xf32, #tpu.memory_space<vmem>>, %arg4: memref<1xf32, #tpu.memory_space<smem>>, %arg5: memref<1x63x128xf32, #tpu.memory_space<vmem>>) attributes {dimension_semantics = [#tpu.dimension_semantics<parallel>], iteration_bounds = array<i64: 2>, scalar_prefetch = 0 : i64, scratch_operands = 0 : i64, tpu.core_type = #tpu.core_type<tc>, window_params = [{transform_indices = @transform_0, window_bounds = array<i64: 1, 63, 128>}, {pipeline_mode = #tpu.pipeline_mode<synchronous>, transform_indices = @transform_1, window_bounds = array<i64: 1, 128>}, {pipeline_mode = #tpu.pipeline_mode<synchronous>, transform_indices = @transform_2, window_bounds = array<i64: 1, 128>}, {transform_indices = @transform_3, window_bounds = array<i64: 1>}, {transform_indices = @transform_4, window_bounds = array<i64: 1, 63, 128>}]} {
    %c0 = arith.constant 0 : index
    %c0_0 = arith.constant 0 : index
    %c0_1 = arith.constant 0 : index
    %0 = vector.load %arg1[%c0, %c0_0, %c0_1] : memref<1x63x128xf32, #tpu.memory_space<vmem>>, vector<1x63x128xf32>
    %1 = vector.shape_cast %0 : vector<1x63x128xf32> to vector<63x128xf32>
    %c0_2 = arith.constant 0 : index
    %2 = memref.load %arg4[%c0_2] : memref<1xf32, #tpu.memory_space<smem>>
    %cst = arith.constant 0.000000e+00 : f32
    %3 = vector.broadcast %cst : f32 to vector<63x128xf32>
    %4 = arith.cmpf ogt, %1, %3 : vector<63x128xf32>
    %5 = vector.broadcast %2 : f32 to vector<63x128xf32>
    %6 = arith.mulf %5, %1 : vector<63x128xf32>
    %7 = arith.select %4, %1, %6 : vector<63x128xi1>, vector<63x128xf32>
    %8 = vector.shape_cast %7 : vector<63x128xf32> to vector<1x63x128xf32>
    %cst_3 = arith.constant dense<0.000000e+00> : vector<1xf32>
    %9 = vector.multi_reduction <add>, %8, %cst_3 [1, 2] : vector<1x63x128xf32> to vector<1xf32>
    %10 = vector.shape_cast %9 : vector<1xf32> to vector<1x1x1xf32>
    %11 = vector.extract %10[0, 0, 0] : f32 from vector<1x1x1xf32>
    %cst_4 = arith.constant 1.24007944E-4 : f32
    %12 = arith.mulf %11, %cst_4 : f32
    %13 = arith.mulf %7, %7 : vector<63x128xf32>
    %14 = vector.shape_cast %13 : vector<63x128xf32> to vector<1x63x128xf32>
    %cst_5 = arith.constant dense<0.000000e+00> : vector<1xf32>
    %15 = vector.multi_reduction <add>, %14, %cst_5 [1, 2] : vector<1x63x128xf32> to vector<1xf32>
    %16 = vector.shape_cast %15 : vector<1xf32> to vector<1x1x1xf32>
    %17 = vector.extract %16[0, 0, 0] : f32 from vector<1x1x1xf32>
    %cst_6 = arith.constant 1.24007944E-4 : f32
    %18 = arith.mulf %17, %cst_6 : f32
    %19 = arith.mulf %12, %12 : f32
    %20 = arith.subf %18, %19 : f32
    %cst_7 = arith.constant 9.99999974E-6 : f32
    %21 = arith.addf %20, %cst_7 : f32
    %22 = math.rsqrt %21 : f32
    %c0_8 = arith.constant 0 : index
    %c0_9 = arith.constant 0 : index
    %23 = vector.load %arg2[%c0_8, %c0_9] : memref<1x128xf32, #tpu.memory_space<vmem>>, vector<1x128xf32>
    %24 = vector.broadcast %12 : f32 to vector<63x128xf32>
    %25 = arith.subf %7, %24 : vector<63x128xf32>
    %26 = vector.broadcast %23 : vector<1x128xf32> to vector<63x128xf32>
    %27 = arith.mulf %26, %25 : vector<63x128xf32>
    %28 = vector.broadcast %22 : f32 to vector<63x128xf32>
    %29 = arith.mulf %27, %28 : vector<63x128xf32>
    %c0_10 = arith.constant 0 : index
    %c0_11 = arith.constant 0 : index
    %30 = vector.load %arg3[%c0_10, %c0_11] : memref<1x128xf32, #tpu.memory_space<vmem>>, vector<1x128xf32>
    %31 = vector.broadcast %30 : vector<1x128xf32> to vector<63x128xf32>
    %32 = arith.addf %29, %31 : vector<63x128xf32>
    %c0_12 = arith.constant 0 : index
    %c0_13 = arith.constant 0 : index
    %c0_14 = arith.constant 0 : index
    %33 = vector.load %arg5[%c0_12, %c0_13, %c0_14] : memref<1x63x128xf32, #tpu.memory_space<vmem>>, vector<1x63x128xf32>
    %34 = vector.shape_cast %33 : vector<1x63x128xf32> to vector<63x128xf32>
    %35 = vector.shape_cast %32 : vector<63x128xf32> to vector<1x63x128xf32>
    tpu.vector_store %arg5[%c0_12, %c0_13, %c0_14], %35 {strides = array<i32>} : memref<1x63x128xf32, #tpu.memory_space<vmem>>, vector<1x63x128xf32>,
    return
  }
  func.func @transform_0(%arg0: i32) -> (i32, i32, i32) {
    %c0_i32 = arith.constant 0 : i32
    %c0_i32_0 = arith.constant 0 : i32
    %c0_i32_1 = arith.constant 0 : i32
    return %arg0, %c0_i32, %c0_i32_0 : i32, i32, i32
  }
  func.func @transform_1(%arg0: i32) -> (i32, i32) {
    %c0_i32 = arith.constant 0 : i32
    %c0_i32_0 = arith.constant 0 : i32
    %c0_i32_1 = arith.constant 0 : i32
    return %c0_i32, %c0_i32_0 : i32, i32
  }
  func.func @transform_2(%arg0: i32) -> (i32, i32) {
    %c0_i32 = arith.constant 0 : i32
    %c0_i32_0 = arith.constant 0 : i32
    %c0_i32_1 = arith.constant 0 : i32
    return %c0_i32, %c0_i32_0 : i32, i32
  }
  func.func @transform_3(%arg0: i32) -> i32 {
    %c0_i32 = arith.constant 0 : i32
    %c0_i32_0 = arith.constant 0 : i32
    return %c0_i32 : i32
  }
  func.func @transform_4(%arg0: i32) -> (i32, i32, i32) {
    %c0_i32 = arith.constant 0 : i32
    %c0_i32_0 = arith.constant 0 : i32
    %c0_i32_1 = arith.constant 0 : i32
    return %arg0, %c0_i32, %c0_i32_0 : i32, i32, i32
  }
}

module attributes {stable_mosaic.version = 11 : i64} {
  func.func @_mm_kernel(%arg0: i32, %arg1: memref<126x128xbf16, #tpu.memory_space<vmem>>, %arg2: memref<128x64xbf16, #tpu.memory_space<vmem>>, %arg3: memref<1x64xf32, #tpu.memory_space<vmem>>, %arg4: memref<126x64xf32, #tpu.memory_space<vmem>>, %arg5: memref<126x64xf32, #tpu.memory_space<vmem>>) attributes {dimension_semantics = [#tpu.dimension_semantics<parallel>], iteration_bounds = array<i64: 1>, scalar_prefetch = 0 : i64, scratch_operands = 0 : i64, tpu.core_type = #tpu.core_type<tc>, window_params = [{transform_indices = @transform_0, window_bounds = array<i64: 126, 128>}, {pipeline_mode = #tpu.pipeline_mode<synchronous>, transform_indices = @transform_1, window_bounds = array<i64: 128, 64>}, {pipeline_mode = #tpu.pipeline_mode<synchronous>, transform_indices = @transform_2, window_bounds = array<i64: 1, 64>}, {transform_indices = @transform_3, window_bounds = array<i64: 126, 64>}, {transform_indices = @transform_4, window_bounds = array<i64: 126, 64>}]} {
    %c0 = arith.constant 0 : index
    %c0_0 = arith.constant 0 : index
    %0 = vector.load %arg1[%c0, %c0_0] : memref<126x128xbf16, #tpu.memory_space<vmem>>, vector<126x128xbf16>
    %c0_1 = arith.constant 0 : index
    %c0_2 = arith.constant 0 : index
    %1 = vector.load %arg2[%c0_1, %c0_2] : memref<128x64xbf16, #tpu.memory_space<vmem>>, vector<128x64xbf16>
    %cst = arith.constant dense<0.000000e+00> : vector<126x64xf32>
    %2 = tpu.matmul %0, %1, %cst {dimension_numbers = #tpu.dot_dimension_numbers<[1], [0], [0], [1], [0, 0, 1, 1], [], []>} : vector<126x128xbf16>, vector<128x64xbf16>, vector<126x64xf32> -> vector<126x64xf32>
    %c0_3 = arith.constant 0 : index
    %c0_4 = arith.constant 0 : index
    %3 = vector.load %arg3[%c0_3, %c0_4] : memref<1x64xf32, #tpu.memory_space<vmem>>, vector<1x64xf32>
    %4 = vector.broadcast %3 : vector<1x64xf32> to vector<126x64xf32>
    %5 = arith.addf %2, %4 : vector<126x64xf32>
    %c0_5 = arith.constant 0 : index
    %c0_6 = arith.constant 0 : index
    %6 = vector.load %arg4[%c0_5, %c0_6] : memref<126x64xf32, #tpu.memory_space<vmem>>, vector<126x64xf32>
    %7 = arith.addf %5, %6 : vector<126x64xf32>
    %c0_7 = arith.constant 0 : index
    %c0_8 = arith.constant 0 : index
    %8 = vector.load %arg5[%c0_7, %c0_8] : memref<126x64xf32, #tpu.memory_space<vmem>>, vector<126x64xf32>
    tpu.vector_store %arg5[%c0_7, %c0_8], %7 {strides = array<i32>} : memref<126x64xf32, #tpu.memory_space<vmem>>, vector<126x64xf32>,
    return
  }
  func.func @transform_0(%arg0: i32) -> (i32, i32) {
    %c0_i32 = arith.constant 0 : i32
    %c0_i32_0 = arith.constant 0 : i32
    return %arg0, %c0_i32 : i32, i32
  }
  func.func @transform_1(%arg0: i32) -> (i32, i32) {
    %c0_i32 = arith.constant 0 : i32
    %c0_i32_0 = arith.constant 0 : i32
    %c0_i32_1 = arith.constant 0 : i32
    return %c0_i32, %c0_i32_0 : i32, i32
  }
  func.func @transform_2(%arg0: i32) -> (i32, i32) {
    %c0_i32 = arith.constant 0 : i32
    %c0_i32_0 = arith.constant 0 : i32
    %c0_i32_1 = arith.constant 0 : i32
    return %c0_i32, %c0_i32_0 : i32, i32
  }
  func.func @transform_3(%arg0: i32) -> (i32, i32) {
    %c0_i32 = arith.constant 0 : i32
    %c0_i32_0 = arith.constant 0 : i32
    return %arg0, %c0_i32 : i32, i32
  }
  func.func @transform_4(%arg0: i32) -> (i32, i32) {
    %c0_i32 = arith.constant 0 : i32
    %c0_i32_0 = arith.constant 0 : i32
    return %arg0, %c0_i32 : i32, i32
  }
}

module attributes {stable_mosaic.version = 11 : i64} {
  func.func @_mm_kernel(%arg0: i32, %arg1: memref<126x64xbf16, #tpu.memory_space<vmem>>, %arg2: memref<64x128xbf16, #tpu.memory_space<vmem>>, %arg3: memref<1x128xf32, #tpu.memory_space<vmem>>, %arg4: memref<126x128xf32, #tpu.memory_space<vmem>>) attributes {dimension_semantics = [#tpu.dimension_semantics<parallel>], iteration_bounds = array<i64: 1>, scalar_prefetch = 0 : i64, scratch_operands = 0 : i64, tpu.core_type = #tpu.core_type<tc>, window_params = [{transform_indices = @transform_0, window_bounds = array<i64: 126, 64>}, {pipeline_mode = #tpu.pipeline_mode<synchronous>, transform_indices = @transform_1, window_bounds = array<i64: 64, 128>}, {pipeline_mode = #tpu.pipeline_mode<synchronous>, transform_indices = @transform_2, window_bounds = array<i64: 1, 128>}, {transform_indices = @transform_3, window_bounds = array<i64: 126, 128>}]} {
    %c0 = arith.constant 0 : index
    %c0_0 = arith.constant 0 : index
    %0 = vector.load %arg1[%c0, %c0_0] : memref<126x64xbf16, #tpu.memory_space<vmem>>, vector<126x64xbf16>
    %c0_1 = arith.constant 0 : index
    %c0_2 = arith.constant 0 : index
    %1 = vector.load %arg2[%c0_1, %c0_2] : memref<64x128xbf16, #tpu.memory_space<vmem>>, vector<64x128xbf16>
    %cst = arith.constant dense<0.000000e+00> : vector<126x128xf32>
    %2 = tpu.matmul %0, %1, %cst {dimension_numbers = #tpu.dot_dimension_numbers<[1], [0], [0], [1], [0, 0, 1, 1], [], []>} : vector<126x64xbf16>, vector<64x128xbf16>, vector<126x128xf32> -> vector<126x128xf32>
    %c0_3 = arith.constant 0 : index
    %c0_4 = arith.constant 0 : index
    %3 = vector.load %arg3[%c0_3, %c0_4] : memref<1x128xf32, #tpu.memory_space<vmem>>, vector<1x128xf32>
    %4 = vector.broadcast %3 : vector<1x128xf32> to vector<126x128xf32>
    %5 = arith.addf %2, %4 : vector<126x128xf32>
    %c0_5 = arith.constant 0 : index
    %c0_6 = arith.constant 0 : index
    %6 = vector.load %arg4[%c0_5, %c0_6] : memref<126x128xf32, #tpu.memory_space<vmem>>, vector<126x128xf32>
    tpu.vector_store %arg4[%c0_5, %c0_6], %5 {strides = array<i32>} : memref<126x128xf32, #tpu.memory_space<vmem>>, vector<126x128xf32>,
    return
  }
  func.func @transform_0(%arg0: i32) -> (i32, i32) {
    %c0_i32 = arith.constant 0 : i32
    %c0_i32_0 = arith.constant 0 : i32
    return %arg0, %c0_i32 : i32, i32
  }
  func.func @transform_1(%arg0: i32) -> (i32, i32) {
    %c0_i32 = arith.constant 0 : i32
    %c0_i32_0 = arith.constant 0 : i32
    %c0_i32_1 = arith.constant 0 : i32
    return %c0_i32, %c0_i32_0 : i32, i32
  }
  func.func @transform_2(%arg0: i32) -> (i32, i32) {
    %c0_i32 = arith.constant 0 : i32
    %c0_i32_0 = arith.constant 0 : i32
    %c0_i32_1 = arith.constant 0 : i32
    return %c0_i32, %c0_i32_0 : i32, i32
  }
  func.func @transform_3(%arg0: i32) -> (i32, i32) {
    %c0_i32 = arith.constant 0 : i32
    %c0_i32_0 = arith.constant 0 : i32
    return %arg0, %c0_i32 : i32, i32
  }
}

module attributes {stable_mosaic.version = 11 : i64} {
  func.func @_dwconv_prelu_gln_kernel(%arg0: i32, %arg1: memref<1x67x128xf32, #tpu.memory_space<vmem>>, %arg2: memref<3x128xf32, #tpu.memory_space<vmem>>, %arg3: memref<1x128xf32, #tpu.memory_space<vmem>>, %arg4: memref<1xf32, #tpu.memory_space<smem>>, %arg5: memref<1x128xf32, #tpu.memory_space<vmem>>, %arg6: memref<1x128xf32, #tpu.memory_space<vmem>>, %arg7: memref<1x63x128xf32, #tpu.memory_space<vmem>>) attributes {dimension_semantics = [#tpu.dimension_semantics<parallel>], iteration_bounds = array<i64: 2>, scalar_prefetch = 0 : i64, scratch_operands = 0 : i64, tpu.core_type = #tpu.core_type<tc>, window_params = [{transform_indices = @transform_0, window_bounds = array<i64: 1, 67, 128>}, {pipeline_mode = #tpu.pipeline_mode<synchronous>, transform_indices = @transform_1, window_bounds = array<i64: 3, 128>}, {pipeline_mode = #tpu.pipeline_mode<synchronous>, transform_indices = @transform_2, window_bounds = array<i64: 1, 128>}, {transform_indices = @transform_3, window_bounds = array<i64: 1>}, {pipeline_mode = #tpu.pipeline_mode<synchronous>, transform_indices = @transform_4, window_bounds = array<i64: 1, 128>}, {pipeline_mode = #tpu.pipeline_mode<synchronous>, transform_indices = @transform_5, window_bounds = array<i64: 1, 128>}, {transform_indices = @transform_6, window_bounds = array<i64: 1, 63, 128>}]} {
    %c0 = arith.constant 0 : index
    %c0_0 = arith.constant 0 : index
    %c0_1 = arith.constant 0 : index
    %0 = vector.load %arg1[%c0, %c0_0, %c0_1] : memref<1x67x128xf32, #tpu.memory_space<vmem>>, vector<1x67x128xf32>
    %1 = vector.shape_cast %0 : vector<1x67x128xf32> to vector<67x128xf32>
    %2 = vector.extract_strided_slice %1 {offsets = [0, 0], sizes = [63, 128], strides = [1, 1]} : vector<67x128xf32> to vector<63x128xf32>
    %c0_2 = arith.constant 0 : index
    %c0_3 = arith.constant 0 : index
    %3 = vector.load %arg2[%c0_2, %c0_3] : memref<3x128xf32, #tpu.memory_space<vmem>>, vector<1x128xf32>
    %4 = vector.broadcast %3 : vector<1x128xf32> to vector<63x128xf32>
    %5 = arith.mulf %2, %4 : vector<63x128xf32>
    %6 = vector.extract_strided_slice %1 {offsets = [2, 0], sizes = [63, 128], strides = [1, 1]} : vector<67x128xf32> to vector<63x128xf32>
    %c1 = arith.constant 1 : index
    %c0_4 = arith.constant 0 : index
    %7 = vector.load %arg2[%c1, %c0_4] : memref<3x128xf32, #tpu.memory_space<vmem>>, vector<1x128xf32>
    %8 = vector.broadcast %7 : vector<1x128xf32> to vector<63x128xf32>
    %9 = arith.mulf %6, %8 : vector<63x128xf32>
    %10 = arith.addf %5, %9 : vector<63x128xf32>
    %11 = vector.extract_strided_slice %1 {offsets = [4, 0], sizes = [63, 128], strides = [1, 1]} : vector<67x128xf32> to vector<63x128xf32>
    %c2 = arith.constant 2 : index
    %c0_5 = arith.constant 0 : index
    %12 = vector.load %arg2[%c2, %c0_5] : memref<3x128xf32, #tpu.memory_space<vmem>>, vector<1x128xf32>
    %13 = vector.broadcast %12 : vector<1x128xf32> to vector<63x128xf32>
    %14 = arith.mulf %11, %13 : vector<63x128xf32>
    %15 = arith.addf %10, %14 : vector<63x128xf32>
    %c0_6 = arith.constant 0 : index
    %c0_7 = arith.constant 0 : index
    %16 = vector.load %arg3[%c0_6, %c0_7] : memref<1x128xf32, #tpu.memory_space<vmem>>, vector<1x128xf32>
    %17 = vector.broadcast %16 : vector<1x128xf32> to vector<63x128xf32>
    %18 = arith.addf %15, %17 : vector<63x128xf32>
    %c0_8 = arith.constant 0 : index
    %19 = memref.load %arg4[%c0_8] : memref<1xf32, #tpu.memory_space<smem>>
    %cst = arith.constant 0.000000e+00 : f32
    %20 = vector.broadcast %cst : f32 to vector<63x128xf32>
    %21 = arith.cmpf ogt, %18, %20 : vector<63x128xf32>
    %22 = vector.broadcast %19 : f32 to vector<63x128xf32>
    %23 = arith.mulf %22, %18 : vector<63x128xf32>
    %24 = arith.select %21, %18, %23 : vector<63x128xi1>, vector<63x128xf32>
    %25 = vector.shape_cast %24 : vector<63x128xf32> to vector<1x63x128xf32>
    %cst_9 = arith.constant dense<0.000000e+00> : vector<1xf32>
    %26 = vector.multi_reduction <add>, %25, %cst_9 [1, 2] : vector<1x63x128xf32> to vector<1xf32>
    %27 = vector.shape_cast %26 : vector<1xf32> to vector<1x1x1xf32>
    %28 = vector.extract %27[0, 0, 0] : f32 from vector<1x1x1xf32>
    %cst_10 = arith.constant 1.24007944E-4 : f32
    %29 = arith.mulf %28, %cst_10 : f32
    %30 = arith.mulf %24, %24 : vector<63x128xf32>
    %31 = vector.shape_cast %30 : vector<63x128xf32> to vector<1x63x128xf32>
    %cst_11 = arith.constant dense<0.000000e+00> : vector<1xf32>
    %32 = vector.multi_reduction <add>, %31, %cst_11 [1, 2] : vector<1x63x128xf32> to vector<1xf32>
    %33 = vector.shape_cast %32 : vector<1xf32> to vector<1x1x1xf32>
    %34 = vector.extract %33[0, 0, 0] : f32 from vector<1x1x1xf32>
    %cst_12 = arith.constant 1.24007944E-4 : f32
    %35 = arith.mulf %34, %cst_12 : f32
    %36 = arith.mulf %29, %29 : f32
    %37 = arith.subf %35, %36 : f32
    %cst_13 = arith.constant 9.99999974E-6 : f32
    %38 = arith.addf %37, %cst_13 : f32
    %39 = math.rsqrt %38 : f32
    %c0_14 = arith.constant 0 : index
    %c0_15 = arith.constant 0 : index
    %40 = vector.load %arg5[%c0_14, %c0_15] : memref<1x128xf32, #tpu.memory_space<vmem>>, vector<1x128xf32>
    %41 = vector.broadcast %29 : f32 to vector<63x128xf32>
    %42 = arith.subf %24, %41 : vector<63x128xf32>
    %43 = vector.broadcast %40 : vector<1x128xf32> to vector<63x128xf32>
    %44 = arith.mulf %43, %42 : vector<63x128xf32>
    %45 = vector.broadcast %39 : f32 to vector<63x128xf32>
    %46 = arith.mulf %44, %45 : vector<63x128xf32>
    %c0_16 = arith.constant 0 : index
    %c0_17 = arith.constant 0 : index
    %47 = vector.load %arg6[%c0_16, %c0_17] : memref<1x128xf32, #tpu.memory_space<vmem>>, vector<1x128xf32>
    %48 = vector.broadcast %47 : vector<1x128xf32> to vector<63x128xf32>
    %49 = arith.addf %46, %48 : vector<63x128xf32>
    %c0_18 = arith.constant 0 : index
    %c0_19 = arith.constant 0 : index
    %c0_20 = arith.constant 0 : index
    %50 = vector.load %arg7[%c0_18, %c0_19, %c0_20] : memref<1x63x128xf32, #tpu.memory_space<vmem>>, vector<1x63x128xf32>
    %51 = vector.shape_cast %50 : vector<1x63x128xf32> to vector<63x128xf32>
    %52 = vector.shape_cast %49 : vector<63x128xf32> to vector<1x63x128xf32>
    tpu.vector_store %arg7[%c0_18, %c0_19, %c0_20], %52 {strides = array<i32>} : memref<1x63x128xf32, #tpu.memory_space<vmem>>, vector<1x63x128xf32>,
    return
  }
  func.func @transform_0(%arg0: i32) -> (i32, i32, i32) {
    %c0_i32 = arith.constant 0 : i32
    %c0_i32_0 = arith.constant 0 : i32
    %c0_i32_1 = arith.constant 0 : i32
    return %arg0, %c0_i32, %c0_i32_0 : i32, i32, i32
  }
  func.func @transform_1(%arg0: i32) -> (i32, i32) {
    %c0_i32 = arith.constant 0 : i32
    %c0_i32_0 = arith.constant 0 : i32
    %c0_i32_1 = arith.constant 0 : i32
    return %c0_i32, %c0_i32_0 : i32, i32
  }
  func.func @transform_2(%arg0: i32) -> (i32, i32) {
    %c0_i32 = arith.constant 0 : i32
    %c0_i32_0 = arith.constant 0 : i32
    %c0_i32_1 = arith.constant 0 : i32
    return %c0_i32, %c0_i32_0 : i32, i32
  }
  func.func @transform_3(%arg0: i32) -> i32 {
    %c0_i32 = arith.constant 0 : i32
    %c0_i32_0 = arith.constant 0 : i32
    return %c0_i32 : i32
  }
  func.func @transform_4(%arg0: i32) -> (i32, i32) {
    %c0_i32 = arith.constant 0 : i32
    %c0_i32_0 = arith.constant 0 : i32
    %c0_i32_1 = arith.constant 0 : i32
    return %c0_i32, %c0_i32_0 : i32, i32
  }
  func.func @transform_5(%arg0: i32) -> (i32, i32) {
    %c0_i32 = arith.constant 0 : i32
    %c0_i32_0 = arith.constant 0 : i32
    %c0_i32_1 = arith.constant 0 : i32
    return %c0_i32, %c0_i32_0 : i32, i32
  }
  func.func @transform_6(%arg0: i32) -> (i32, i32, i32) {
    %c0_i32 = arith.constant 0 : i32
    %c0_i32_0 = arith.constant 0 : i32
    %c0_i32_1 = arith.constant 0 : i32
    return %arg0, %c0_i32, %c0_i32_0 : i32, i32, i32
  }
}

module attributes {stable_mosaic.version = 11 : i64} {
  func.func @_mm_kernel(%arg0: i32, %arg1: memref<126x64xbf16, #tpu.memory_space<vmem>>, %arg2: memref<64x192xbf16, #tpu.memory_space<vmem>>, %arg3: memref<1x192xf32, #tpu.memory_space<vmem>>, %arg4: memref<126x192xf32, #tpu.memory_space<vmem>>, %arg5: memref<126x192xf32, #tpu.memory_space<vmem>>) attributes {dimension_semantics = [#tpu.dimension_semantics<parallel>], iteration_bounds = array<i64: 1>, scalar_prefetch = 0 : i64, scratch_operands = 0 : i64, tpu.core_type = #tpu.core_type<tc>, window_params = [{transform_indices = @transform_0, window_bounds = array<i64: 126, 64>}, {pipeline_mode = #tpu.pipeline_mode<synchronous>, transform_indices = @transform_1, window_bounds = array<i64: 64, 192>}, {pipeline_mode = #tpu.pipeline_mode<synchronous>, transform_indices = @transform_2, window_bounds = array<i64: 1, 192>}, {transform_indices = @transform_3, window_bounds = array<i64: 126, 192>}, {transform_indices = @transform_4, window_bounds = array<i64: 126, 192>}]} {
    %c0 = arith.constant 0 : index
    %c0_0 = arith.constant 0 : index
    %0 = vector.load %arg1[%c0, %c0_0] : memref<126x64xbf16, #tpu.memory_space<vmem>>, vector<126x64xbf16>
    %c0_1 = arith.constant 0 : index
    %c0_2 = arith.constant 0 : index
    %1 = vector.load %arg2[%c0_1, %c0_2] : memref<64x192xbf16, #tpu.memory_space<vmem>>, vector<64x192xbf16>
    %cst = arith.constant dense<0.000000e+00> : vector<126x192xf32>
    %2 = tpu.matmul %0, %1, %cst {dimension_numbers = #tpu.dot_dimension_numbers<[1], [0], [0], [1], [0, 0, 1, 1], [], []>} : vector<126x64xbf16>, vector<64x192xbf16>, vector<126x192xf32> -> vector<126x192xf32>
    %c0_3 = arith.constant 0 : index
    %c0_4 = arith.constant 0 : index
    %3 = vector.load %arg3[%c0_3, %c0_4] : memref<1x192xf32, #tpu.memory_space<vmem>>, vector<1x192xf32>
    %4 = vector.broadcast %3 : vector<1x192xf32> to vector<126x192xf32>
    %5 = arith.addf %2, %4 : vector<126x192xf32>
    %cst_5 = arith.constant 0.000000e+00 : f32
    %6 = vector.broadcast %cst_5 : f32 to vector<126x192xf32>
    %7 = arith.maximumf %5, %6 : vector<126x192xf32>
    %c0_6 = arith.constant 0 : index
    %c0_7 = arith.constant 0 : index
    %8 = vector.load %arg4[%c0_6, %c0_7] : memref<126x192xf32, #tpu.memory_space<vmem>>, vector<126x192xf32>
    %9 = arith.mulf %7, %8 : vector<126x192xf32>
    %c0_8 = arith.constant 0 : index
    %c0_9 = arith.constant 0 : index
    %10 = vector.load %arg5[%c0_8, %c0_9] : memref<126x192xf32, #tpu.memory_space<vmem>>, vector<126x192xf32>
    tpu.vector_store %arg5[%c0_8, %c0_9], %9 {strides = array<i32>} : memref<126x192xf32, #tpu.memory_space<vmem>>, vector<126x192xf32>,
    return
  }
  func.func @transform_0(%arg0: i32) -> (i32, i32) {
    %c0_i32 = arith.constant 0 : i32
    %c0_i32_0 = arith.constant 0 : i32
    return %arg0, %c0_i32 : i32, i32
  }
  func.func @transform_1(%arg0: i32) -> (i32, i32) {
    %c0_i32 = arith.constant 0 : i32
    %c0_i32_0 = arith.constant 0 : i32
    %c0_i32_1 = arith.constant 0 : i32
    return %c0_i32, %c0_i32_0 : i32, i32
  }
  func.func @transform_2(%arg0: i32) -> (i32, i32) {
    %c0_i32 = arith.constant 0 : i32
    %c0_i32_0 = arith.constant 0 : i32
    %c0_i32_1 = arith.constant 0 : i32
    return %c0_i32, %c0_i32_0 : i32, i32
  }
  func.func @transform_3(%arg0: i32) -> (i32, i32) {
    %c0_i32 = arith.constant 0 : i32
    %c0_i32_0 = arith.constant 0 : i32
    return %arg0, %c0_i32 : i32, i32
  }
  func.func @transform_4(%arg0: i32) -> (i32, i32) {
    %c0_i32 = arith.constant 0 : i32
    %c0_i32_0 = arith.constant 0 : i32
    return %arg0, %c0_i32 : i32, i32
  }
}

module attributes {stable_mosaic.version = 11 : i64} {
  func.func @_mm_kernel(%arg0: i32, %arg1: memref<126x64xbf16, #tpu.memory_space<vmem>>, %arg2: memref<64x16xbf16, #tpu.memory_space<vmem>>, %arg3: memref<126x16xf32, #tpu.memory_space<vmem>>) attributes {dimension_semantics = [#tpu.dimension_semantics<parallel>], iteration_bounds = array<i64: 1>, scalar_prefetch = 0 : i64, scratch_operands = 0 : i64, tpu.core_type = #tpu.core_type<tc>, window_params = [{transform_indices = @transform_0, window_bounds = array<i64: 126, 64>}, {pipeline_mode = #tpu.pipeline_mode<synchronous>, transform_indices = @transform_1, window_bounds = array<i64: 64, 16>}, {transform_indices = @transform_2, window_bounds = array<i64: 126, 16>}]} {
    %c0 = arith.constant 0 : index
    %c0_0 = arith.constant 0 : index
    %0 = vector.load %arg1[%c0, %c0_0] : memref<126x64xbf16, #tpu.memory_space<vmem>>, vector<126x64xbf16>
    %c0_1 = arith.constant 0 : index
    %c0_2 = arith.constant 0 : index
    %1 = vector.load %arg2[%c0_1, %c0_2] : memref<64x16xbf16, #tpu.memory_space<vmem>>, vector<64x16xbf16>
    %cst = arith.constant dense<0.000000e+00> : vector<126x16xf32>
    %2 = tpu.matmul %0, %1, %cst {dimension_numbers = #tpu.dot_dimension_numbers<[1], [0], [0], [1], [0, 0, 1, 1], [], []>} : vector<126x64xbf16>, vector<64x16xbf16>, vector<126x16xf32> -> vector<126x16xf32>
    %c0_3 = arith.constant 0 : index
    %c0_4 = arith.constant 0 : index
    %3 = vector.load %arg3[%c0_3, %c0_4] : memref<126x16xf32, #tpu.memory_space<vmem>>, vector<126x16xf32>
    tpu.vector_store %arg3[%c0_3, %c0_4], %2 {strides = array<i32>} : memref<126x16xf32, #tpu.memory_space<vmem>>, vector<126x16xf32>,
    return
  }
  func.func @transform_0(%arg0: i32) -> (i32, i32) {
    %c0_i32 = arith.constant 0 : i32
    %c0_i32_0 = arith.constant 0 : i32
    return %arg0, %c0_i32 : i32, i32
  }
  func.func @transform_1(%arg0: i32) -> (i32, i32) {
    %c0_i32 = arith.constant 0 : i32
    %c0_i32_0 = arith.constant 0 : i32
    %c0_i32_1 = arith.constant 0 : i32
    return %c0_i32, %c0_i32_0 : i32, i32
  }
  func.func @transform_2(%arg0: i32) -> (i32, i32) {
    %c0_i32 = arith.constant 0 : i32
    %c0_i32_0 = arith.constant 0 : i32
    return %arg0, %c0_i32 : i32, i32
  }
}

module attributes {stable_mosaic.version = 11 : i64} {
  func.func @_mm_kernel(%arg0: i32, %arg1: memref<126x64xbf16, #tpu.memory_space<vmem>>, %arg2: memref<64x8xbf16, #tpu.memory_space<vmem>>, %arg3: memref<126x8xf32, #tpu.memory_space<vmem>>) attributes {dimension_semantics = [#tpu.dimension_semantics<parallel>], iteration_bounds = array<i64: 1>, scalar_prefetch = 0 : i64, scratch_operands = 0 : i64, tpu.core_type = #tpu.core_type<tc>, window_params = [{transform_indices = @transform_0, window_bounds = array<i64: 126, 64>}, {pipeline_mode = #tpu.pipeline_mode<synchronous>, transform_indices = @transform_1, window_bounds = array<i64: 64, 8>}, {transform_indices = @transform_2, window_bounds = array<i64: 126, 8>}]} {
    %c0 = arith.constant 0 : index
    %c0_0 = arith.constant 0 : index
    %0 = vector.load %arg1[%c0, %c0_0] : memref<126x64xbf16, #tpu.memory_space<vmem>>, vector<126x64xbf16>
    %c0_1 = arith.constant 0 : index
    %c0_2 = arith.constant 0 : index
    %1 = vector.load %arg2[%c0_1, %c0_2] : memref<64x8xbf16, #tpu.memory_space<vmem>>, vector<64x8xbf16>
    %cst = arith.constant dense<0.000000e+00> : vector<126x8xf32>
    %2 = tpu.matmul %0, %1, %cst {dimension_numbers = #tpu.dot_dimension_numbers<[1], [0], [0], [1], [0, 0, 1, 1], [], []>} : vector<126x64xbf16>, vector<64x8xbf16>, vector<126x8xf32> -> vector<126x8xf32>
    %c0_3 = arith.constant 0 : index
    %c0_4 = arith.constant 0 : index
    %3 = vector.load %arg3[%c0_3, %c0_4] : memref<126x8xf32, #tpu.memory_space<vmem>>, vector<126x8xf32>
    tpu.vector_store %arg3[%c0_3, %c0_4], %2 {strides = array<i32>} : memref<126x8xf32, #tpu.memory_space<vmem>>, vector<126x8xf32>,
    return
  }
  func.func @transform_0(%arg0: i32) -> (i32, i32) {
    %c0_i32 = arith.constant 0 : i32
    %c0_i32_0 = arith.constant 0 : i32
    return %arg0, %c0_i32 : i32, i32
  }
  func.func @transform_1(%arg0: i32) -> (i32, i32) {
    %c0_i32 = arith.constant 0 : i32
    %c0_i32_0 = arith.constant 0 : i32
    %c0_i32_1 = arith.constant 0 : i32
    return %c0_i32, %c0_i32_0 : i32, i32
  }
  func.func @transform_2(%arg0: i32) -> (i32, i32) {
    %c0_i32 = arith.constant 0 : i32
    %c0_i32_0 = arith.constant 0 : i32
    return %arg0, %c0_i32 : i32, i32
  }
}

module attributes {stable_mosaic.version = 11 : i64} {
  func.func @_mm_kernel(%arg0: i32, %arg1: memref<126x64xbf16, #tpu.memory_space<vmem>>, %arg2: memref<64x4xbf16, #tpu.memory_space<vmem>>, %arg3: memref<126x4xf32, #tpu.memory_space<vmem>>) attributes {dimension_semantics = [#tpu.dimension_semantics<parallel>], iteration_bounds = array<i64: 1>, scalar_prefetch = 0 : i64, scratch_operands = 0 : i64, tpu.core_type = #tpu.core_type<tc>, window_params = [{transform_indices = @transform_0, window_bounds = array<i64: 126, 64>}, {pipeline_mode = #tpu.pipeline_mode<synchronous>, transform_indices = @transform_1, window_bounds = array<i64: 64, 4>}, {transform_indices = @transform_2, window_bounds = array<i64: 126, 4>}]} {
    %c0 = arith.constant 0 : index
    %c0_0 = arith.constant 0 : index
    %0 = vector.load %arg1[%c0, %c0_0] : memref<126x64xbf16, #tpu.memory_space<vmem>>, vector<126x64xbf16>
    %c0_1 = arith.constant 0 : index
    %c0_2 = arith.constant 0 : index
    %1 = vector.load %arg2[%c0_1, %c0_2] : memref<64x4xbf16, #tpu.memory_space<vmem>>, vector<64x4xbf16>
    %cst = arith.constant dense<0.000000e+00> : vector<126x4xf32>
    %2 = tpu.matmul %0, %1, %cst {dimension_numbers = #tpu.dot_dimension_numbers<[1], [0], [0], [1], [0, 0, 1, 1], [], []>} : vector<126x64xbf16>, vector<64x4xbf16>, vector<126x4xf32> -> vector<126x4xf32>
    %c0_3 = arith.constant 0 : index
    %c0_4 = arith.constant 0 : index
    %3 = vector.load %arg3[%c0_3, %c0_4] : memref<126x4xf32, #tpu.memory_space<vmem>>, vector<126x4xf32>
    tpu.vector_store %arg3[%c0_3, %c0_4], %2 {strides = array<i32>} : memref<126x4xf32, #tpu.memory_space<vmem>>, vector<126x4xf32>,
    return
  }
  func.func @transform_0(%arg0: i32) -> (i32, i32) {
    %c0_i32 = arith.constant 0 : i32
    %c0_i32_0 = arith.constant 0 : i32
    return %arg0, %c0_i32 : i32, i32
  }
  func.func @transform_1(%arg0: i32) -> (i32, i32) {
    %c0_i32 = arith.constant 0 : i32
    %c0_i32_0 = arith.constant 0 : i32
    %c0_i32_1 = arith.constant 0 : i32
    return %c0_i32, %c0_i32_0 : i32, i32
  }
  func.func @transform_2(%arg0: i32) -> (i32, i32) {
    %c0_i32 = arith.constant 0 : i32
    %c0_i32_0 = arith.constant 0 : i32
    return %arg0, %c0_i32 : i32, i32
  }
}

module attributes {stable_mosaic.version = 11 : i64} {
  func.func @_mm_kernel(%arg0: i32, %arg1: memref<2x64xbf16, #tpu.memory_space<vmem>>, %arg2: memref<64x16xbf16, #tpu.memory_space<vmem>>, %arg3: memref<1x16xf32, #tpu.memory_space<vmem>>, %arg4: memref<2x16xf32, #tpu.memory_space<vmem>>) attributes {dimension_semantics = [#tpu.dimension_semantics<parallel>], iteration_bounds = array<i64: 1>, scalar_prefetch = 0 : i64, scratch_operands = 0 : i64, tpu.core_type = #tpu.core_type<tc>, window_params = [{transform_indices = @transform_0, window_bounds = array<i64: 2, 64>}, {pipeline_mode = #tpu.pipeline_mode<synchronous>, transform_indices = @transform_1, window_bounds = array<i64: 64, 16>}, {pipeline_mode = #tpu.pipeline_mode<synchronous>, transform_indices = @transform_2, window_bounds = array<i64: 1, 16>}, {transform_indices = @transform_3, window_bounds = array<i64: 2, 16>}]} {
    %c0 = arith.constant 0 : index
    %c0_0 = arith.constant 0 : index
    %0 = vector.load %arg1[%c0, %c0_0] : memref<2x64xbf16, #tpu.memory_space<vmem>>, vector<2x64xbf16>
    %c0_1 = arith.constant 0 : index
    %c0_2 = arith.constant 0 : index
    %1 = vector.load %arg2[%c0_1, %c0_2] : memref<64x16xbf16, #tpu.memory_space<vmem>>, vector<64x16xbf16>
    %cst = arith.constant dense<0.000000e+00> : vector<2x16xf32>
    %2 = tpu.matmul %0, %1, %cst {dimension_numbers = #tpu.dot_dimension_numbers<[1], [0], [0], [1], [0, 0, 1, 1], [], []>} : vector<2x64xbf16>, vector<64x16xbf16>, vector<2x16xf32> -> vector<2x16xf32>
    %c0_3 = arith.constant 0 : index
    %c0_4 = arith.constant 0 : index
    %3 = vector.load %arg3[%c0_3, %c0_4] : memref<1x16xf32, #tpu.memory_space<vmem>>, vector<1x16xf32>
    %4 = vector.broadcast %3 : vector<1x16xf32> to vector<2x16xf32>
    %5 = arith.addf %2, %4 : vector<2x16xf32>
    %c0_5 = arith.constant 0 : index
    %c0_6 = arith.constant 0 : index
    %6 = vector.load %arg4[%c0_5, %c0_6] : memref<2x16xf32, #tpu.memory_space<vmem>>, vector<2x16xf32>
    tpu.vector_store %arg4[%c0_5, %c0_6], %5 {strides = array<i32>} : memref<2x16xf32, #tpu.memory_space<vmem>>, vector<2x16xf32>,
    return
  }
  func.func @transform_0(%arg0: i32) -> (i32, i32) {
    %c0_i32 = arith.constant 0 : i32
    %c0_i32_0 = arith.constant 0 : i32
    return %arg0, %c0_i32 : i32, i32
  }
  func.func @transform_1(%arg0: i32) -> (i32, i32) {
    %c0_i32 = arith.constant 0 : i32
    %c0_i32_0 = arith.constant 0 : i32
    %c0_i32_1 = arith.constant 0 : i32
    return %c0_i32, %c0_i32_0 : i32, i32
  }
  func.func @transform_2(%arg0: i32) -> (i32, i32) {
    %c0_i32 = arith.constant 0 : i32
    %c0_i32_0 = arith.constant 0 : i32
    %c0_i32_1 = arith.constant 0 : i32
    return %c0_i32, %c0_i32_0 : i32, i32
  }
  func.func @transform_3(%arg0: i32) -> (i32, i32) {
    %c0_i32 = arith.constant 0 : i32
    %c0_i32_0 = arith.constant 0 : i32
    return %arg0, %c0_i32 : i32, i32
  }
}

</mosaic_0001>

<bundles_post_ra>
// kernel: spex_plus_forward.54
= control target key start
LH: loop header
LB: loop body
LE: loop exit
PB: predicated region body
PF: predicated region fallthrough
CT: control target
= control target key end

     0   :  { %v335_v1 = vmov 0   ;;  %vm95_vm0 = vcmask 130048   ;;  %v35_v11 = vlaneseq  ;;  %vm266_vm1 = vcmask 523264   ;;  %s544_s1 = inlined_call_operand.vmem [shape: bf16[16,192], index: 1, kind: input, shape index: {}]   ;;  %s545_s0 = inlined_call_operand.vmem [shape: bf16[126,16], index: 0, kind: input, shape index: {}]   ;;  %s546_s2 = inlined_call_operand.vmem [shape: f32[1,192], index: 2, kind: input, shape index: {}]   ;;  %s547_s3 = inlined_call_operand.vmem [shape: f32[126,192], index: 3, kind: output, shape index: {}]  }
   0x1   :  { %v324_v0 = vld [vmem:[%s544_s1 + $0x4] ss:$8 sps:$4 sm:$0xff]   ;;  %152 = vmatprep.mubr.bf16.mxu0 %v335_v1  ;;  %192 = vmatprep.mubr.bf16.mxu1 %v335_v1  ;;  %v326_v2 = vld [vmem:[%s544_s1] ss:$8 sps:$4 sm:$0xff]   ;;  %v331_v7 = vld [vmem:[%s545_s0 + $0x10] sm:$0xff]   ;;  %vm297_vm2 = vcmask 521216  }
   0x2   :  { %134 = vmatprep.subr.bf16.mxu0 %v324_v0  ;;  %321 = vmatprep.subr.bf16.mxu1 %v324_v0  ;;  %v327_v3 = vld [vmem:[%s545_s0] sm:$0xff]   ;;  %v329_v5 = vld [vmem:[%s545_s0 + $0x8] sm:$0xff]   ;;  %v332_v8 = vld [vmem:[%s545_s0 + $0x30] sm:$0xff]   ;;  %v36_v12 = vshrl.u32 %v35_v11, 7 }
   0x3   :  { %135 = vmatpush1.bf16.msra.mxu0 %v326_v2  ;;  %322 = vmatpush1.bf16.msra.mxu1 %v326_v2  ;;  %v328_v4 = vld [vmem:[%s545_s0 + $0x20] sm:$0xff]   ;;  %v330_v6 = vld [vmem:[%s545_s0 + $0x28] sm:$0xff]   ;;  %v333_v9 = vld [vmem:[%s545_s0 + $0x18] sm:$0xff]  }
   0x4   :  { %v334_v10 = vld [vmem:[%s545_s0 + $0x38] sm:$0x7f]   ;;  %v37_v13 = vsub.s32 0, %v36_v12  ;;  %v33_v14 = vld [vmem:[%s546_s2] sm:$0x3]  ;;  %v41_v15 = vsub.s32 1, %v36_v12 }
   0x6   :  { %313 = vmatmul.mubr.msk.bf16.vlgmr.msra.gmra.mxu0 %vm95_vm0, %v327_v3  ;;  %317 = vmatmul.mubr.msk.bf16.vlgmr.msra.gmra.mxu1 %vm95_vm0, %v328_v4  ;;  %v397_v16 = vrot.slane %v33_v14, %v37_v13  ;;  %v399_v17 = vrot.slane %v33_v14, %v41_v15 }
   0x7   :  { %162 = vmatprep.mubr.bf16.mxu0 %v335_v1  ;;  %202 = vmatprep.mubr.bf16.mxu1 %v335_v1 }
   0xe   :  { %314 = vmatmul.mubr.msk.bf16.gmra.mxu0 %vm95_vm0, %v329_v5  ;;  %318 = vmatmul.mubr.msk.bf16.gmra.mxu1 %vm95_vm0, %v330_v6 }
   0xf   :  { %172 = vmatprep.mubr.bf16.mxu0 %v335_v1  ;;  %212 = vmatprep.mubr.bf16.mxu1 %v335_v1 }
  0x16   :  { %315 = vmatmul.mubr.msk.bf16.gmra.mxu0 %vm95_vm0, %v331_v7  ;;  %319 = vmatmul.mubr.msk.bf16.gmra.mxu1 %vm95_vm0, %v332_v8 }
  0x17   :  { %182 = vmatprep.mubr.bf16.mxu0 %v335_v1  ;;  %222 = vmatprep.mubr.bf16.mxu1 %v335_v1 }
  0x1e   :  { %316 = vmatmul.mubr.msk.bf16.gmra.mxu0 %vm95_vm0, %v333_v9  ;;  %320 = vmatmul.mubr.msk.bf16.gmra.mxu1 %vm95_vm0, %v334_v10 }
  0xc6   :  { %v154_v18 = vpop.f32.mrf.mxu0  ;;  %v194_v19 = vpop.f32.mrf.mxu1 }
  0xc7   :  { %v155_v20 = vadd.f32 %v154_v18, %v397_v16  ;;  %v195_v21 = vadd.f32 %v194_v19, %v397_v16 }
  0xc8   :  { %v156_v22 = vpop.f32.mrf.mxu0  ;;  %v196_v23 = vpop.f32.mrf.mxu1 }
  0xc9   :  { %v233_v24 = vmax.f32 %v155_v20, 0.0  ;;  %v249_v25 = vmax.f32 %v195_v21, 0.0  ;;  %v157_v26 = vadd.f32 %v156_v22, %v399_v17  ;;  %v197_v27 = vadd.f32 %v196_v23, %v399_v17 }
  0xca   :  { %v158_v28 = vpop.f32.mrf.mxu0  ;;  %v198_v29 = vpop.f32.mrf.mxu1 }
  0xcb   :  { %265 = vst [vmem:[%s547_s3] sm:$0xff] %v233_v24  ;;  %282 = vst [vmem:[%s547_s3 + $0x80] sm:$0xff] %v249_v25  ;;  %v234_v30 = vmax.f32 %v157_v26, 0.0  ;;  %v250_v31 = vmax.f32 %v197_v27, 0.0  ;;  %v159_v32 = vadd.f32 %v158_v28, %v397_v16  ;;  %v199_v33 = vadd.f32 %v198_v29, %v397_v16 }
  0xcc   :  { %v160_v34 = vpop.f32.mrf.mxu0  ;;  %v200_v35 = vpop.f32.mrf.mxu1 }
  0xcd   :  { %267 = vst.msk [vmem:[%s547_s3 + $0x8] sm:$0xff] %vm266_vm1, %v234_v30  ;;  %283 = vst.msk [vmem:[%s547_s3 + $0x88] sm:$0xff] %vm266_vm1, %v250_v31  ;;  %v235_v36 = vmax.f32 %v159_v32, 0.0  ;;  %v251_v37 = vmax.f32 %v199_v33, 0.0  ;;  %v161_v38 = vadd.f32 %v160_v34, %v399_v17  ;;  %v201_v39 = vadd.f32 %v200_v35, %v399_v17 }
  0xce   :  { %v164_v40 = vpop.f32.mrf.mxu0  ;;  %v204_v41 = vpop.f32.mrf.mxu1 }
  0xcf   :  { %268 = vst [vmem:[%s547_s3 + $0x10] sm:$0xff] %v235_v36  ;;  %284 = vst [vmem:[%s547_s3 + $0x90] sm:$0xff] %v251_v37  ;;  %v236_v42 = vmax.f32 %v161_v38, 0.0  ;;  %v252_v43 = vmax.f32 %v201_v39, 0.0  ;;  %v165_v44 = vadd.f32 %v164_v40, %v397_v16  ;;  %v205_v45 = vadd.f32 %v204_v41, %v397_v16 }
  0xd0   :  { %v166_v46 = vpop.f32.mrf.mxu0  ;;  %v206_v47 = vpop.f32.mrf.mxu1 }
  0xd1   :  { %269 = vst.msk [vmem:[%s547_s3 + $0x18] sm:$0xff] %vm266_vm1, %v236_v42  ;;  %285 = vst.msk [vmem:[%s547_s3 + $0x98] sm:$0xff] %vm266_vm1, %v252_v43  ;;  %v237_v48 = vmax.f32 %v165_v44, 0.0  ;;  %v253_v49 = vmax.f32 %v205_v45, 0.0  ;;  %v167_v50 = vadd.f32 %v166_v46, %v399_v17  ;;  %v207_v51 = vadd.f32 %v206_v47, %v399_v17 }
  0xd2   :  { %v168_v52 = vpop.f32.mrf.mxu0  ;;  %v208_v53 = vpop.f32.mrf.mxu1 }
  0xd3   :  { %270 = vst [vmem:[%s547_s3 + $0x20] sm:$0xff] %v237_v48  ;;  %286 = vst [vmem:[%s547_s3 + $0xa0] sm:$0xff] %v253_v49  ;;  %v238_v54 = vmax.f32 %v167_v50, 0.0  ;;  %v254_v55 = vmax.f32 %v207_v51, 0.0  ;;  %v169_v56 = vadd.f32 %v168_v52, %v397_v16  ;;  %v209_v57 = vadd.f32 %v208_v53, %v397_v16 }
  0xd4   :  { %v170_v58 = vpop.f32.mrf.mxu0  ;;  %v210_v59 = vpop.f32.mrf.mxu1 }
  0xd5   :  { %271 = vst.msk [vmem:[%s547_s3 + $0x28] sm:$0xff] %vm266_vm1, %v238_v54  ;;  %287 = vst.msk [vmem:[%s547_s3 + $0xa8] sm:$0xff] %vm266_vm1, %v254_v55  ;;  %v239_v60 = vmax.f32 %v169_v56, 0.0  ;;  %v255_v61 = vmax.f32 %v209_v57, 0.0  ;;  %v171_v62 = vadd.f32 %v170_v58, %v399_v17  ;;  %v211_v63 = vadd.f32 %v210_v59, %v399_v17 }
  0xd6   :  { %v174_v0 = vpop.f32.mrf.mxu0  ;;  %v214_v1 = vpop.f32.mrf.mxu1 }
  0xd7   :  { %272 = vst [vmem:[%s547_s3 + $0x30] sm:$0xff] %v239_v60  ;;  %288 = vst [vmem:[%s547_s3 + $0xb0] sm:$0xff] %v255_v61  ;;  %v240_v2 = vmax.f32 %v171_v62, 0.0  ;;  %v256_v3 = vmax.f32 %v211_v63, 0.0  ;;  %v175_v4 = vadd.f32 %v174_v0, %v397_v16  ;;  %v215_v5 = vadd.f32 %v214_v1, %v397_v16 }
  0xd8   :  { %v176_v6 = vpop.f32.mrf.mxu0  ;;  %v216_v7 = vpop.f32.mrf.mxu1 }
  0xd9   :  { %273 = vst.msk [vmem:[%s547_s3 + $0x38] sm:$0xff] %vm266_vm1, %v240_v2  ;;  %289 = vst.msk [vmem:[%s547_s3 + $0xb8] sm:$0xff] %vm266_vm1, %v256_v3  ;;  %v241_v8 = vmax.f32 %v175_v4, 0.0  ;;  %v257_v9 = vmax.f32 %v215_v5, 0.0  ;;  %v177_v10 = vadd.f32 %v176_v6, %v399_v17  ;;  %v217_v11 = vadd.f32 %v216_v7, %v399_v17 }
  0xda   :  { %v178_v12 = vpop.f32.mrf.mxu0  ;;  %v218_v13 = vpop.f32.mrf.mxu1 }
  0xdb   :  { %274 = vst [vmem:[%s547_s3 + $0x40] sm:$0xff] %v241_v8  ;;  %290 = vst [vmem:[%s547_s3 + $0xc0] sm:$0xff] %v257_v9  ;;  %v242_v14 = vmax.f32 %v177_v10, 0.0  ;;  %v258_v15 = vmax.f32 %v217_v11, 0.0  ;;  %v179_v18 = vadd.f32 %v178_v12, %v397_v16  ;;  %v219_v19 = vadd.f32 %v218_v13, %v397_v16 }
  0xdc   :  { %v180_v20 = vpop.f32.mrf.mxu0  ;;  %v220_v21 = vpop.f32.mrf.mxu1 }
  0xdd   :  { %275 = vst.msk [vmem:[%s547_s3 + $0x48] sm:$0xff] %vm266_vm1, %v242_v14  ;;  %291 = vst.msk [vmem:[%s547_s3 + $0xc8] sm:$0xff] %vm266_vm1, %v258_v15  ;;  %v243_v22 = vmax.f32 %v179_v18, 0.0  ;;  %v259_v23 = vmax.f32 %v219_v19, 0.0  ;;  %v181_v24 = vadd.f32 %v180_v20, %v399_v17  ;;  %v221_v25 = vadd.f32 %v220_v21, %v399_v17 }
  0xde   :  { %v184_v26 = vpop.f32.mrf.mxu0  ;;  %v224_v27 = vpop.f32.mrf.mxu1 }
  0xdf   :  { %276 = vst [vmem:[%s547_s3 + $0x50] sm:$0xff] %v243_v22  ;;  %292 = vst [vmem:[%s547_s3 + $0xd0] sm:$0xff] %v259_v23  ;;  %v244_v28 = vmax.f32 %v181_v24, 0.0  ;;  %v260_v29 = vmax.f32 %v221_v25, 0.0  ;;  %v185_v30 = vadd.f32 %v184_v26, %v397_v16  ;;  %v225_v31 = vadd.f32 %v224_v27, %v397_v16 }
  0xe0   :  { %v186_v32 = vpop.f32.mrf.mxu0  ;;  %v226_v33 = vpop.f32.mrf.mxu1 }
  0xe1   :  { %277 = vst.msk [vmem:[%s547_s3 + $0x58] sm:$0xff] %vm266_vm1, %v244_v28  ;;  %293 = vst.msk [vmem:[%s547_s3 + $0xd8] sm:$0xff] %vm266_vm1, %v260_v29  ;;  %v245_v34 = vmax.f32 %v185_v30, 0.0  ;;  %v261_v35 = vmax.f32 %v225_v31, 0.0  ;;  %v187_v36 = vadd.f32 %v186_v32, %v399_v17  ;;  %v227_v37 = vadd.f32 %v226_v33, %v399_v17 }
  0xe2   :  { %v188_v38 = vpop.f32.mrf.mxu0  ;;  %v228_v39 = vpop.f32.mrf.mxu1 }
  0xe3   :  { %278 = vst [vmem:[%s547_s3 + $0x60] sm:$0xff] %v245_v34  ;;  %294 = vst [vmem:[%s547_s3 + $0xe0] sm:$0xff] %v261_v35  ;;  %v246_v40 = vmax.f32 %v187_v36, 0.0  ;;  %v262_v41 = vmax.f32 %v227_v37, 0.0  ;;  %v189_v42 = vadd.f32 %v188_v38, %v397_v16  ;;  %v229_v43 = vadd.f32 %v228_v39, %v397_v16 }
  0xe4   :  { %v190_v44 = vpop.f32.mrf.mxu0  ;;  %v230_v45 = vpop.f32.mrf.mxu1 }
  0xe5   :  { %279 = vst.msk [vmem:[%s547_s3 + $0x68] sm:$0xff] %vm266_vm1, %v246_v40  ;;  %295 = vst.msk [vmem:[%s547_s3 + $0xe8] sm:$0xff] %vm266_vm1, %v262_v41  ;;  %v247_v46 = vmax.f32 %v189_v42, 0.0  ;;  %v263_v47 = vmax.f32 %v229_v43, 0.0  ;;  %v191_v48 = vadd.f32 %v190_v44, %v399_v17  ;;  %v231_v49 = vadd.f32 %v230_v45, %v399_v17 }
  0xe7   :  { %280 = vst [vmem:[%s547_s3 + $0x70] sm:$0xff] %v247_v46  ;;  %296 = vst [vmem:[%s547_s3 + $0xf0] sm:$0x3f] %v263_v47  ;;  %v248_v16 = vmax.f32 %v191_v48, 0.0  ;;  %v264_v50 = vmax.f32 %v231_v49, 0.0 }
  0xe9   :  { %281 = vst.msk [vmem:[%s547_s3 + $0x78] sm:$0xff] %vm266_vm1, %v248_v16 }
  0xea   :  { %298 = vst.msk [vmem:[%s547_s3 + $0xf8] sm:$0x3f] %vm297_vm2, %v264_v50 }

// kernel: spex_plus_forward.55
= control target key start
LH: loop header
LB: loop body
LE: loop exit
PB: predicated region body
PF: predicated region fallthrough
CT: control target
= control target key end

     0   :  { %vm46_vm0 = vcmask 523264   ;;  %vm107_vm1 = vcmask 1045504   ;;  %vm109_vm2 = vcmask 521216   ;;  %s1249_s0 = inlined_call_operand.vmem [shape: f32[126,192], index: 0, kind: input, shape index: {}]   ;;  %s1250_s1 = inlined_call_operand.vmem [shape: f32[1,192], index: 1, kind: input, shape index: {}]   ;;  %s1251_s2 = inlined_call_operand.vmem [shape: f32[1,192], index: 2, kind: input, shape index: {}]   ;;  %s1252_s3 = inlined_call_operand.vmem [shape: f32[126,192], index: 3, kind: output, shape index: {}]  }
   0x1   :  { %v551_v0 = vld [vmem:[%s1249_s0 + $0x20] sm:$0xff]  ;;  %v556_v1 = vld [vmem:[%s1249_s0 + $0x28] sm:$0xff]  ;;  %v573_v5 = vld [vmem:[%s1249_s0 + $0x30] sm:$0xff] }
   0x2   :  { %v561_v2 = vld [vmem:[%s1249_s0] sm:$0xff]  ;;  %v55_v3 = vsel %vm46_vm0, %v556_v1, 0.0  ;;  %v568_v4 = vld [vmem:[%s1249_s0 + $0x8] sm:$0xff]  ;;  %v578_v6 = vld [vmem:[%s1249_s0 + $0x38] sm:$0xff] }
   0x3   :  { %v56_v7 = vadd.f32 %v55_v3, %v551_v0  ;;  %v47_v8 = vsel %vm46_vm0, %v568_v4, 0.0  ;;  %v59_v9 = vsel %vm46_vm0, %v578_v6, 0.0  ;;  %v588_v10 = vld [vmem:[%s1249_s0 + $0x10] sm:$0xff]  ;;  %v593_v11 = vld [vmem:[%s1249_s0 + $0x18] sm:$0xff]  ;;  %v606_v15 = vld [vmem:[%s1249_s0 + $0x48] sm:$0xff]  ;;  %v132_v3 = vmul.f32 %v568_v4, %v568_v4 }
   0x4   :  { %v48_v12 = vadd.f32 %v47_v8, %v561_v2  ;;  %v51_v13 = vsel %vm46_vm0, %v593_v11, 0.0  ;;  %v601_v14 = vld [vmem:[%s1249_s0 + $0x58] sm:$0xff]  ;;  %v60_v16 = vadd.f32 %v59_v9, %v573_v5  ;;  %v613_v18 = vld [vmem:[%s1249_s0 + $0x50] sm:$0xff]  ;;  %v620_v20 = vld [vmem:[%s1249_s0 + $0x40] sm:$0xff]  ;;  %v63_v21 = vsel %vm46_vm0, %v606_v15, 0.0 }
   0x5   :  { %57 = vadd.xlane.f32.xlu1 %v56_v7  ;;  %v52_v17 = vadd.f32 %v51_v13, %v588_v10  ;;  %v67_v19 = vsel %vm46_vm0, %v601_v14, 0.0  ;;  %v627_v22 = vld [vmem:[%s1249_s0 + $0x78] sm:$0xff]  ;;  %v632_v23 = vld [vmem:[%s1249_s0 + $0x68] sm:$0xff]  ;;  %v64_v25 = vadd.f32 %v63_v21, %v620_v20  ;;  %v639_v26 = vld [vmem:[%s1249_s0 + $0x70] sm:$0xff]  ;;  %v134_v61 = vmul.f32 %v593_v11, %v593_v11 }
   0x6   :  { %49 = vadd.xlane.f32.xlu0 %v48_v12  ;;  %v68_v24 = vadd.f32 %v67_v19, %v613_v18  ;;  %v75_v27 = vsel %vm46_vm0, %v627_v22, 0.0  ;;  %v646_v28 = vld [vmem:[%s1249_s0 + $0x60] sm:$0xff]  ;;  %v71_v29 = vsel %vm46_vm0, %v632_v23, 0.0  ;;  %v653_v30 = vld [vmem:[%s1249_s0 + $0x98] sm:$0xff]  ;;  %v658_v31 = vld [vmem:[%s1249_s0 + $0x88] sm:$0xff]  ;;  %v133_v8 = vmul.f32 %v588_v10, %v588_v10 }
   0x7   :  { %v76_v32 = vadd.f32 %v75_v27, %v639_v26  ;;  %v72_v33 = vadd.f32 %v71_v29, %v646_v28  ;;  %v665_v34 = vld [vmem:[%s1249_s0 + $0x90] sm:$0xff]  ;;  %v83_v35 = vsel %vm46_vm0, %v653_v30, 0.0  ;;  %v672_v36 = vld [vmem:[%s1249_s0 + $0x80] sm:$0xff]  ;;  %v79_v37 = vsel %vm46_vm0, %v658_v31, 0.0  ;;  %v679_v38 = vld [vmem:[%s1249_s0 + $0xb8] sm:$0xff] }
   0x8   :  { %v684_v39 = vld [vmem:[%s1249_s0 + $0xa8] sm:$0xff]  ;;  %v84_v40 = vadd.f32 %v83_v35, %v665_v34  ;;  %v80_v41 = vadd.f32 %v79_v37, %v672_v36  ;;  %v691_v42 = vld [vmem:[%s1249_s0 + $0xb0] sm:$0xff]  ;;  %v91_v43 = vsel %vm46_vm0, %v679_v38, 0.0  ;;  %v698_v44 = vld [vmem:[%s1249_s0 + $0xa0] sm:$0xff]  ;;  %v167_v12 = vsel %vm46_vm0, %v134_v61, 0.0 }
   0x9   :  { %61 = vadd.xlane.f32.xlu1 %v60_v16  ;;  %v87_v45 = vsel %vm46_vm0, %v684_v39, 0.0  ;;  %v705_v46 = vld [vmem:[%s1249_s0 + $0xd8] sm:$0xff]  ;;  %v710_v47 = vld [vmem:[%s1249_s0 + $0xc8] sm:$0xff]  ;;  %v92_v48 = vadd.f32 %v91_v43, %v691_v42  ;;  %v717_v50 = vld [vmem:[%s1249_s0 + $0xd0] sm:$0xff]  ;;  %v131_v13 = vmul.f32 %v561_v2, %v561_v2  ;;  %v138_v16 = vmul.f32 %v578_v6, %v578_v6 }
   0xa   :  { %53 = vadd.xlane.f32.xlu0 %v52_v17  ;;  %1269 = vst [vmem:[#allocation2_spill] sm:$0xff] %v705_v46  ;;  %1270 = vst [vmem:[#allocation3_spill] sm:$0xff] %v710_v47  ;;  %v88_v49 = vadd.f32 %v87_v45, %v698_v44  ;;  %v99_v51 = vsel %vm46_vm0, %v705_v46, 0.0  ;;  %v724_v52 = vld [vmem:[%s1249_s0 + $0xc0] sm:$0xff]  ;;  %v95_v53 = vsel %vm46_vm0, %v710_v47, 0.0  ;;  %v741_v56 = vld [vmem:[%s1249_s0 + $0xe8] sm:$0xff]  ;;  %v136_v19 = vmul.f32 %v556_v1, %v556_v1 }
   0xb   :  { %1271 = vst [vmem:[#allocation4_spill] sm:$0xff] %v717_v50  ;;  %1272 = vst [vmem:[#allocation5_spill] sm:$0xff] %v724_v52  ;;  %v731_v54 = vld [vmem:[%s1249_s0 + $0xf0] sm:$0x3f]  ;;  %v736_v55 = vld [vmem:[%s1249_s0 + $0xf8] sm:$0x3f]  ;;  %v100_v57 = vadd.f32 %v99_v51, %v717_v50  ;;  %v96_v58 = vadd.f32 %v95_v53, %v724_v52  ;;  %v168_v21 = vadd.f32 %v167_v12, %v133_v8 }
   0xc   :  { %1273 = vst [vmem:[#allocation6_spill] sm:$0xff] %v731_v54  ;;  %1274 = vst [vmem:[#allocation7_spill] sm:$0xff] %v736_v55  ;;  %v108_v59 = vsel %vm107_vm1, %v731_v54, 0.0  ;;  %v110_v60 = vsel %vm109_vm2, %v736_v55, 0.0  ;;  %v754_v62 = vld [vmem:[%s1249_s0 + $0xe0] sm:$0xff]  ;;  %v103_v63 = vsel %vm46_vm0, %v741_v56, 0.0  ;;  %v135_v29 = vmul.f32 %v551_v0, %v551_v0 }
   0xd   :  { %69 = vadd.xlane.f32.xlu1 %v68_v24  ;;  %1275 = vst [vmem:[#allocation8_spill] sm:$0xff] %v741_v56  ;;  %1276 = vst [vmem:[#allocation9_spill] sm:$0xff] %v754_v62  ;;  %v111_v7 = vadd.f32 %v110_v60, %v108_v59  ;;  %v104_v9 = vadd.f32 %v103_v63, %v754_v62  ;;  %v163_v17 = vsel %vm46_vm0, %v132_v3, 0.0  ;;  %v175_v27 = vsel %vm46_vm0, %v138_v16, 0.0 }
   0xe   :  { %65 = vadd.xlane.f32.xlu0 %v64_v25  ;;  %v137_v24 = vmul.f32 %v573_v5, %v573_v5  ;;  %v164_v25 = vadd.f32 %v163_v17, %v131_v13  ;;  %v140_v35 = vmul.f32 %v606_v15, %v606_v15  ;;  %v139_v45 = vmul.f32 %v620_v20, %v620_v20 }
   0xf   :  { %v144_v51 = vmul.f32 %v632_v23, %v632_v23  ;;  %v143_v60 = vmul.f32 %v646_v28, %v646_v28  ;;  %v150_v61 = vmul.f32 %v653_v30, %v653_v30  ;;  %v148_v3 = vmul.f32 %v658_v31, %v658_v31 }
  0x10   :  { %v176_v37 = vadd.f32 %v175_v27, %v137_v24  ;;  %v149_v8 = vmul.f32 %v665_v34, %v665_v34  ;;  %v147_v13 = vmul.f32 %v672_v36, %v672_v36  ;;  %v154_v16 = vmul.f32 %v679_v38, %v679_v38 }
  0x11   :  { %77 = vadd.xlane.f32.xlu1 %v76_v32  ;;  %v142_v32 = vmul.f32 %v601_v14, %v601_v14  ;;  %v187_v63 = vsel %vm46_vm0, %v144_v51, 0.0  ;;  %v199_v12 = vsel %vm46_vm0, %v150_v61, 0.0  ;;  %v195_v17 = vsel %vm46_vm0, %v148_v3, 0.0 }
  0x12   :  { %73 = vadd.xlane.f32.xlu0 %v72_v33  ;;  %v171_v33 = vsel %vm46_vm0, %v136_v19, 0.0  ;;  %v152_v19 = vmul.f32 %v684_v39, %v684_v39  ;;  %v153_v24 = vmul.f32 %v691_v42, %v691_v42  ;;  %v207_v27 = vsel %vm46_vm0, %v154_v16, 0.0 }
  0x13   :  { %v183_v43 = vsel %vm46_vm0, %v142_v32, 0.0  ;;  %v158_v32 = vmul.f32 %v705_v46, %v705_v46  ;;  %v159_v61 = vmul.f32 %v754_v62, %v754_v62 }
  0x15   :  { %85 = vadd.xlane.f32.xlu1 %v84_v40  ;;  %v141_v40 = vmul.f32 %v613_v18, %v613_v18 }
  0x16   :  { %81 = vadd.xlane.f32.xlu0 %v80_v41  ;;  %v172_v41 = vadd.f32 %v171_v33, %v135_v29  ;;  %v151_v29 = vmul.f32 %v698_v44, %v698_v44  ;;  %v203_v33 = vsel %vm46_vm0, %v152_v19, 0.0 }
  0x17   :  { %v184_v53 = vadd.f32 %v183_v43, %v141_v40  ;;  %v157_v40 = vmul.f32 %v717_v50, %v717_v50 }
  0x18   :  { %v204_v43 = vadd.f32 %v203_v33, %v151_v29 }
  0x19   :  { %93 = vadd.xlane.f32.xlu1 %v92_v48  ;;  %v146_v48 = vmul.f32 %v627_v22, %v627_v22 }
  0x1a   :  { %89 = vadd.xlane.f32.xlu0 %v88_v49  ;;  %v179_v49 = vsel %vm46_vm0, %v140_v35, 0.0  ;;  %v156_v35 = vmul.f32 %v710_v47, %v710_v47 }
  0x1b   :  { %v191_v59 = vsel %vm46_vm0, %v146_v48, 0.0  ;;  %v161_v48 = vmul.f32 %v731_v54, %v731_v54 }
  0x1c   :  { %v211_v51 = vsel %vm46_vm0, %v156_v35, 0.0 }
  0x1d   :  { %101 = vadd.xlane.f32.xlu1 %v100_v57  ;;  %v145_v57 = vmul.f32 %v639_v26, %v639_v26 }
  0x1e   :  { %97 = vadd.xlane.f32.xlu0 %v96_v58  ;;  %v180_v58 = vadd.f32 %v179_v49, %v139_v45  ;;  %v215_v45 = vsel %vm46_vm0, %v158_v32, 0.0  ;;  %v162_v49 = vmul.f32 %v736_v55, %v736_v55 }
  0x21   :  { %112 = vadd.xlane.f32.xlu1 %v111_v7  ;;  %v192_v7 = vadd.f32 %v191_v59, %v145_v57  ;;  %v216_v57 = vadd.f32 %v215_v45, %v157_v40  ;;  %v223_v59 = vsel %vm107_vm1, %v161_v48, 0.0  ;;  %v372_v48 = vld [vmem:[%s1250_s1] sm:$0x3] }
  0x22   :  { %105 = vadd.xlane.f32.xlu0 %v104_v9  ;;  %v188_v9 = vadd.f32 %v187_v63, %v143_v60  ;;  %v224_v60 = vsel %vm109_vm2, %v162_v49, 0.0  ;;  %v416_v49 = vld [vmem:[%s1251_s2] sm:$0x3] }
  0x23   :  { %v225_v3 = vadd.f32 %v224_v60, %v223_v59 }
  0x25   :  { %169 = vadd.xlane.f32.xlu1 %v168_v21  ;;  %v200_v21 = vadd.f32 %v199_v12, %v149_v8 }
  0x26   :  { %165 = vadd.xlane.f32.xlu0 %v164_v25  ;;  %v196_v25 = vadd.f32 %v195_v17, %v147_v13 }
  0x29   :  { %177 = vadd.xlane.f32.xlu1 %v176_v37  ;;  %v208_v37 = vadd.f32 %v207_v27, %v153_v24  ;;  %v374_v27 = vlaneseq }
  0x2a   :  { %173 = vadd.xlane.f32.xlu0 %v172_v41  ;;  %v155_v41 = vmul.f32 %v724_v52, %v724_v52 }
  0x2b   :  { %v375_v33 = vshrl.u32 %v374_v27, 7 }
  0x2d   :  { %185 = vadd.xlane.f32.xlu1 %v184_v53  ;;  %v160_v53 = vmul.f32 %v741_v56, %v741_v56  ;;  %v376_v40 = vsub.s32 0, %v375_v33 }
  0x2e   :  { %181 = vadd.xlane.f32.xlu0 %v180_v58  ;;  %v212_v58 = vadd.f32 %v211_v51, %v155_v41  ;;  %v380_v41 = vsub.s32 1, %v375_v33 }
  0x2f   :  { %v219_v63 = vsel %vm46_vm0, %v160_v53, 0.0  ;;  %v866_v59 = vrot.slane %v372_v48, %v376_v40 }
  0x30   :  { %v868_v60 = vrot.slane %v372_v48, %v380_v41 }
  0x31   :  { %193 = vadd.xlane.f32.xlu1 %v192_v7  ;;  %v220_v7 = vadd.f32 %v219_v63, %v159_v61  ;;  %v870_v61 = vrot.slane %v416_v49, %v376_v40  ;;  %v872_v63 = vrot.slane %v416_v49, %v380_v41 }
  0x32   :  { %189 = vadd.xlane.f32.xlu0 %v188_v9 }
  0x35   :  { %201 = vadd.xlane.f32.xlu1 %v200_v21 }
  0x36   :  { %197 = vadd.xlane.f32.xlu0 %v196_v25 }
  0x39   :  { %209 = vadd.xlane.f32.xlu1 %v208_v37 }
  0x3a   :  { %205 = vadd.xlane.f32.xlu0 %v204_v43 }
  0x3d   :  { %217 = vadd.xlane.f32.xlu1 %v216_v57 }
  0x3e   :  { %213 = vadd.xlane.f32.xlu0 %v212_v58 }
  0x41   :  { %226 = vadd.xlane.f32.xlu1 %v225_v3 }
  0x42   :  { %221 = vadd.xlane.f32.xlu0 %v220_v7 }
  0x8e   :  { %v58_v8 = vpop.xlane.xlu1 %57 }
  0x8f   :  { %v50_v9 = vpop.xlane.xlu0 %49  ;;  %v848_v43 = vmul.f32 0.0052083335, %v58_v8 }
  0x90   :  { %v858_v51 = vmul.f32 0.0052083335, %v50_v9 }
  0x92   :  { %v62_v12 = vpop.xlane.xlu1 %61  ;;  %v244_v49 = vmul.f32 %v858_v51, %v858_v51 }
  0x93   :  { %v54_v13 = vpop.xlane.xlu0 %53  ;;  %v864_v58 = vmul.f32 0.0052083335, %v62_v12  ;;  %v246_v12 = vmul.f32 %v848_v43, %v848_v43 }
  0x94   :  { %v860_v53 = vmul.f32 0.0052083335, %v54_v13 }
  0x95   :  { %v247_v13 = vmul.f32 %v864_v58, %v864_v58 }
  0x96   :  { %v70_v16 = vpop.xlane.xlu1 %69  ;;  %v245_v40 = vmul.f32 %v860_v53, %v860_v53 }
  0x97   :  { %v66_v17 = vpop.xlane.xlu0 %65  ;;  %v878_v8 = vmul.f32 0.0052083335, %v70_v16 }
  0x98   :  { %v890_v16 = vmul.f32 0.0052083335, %v66_v17 }
  0x9a   :  { %v78_v19 = vpop.xlane.xlu1 %77 }
  0x9b   :  { %v74_v21 = vpop.xlane.xlu0 %73  ;;  %v904_v48 = vmul.f32 0.0052083335, %v78_v19 }
  0x9c   :  { %v912_v56 = vmul.f32 0.0052083335, %v74_v21 }
  0x9e   :  { %v86_v24 = vpop.xlane.xlu1 %85 }
  0x9f   :  { %v838_v25 = vpop.xlane.xlu0 %81 }
  0xa2   :  { %v840_v29 = vpop.xlane.xlu1 %93 }
  0xa3   :  { %v842_v32 = vpop.xlane.xlu0 %89 }
  0xa6   :  { %v844_v35 = vpop.xlane.xlu1 %101 }
  0xa7   :  { %v846_v37 = vpop.xlane.xlu0 %97 }
  0xaa   :  { %v850_v45 = vpop.xlane.xlu1 %112 }
  0xab   :  { %v862_v57 = vpop.xlane.xlu0 %105 }
  0xae   :  { %v170_v9 = vpop.xlane.xlu1 %169 }
  0xaf   :  { %v229_v33 = vmul.f32 0.0052083335, %v170_v9  ;;  %v166_v41 = vpop.xlane.xlu0 %165 }
  0xb0   :  { %v228_v7 = vmul.f32 0.0052083335, %v166_v41 }
  0xb1   :  { %v261_v9 = vsub.f32 %v229_v33, %v245_v40  ;;  %v249_v33 = vmul.f32 %v878_v8, %v878_v8 }
  0xb2   :  { %v260_v62 = vsub.f32 %v228_v7, %v244_v49  ;;  %v178_v41 = vpop.xlane.xlu1 %177  ;;  %v248_v49 = vmul.f32 %v890_v16, %v890_v16 }
  0xb3   :  { %v277_v55 = vadd.f32 1e-05, %v261_v9  ;;  %v231_v54 = vmul.f32 0.0052083335, %v178_v41  ;;  %v174_v27 = vpop.xlane.xlu0 %173  ;;  %v920_v41 = vmul.f32 0.0052083335, %v86_v24 }
  0xb4   :  { %v276_v47 = vadd.f32 1e-05, %v260_v62  ;;  %v230_v17 = vmul.f32 0.0052083335, %v174_v27 }
  0xb5   :  { %496 = vrsqrt.f32 %v277_v55  ;;  %v263_v7 = vsub.f32 %v231_v54, %v247_v13  ;;  %v251_v54 = vmul.f32 %v904_v48, %v904_v48  ;;  %v929_v13 = vmul.f32 0.0052083335, %v838_v25 }
  0xb6   :  { %498 = vrsqrt.f32 %v276_v47  ;;  %v262_v3 = vsub.f32 %v230_v17, %v246_v12  ;;  %v186_v40 = vpop.xlane.xlu1 %185  ;;  %v250_v17 = vmul.f32 %v912_v56, %v912_v56 }
  0xb7   :  { %v279_v21 = vadd.f32 1e-05, %v263_v7  ;;  %v233_v27 = vmul.f32 0.0052083335, %v186_v40  ;;  %v182_v52 = vpop.xlane.xlu0 %181 }
  0xb8   :  { %v278_v24 = vadd.f32 1e-05, %v262_v3  ;;  %v232_v9 = vmul.f32 0.0052083335, %v182_v52  ;;  %v940_v3 = vmul.f32 0.0052083335, %v840_v29 }
  0xb9   :  { %500 = vrsqrt.f32 %v279_v21  ;;  %v265_v12 = vsub.f32 %v233_v27, %v249_v33  ;;  %v253_v33 = vmul.f32 %v920_v41, %v920_v41  ;;  %v947_v27 = vmul.f32 0.0052083335, %v842_v32 }
  0xba   :  { %502 = vrsqrt.f32 %v278_v24  ;;  %v264_v55 = vsub.f32 %v232_v9, %v248_v49  ;;  %v194_v25 = vpop.xlane.xlu1 %193  ;;  %v950_v49 = vmul.f32 0.0052083335, %v844_v35  ;;  %v953_v29 = vmul.f32 0.0052083335, %v846_v37 }
  0xbb   :  { %v281_v52 = vadd.f32 1e-05, %v265_v12  ;;  %v235_v62 = vmul.f32 0.0052083335, %v194_v25  ;;  %v190_v47 = vpop.xlane.xlu0 %189  ;;  %v956_v24 = vmul.f32 0.0052083335, %v850_v45  ;;  %v252_v37 = vmul.f32 %v929_v13, %v929_v13 }
  0xbc   :  { %v280_v40 = vadd.f32 1e-05, %v264_v55  ;;  %v234_v7 = vmul.f32 0.0052083335, %v190_v47  ;;  %1277 = vst [vmem:[#allocation10_spill] sm:$0xff] %v950_v49  ;;  %1278 = vst [vmem:[#allocation11_spill] sm:$0xff] %v953_v29  ;;  %v255_v45 = vmul.f32 %v940_v3, %v940_v3  ;;  %v1282_v55 = vsub.f32 %v593_v11, %v860_v53 }
  0xbd   :  { %504 = vrsqrt.f32 %v281_v52  ;;  %v267_v9 = vsub.f32 %v235_v62, %v251_v54  ;;  %1279 = vst [vmem:[#allocation12_spill] sm:$0xff] %v956_v24  ;;  %v959_v12 = vmul.f32 0.0052083335, %v862_v57  ;;  %v254_v57 = vmul.f32 %v947_v27, %v947_v27 }
  0xbe   :  { %506 = vrsqrt.f32 %v280_v40  ;;  %v266_v25 = vsub.f32 %v234_v7, %v250_v17  ;;  %v202_v32 = vpop.xlane.xlu1 %201  ;;  %v971_v17 = vmul.f32 %v950_v49, %v950_v49  ;;  %v975_v40 = vmul.f32 %v953_v29, %v953_v29 }
  0xbf   :  { %1280 = vst [vmem:[#allocation13_spill] sm:$0xff] %v959_v12  ;;  %v283_v47 = vadd.f32 1e-05, %v267_v9  ;;  %v237_v35 = vmul.f32 0.0052083335, %v202_v32  ;;  %v198_v21 = vpop.xlane.xlu0 %197  ;;  %v983_v32 = vmul.f32 %v959_v12, %v959_v12  ;;  %v1284_v12 = vsub.f32 %v568_v4, %v858_v51 }
  0xc0   :  { %v282_v52 = vadd.f32 1e-05, %v266_v25  ;;  %v236_v62 = vmul.f32 0.0052083335, %v198_v21  ;;  %v979_v25 = vmul.f32 %v956_v24, %v956_v24  ;;  %v1283_v24 = vsub.f32 %v561_v2, %v858_v51 }
  0xc1   :  { %508 = vrsqrt.f32 %v283_v47  ;;  %v269_v54 = vsub.f32 %v237_v35, %v253_v33  ;;  %v1281_v47 = vsub.f32 %v588_v10, %v860_v53  ;;  %v1285_v51 = vsub.f32 %v573_v5, %v864_v58 }
  0xc2   :  { %v497_v7 = vpop.eup %496  ;;  %510 = vrsqrt.f32 %v282_v52  ;;  %v268_v9 = vsub.f32 %v236_v62, %v252_v37  ;;  %v210_v21 = vpop.xlane.xlu1 %209 }
  0xc3   :  { %v499_v33 = vpop.eup %498  ;;  %v342_v35 = vmul.f32 %v497_v7, %v1281_v47  ;;  %v343_v19 = vmul.f32 %v497_v7, %v1282_v55  ;;  %v285_v52 = vadd.f32 1e-05, %v269_v54  ;;  %v239_v37 = vmul.f32 0.0052083335, %v210_v21  ;;  %v206_v62 = vpop.xlane.xlu0 %205 }
  0xc4   :  { %v340_v29 = vmul.f32 %v499_v33, %v1283_v24  ;;  %v341_v46 = vmul.f32 %v499_v33, %v1284_v12  ;;  %v284_v50 = vadd.f32 1e-05, %v268_v9  ;;  %v238_v49 = vmul.f32 0.0052083335, %v206_v62 }
  0xc5   :  { %v386_v10 = vmul.f32 %v866_v59, %v342_v35  ;;  %v387_v47 = vmul.f32 %v868_v60, %v343_v19  ;;  %512 = vrsqrt.f32 %v285_v52  ;;  %v271_v11 = vsub.f32 %v239_v37, %v255_v45 }
  0xc6   :  { %v501_v53 = vpop.eup %500  ;;  %v384_v55 = vmul.f32 %v866_v59, %v340_v29  ;;  %v385_v54 = vmul.f32 %v868_v60, %v341_v46  ;;  %514 = vrsqrt.f32 %v284_v50  ;;  %v270_v2 = vsub.f32 %v238_v49, %v254_v57  ;;  %v218_v9 = vpop.xlane.xlu1 %217 }
  0xc7   :  { %v503_v24 = vpop.eup %502  ;;  %v430_v7 = vadd.f32 %v870_v61, %v386_v10  ;;  %v431_v4 = vadd.f32 %v872_v63, %v387_v47  ;;  %v346_v12 = vmul.f32 %v501_v53, %v1285_v51  ;;  %v1286_v19 = vsub.f32 %v578_v6, %v864_v58  ;;  %v214_v21 = vpop.xlane.xlu0 %213 }
  0xc8   :  { %v428_v29 = vadd.f32 %v870_v61, %v384_v55  ;;  %v429_v46 = vadd.f32 %v872_v63, %v385_v54  ;;  %v1287_v50 = vsub.f32 %v551_v0, %v848_v43  ;;  %v1288_v57 = vsub.f32 %v556_v1, %v848_v43 }
  0xc9   :  { %v347_v45 = vmul.f32 %v501_v53, %v1286_v19  ;;  %462 = vst [vmem:[%s1252_s3 + $0x10] sm:$0xff] %v430_v7  ;;  %463 = vst.msk [vmem:[%s1252_s3 + $0x18] sm:$0xff] %vm46_vm0, %v431_v4  ;;  %v390_v5 = vmul.f32 %v866_v59, %v346_v12  ;;  %v287_v58 = vadd.f32 1e-05, %v271_v11  ;;  %v286_v0 = vadd.f32 1e-05, %v270_v2 }
  0xca   :  { %v344_v49 = vmul.f32 %v503_v24, %v1287_v50  ;;  %v345_v33 = vmul.f32 %v503_v24, %v1288_v57  ;;  %v505_v35 = vpop.eup %504  ;;  %460 = vst [vmem:[%s1252_s3] sm:$0xff] %v428_v29  ;;  %461 = vst.msk [vmem:[%s1252_s3 + $0x8] sm:$0xff] %vm46_vm0, %v429_v46  ;;  %v241_v52 = vmul.f32 0.0052083335, %v218_v9  ;;  %v240_v37 = vmul.f32 0.0052083335, %v214_v21 }
  0xcb   :  { %v391_v6 = vmul.f32 %v868_v60, %v347_v45  ;;  %v507_v62 = vpop.eup %506  ;;  %v434_v10 = vadd.f32 %v870_v61, %v390_v5  ;;  %v1289_v11 = vsub.f32 %v613_v18, %v878_v8  ;;  %v1290_v55 = vsub.f32 %v601_v14, %v878_v8  ;;  %v222_v57 = vpop.xlane.xlu0 %221 }
  0xcc   :  { %v388_v1 = vmul.f32 %v866_v59, %v344_v49  ;;  %v389_v43 = vmul.f32 %v868_v60, %v345_v33  ;;  %v1291_v7 = vsub.f32 %v620_v20, %v890_v16  ;;  %v1292_v51 = vsub.f32 %v606_v15, %v890_v16  ;;  %v227_v49 = vpop.xlane.xlu1 %226 }
  0xcd   :  { %v435_v47 = vadd.f32 %v872_v63, %v391_v6  ;;  %v350_v53 = vmul.f32 %v505_v35, %v1289_v11  ;;  %v351_v54 = vmul.f32 %v505_v35, %v1290_v55  ;;  %466 = vst [vmem:[%s1252_s3 + $0x30] sm:$0xff] %v434_v10  ;;  %516 = vrsqrt.f32 %v287_v58 }
  0xce   :  { %v432_v2 = vadd.f32 %v870_v61, %v388_v1  ;;  %v433_v24 = vadd.f32 %v872_v63, %v389_v43  ;;  %v348_v4 = vmul.f32 %v507_v62, %v1291_v7  ;;  %v349_v12 = vmul.f32 %v507_v62, %v1292_v51  ;;  %v509_v8 = vpop.eup %508 }
  0xcf   :  { %467 = vst.msk [vmem:[%s1252_s3 + $0x38] sm:$0xff] %vm46_vm0, %v435_v47  ;;  %v394_v14 = vmul.f32 %v866_v59, %v350_v53  ;;  %v395_v18 = vmul.f32 %v868_v60, %v351_v54  ;;  %v273_v20 = vsub.f32 %v241_v52, %v971_v17  ;;  %518 = vrsqrt.f32 %v286_v0  ;;  %v511_v45 = vpop.eup %510 }
  0xd0   :  { %464 = vst [vmem:[%s1252_s3 + $0x20] sm:$0xff] %v432_v2  ;;  %465 = vst.msk [vmem:[%s1252_s3 + $0x28] sm:$0xff] %vm46_vm0, %v433_v24  ;;  %v392_v15 = vmul.f32 %v866_v59, %v348_v4  ;;  %v393_v16 = vmul.f32 %v868_v60, %v349_v12  ;;  %v272_v19 = vsub.f32 %v240_v37, %v975_v40  ;;  %v243_v1 = vmul.f32 0.0052083335, %v227_v49  ;;  %v1301_v49 = vld [vmem:[#allocation10_spill] sm:$0xff] }
  0xd1   :  { %v438_v17 = vadd.f32 %v870_v61, %v394_v14  ;;  %v439_v9 = vadd.f32 %v872_v63, %v395_v18  ;;  %v1293_v21 = vsub.f32 %v639_v26, %v904_v48  ;;  %v1294_v46 = vsub.f32 %v627_v22, %v904_v48 }
  0xd2   :  { %v436_v33 = vadd.f32 %v870_v61, %v392_v15  ;;  %v437_v5 = vadd.f32 %v872_v63, %v393_v16  ;;  %v1295_v40 = vsub.f32 %v646_v28, %v912_v56  ;;  %v1296_v58 = vsub.f32 %v632_v23, %v912_v56  ;;  %v513_v35 = vpop.eup %512 }
  0xd3   :  { %v354_v29 = vmul.f32 %v509_v8, %v1293_v21  ;;  %v355_v50 = vmul.f32 %v509_v8, %v1294_v46  ;;  %470 = vst [vmem:[%s1252_s3 + $0x50] sm:$0xff] %v438_v17  ;;  %471 = vst.msk [vmem:[%s1252_s3 + $0x58] sm:$0xff] %vm46_vm0, %v439_v9  ;;  %v289_v48 = vadd.f32 1e-05, %v273_v20  ;;  %v288_v28 = vadd.f32 1e-05, %v272_v19  ;;  %v515_v52 = vpop.eup %514 }
  0xd4   :  { %v352_v6 = vmul.f32 %v511_v45, %v1295_v40  ;;  %v353_v0 = vmul.f32 %v511_v45, %v1296_v58  ;;  %468 = vst [vmem:[%s1252_s3 + $0x40] sm:$0xff] %v436_v33  ;;  %469 = vst.msk [vmem:[%s1252_s3 + $0x48] sm:$0xff] %vm46_vm0, %v437_v5  ;;  %v242_v43 = vmul.f32 0.0052083335, %v222_v57  ;;  %v1297_v10 = vsub.f32 %v665_v34, %v920_v41  ;;  %v1302_v57 = vld [vmem:[#allocation4_spill] sm:$0xff]  ;;  %v1303_v5 = vld [vmem:[#allocation2_spill] sm:$0xff] }
  0xd5   :  { %v398_v22 = vmul.f32 %v866_v59, %v354_v29  ;;  %v399_v26 = vmul.f32 %v868_v60, %v355_v50  ;;  %v1298_v11 = vsub.f32 %v653_v30, %v920_v41  ;;  %v1299_v2 = vsub.f32 %v672_v36, %v929_v13  ;;  %v1304_v58 = vld [vmem:[#allocation11_spill] sm:$0xff] }
  0xd6   :  { %v396_v23 = vmul.f32 %v866_v59, %v352_v6  ;;  %v397_v56 = vmul.f32 %v868_v60, %v353_v0  ;;  %v358_v47 = vmul.f32 %v513_v35, %v1297_v10  ;;  %v1300_v7 = vsub.f32 %v658_v31, %v929_v13  ;;  %v1305_v0 = vld [vmem:[#allocation5_spill] sm:$0xff] }
  0xd7   :  { %v442_v37 = vadd.f32 %v870_v61, %v398_v22  ;;  %v443_v62 = vadd.f32 %v872_v63, %v399_v26  ;;  %v359_v53 = vmul.f32 %v513_v35, %v1298_v11  ;;  %v356_v24 = vmul.f32 %v515_v52, %v1299_v2  ;;  %v1306_v26 = vld [vmem:[#allocation3_spill] sm:$0xff] }
  0xd8   :  { %v440_v55 = vadd.f32 %v870_v61, %v396_v23  ;;  %v441_v54 = vadd.f32 %v872_v63, %v397_v56  ;;  %v357_v4 = vmul.f32 %v515_v52, %v1300_v7  ;;  %v402_v30 = vmul.f32 %v866_v59, %v358_v47  ;;  %v1308_v52 = vld [vmem:[#allocation6_spill] sm:$0xff] }
  0xd9   :  { %474 = vst [vmem:[%s1252_s3 + $0x70] sm:$0xff] %v442_v37  ;;  %475 = vst.msk [vmem:[%s1252_s3 + $0x78] sm:$0xff] %vm46_vm0, %v443_v62  ;;  %v403_v34 = vmul.f32 %v868_v60, %v359_v53  ;;  %520 = vrsqrt.f32 %v289_v48  ;;  %v275_v36 = vsub.f32 %v243_v1, %v979_v25  ;;  %v400_v31 = vmul.f32 %v866_v59, %v356_v24  ;;  %v1309_v62 = vld [vmem:[#allocation7_spill] sm:$0xff]  ;;  %v1312_v24 = vld [vmem:[#allocation8_spill] sm:$0xff] }
  0xda   :  { %472 = vst [vmem:[%s1252_s3 + $0x60] sm:$0xff] %v440_v55  ;;  %473 = vst.msk [vmem:[%s1252_s3 + $0x68] sm:$0xff] %vm46_vm0, %v441_v54  ;;  %v401_v41 = vmul.f32 %v868_v60, %v357_v4  ;;  %522 = vrsqrt.f32 %v288_v28  ;;  %v274_v13 = vsub.f32 %v242_v43, %v983_v32  ;;  %v446_v51 = vadd.f32 %v870_v61, %v402_v30  ;;  %v517_v32 = vpop.eup %516  ;;  %v1307_v43 = vld [vmem:[#allocation12_spill] sm:$0xff]  ;;  %v1310_v55 = vld [vmem:[#allocation13_spill] sm:$0xff] }
  0xdb   :  { %v447_v25 = vadd.f32 %v872_v63, %v403_v34  ;;  %v291_v12 = vadd.f32 1e-05, %v275_v36  ;;  %v444_v14 = vadd.f32 %v870_v61, %v400_v31  ;;  %v330_v8 = vsub.f32 %v691_v42, %v940_v3  ;;  %v1311_v54 = vld [vmem:[#allocation9_spill] sm:$0xff] }
  0xdc   :  { %v445_v18 = vadd.f32 %v872_v63, %v401_v41  ;;  %v290_v20 = vadd.f32 1e-05, %v274_v13  ;;  %v331_v15 = vsub.f32 %v679_v38, %v940_v3  ;;  %478 = vst [vmem:[%s1252_s3 + $0x90] sm:$0xff] %v446_v51  ;;  %v328_v16 = vsub.f32 %v698_v44, %v947_v27  ;;  %v519_v38 = vpop.eup %518 }
  0xdd   :  { %479 = vst.msk [vmem:[%s1252_s3 + $0x98] sm:$0xff] %vm46_vm0, %v447_v25  ;;  %524 = vrsqrt.f32 %v291_v12  ;;  %v329_v42 = vsub.f32 %v684_v39, %v947_v27  ;;  %476 = vst [vmem:[%s1252_s3 + $0x80] sm:$0xff] %v444_v14  ;;  %v362_v3 = vmul.f32 %v517_v32, %v330_v8  ;;  %v334_v33 = vsub.f32 %v1302_v57, %v1301_v49 }
  0xde   :  { %477 = vst.msk [vmem:[%s1252_s3 + $0x88] sm:$0xff] %vm46_vm0, %v445_v18  ;;  %526 = vrsqrt.f32 %v290_v20  ;;  %v363_v19 = vmul.f32 %v517_v32, %v331_v15  ;;  %v360_v45 = vmul.f32 %v519_v38, %v328_v16  ;;  %v335_v40 = vsub.f32 %v1303_v5, %v1301_v49 }
  0xdf   :  { %v361_v17 = vmul.f32 %v519_v38, %v329_v42  ;;  %v406_v44 = vmul.f32 %v866_v59, %v362_v3  ;;  %v332_v22 = vsub.f32 %v1305_v0, %v1304_v58  ;;  %v333_v48 = vsub.f32 %v1306_v26, %v1304_v58 }
  0xe0   :  { %v407_v9 = vmul.f32 %v868_v60, %v363_v19  ;;  %v404_v39 = vmul.f32 %v866_v59, %v360_v45  ;;  %v338_v37 = vsub.f32 %v1308_v52, %v1307_v43  ;;  %v339_v10 = vsub.f32 %v1309_v62, %v1307_v43 }
  0xe1   :  { %v405_v27 = vmul.f32 %v868_v60, %v361_v17  ;;  %v450_v21 = vadd.f32 %v870_v61, %v406_v44  ;;  %v336_v2 = vsub.f32 %v1311_v54, %v1310_v55  ;;  %v337_v7 = vsub.f32 %v1312_v24, %v1310_v55 }
  0xe2   :  { %v451_v29 = vadd.f32 %v872_v63, %v407_v9  ;;  %v448_v46 = vadd.f32 %v870_v61, %v404_v39 }
  0xe3   :  { %v449_v50 = vadd.f32 %v872_v63, %v405_v27  ;;  %482 = vst [vmem:[%s1252_s3 + $0xb0] sm:$0xff] %v450_v21 }
  0xe4   :  { %483 = vst.msk [vmem:[%s1252_s3 + $0xb8] sm:$0xff] %vm46_vm0, %v451_v29  ;;  %480 = vst [vmem:[%s1252_s3 + $0xa0] sm:$0xff] %v448_v46 }
  0xe5   :  { %481 = vst.msk [vmem:[%s1252_s3 + $0xa8] sm:$0xff] %vm46_vm0, %v449_v50 }
  0xe6   :  { %v521_v6 = vpop.eup %520 }
  0xe7   :  { %v523_v28 = vpop.eup %522  ;;  %v366_v35 = vmul.f32 %v521_v6, %v334_v33  ;;  %v367_v23 = vmul.f32 %v521_v6, %v335_v40 }
  0xe8   :  { %v364_v56 = vmul.f32 %v523_v28, %v332_v22  ;;  %v365_v1 = vmul.f32 %v523_v28, %v333_v48 }
  0xe9   :  { %v410_v47 = vmul.f32 %v866_v59, %v366_v35  ;;  %v411_v11 = vmul.f32 %v868_v60, %v367_v23 }
  0xea   :  { %v525_v53 = vpop.eup %524  ;;  %v408_v4 = vmul.f32 %v866_v59, %v364_v56  ;;  %v409_v30 = vmul.f32 %v868_v60, %v365_v1 }
  0xeb   :  { %v527_v34 = vpop.eup %526  ;;  %v454_v36 = vadd.f32 %v870_v61, %v410_v47  ;;  %v455_v31 = vadd.f32 %v872_v63, %v411_v11  ;;  %v370_v41 = vmul.f32 %v525_v53, %v338_v37  ;;  %v371_v13 = vmul.f32 %v525_v53, %v339_v10 }
  0xec   :  { %v452_v51 = vadd.f32 %v870_v61, %v408_v4  ;;  %v453_v25 = vadd.f32 %v872_v63, %v409_v30  ;;  %v368_v12 = vmul.f32 %v527_v34, %v336_v2  ;;  %v369_v14 = vmul.f32 %v527_v34, %v337_v7 }
  0xed   :  { %486 = vst [vmem:[%s1252_s3 + $0xd0] sm:$0xff] %v454_v36  ;;  %487 = vst.msk [vmem:[%s1252_s3 + $0xd8] sm:$0xff] %vm46_vm0, %v455_v31  ;;  %v414_v18 = vmul.f32 %v866_v59, %v370_v41  ;;  %v415_v20 = vmul.f32 %v868_v60, %v371_v13 }
  0xee   :  { %484 = vst [vmem:[%s1252_s3 + $0xc0] sm:$0xff] %v452_v51  ;;  %485 = vst.msk [vmem:[%s1252_s3 + $0xc8] sm:$0xff] %vm46_vm0, %v453_v25  ;;  %v412_v8 = vmul.f32 %v866_v59, %v368_v12  ;;  %v413_v15 = vmul.f32 %v868_v60, %v369_v14 }
  0xef   :  { %v458_v32 = vadd.f32 %v870_v61, %v414_v18  ;;  %v459_v16 = vadd.f32 %v872_v63, %v415_v20 }
  0xf0   :  { %v456_v42 = vadd.f32 %v870_v61, %v412_v8  ;;  %v457_v38 = vadd.f32 %v872_v63, %v413_v15 }
  0xf1   :  { %490 = vst [vmem:[%s1252_s3 + $0xf0] sm:$0x3f] %v458_v32  ;;  %491 = vst.msk [vmem:[%s1252_s3 + $0xf8] sm:$0x3f] %vm109_vm2, %v459_v16 }
  0xf2   :  { %488 = vst [vmem:[%s1252_s3 + $0xe0] sm:$0xff] %v456_v42  ;;  %489 = vst.msk [vmem:[%s1252_s3 + $0xe8] sm:$0xff] %vm46_vm0, %v457_v38 }

// kernel: spex_plus_forward.56
= control target key start
LH: loop header
LB: loop body
LE: loop exit
PB: predicated region body
PF: predicated region fallthrough
CT: control target
= control target key end

     0   :  { %v447_v0 = vmov 0   ;;  %vm206_vm0 = vcmask 523264   ;;  %vm343_vm1 = vcmask 521216   ;;  %s650_s1 = inlined_call_operand.vmem [shape: bf16[192,64], index: 1, kind: input, shape index: {}]   ;;  %s651_s0 = inlined_call_operand.vmem [shape: bf16[126,192], index: 0, kind: input, shape index: {}]   ;;  %s652_s2 = inlined_call_operand.vmem [shape: f32[1,64], index: 2, kind: input, shape index: {}]   ;;  %s653_s3 = inlined_call_operand.vmem [shape: f32[126,64], index: 3, kind: output, shape index: {}]  }
   0x1   :  { %231 = vmatprep.subr.bf16.mxu0 %v447_v0  ;;  %386 = vmatprep.subr.bf16.mxu1 %v447_v0  ;;  %v411_v1 = vld [vmem:[%s650_s1 + $0x38] sm:$0xff]   ;;  %v412_v2 = vld [vmem:[%s650_s1 + $0x30] sm:$0xff]   ;;  %v413_v3 = vld [vmem:[%s650_s1 + $0x28] sm:$0xff]  }
   0x2   :  { %232 = vmatpush1.bf16.msra.mxu0 %v411_v1  ;;  %398 = vmatpush1.bf16.msra.mxu1 %v411_v1  ;;  %v414_v4 = vld [vmem:[%s650_s1 + $0x20] sm:$0xff]   ;;  %v415_v6 = vld [vmem:[%s650_s1 + $0x18] sm:$0xff]   ;;  %v416_v8 = vld [vmem:[%s650_s1 + $0x10] sm:$0xff]  }
   0x3   :  { %233 = vmatprep.subr.bf16.mxu0 %v447_v0  ;;  %387 = vmatprep.subr.bf16.mxu1 %v447_v0  ;;  %v425_v5 = vld [vmem:[%s651_s0 + $0x4] ss:$8 sps:$4 sm:$0xff]   ;;  %v419_v11 = vld [vmem:[%s650_s1 + $0x58] sm:$0xff]   ;;  %v420_v12 = vld [vmem:[%s650_s1 + $0x50] sm:$0xff]  }
   0x4   :  { %v428_v7 = vld [vmem:[%s651_s0 + $0x44] ss:$8 sps:$4 sm:$0xff]   ;;  %378 = vmatprep.mubr.msk.bf16.mxu0 %vm206_vm0, %v425_v5  ;;  %v423_v15 = vld [vmem:[%s651_s0] ss:$8 sps:$4 sm:$0xff]   ;;  %v429_v17 = vld [vmem:[%s651_s0 + $0x14] ss:$8 sps:$4 sm:$0xff]  }
   0x5   :  { %382 = vmatprep.mubr.msk.bf16.mxu1 %vm206_vm0, %v428_v7  ;;  %v417_v9 = vld [vmem:[%s650_s1 + $0x8] sm:$0xff]   ;;  %v418_v10 = vld [vmem:[%s650_s1] sm:$0xff]   ;;  %v431_v18 = vld [vmem:[%s651_s0 + $0x54] ss:$8 sps:$4 sm:$0xff]  }
   0x6   :  { %234 = vmatpush1.bf16.msra.mxu0 %v412_v2  ;;  %399 = vmatpush1.bf16.msra.mxu1 %v412_v2  ;;  %v421_v13 = vld [vmem:[%s650_s1 + $0x48] sm:$0xff]   ;;  %v422_v14 = vld [vmem:[%s650_s1 + $0x40] sm:$0xff]   ;;  %v433_v19 = vld [vmem:[%s651_s0 + $0x10] ss:$8 sps:$4 sm:$0xff]  }
   0x7   :  { %235 = vmatprep.subr.bf16.mxu0 %v447_v0  ;;  %388 = vmatprep.subr.bf16.mxu1 %v447_v0  ;;  %v426_v16 = vld [vmem:[%s651_s0 + $0x40] ss:$8 sps:$4 sm:$0xff]   ;;  %v434_v20 = vld [vmem:[%s651_s0 + $0x50] ss:$8 sps:$4 sm:$0xff]   ;;  %v435_v21 = vld [vmem:[%s651_s0 + $0x24] ss:$8 sps:$4 sm:$0xff]  }
   0x8   :  { %v437_v22 = vld [vmem:[%s651_s0 + $0x64] ss:$8 sps:$4 sm:$0xff]   ;;  %v439_v23 = vld [vmem:[%s651_s0 + $0x20] ss:$8 sps:$4 sm:$0xff]   ;;  %v441_v25 = vld [vmem:[%s651_s0 + $0x34] ss:$8 sps:$4 sm:$0xff]  }
   0x9   :  { %v440_v24 = vld [vmem:[%s651_s0 + $0x60] ss:$8 sps:$4 sm:$0xff]   ;;  %v443_v26 = vld [vmem:[%s651_s0 + $0x74] ss:$8 sps:$4 sm:$0x7f]  }
   0xa   :  { %236 = vmatpush1.bf16.msra.mxu0 %v413_v3  ;;  %400 = vmatpush1.bf16.msra.mxu1 %v413_v3  ;;  %v445_v27 = vld [vmem:[%s651_s0 + $0x30] ss:$8 sps:$4 sm:$0xff]   ;;  %v349_v29 = vld [vmem:[%s652_s2] ss:$0 sm:$0xff] }
   0xb   :  { %237 = vmatprep.subr.bf16.mxu0 %v447_v0  ;;  %389 = vmatprep.subr.bf16.mxu1 %v447_v0  ;;  %v446_v28 = vld [vmem:[%s651_s0 + $0x70] ss:$8 sps:$4 sm:$0x7f]  }
   0xe   :  { %238 = vmatpush1.bf16.msra.mxu0 %v414_v4  ;;  %401 = vmatpush1.bf16.msra.mxu1 %v414_v4 }
   0xf   :  { %239 = vmatprep.subr.bf16.mxu0 %v447_v0  ;;  %390 = vmatprep.subr.bf16.mxu1 %v447_v0 }
  0x12   :  { %240 = vmatpush1.bf16.msra.mxu0 %v415_v6  ;;  %402 = vmatpush1.bf16.msra.mxu1 %v415_v6 }
  0x13   :  { %241 = vmatprep.subr.bf16.mxu0 %v447_v0  ;;  %391 = vmatprep.subr.bf16.mxu1 %v447_v0 }
  0x16   :  { %242 = vmatpush1.bf16.msra.mxu0 %v416_v8  ;;  %403 = vmatpush1.bf16.msra.mxu1 %v416_v8 }
  0x17   :  { %243 = vmatprep.subr.bf16.mxu0 %v447_v0  ;;  %392 = vmatprep.subr.bf16.mxu1 %v447_v0 }
  0x1a   :  { %244 = vmatpush1.bf16.msra.mxu0 %v417_v9  ;;  %404 = vmatpush1.bf16.msra.mxu1 %v417_v9 }
  0x1b   :  { %245 = vmatprep.subr.bf16.mxu0 %v447_v0  ;;  %393 = vmatprep.subr.bf16.mxu1 %v447_v0 }
  0x1e   :  { %246 = vmatpush1.bf16.msra.mxu0 %v418_v10  ;;  %405 = vmatpush1.bf16.msra.mxu1 %v418_v10 }
  0x1f   :  { %255 = vmatprep.subr.bf16.mxu0 %v447_v0  ;;  %394 = vmatprep.subr.bf16.mxu1 %v447_v0 }
  0x22   :  { %256 = vmatpush2.bf16.msra.mxu0 %v419_v11  ;;  %406 = vmatpush2.bf16.msra.mxu1 %v419_v11 }
  0x23   :  { %257 = vmatprep.subr.bf16.mxu0 %v447_v0  ;;  %395 = vmatprep.subr.bf16.mxu1 %v447_v0 }
  0x26   :  { %258 = vmatpush2.bf16.msra.mxu0 %v420_v12  ;;  %407 = vmatpush2.bf16.msra.mxu1 %v420_v12 }
  0x27   :  { %259 = vmatprep.subr.bf16.mxu0 %v447_v0  ;;  %396 = vmatprep.subr.bf16.mxu1 %v447_v0 }
  0x2a   :  { %260 = vmatpush2.bf16.msra.mxu0 %v421_v13  ;;  %408 = vmatpush2.bf16.msra.mxu1 %v421_v13 }
  0x2b   :  { %261 = vmatprep.subr.bf16.mxu0 %v447_v0  ;;  %397 = vmatprep.subr.bf16.mxu1 %v447_v0 }
  0x2e   :  { %262 = vmatpush2.bf16.msra.mxu0 %v422_v14  ;;  %409 = vmatpush2.bf16.msra.mxu1 %v422_v14 }
  0x31   :  { %264 = vmatmul.mubr.bf16.vlgmr.msra.gmra.mxu0 %v423_v15  ;;  %296 = vmatmul.mubr.bf16.vlgmr.msra.gmra.mxu1 %v426_v16 }
  0x32   :  { %379 = vmatprep.mubr.msk.bf16.mxu0 %vm206_vm0, %v429_v17  ;;  %383 = vmatprep.mubr.msk.bf16.mxu1 %vm206_vm0, %v431_v18 }
  0x39   :  { %272 = vmatmul.mubr.bf16.gmra.mxu0 %v433_v19  ;;  %304 = vmatmul.mubr.bf16.gmra.mxu1 %v434_v20 }
  0x3a   :  { %380 = vmatprep.mubr.msk.bf16.mxu0 %vm206_vm0, %v435_v21  ;;  %384 = vmatprep.mubr.msk.bf16.mxu1 %vm206_vm0, %v437_v22 }
  0x41   :  { %280 = vmatmul.mubr.bf16.gmra.mxu0 %v439_v23  ;;  %312 = vmatmul.mubr.bf16.gmra.mxu1 %v440_v24 }
  0x42   :  { %381 = vmatprep.mubr.msk.bf16.mxu0 %vm206_vm0, %v441_v25  ;;  %385 = vmatprep.mubr.msk.bf16.mxu1 %vm206_vm0, %v443_v26 }
  0x49   :  { %288 = vmatmul.mubr.bf16.gmra.mxu0 %v445_v27  ;;  %320 = vmatmul.mubr.bf16.gmra.mxu1 %v446_v28 }
  0xf1   :  { %v265_v30 = vpop.f32.mrf.mxu0  ;;  %v297_v31 = vpop.f32.mrf.mxu1 }
  0xf2   :  { %v266_v32 = vadd.f32 %v349_v29, %v265_v30  ;;  %v298_v33 = vadd.f32 %v349_v29, %v297_v31 }
  0xf3   :  { %v267_v34 = vpop.f32.mrf.mxu0  ;;  %v299_v35 = vpop.f32.mrf.mxu1 }
  0xf4   :  { %328 = vst.msk [vmem:[%s653_s3] sm:$0xff] %vm206_vm0, %v266_v32  ;;  %336 = vst.msk [vmem:[%s653_s3 + $0x40] sm:$0xff] %vm206_vm0, %v298_v33 }
  0xf5   :  { %v268_v36 = vpop.f32.mrf.mxu0  ;;  %v300_v37 = vpop.f32.mrf.mxu1 }
  0xf6   :  { %v269_v38 = vadd.f32 %v349_v29, %v268_v36  ;;  %v301_v39 = vadd.f32 %v349_v29, %v300_v37 }
  0xf7   :  { %v270_v40 = vpop.f32.mrf.mxu0  ;;  %v302_v41 = vpop.f32.mrf.mxu1 }
  0xf8   :  { %329 = vst.msk [vmem:[%s653_s3 + $0x8] sm:$0xff] %vm206_vm0, %v269_v38  ;;  %337 = vst.msk [vmem:[%s653_s3 + $0x48] sm:$0xff] %vm206_vm0, %v301_v39 }
  0xf9   :  { %v273_v42 = vpop.f32.mrf.mxu0  ;;  %v305_v43 = vpop.f32.mrf.mxu1 }
  0xfa   :  { %v274_v44 = vadd.f32 %v349_v29, %v273_v42  ;;  %v306_v45 = vadd.f32 %v349_v29, %v305_v43 }
  0xfb   :  { %v275_v46 = vpop.f32.mrf.mxu0  ;;  %v307_v47 = vpop.f32.mrf.mxu1 }
  0xfc   :  { %330 = vst.msk [vmem:[%s653_s3 + $0x10] sm:$0xff] %vm206_vm0, %v274_v44  ;;  %338 = vst.msk [vmem:[%s653_s3 + $0x50] sm:$0xff] %vm206_vm0, %v306_v45 }
  0xfd   :  { %v276_v48 = vpop.f32.mrf.mxu0  ;;  %v308_v49 = vpop.f32.mrf.mxu1 }
  0xfe   :  { %v277_v50 = vadd.f32 %v349_v29, %v276_v48  ;;  %v309_v51 = vadd.f32 %v349_v29, %v308_v49 }
  0xff   :  { %v278_v52 = vpop.f32.mrf.mxu0  ;;  %v310_v53 = vpop.f32.mrf.mxu1 }
 0x100   :  { %331 = vst.msk [vmem:[%s653_s3 + $0x18] sm:$0xff] %vm206_vm0, %v277_v50  ;;  %339 = vst.msk [vmem:[%s653_s3 + $0x58] sm:$0xff] %vm206_vm0, %v309_v51 }
 0x101   :  { %v281_v54 = vpop.f32.mrf.mxu0  ;;  %v313_v55 = vpop.f32.mrf.mxu1 }
 0x102   :  { %v282_v56 = vadd.f32 %v349_v29, %v281_v54  ;;  %v314_v57 = vadd.f32 %v349_v29, %v313_v55 }
 0x103   :  { %v283_v58 = vpop.f32.mrf.mxu0  ;;  %v315_v59 = vpop.f32.mrf.mxu1 }
 0x104   :  { %332 = vst.msk [vmem:[%s653_s3 + $0x20] sm:$0xff] %vm206_vm0, %v282_v56  ;;  %340 = vst.msk [vmem:[%s653_s3 + $0x60] sm:$0xff] %vm206_vm0, %v314_v57 }
 0x105   :  { %v284_v60 = vpop.f32.mrf.mxu0  ;;  %v316_v61 = vpop.f32.mrf.mxu1 }
 0x106   :  { %v285_v62 = vadd.f32 %v349_v29, %v284_v60  ;;  %v317_v63 = vadd.f32 %v349_v29, %v316_v61 }
 0x107   :  { %v286_v0 = vpop.f32.mrf.mxu0  ;;  %v318_v1 = vpop.f32.mrf.mxu1 }
 0x108   :  { %333 = vst.msk [vmem:[%s653_s3 + $0x28] sm:$0xff] %vm206_vm0, %v285_v62  ;;  %341 = vst.msk [vmem:[%s653_s3 + $0x68] sm:$0xff] %vm206_vm0, %v317_v63 }
 0x109   :  { %v289_v2 = vpop.f32.mrf.mxu0  ;;  %v321_v3 = vpop.f32.mrf.mxu1 }
 0x10a   :  { %v290_v4 = vadd.f32 %v349_v29, %v289_v2  ;;  %v322_v5 = vadd.f32 %v349_v29, %v321_v3 }
 0x10b   :  { %v291_v6 = vpop.f32.mrf.mxu0  ;;  %v323_v7 = vpop.f32.mrf.mxu1 }
 0x10c   :  { %334 = vst.msk [vmem:[%s653_s3 + $0x30] sm:$0xff] %vm206_vm0, %v290_v4  ;;  %342 = vst.msk [vmem:[%s653_s3 + $0x70] sm:$0xff] %vm206_vm0, %v322_v5 }
 0x10d   :  { %v292_v8 = vpop.f32.mrf.mxu0  ;;  %v324_v9 = vpop.f32.mrf.mxu1 }
 0x10e   :  { %v293_v10 = vadd.f32 %v349_v29, %v292_v8  ;;  %v325_v11 = vadd.f32 %v349_v29, %v324_v9 }
 0x10f   :  { %v294_v12 = vpop.f32.mrf.mxu0  ;;  %v326_v13 = vpop.f32.mrf.mxu1 }
 0x110   :  { %335 = vst.msk [vmem:[%s653_s3 + $0x38] sm:$0xff] %vm206_vm0, %v293_v10 }
 0x111   :  { %344 = vst.msk [vmem:[%s653_s3 + $0x78] sm:$0x3f] %vm343_vm1, %v325_v11 }

// kernel: spex_plus_forward.57
= control target key start
LH: loop header
LB: loop body
LE: loop exit
PB: predicated region body
PF: predicated region fallthrough
CT: control target
= control target key end

     0   :  { %vm110_vm0 = vcmask 523264   ;;  %vm343_vm13 = vcmask 521216   ;;  %s627_s1 = inlined_call_operand.vmem [shape: bf16[64,64], index: 1, kind: input, shape index: {}]   ;;  %s628_s0 = inlined_call_operand.vmem [shape: bf16[126,64], index: 0, kind: input, shape index: {}]   ;;  %s629_s2 = inlined_call_operand.vmem [shape: f32[1,64], index: 2, kind: input, shape index: {}]   ;;  %s630_s3 = inlined_call_operand.vmem [shape: f32[1,64], index: 3, kind: input, shape index: {}]   ;;  %s631_s4 = inlined_call_operand.<no memory space> [shape: f32[1], index: 4, kind: input, shape index: {}]   ;;  %s632_s5 = inlined_call_operand.vmem [shape: f32[126,64], index: 5, kind: output, shape index: {}]  }
   0x1   :  { %v415_v0 = vld [vmem:[%s627_s1 + $0x18] sm:$0xff]   ;;  %v416_v1 = vld [vmem:[%s627_s1 + $0x10] sm:$0xff]   ;;  %v417_v2 = vld [vmem:[%s627_s1 + $0x8] sm:$0xff]   ;;  %v516_v18 = vstv %s631_s4 }
   0x2   :  { %383 = vmatprep.subr.bf16.mxu0 %v415_v0  ;;  %407 = vmatprep.subr.bf16.mxu1 %v415_v0  ;;  %v419_v3 = vld [vmem:[%s628_s0] sm:$0xff]   ;;  %v421_v6 = vld [vmem:[%s628_s0 + $0x8] sm:$0xff]   ;;  %v423_v8 = vld [vmem:[%s628_s0 + $0x10] sm:$0xff]  }
   0x3   :  { %384 = vmatpush3.bf16.msra.mxu0 %v415_v0  ;;  %411 = vmatpush3.bf16.msra.mxu1 %v415_v0  ;;  %v420_v4 = vld [vmem:[%s628_s0 + $0x20] sm:$0xff]   ;;  %v422_v7 = vld [vmem:[%s628_s0 + $0x28] sm:$0xff]   ;;  %v424_v9 = vld [vmem:[%s628_s0 + $0x30] sm:$0xff]  }
   0x4   :  { %385 = vmatprep.subr.bf16.mxu0 %v416_v1  ;;  %408 = vmatprep.subr.bf16.mxu1 %v416_v1  ;;  %v418_v5 = vld [vmem:[%s627_s1] sm:$0xff]   ;;  %v425_v10 = vld [vmem:[%s628_s0 + $0x18] sm:$0xff]  }
   0x5   :  { %391 = vmatprep.mubr.msk.bf16.mxu0 %vm110_vm0, %v419_v3  ;;  %399 = vmatprep.mubr.msk.bf16.mxu1 %vm110_vm0, %v420_v4  ;;  %v426_v11 = vld [vmem:[%s628_s0 + $0x38] sm:$0x7f]   ;;  %v504_v12 = vld [vmem:[%s629_s2] ss:$0 sm:$0xff] }
   0x6   :  { %v509_v14 = vld [vmem:[%s630_s3] ss:$0 sm:$0xff] }
   0x7   :  { %386 = vmatpush3.bf16.msra.mxu0 %v416_v1  ;;  %412 = vmatpush3.bf16.msra.mxu1 %v416_v1 }
   0x8   :  { %387 = vmatprep.subr.bf16.mxu0 %v417_v2  ;;  %409 = vmatprep.subr.bf16.mxu1 %v417_v2 }
   0xb   :  { %388 = vmatpush3.bf16.msra.mxu0 %v417_v2  ;;  %413 = vmatpush3.bf16.msra.mxu1 %v417_v2 }
   0xc   :  { %389 = vmatprep.subr.bf16.mxu0 %v418_v5  ;;  %410 = vmatprep.subr.bf16.mxu1 %v418_v5 }
   0xf   :  { %390 = vmatpush3.bf16.msra.mxu0 %v418_v5  ;;  %414 = vmatpush3.bf16.msra.mxu1 %v418_v5 }
  0x12   :  { %392 = vmatmul.mubr.msk.bf16.vlgmr.msra.gmra.mxu0 %vm110_vm0, %v421_v6  ;;  %400 = vmatmul.mubr.msk.bf16.vlgmr.msra.gmra.mxu1 %vm110_vm0, %v422_v7 }
  0x13   :  { %395 = vmatprep.mubr.msk.bf16.mxu0 %vm110_vm0, %v423_v8  ;;  %403 = vmatprep.mubr.msk.bf16.mxu1 %vm110_vm0, %v424_v9 }
  0x1a   :  { %396 = vmatmul.mubr.msk.bf16.gmra.mxu0 %vm110_vm0, %v425_v10  ;;  %404 = vmatmul.mubr.msk.bf16.gmra.mxu1 %vm110_vm0, %v426_v11 }
  0xd2   :  { %v393_v13 = vpop.f32.mrf.mxu0  ;;  %v401_v15 = vpop.f32.mrf.mxu1 }
  0xd3   :  { %v241_v16 = vmul.f32 %v393_v13, %v504_v12  ;;  %v249_v17 = vmul.f32 %v401_v15, %v504_v12 }
  0xd4   :  { %v169_v19 = vpop.f32.mrf.mxu0  ;;  %v201_v20 = vpop.f32.mrf.mxu1 }
  0xd5   :  { %v264_v21 = vadd.f32 %v509_v14, %v241_v16  ;;  %v272_v22 = vadd.f32 %v509_v14, %v249_v17  ;;  %v239_v23 = vmul.f32 %v504_v12, %v169_v19  ;;  %v247_v24 = vmul.f32 %v504_v12, %v201_v20 }
  0xd6   :  { %v394_v25 = vpop.f32.mrf.mxu0  ;;  %v402_v26 = vpop.f32.mrf.mxu1 }
  0xd7   :  { %vm281_vm1 = vcmp.gt.f32.partialorder %v264_v21, 0.0  ;;  %v298_v27 = vmul.f32 %v516_v18, %v264_v21  ;;  %vm289_vm2 = vcmp.gt.f32.partialorder %v272_v22, 0.0  ;;  %v306_v28 = vmul.f32 %v516_v18, %v272_v22 }
  0xd8   :  { %v262_v29 = vadd.f32 %v509_v14, %v239_v23  ;;  %v270_v30 = vadd.f32 %v509_v14, %v247_v24  ;;  %v242_v31 = vmul.f32 %v394_v25, %v504_v12  ;;  %v250_v32 = vmul.f32 %v402_v26, %v504_v12  ;;  %v172_v33 = vpop.f32.mrf.mxu0  ;;  %v204_v34 = vpop.f32.mrf.mxu1 }
  0xd9   :  { %v314_v35 = vsel %vm281_vm1, %v264_v21, %v298_v27  ;;  %v322_v36 = vsel %vm289_vm2, %v272_v22, %v306_v28  ;;  %v240_v37 = vmul.f32 %v504_v12, %v172_v33  ;;  %v248_v38 = vmul.f32 %v504_v12, %v204_v34 }
  0xda   :  { %330 = vst.msk [vmem:[%s632_s5 + $0x10] sm:$0xff] %vm110_vm0, %v314_v35  ;;  %338 = vst.msk [vmem:[%s632_s5 + $0x50] sm:$0xff] %vm110_vm0, %v322_v36  ;;  %vm279_vm3 = vcmp.gt.f32.partialorder %v262_v29, 0.0  ;;  %v296_v39 = vmul.f32 %v516_v18, %v262_v29  ;;  %vm287_vm4 = vcmp.gt.f32.partialorder %v270_v30, 0.0  ;;  %v304_v40 = vmul.f32 %v516_v18, %v270_v30  ;;  %v397_v41 = vpop.f32.mrf.mxu0  ;;  %v405_v42 = vpop.f32.mrf.mxu1 }
  0xdb   :  { %v265_v43 = vadd.f32 %v509_v14, %v242_v31  ;;  %v273_v44 = vadd.f32 %v509_v14, %v250_v32  ;;  %v263_v45 = vadd.f32 %v509_v14, %v240_v37  ;;  %v271_v46 = vadd.f32 %v509_v14, %v248_v38 }
  0xdc   :  { %v312_v47 = vsel %vm279_vm3, %v262_v29, %v296_v39  ;;  %v320_v48 = vsel %vm287_vm4, %v270_v30, %v304_v40  ;;  %v245_v49 = vmul.f32 %v397_v41, %v504_v12  ;;  %v253_v50 = vmul.f32 %v405_v42, %v504_v12  ;;  %v185_v51 = vpop.f32.mrf.mxu0  ;;  %v217_v52 = vpop.f32.mrf.mxu1 }
  0xdd   :  { %328 = vst.msk [vmem:[%s632_s5] sm:$0xff] %vm110_vm0, %v312_v47  ;;  %336 = vst.msk [vmem:[%s632_s5 + $0x40] sm:$0xff] %vm110_vm0, %v320_v48  ;;  %vm282_vm5 = vcmp.gt.f32.partialorder %v265_v43, 0.0  ;;  %v299_v53 = vmul.f32 %v516_v18, %v265_v43  ;;  %vm290_vm6 = vcmp.gt.f32.partialorder %v273_v44, 0.0  ;;  %v307_v54 = vmul.f32 %v516_v18, %v273_v44 }
  0xde   :  { %vm280_vm7 = vcmp.gt.f32.partialorder %v263_v45, 0.0  ;;  %v297_v55 = vmul.f32 %v516_v18, %v263_v45  ;;  %vm288_vm8 = vcmp.gt.f32.partialorder %v271_v46, 0.0  ;;  %v305_v56 = vmul.f32 %v516_v18, %v271_v46  ;;  %v398_v57 = vpop.f32.mrf.mxu0  ;;  %v406_v58 = vpop.f32.mrf.mxu1 }
  0xdf   :  { %v315_v59 = vsel %vm282_vm5, %v265_v43, %v299_v53  ;;  %v323_v60 = vsel %vm290_vm6, %v273_v44, %v307_v54  ;;  %v268_v61 = vadd.f32 %v509_v14, %v245_v49  ;;  %v276_v62 = vadd.f32 %v509_v14, %v253_v50 }
  0xe0   :  { %331 = vst.msk [vmem:[%s632_s5 + $0x18] sm:$0xff] %vm110_vm0, %v315_v59  ;;  %339 = vst.msk [vmem:[%s632_s5 + $0x58] sm:$0xff] %vm110_vm0, %v323_v60  ;;  %v313_v63 = vsel %vm280_vm7, %v263_v45, %v297_v55  ;;  %v321_v0 = vsel %vm288_vm8, %v271_v46, %v305_v56  ;;  %v243_v1 = vmul.f32 %v504_v12, %v185_v51  ;;  %v188_v3 = vpop.f32.mrf.mxu0  ;;  %v220_v4 = vpop.f32.mrf.mxu1 }
  0xe1   :  { %v251_v2 = vmul.f32 %v504_v12, %v217_v52  ;;  %329 = vst.msk [vmem:[%s632_s5 + $0x8] sm:$0xff] %vm110_vm0, %v313_v63  ;;  %337 = vst.msk [vmem:[%s632_s5 + $0x48] sm:$0xff] %vm110_vm0, %v321_v0  ;;  %vm285_vm9 = vcmp.gt.f32.partialorder %v268_v61, 0.0  ;;  %v302_v5 = vmul.f32 %v516_v18, %v268_v61  ;;  %vm293_vm10 = vcmp.gt.f32.partialorder %v276_v62, 0.0 }
  0xe2   :  { %v310_v6 = vmul.f32 %v516_v18, %v276_v62  ;;  %v266_v7 = vadd.f32 %v509_v14, %v243_v1  ;;  %v246_v9 = vmul.f32 %v398_v57, %v504_v12  ;;  %v254_v10 = vmul.f32 %v406_v58, %v504_v12 }
  0xe3   :  { %v274_v8 = vadd.f32 %v509_v14, %v251_v2  ;;  %v318_v11 = vsel %vm285_vm9, %v268_v61, %v302_v5  ;;  %v244_v15 = vmul.f32 %v504_v12, %v188_v3  ;;  %v252_v16 = vmul.f32 %v504_v12, %v220_v4 }
  0xe4   :  { %v326_v13 = vsel %vm293_vm10, %v276_v62, %v310_v6  ;;  %334 = vst.msk [vmem:[%s632_s5 + $0x30] sm:$0xff] %vm110_vm0, %v318_v11  ;;  %vm283_vm11 = vcmp.gt.f32.partialorder %v266_v7, 0.0  ;;  %v300_v17 = vmul.f32 %v516_v18, %v266_v7  ;;  %v269_v20 = vadd.f32 %v509_v14, %v246_v9 }
  0xe5   :  { %342 = vst.msk [vmem:[%s632_s5 + $0x70] sm:$0xff] %vm110_vm0, %v326_v13  ;;  %vm291_vm12 = vcmp.gt.f32.partialorder %v274_v8, 0.0  ;;  %v308_v19 = vmul.f32 %v516_v18, %v274_v8  ;;  %v277_v12 = vadd.f32 %v509_v14, %v254_v10  ;;  %v267_v21 = vadd.f32 %v509_v14, %v244_v15 }
  0xe6   :  { %v275_v22 = vadd.f32 %v509_v14, %v252_v16  ;;  %v316_v23 = vsel %vm283_vm11, %v266_v7, %v300_v17  ;;  %vm286_vm14 = vcmp.gt.f32.partialorder %v269_v20, 0.0  ;;  %v303_v25 = vmul.f32 %v516_v18, %v269_v20 }
  0xe7   :  { %v324_v24 = vsel %vm291_vm12, %v274_v8, %v308_v19  ;;  %332 = vst.msk [vmem:[%s632_s5 + $0x20] sm:$0xff] %vm110_vm0, %v316_v23  ;;  %vm294_vm15 = vcmp.gt.f32.partialorder %v277_v12, 0.0  ;;  %v311_v26 = vmul.f32 %v516_v18, %v277_v12  ;;  %vm284_vm1 = vcmp.gt.f32.partialorder %v267_v21, 0.0 }
  0xe8   :  { %340 = vst.msk [vmem:[%s632_s5 + $0x60] sm:$0xff] %vm110_vm0, %v324_v24  ;;  %v301_v14 = vmul.f32 %v516_v18, %v267_v21  ;;  %vm292_vm2 = vcmp.gt.f32.partialorder %v275_v22, 0.0  ;;  %v309_v27 = vmul.f32 %v516_v18, %v275_v22  ;;  %v319_v28 = vsel %vm286_vm14, %v269_v20, %v303_v25 }
  0xe9   :  { %v327_v29 = vsel %vm294_vm15, %v277_v12, %v311_v26  ;;  %335 = vst.msk [vmem:[%s632_s5 + $0x38] sm:$0xff] %vm110_vm0, %v319_v28 }
  0xea   :  { %344 = vst.msk [vmem:[%s632_s5 + $0x78] sm:$0x3f] %vm343_vm13, %v327_v29  ;;  %v317_v30 = vsel %vm284_vm1, %v267_v21, %v301_v14  ;;  %v325_v31 = vsel %vm292_vm2, %v275_v22, %v309_v27 }
  0xeb   :  { %333 = vst.msk [vmem:[%s632_s5 + $0x28] sm:$0xff] %vm110_vm0, %v317_v30  ;;  %341 = vst.msk [vmem:[%s632_s5 + $0x68] sm:$0xff] %vm110_vm0, %v325_v31 }

// kernel: spex_plus_forward.58
= control target key start
LH: loop header
LB: loop body
LE: loop exit
PB: predicated region body
PF: predicated region fallthrough
CT: control target
= control target key end

     0   :  { %vm113_vm0 = vcmask 523264   ;;  %vm378_vm13 = vcmask 521216   ;;  %s715_s1 = inlined_call_operand.vmem [shape: bf16[64,64], index: 1, kind: input, shape index: {}]   ;;  %s716_s0 = inlined_call_operand.vmem [shape: bf16[126,64], index: 0, kind: input, shape index: {}]   ;;  %s717_s2 = inlined_call_operand.vmem [shape: f32[1,64], index: 2, kind: input, shape index: {}]   ;;  %s718_s3 = inlined_call_operand.vmem [shape: f32[1,64], index: 3, kind: input, shape index: {}]   ;;  %s719_s4 = inlined_call_operand.vmem [shape: f32[126,64], index: 4, kind: input, shape index: {}]   ;;  %s720_s5 = inlined_call_operand.<no memory space> [shape: f32[1], index: 5, kind: input, shape index: {}]   ;;  %s721_s6 = inlined_call_operand.vmem [shape: f32[126,64], index: 6, kind: output, shape index: {}]  }
   0x1   :  { %v450_v0 = vld [vmem:[%s715_s1 + $0x18] sm:$0xff]   ;;  %v451_v1 = vld [vmem:[%s715_s1 + $0x10] sm:$0xff]   ;;  %v452_v2 = vld [vmem:[%s715_s1 + $0x8] sm:$0xff]   ;;  %v566_v26 = vstv %s720_s5 }
   0x2   :  { %418 = vmatprep.subr.bf16.mxu0 %v450_v0  ;;  %442 = vmatprep.subr.bf16.mxu1 %v450_v0  ;;  %v454_v3 = vld [vmem:[%s716_s0] sm:$0xff]   ;;  %v456_v6 = vld [vmem:[%s716_s0 + $0x8] sm:$0xff]   ;;  %v458_v8 = vld [vmem:[%s716_s0 + $0x10] sm:$0xff]  }
   0x3   :  { %419 = vmatpush3.bf16.msra.mxu0 %v450_v0  ;;  %446 = vmatpush3.bf16.msra.mxu1 %v450_v0  ;;  %v455_v4 = vld [vmem:[%s716_s0 + $0x20] sm:$0xff]   ;;  %v457_v7 = vld [vmem:[%s716_s0 + $0x28] sm:$0xff]   ;;  %v459_v9 = vld [vmem:[%s716_s0 + $0x30] sm:$0xff]  }
   0x4   :  { %420 = vmatprep.subr.bf16.mxu0 %v451_v1  ;;  %443 = vmatprep.subr.bf16.mxu1 %v451_v1  ;;  %v453_v5 = vld [vmem:[%s715_s1] sm:$0xff]   ;;  %v460_v10 = vld [vmem:[%s716_s0 + $0x18] sm:$0xff]   ;;  %v283_v18 = vld [vmem:[%s719_s4 + $0x10] sm:$0xff] }
   0x5   :  { %426 = vmatprep.mubr.msk.bf16.mxu0 %vm113_vm0, %v454_v3  ;;  %434 = vmatprep.mubr.msk.bf16.mxu1 %vm113_vm0, %v455_v4  ;;  %v461_v11 = vld [vmem:[%s716_s0 + $0x38] sm:$0x7f]   ;;  %v544_v12 = vld [vmem:[%s717_s2] ss:$0 sm:$0xff]  ;;  %v291_v19 = vld [vmem:[%s719_s4 + $0x50] sm:$0xff] }
   0x6   :  { %v549_v14 = vld [vmem:[%s718_s3] ss:$0 sm:$0xff]  ;;  %v284_v44 = vld [vmem:[%s719_s4 + $0x18] sm:$0xff]  ;;  %v282_v60 = vld [vmem:[%s719_s4 + $0x8] sm:$0xff] }
   0x7   :  { %421 = vmatpush3.bf16.msra.mxu0 %v451_v1  ;;  %447 = vmatpush3.bf16.msra.mxu1 %v451_v1  ;;  %v281_v32 = vld [vmem:[%s719_s4] sm:$0xff]  ;;  %v292_v46 = vld [vmem:[%s719_s4 + $0x58] sm:$0xff]  ;;  %v290_v62 = vld [vmem:[%s719_s4 + $0x48] sm:$0xff] }
   0x8   :  { %422 = vmatprep.subr.bf16.mxu0 %v452_v2  ;;  %444 = vmatprep.subr.bf16.mxu1 %v452_v2  ;;  %v289_v34 = vld [vmem:[%s719_s4 + $0x40] sm:$0xff] }
   0xb   :  { %423 = vmatpush3.bf16.msra.mxu0 %v452_v2  ;;  %448 = vmatpush3.bf16.msra.mxu1 %v452_v2 }
   0xc   :  { %424 = vmatprep.subr.bf16.mxu0 %v453_v5  ;;  %445 = vmatprep.subr.bf16.mxu1 %v453_v5 }
   0xf   :  { %425 = vmatpush3.bf16.msra.mxu0 %v453_v5  ;;  %449 = vmatpush3.bf16.msra.mxu1 %v453_v5 }
  0x12   :  { %427 = vmatmul.mubr.msk.bf16.vlgmr.msra.gmra.mxu0 %vm113_vm0, %v456_v6  ;;  %435 = vmatmul.mubr.msk.bf16.vlgmr.msra.gmra.mxu1 %vm113_vm0, %v457_v7 }
  0x13   :  { %430 = vmatprep.mubr.msk.bf16.mxu0 %vm113_vm0, %v458_v8  ;;  %438 = vmatprep.mubr.msk.bf16.mxu1 %vm113_vm0, %v459_v9  ;;  %v287_v8 = vld [vmem:[%s719_s4 + $0x30] sm:$0xff] }
  0x1a   :  { %431 = vmatmul.mubr.msk.bf16.gmra.mxu0 %vm113_vm0, %v460_v10  ;;  %439 = vmatmul.mubr.msk.bf16.gmra.mxu1 %vm113_vm0, %v461_v11  ;;  %v295_v10 = vld [vmem:[%s719_s4 + $0x70] sm:$0xff] }
  0xd2   :  { %v428_v13 = vpop.f32.mrf.mxu0  ;;  %v436_v15 = vpop.f32.mrf.mxu1 }
  0xd3   :  { %v244_v16 = vmul.f32 %v428_v13, %v544_v12  ;;  %v252_v17 = vmul.f32 %v436_v15, %v544_v12 }
  0xd4   :  { %v172_v20 = vpop.f32.mrf.mxu0  ;;  %v204_v21 = vpop.f32.mrf.mxu1 }
  0xd5   :  { %v267_v22 = vadd.f32 %v549_v14, %v244_v16  ;;  %v275_v23 = vadd.f32 %v549_v14, %v252_v17  ;;  %v242_v24 = vmul.f32 %v544_v12, %v172_v20  ;;  %v250_v25 = vmul.f32 %v544_v12, %v204_v21 }
  0xd6   :  { %v429_v27 = vpop.f32.mrf.mxu0  ;;  %v437_v28 = vpop.f32.mrf.mxu1 }
  0xd7   :  { %v299_v29 = vadd.f32 %v283_v18, %v267_v22  ;;  %v307_v30 = vadd.f32 %v291_v19, %v275_v23  ;;  %v265_v31 = vadd.f32 %v549_v14, %v242_v24  ;;  %v273_v33 = vadd.f32 %v549_v14, %v250_v25  ;;  %v285_v24 = vld [vmem:[%s719_s4 + $0x20] sm:$0xff] }
  0xd8   :  { %v245_v35 = vmul.f32 %v429_v27, %v544_v12  ;;  %v253_v36 = vmul.f32 %v437_v28, %v544_v12  ;;  %v175_v37 = vpop.f32.mrf.mxu0  ;;  %v207_v38 = vpop.f32.mrf.mxu1  ;;  %v293_v27 = vld [vmem:[%s719_s4 + $0x60] sm:$0xff] }
  0xd9   :  { %vm316_vm1 = vcmp.gt.f32.partialorder %v299_v29, 0.0  ;;  %v333_v39 = vmul.f32 %v566_v26, %v299_v29  ;;  %vm324_vm2 = vcmp.gt.f32.partialorder %v307_v30, 0.0  ;;  %v341_v40 = vmul.f32 %v566_v26, %v307_v30 }
  0xda   :  { %v297_v41 = vadd.f32 %v281_v32, %v265_v31  ;;  %v305_v42 = vadd.f32 %v289_v34, %v273_v33  ;;  %v268_v43 = vadd.f32 %v549_v14, %v245_v35  ;;  %v276_v45 = vadd.f32 %v549_v14, %v253_v36  ;;  %v432_v47 = vpop.f32.mrf.mxu0  ;;  %v440_v48 = vpop.f32.mrf.mxu1 }
  0xdb   :  { %v349_v49 = vsel %vm316_vm1, %v299_v29, %v333_v39  ;;  %v357_v50 = vsel %vm324_vm2, %v307_v30, %v341_v40  ;;  %v243_v51 = vmul.f32 %v544_v12, %v175_v37  ;;  %v251_v52 = vmul.f32 %v544_v12, %v207_v38  ;;  %v288_v39 = vld [vmem:[%s719_s4 + $0x38] sm:$0xff] }
  0xdc   :  { %365 = vst.msk [vmem:[%s721_s6 + $0x10] sm:$0xff] %vm113_vm0, %v349_v49  ;;  %373 = vst.msk [vmem:[%s721_s6 + $0x50] sm:$0xff] %vm113_vm0, %v357_v50  ;;  %vm314_vm3 = vcmp.gt.f32.partialorder %v297_v41, 0.0  ;;  %v331_v53 = vmul.f32 %v566_v26, %v297_v41  ;;  %vm322_vm4 = vcmp.gt.f32.partialorder %v305_v42, 0.0  ;;  %v339_v54 = vmul.f32 %v566_v26, %v305_v42  ;;  %v188_v55 = vpop.f32.mrf.mxu0  ;;  %v220_v56 = vpop.f32.mrf.mxu1  ;;  %v286_v50 = vld [vmem:[%s719_s4 + $0x28] sm:$0xff] }
  0xdd   :  { %v300_v57 = vadd.f32 %v284_v44, %v268_v43  ;;  %v308_v58 = vadd.f32 %v292_v46, %v276_v45  ;;  %v266_v59 = vadd.f32 %v549_v14, %v243_v51  ;;  %v274_v61 = vadd.f32 %v549_v14, %v251_v52  ;;  %v294_v52 = vld [vmem:[%s719_s4 + $0x68] sm:$0xff] }
  0xde   :  { %v347_v63 = vsel %vm314_vm3, %v297_v41, %v331_v53  ;;  %v355_v0 = vsel %vm322_vm4, %v305_v42, %v339_v54  ;;  %v248_v1 = vmul.f32 %v432_v47, %v544_v12  ;;  %v256_v2 = vmul.f32 %v440_v48, %v544_v12  ;;  %v433_v11 = vpop.f32.mrf.mxu0  ;;  %v441_v13 = vpop.f32.mrf.mxu1  ;;  %v296_v41 = vld [vmem:[%s719_s4 + $0x78] sm:$0x3f] }
  0xdf   :  { %363 = vst.msk [vmem:[%s721_s6] sm:$0xff] %vm113_vm0, %v347_v63  ;;  %371 = vst.msk [vmem:[%s721_s6 + $0x40] sm:$0xff] %vm113_vm0, %v355_v0  ;;  %vm317_vm5 = vcmp.gt.f32.partialorder %v300_v57, 0.0  ;;  %v334_v3 = vmul.f32 %v566_v26, %v300_v57  ;;  %vm325_vm6 = vcmp.gt.f32.partialorder %v308_v58, 0.0  ;;  %v342_v4 = vmul.f32 %v566_v26, %v308_v58 }
  0xe0   :  { %v298_v5 = vadd.f32 %v282_v60, %v266_v59  ;;  %v306_v6 = vadd.f32 %v290_v62, %v274_v61  ;;  %v271_v7 = vadd.f32 %v549_v14, %v248_v1  ;;  %v279_v9 = vadd.f32 %v549_v14, %v256_v2  ;;  %v191_v32 = vpop.f32.mrf.mxu0  ;;  %v223_v33 = vpop.f32.mrf.mxu1 }
  0xe1   :  { %v350_v15 = vsel %vm317_vm5, %v300_v57, %v334_v3  ;;  %v358_v16 = vsel %vm325_vm6, %v308_v58, %v342_v4  ;;  %v246_v17 = vmul.f32 %v544_v12, %v188_v55  ;;  %v254_v18 = vmul.f32 %v544_v12, %v220_v56 }
  0xe2   :  { %366 = vst.msk [vmem:[%s721_s6 + $0x18] sm:$0xff] %vm113_vm0, %v350_v15  ;;  %374 = vst.msk [vmem:[%s721_s6 + $0x58] sm:$0xff] %vm113_vm0, %v358_v16  ;;  %vm315_vm7 = vcmp.gt.f32.partialorder %v298_v5, 0.0  ;;  %v332_v19 = vmul.f32 %v566_v26, %v298_v5  ;;  %vm323_vm8 = vcmp.gt.f32.partialorder %v306_v6, 0.0  ;;  %v340_v20 = vmul.f32 %v566_v26, %v306_v6 }
  0xe3   :  { %v303_v21 = vadd.f32 %v287_v8, %v271_v7  ;;  %v311_v22 = vadd.f32 %v295_v10, %v279_v9  ;;  %v269_v23 = vadd.f32 %v549_v14, %v246_v17  ;;  %v277_v25 = vadd.f32 %v549_v14, %v254_v18 }
  0xe4   :  { %v348_v28 = vsel %vm315_vm7, %v298_v5, %v332_v19  ;;  %v356_v29 = vsel %vm323_vm8, %v306_v6, %v340_v20  ;;  %v249_v30 = vmul.f32 %v433_v11, %v544_v12  ;;  %v257_v31 = vmul.f32 %v441_v13, %v544_v12 }
  0xe5   :  { %364 = vst.msk [vmem:[%s721_s6 + $0x8] sm:$0xff] %vm113_vm0, %v348_v28  ;;  %372 = vst.msk [vmem:[%s721_s6 + $0x48] sm:$0xff] %vm113_vm0, %v356_v29  ;;  %vm320_vm9 = vcmp.gt.f32.partialorder %v303_v21, 0.0  ;;  %v337_v34 = vmul.f32 %v566_v26, %v303_v21  ;;  %vm328_vm10 = vcmp.gt.f32.partialorder %v311_v22, 0.0  ;;  %v345_v35 = vmul.f32 %v566_v26, %v311_v22 }
  0xe6   :  { %v301_v36 = vadd.f32 %v285_v24, %v269_v23  ;;  %v309_v37 = vadd.f32 %v293_v27, %v277_v25  ;;  %v272_v38 = vadd.f32 %v549_v14, %v249_v30  ;;  %v280_v40 = vadd.f32 %v549_v14, %v257_v31 }
  0xe7   :  { %v353_v42 = vsel %vm320_vm9, %v303_v21, %v337_v34  ;;  %v361_v43 = vsel %vm328_vm10, %v311_v22, %v345_v35  ;;  %v247_v44 = vmul.f32 %v544_v12, %v191_v32  ;;  %v255_v45 = vmul.f32 %v544_v12, %v223_v33 }
  0xe8   :  { %369 = vst.msk [vmem:[%s721_s6 + $0x30] sm:$0xff] %vm113_vm0, %v353_v42  ;;  %377 = vst.msk [vmem:[%s721_s6 + $0x70] sm:$0xff] %vm113_vm0, %v361_v43  ;;  %vm318_vm11 = vcmp.gt.f32.partialorder %v301_v36, 0.0  ;;  %v335_v46 = vmul.f32 %v566_v26, %v301_v36  ;;  %vm326_vm12 = vcmp.gt.f32.partialorder %v309_v37, 0.0  ;;  %v343_v47 = vmul.f32 %v566_v26, %v309_v37 }
  0xe9   :  { %v304_v48 = vadd.f32 %v288_v39, %v272_v38  ;;  %v312_v49 = vadd.f32 %v296_v41, %v280_v40  ;;  %v270_v12 = vadd.f32 %v549_v14, %v247_v44  ;;  %v278_v51 = vadd.f32 %v549_v14, %v255_v45 }
  0xea   :  { %v351_v53 = vsel %vm318_vm11, %v301_v36, %v335_v46  ;;  %v359_v54 = vsel %vm326_vm12, %v309_v37, %v343_v47 }
  0xeb   :  { %367 = vst.msk [vmem:[%s721_s6 + $0x20] sm:$0xff] %vm113_vm0, %v351_v53  ;;  %375 = vst.msk [vmem:[%s721_s6 + $0x60] sm:$0xff] %vm113_vm0, %v359_v54  ;;  %vm321_vm14 = vcmp.gt.f32.partialorder %v304_v48, 0.0  ;;  %v338_v14 = vmul.f32 %v566_v26, %v304_v48  ;;  %vm329_vm15 = vcmp.gt.f32.partialorder %v312_v49, 0.0  ;;  %v346_v55 = vmul.f32 %v566_v26, %v312_v49 }
  0xec   :  { %v302_v56 = vadd.f32 %v286_v50, %v270_v12  ;;  %v310_v57 = vadd.f32 %v294_v52, %v278_v51 }
  0xed   :  { %v354_v58 = vsel %vm321_vm14, %v304_v48, %v338_v14  ;;  %v362_v59 = vsel %vm329_vm15, %v312_v49, %v346_v55 }
  0xee   :  { %370 = vst.msk [vmem:[%s721_s6 + $0x38] sm:$0xff] %vm113_vm0, %v354_v58  ;;  %vm319_vm1 = vcmp.gt.f32.partialorder %v302_v56, 0.0  ;;  %v336_v60 = vmul.f32 %v566_v26, %v302_v56  ;;  %vm327_vm2 = vcmp.gt.f32.partialorder %v310_v57, 0.0  ;;  %v344_v61 = vmul.f32 %v566_v26, %v310_v57 }
  0xef   :  { %379 = vst.msk [vmem:[%s721_s6 + $0x78] sm:$0x3f] %vm378_vm13, %v362_v59 }
  0xf0   :  { %v352_v62 = vsel %vm319_vm1, %v302_v56, %v336_v60  ;;  %v360_v63 = vsel %vm327_vm2, %v310_v57, %v344_v61 }
  0xf1   :  { %368 = vst.msk [vmem:[%s721_s6 + $0x28] sm:$0xff] %vm113_vm0, %v352_v62  ;;  %376 = vst.msk [vmem:[%s721_s6 + $0x68] sm:$0xff] %vm113_vm0, %v360_v63 }

// kernel: spex_plus_forward.59
= control target key start
LH: loop header
LB: loop body
LE: loop exit
PB: predicated region body
PF: predicated region fallthrough
CT: control target
= control target key end

     0   :  { %v254_v0 = vmov 0.0   ;;  %vm255_vm0 = vmmov 0   ;;  %vm75_vm1 = vcmask 523264   ;;  %s337_s1 = inlined_call_operand.vmem [shape: bf16[64,128], index: 1, kind: input, shape index: {}]   ;;  %s338_s0 = inlined_call_operand.vmem [shape: bf16[42,64], index: 0, kind: input, shape index: {}]   ;;  %s339_s2 = inlined_call_operand.vmem [shape: f32[1,128], index: 2, kind: input, shape index: {}]   ;;  %s340_s3 = inlined_call_operand.vmem [shape: f32[1,128], index: 3, kind: input, shape index: {}]   ;;  %s341_s4 = inlined_call_operand.<no memory space> [shape: f32[1], index: 4, kind: input, shape index: {}]   ;;  %s342_s5 = inlined_call_operand.vmem [shape: f32[42,128], index: 5, kind: output, shape index: {}]  }
   0x1   :  { %237 = vmatprep.subr.bf16.mxu1 %v254_v0  ;;  %v247_v1 = vld [vmem:[%s337_s1 + $0x18] sm:$0xff]   ;;  %217 = vmatprep.subr.bf16.mxu0 %v254_v0  ;;  %v248_v2 = vld [vmem:[%s337_s1 + $0x10] sm:$0xff]   ;;  %v249_v3 = vld [vmem:[%s337_s1 + $0x8] sm:$0xff]   ;;  %v175_v14 = vstv %s341_s4 }
   0x2   :  { %229 = vmatprep.mubr.msk.bf16.mxu1 %vm255_vm0, %v254_v0  ;;  %225 = vmatprep.mubr.msk.bf16.mxu0 %vm255_vm0, %v254_v0  ;;  %v250_v4 = vld [vmem:[%s337_s1] sm:$0xff]   ;;  %v251_v5 = vld [vmem:[%s338_s0 + $0x8] sm:$0xff]   ;;  %v253_v7 = vld [vmem:[%s338_s0 + $0x10] sm:$0x1f]  }
   0x3   :  { %241 = vmatpush3.bf16.msra.mxu1 %v247_v1  ;;  %218 = vmatpush3.bf16.msra.mxu0 %v247_v1  ;;  %v252_v6 = vld [vmem:[%s338_s0] sm:$0xff]  }
   0x4   :  { %238 = vmatprep.subr.bf16.mxu1 %v254_v0  ;;  %219 = vmatprep.subr.bf16.mxu0 %v254_v0  ;;  %v208_v8 = vld [vmem:[%s339_s2] ss:$0 sm:$0xff] }
   0x5   :  { %v209_v10 = vld [vmem:[%s340_s3] ss:$0 sm:$0xff] }
   0x7   :  { %242 = vmatpush3.bf16.msra.mxu1 %v248_v2  ;;  %220 = vmatpush3.bf16.msra.mxu0 %v248_v2 }
   0x8   :  { %239 = vmatprep.subr.bf16.mxu1 %v254_v0  ;;  %221 = vmatprep.subr.bf16.mxu0 %v254_v0 }
   0xb   :  { %243 = vmatpush3.bf16.msra.mxu1 %v249_v3  ;;  %222 = vmatpush3.bf16.msra.mxu0 %v249_v3 }
   0xc   :  { %240 = vmatprep.subr.bf16.mxu1 %v254_v0  ;;  %223 = vmatprep.subr.bf16.mxu0 %v254_v0 }
   0xf   :  { %244 = vmatpush3.bf16.msra.mxu1 %v250_v4  ;;  %224 = vmatpush3.bf16.msra.mxu0 %v250_v4 }
  0x12   :  { %230 = vmatmul.mubr.msk.bf16.vlgmr.msra.gmra.mxu1 %vm75_vm1, %v251_v5  ;;  %226 = vmatmul.mubr.msk.bf16.vlgmr.msra.gmra.mxu0 %vm75_vm1, %v252_v6 }
  0x13   :  { %233 = vmatprep.mubr.msk.bf16.mxu1 %vm255_vm0, %v254_v0 }
  0x1a   :  { %234 = vmatmul.mubr.msk.bf16.gmra.mxu1 %vm75_vm1, %v253_v7 }
  0xd2   :  { %v127_v9 = vpop.f32.mrf.mxu1  ;;  %v119_v11 = vpop.f32.mrf.mxu0 }
  0xd3   :  { %v151_v12 = vmul.f32 %v208_v8, %v127_v9  ;;  %v149_v13 = vmul.f32 %v208_v8, %v119_v11 }
  0xd4   :  { %v231_v15 = vpop.f32.mrf.mxu1  ;;  %v227_v16 = vpop.f32.mrf.mxu0 }
  0xd5   :  { %v164_v17 = vadd.f32 %v209_v10, %v151_v12  ;;  %v162_v18 = vadd.f32 %v209_v10, %v149_v13 }
  0xd6   :  { %v130_v19 = vpop.f32.mrf.mxu1  ;;  %v122_v20 = vpop.f32.mrf.mxu0 }
  0xd7   :  { %vm171_vm2 = vcmp.gt.f32.partialorder %v164_v17, 0.0  ;;  %v178_v21 = vmul.f32 %v175_v14, %v164_v17  ;;  %vm169_vm3 = vcmp.gt.f32.partialorder %v162_v18, 0.0  ;;  %v176_v22 = vmul.f32 %v175_v14, %v162_v18 }
  0xd8   :  { %v152_v23 = vmul.f32 %v208_v8, %v130_v19  ;;  %v150_v24 = vmul.f32 %v208_v8, %v122_v20  ;;  %v232_v25 = vpop.f32.mrf.mxu1  ;;  %v228_v26 = vpop.f32.mrf.mxu0 }
  0xd9   :  { %v184_v27 = vsel %vm171_vm2, %v164_v17, %v178_v21  ;;  %v182_v28 = vsel %vm169_vm3, %v162_v18, %v176_v22 }
  0xda   :  { %190 = vst [vmem:[%s342_s5 + $0x10] sm:$0xff] %v184_v27  ;;  %188 = vst [vmem:[%s342_s5] sm:$0xff] %v182_v28  ;;  %v165_v29 = vadd.f32 %v209_v10, %v152_v23  ;;  %v163_v30 = vadd.f32 %v209_v10, %v150_v24  ;;  %v135_v31 = vpop.f32.mrf.mxu1 }
  0xdb   :  { %v153_v32 = vmul.f32 %v208_v8, %v135_v31 }
  0xdc   :  { %vm172_vm4 = vcmp.gt.f32.partialorder %v165_v29, 0.0  ;;  %v179_v33 = vmul.f32 %v175_v14, %v165_v29  ;;  %vm170_vm5 = vcmp.gt.f32.partialorder %v163_v30, 0.0  ;;  %v177_v34 = vmul.f32 %v175_v14, %v163_v30  ;;  %v235_v35 = vpop.f32.mrf.mxu1 }
  0xdd   :  { %v166_v36 = vadd.f32 %v209_v10, %v153_v32 }
  0xde   :  { %v185_v37 = vsel %vm172_vm4, %v165_v29, %v179_v33  ;;  %v183_v38 = vsel %vm170_vm5, %v163_v30, %v177_v34  ;;  %v138_v39 = vpop.f32.mrf.mxu1 }
  0xdf   :  { %191 = vst [vmem:[%s342_s5 + $0x18] sm:$0xff] %v185_v37  ;;  %189 = vst [vmem:[%s342_s5 + $0x8] sm:$0xff] %v183_v38  ;;  %vm173_vm6 = vcmp.gt.f32.partialorder %v166_v36, 0.0  ;;  %v180_v40 = vmul.f32 %v175_v14, %v166_v36  ;;  %v154_v41 = vmul.f32 %v208_v8, %v138_v39 }
  0xe0   :  { %v236_v42 = vpop.f32.mrf.mxu1 }
  0xe1   :  { %v186_v43 = vsel %vm173_vm6, %v166_v36, %v180_v40  ;;  %v167_v44 = vadd.f32 %v209_v10, %v154_v41 }
  0xe2   :  { %192 = vst [vmem:[%s342_s5 + $0x20] sm:$0xff] %v186_v43 }
  0xe3   :  { %vm174_vm7 = vcmp.gt.f32.partialorder %v167_v44, 0.0  ;;  %v181_v45 = vmul.f32 %v175_v14, %v167_v44 }
  0xe5   :  { %v187_v46 = vsel %vm174_vm7, %v167_v44, %v181_v45 }
  0xe6   :  { %193 = vst [vmem:[%s342_s5 + $0x28] sm:$0x3] %v187_v46 }

// kernel: spex_plus_forward.60
= control target key start
LH: loop header
LB: loop body
LE: loop exit
PB: predicated region body
PF: predicated region fallthrough
CT: control target
= control target key end

     0   :  { %v196_v0 = vmov 0.0   ;;  %vm197_vm0 = vmmov 0   ;;  %vm65_vm1 = vcmask 523264   ;;  %s255_s1 = inlined_call_operand.vmem [shape: bf16[64,128], index: 1, kind: input, shape index: {}]   ;;  %s256_s0 = inlined_call_operand.vmem [shape: bf16[42,64], index: 0, kind: input, shape index: {}]   ;;  %s257_s2 = inlined_call_operand.vmem [shape: f32[42,128], index: 2, kind: output, shape index: {}]  }
   0x1   :  { %179 = vmatprep.subr.bf16.mxu1 %v196_v0  ;;  %v189_v1 = vld [vmem:[%s255_s1 + $0x18] sm:$0xff]   ;;  %159 = vmatprep.subr.bf16.mxu0 %v196_v0  ;;  %v190_v2 = vld [vmem:[%s255_s1 + $0x10] sm:$0xff]   ;;  %v191_v3 = vld [vmem:[%s255_s1 + $0x8] sm:$0xff]  }
   0x2   :  { %171 = vmatprep.mubr.msk.bf16.mxu1 %vm197_vm0, %v196_v0  ;;  %167 = vmatprep.mubr.msk.bf16.mxu0 %vm197_vm0, %v196_v0  ;;  %v192_v4 = vld [vmem:[%s255_s1] sm:$0xff]   ;;  %v193_v5 = vld [vmem:[%s256_s0 + $0x8] sm:$0xff]   ;;  %v195_v7 = vld [vmem:[%s256_s0 + $0x10] sm:$0x1f]  }
   0x3   :  { %183 = vmatpush3.bf16.msra.mxu1 %v189_v1  ;;  %160 = vmatpush3.bf16.msra.mxu0 %v189_v1  ;;  %v194_v6 = vld [vmem:[%s256_s0] sm:$0xff]  }
   0x4   :  { %180 = vmatprep.subr.bf16.mxu1 %v196_v0  ;;  %161 = vmatprep.subr.bf16.mxu0 %v196_v0 }
   0x7   :  { %184 = vmatpush3.bf16.msra.mxu1 %v190_v2  ;;  %162 = vmatpush3.bf16.msra.mxu0 %v190_v2 }
   0x8   :  { %181 = vmatprep.subr.bf16.mxu1 %v196_v0  ;;  %163 = vmatprep.subr.bf16.mxu0 %v196_v0 }
   0xb   :  { %185 = vmatpush3.bf16.msra.mxu1 %v191_v3  ;;  %164 = vmatpush3.bf16.msra.mxu0 %v191_v3 }
   0xc   :  { %182 = vmatprep.subr.bf16.mxu1 %v196_v0  ;;  %165 = vmatprep.subr.bf16.mxu0 %v196_v0 }
   0xf   :  { %186 = vmatpush3.bf16.msra.mxu1 %v192_v4  ;;  %166 = vmatpush3.bf16.msra.mxu0 %v192_v4 }
  0x12   :  { %172 = vmatmul.mubr.msk.bf16.vlgmr.msra.gmra.mxu1 %vm65_vm1, %v193_v5  ;;  %168 = vmatmul.mubr.msk.bf16.vlgmr.msra.gmra.mxu0 %vm65_vm1, %v194_v6 }
  0x13   :  { %175 = vmatprep.mubr.msk.bf16.mxu1 %vm197_vm0, %v196_v0 }
  0x1a   :  { %176 = vmatmul.mubr.msk.bf16.gmra.mxu1 %vm65_vm1, %v195_v7 }
  0xd2   :  { %v117_v8 = vpop.f32.mrf.mxu1  ;;  %v109_v9 = vpop.f32.mrf.mxu0 }
  0xd3   :  { %134 = vst [vmem:[%s257_s2 + $0x10] sm:$0xff] %v117_v8  ;;  %132 = vst [vmem:[%s257_s2] sm:$0xff] %v109_v9 }
  0xd4   :  { %v173_v10 = vpop.f32.mrf.mxu1  ;;  %v169_v11 = vpop.f32.mrf.mxu0 }
  0xd6   :  { %v120_v12 = vpop.f32.mrf.mxu1  ;;  %v112_v13 = vpop.f32.mrf.mxu0 }
  0xd7   :  { %135 = vst [vmem:[%s257_s2 + $0x18] sm:$0xff] %v120_v12  ;;  %133 = vst [vmem:[%s257_s2 + $0x8] sm:$0xff] %v112_v13 }
  0xd8   :  { %v174_v14 = vpop.f32.mrf.mxu1  ;;  %v170_v15 = vpop.f32.mrf.mxu0 }
  0xda   :  { %v125_v16 = vpop.f32.mrf.mxu1 }
  0xdb   :  { %136 = vst [vmem:[%s257_s2 + $0x20] sm:$0xff] %v125_v16 }
  0xdc   :  { %v177_v17 = vpop.f32.mrf.mxu1 }
  0xde   :  { %v128_v18 = vpop.f32.mrf.mxu1 }
  0xdf   :  { %137 = vst [vmem:[%s257_s2 + $0x28] sm:$0x3] %v128_v18 }
  0xe0   :  { %v178_v19 = vpop.f32.mrf.mxu1 }

// kernel: spex_plus_forward.61
= control target key start
LH: loop header
LB: loop body
LE: loop exit
PB: predicated region body
PF: predicated region fallthrough
CT: control target
= control target key end

     0   :  { %v319_v0 = vmov 0.0   ;;  %vm320_vm0 = vmmov 0   ;;  %s437_s1 = inlined_call_operand.vmem [shape: bf16[128,128], index: 1, kind: input, shape index: {}]   ;;  %s438_s0 = inlined_call_operand.vmem [shape: bf16[42,128], index: 0, kind: input, shape index: {}]   ;;  %s439_s2 = inlined_call_operand.vmem [shape: f32[1,128], index: 2, kind: input, shape index: {}]   ;;  %s440_s3 = inlined_call_operand.vmem [shape: f32[1,128], index: 3, kind: input, shape index: {}]   ;;  %s441_s4 = inlined_call_operand.vmem [shape: f32[42,128], index: 4, kind: input, shape index: {}]   ;;  %s442_s5 = inlined_call_operand.<no memory space> [shape: f32[1], index: 5, kind: input, shape index: {}]   ;;  %s443_s6 = inlined_call_operand.vmem [shape: f32[42,128], index: 6, kind: output, shape index: {}]  }
   0x1   :  { %290 = vmatprep.subr.bf16.mxu1 %v319_v0  ;;  %v308_v1 = vld [vmem:[%s437_s1 + $0x38] sm:$0xff]   ;;  %262 = vmatprep.subr.bf16.mxu0 %v319_v0  ;;  %v309_v2 = vld [vmem:[%s437_s1 + $0x30] sm:$0xff]   ;;  %v310_v3 = vld [vmem:[%s437_s1 + $0x28] sm:$0xff]   ;;  %v215_v24 = vstv %s442_s5 }
   0x2   :  { %282 = vmatprep.mubr.msk.bf16.mxu1 %vm320_vm0, %v319_v0  ;;  %278 = vmatprep.mubr.msk.bf16.mxu0 %vm320_vm0, %v319_v0  ;;  %v311_v4 = vld [vmem:[%s437_s1 + $0x20] sm:$0xff]   ;;  %v312_v5 = vld [vmem:[%s437_s1 + $0x18] sm:$0xff]   ;;  %v313_v6 = vld [vmem:[%s437_s1 + $0x10] sm:$0xff]  }
   0x3   :  { %298 = vmatpush3.bf16.msra.mxu1 %v308_v1  ;;  %263 = vmatpush3.bf16.msra.mxu0 %v308_v1  ;;  %v314_v7 = vld [vmem:[%s437_s1 + $0x8] sm:$0xff]   ;;  %v315_v8 = vld [vmem:[%s437_s1] sm:$0xff]   ;;  %v318_v11 = vld [vmem:[%s438_s0 + $0x10] sm:$0x1f]  }
   0x4   :  { %291 = vmatprep.subr.bf16.mxu1 %v319_v0  ;;  %264 = vmatprep.subr.bf16.mxu0 %v319_v0  ;;  %v316_v9 = vld [vmem:[%s438_s0 + $0x8] sm:$0xff]   ;;  %v317_v10 = vld [vmem:[%s438_s0] sm:$0xff]   ;;  %v198_v18 = vld [vmem:[%s441_s4 + $0x10] sm:$0xff] }
   0x5   :  { %v249_v12 = vld [vmem:[%s439_s2] ss:$0 sm:$0xff]  ;;  %v199_v35 = vld [vmem:[%s441_s4 + $0x18] sm:$0xff]  ;;  %v197_v36 = vld [vmem:[%s441_s4 + $0x8] sm:$0xff] }
   0x6   :  { %v250_v14 = vld [vmem:[%s440_s3] ss:$0 sm:$0xff]  ;;  %v201_v55 = vld [vmem:[%s441_s4 + $0x28] sm:$0x3] }
   0x7   :  { %299 = vmatpush3.bf16.msra.mxu1 %v309_v2  ;;  %265 = vmatpush3.bf16.msra.mxu0 %v309_v2  ;;  %v196_v19 = vld [vmem:[%s441_s4] sm:$0xff] }
   0x8   :  { %292 = vmatprep.subr.bf16.mxu1 %v319_v0  ;;  %266 = vmatprep.subr.bf16.mxu0 %v319_v0  ;;  %v200_v45 = vld [vmem:[%s441_s4 + $0x20] sm:$0xff] }
   0xb   :  { %300 = vmatpush3.bf16.msra.mxu1 %v310_v3  ;;  %267 = vmatpush3.bf16.msra.mxu0 %v310_v3 }
   0xc   :  { %293 = vmatprep.subr.bf16.mxu1 %v319_v0  ;;  %268 = vmatprep.subr.bf16.mxu0 %v319_v0 }
   0xf   :  { %301 = vmatpush3.bf16.msra.mxu1 %v311_v4  ;;  %269 = vmatpush3.bf16.msra.mxu0 %v311_v4 }
  0x10   :  { %294 = vmatprep.subr.bf16.mxu1 %v319_v0  ;;  %270 = vmatprep.subr.bf16.mxu0 %v319_v0 }
  0x13   :  { %302 = vmatpush3.bf16.msra.mxu1 %v312_v5  ;;  %271 = vmatpush3.bf16.msra.mxu0 %v312_v5 }
  0x14   :  { %295 = vmatprep.subr.bf16.mxu1 %v319_v0  ;;  %272 = vmatprep.subr.bf16.mxu0 %v319_v0 }
  0x17   :  { %303 = vmatpush3.bf16.msra.mxu1 %v313_v6  ;;  %273 = vmatpush3.bf16.msra.mxu0 %v313_v6 }
  0x18   :  { %296 = vmatprep.subr.bf16.mxu1 %v319_v0  ;;  %274 = vmatprep.subr.bf16.mxu0 %v319_v0 }
  0x1b   :  { %304 = vmatpush3.bf16.msra.mxu1 %v314_v7  ;;  %275 = vmatpush3.bf16.msra.mxu0 %v314_v7 }
  0x1c   :  { %297 = vmatprep.subr.bf16.mxu1 %v319_v0  ;;  %276 = vmatprep.subr.bf16.mxu0 %v319_v0 }
  0x1f   :  { %305 = vmatpush3.bf16.msra.mxu1 %v315_v8  ;;  %277 = vmatpush3.bf16.msra.mxu0 %v315_v8 }
  0x22   :  { %283 = vmatmul.mubr.bf16.vlgmr.msra.gmra.mxu1 %v316_v9  ;;  %279 = vmatmul.mubr.bf16.vlgmr.msra.gmra.mxu0 %v317_v10 }
  0x23   :  { %286 = vmatprep.mubr.msk.bf16.mxu1 %vm320_vm0, %v319_v0 }
  0x2a   :  { %287 = vmatmul.mubr.bf16.gmra.mxu1 %v318_v11 }
  0xe2   :  { %v155_v13 = vpop.f32.mrf.mxu1  ;;  %v147_v15 = vpop.f32.mrf.mxu0 }
  0xe3   :  { %v179_v16 = vmul.f32 %v249_v12, %v155_v13  ;;  %v177_v17 = vmul.f32 %v249_v12, %v147_v15 }
  0xe4   :  { %v284_v20 = vpop.f32.mrf.mxu1  ;;  %v280_v21 = vpop.f32.mrf.mxu0 }
  0xe5   :  { %v192_v22 = vadd.f32 %v250_v14, %v179_v16  ;;  %v190_v23 = vadd.f32 %v250_v14, %v177_v17 }
  0xe6   :  { %v158_v25 = vpop.f32.mrf.mxu1  ;;  %v150_v26 = vpop.f32.mrf.mxu0 }
  0xe7   :  { %v204_v27 = vadd.f32 %v198_v18, %v192_v22  ;;  %v202_v28 = vadd.f32 %v196_v19, %v190_v23  ;;  %v180_v29 = vmul.f32 %v249_v12, %v158_v25  ;;  %v178_v30 = vmul.f32 %v249_v12, %v150_v26 }
  0xe8   :  { %v285_v31 = vpop.f32.mrf.mxu1  ;;  %v281_v32 = vpop.f32.mrf.mxu0 }
  0xe9   :  { %vm211_vm1 = vcmp.gt.f32.partialorder %v204_v27, 0.0  ;;  %v218_v33 = vmul.f32 %v215_v24, %v204_v27  ;;  %vm209_vm2 = vcmp.gt.f32.partialorder %v202_v28, 0.0  ;;  %v216_v34 = vmul.f32 %v215_v24, %v202_v28 }
  0xea   :  { %v193_v37 = vadd.f32 %v250_v14, %v180_v29  ;;  %v191_v38 = vadd.f32 %v250_v14, %v178_v30  ;;  %v163_v39 = vpop.f32.mrf.mxu1 }
  0xeb   :  { %v224_v40 = vsel %vm211_vm1, %v204_v27, %v218_v33  ;;  %v222_v41 = vsel %vm209_vm2, %v202_v28, %v216_v34  ;;  %v181_v42 = vmul.f32 %v249_v12, %v163_v39 }
  0xec   :  { %230 = vst [vmem:[%s443_s6 + $0x10] sm:$0xff] %v224_v40  ;;  %228 = vst [vmem:[%s443_s6] sm:$0xff] %v222_v41  ;;  %v205_v43 = vadd.f32 %v199_v35, %v193_v37  ;;  %v203_v44 = vadd.f32 %v197_v36, %v191_v38  ;;  %v288_v46 = vpop.f32.mrf.mxu1 }
  0xed   :  { %v194_v47 = vadd.f32 %v250_v14, %v181_v42 }
  0xee   :  { %vm212_vm3 = vcmp.gt.f32.partialorder %v205_v43, 0.0  ;;  %v219_v48 = vmul.f32 %v215_v24, %v205_v43  ;;  %vm210_vm4 = vcmp.gt.f32.partialorder %v203_v44, 0.0  ;;  %v217_v49 = vmul.f32 %v215_v24, %v203_v44  ;;  %v166_v50 = vpop.f32.mrf.mxu1 }
  0xef   :  { %v206_v51 = vadd.f32 %v200_v45, %v194_v47  ;;  %v182_v52 = vmul.f32 %v249_v12, %v166_v50 }
  0xf0   :  { %v225_v53 = vsel %vm212_vm3, %v205_v43, %v219_v48  ;;  %v223_v54 = vsel %vm210_vm4, %v203_v44, %v217_v49  ;;  %v289_v56 = vpop.f32.mrf.mxu1 }
  0xf1   :  { %231 = vst [vmem:[%s443_s6 + $0x18] sm:$0xff] %v225_v53  ;;  %229 = vst [vmem:[%s443_s6 + $0x8] sm:$0xff] %v223_v54  ;;  %vm213_vm5 = vcmp.gt.f32.partialorder %v206_v51, 0.0  ;;  %v220_v57 = vmul.f32 %v215_v24, %v206_v51  ;;  %v195_v58 = vadd.f32 %v250_v14, %v182_v52 }
  0xf3   :  { %v226_v59 = vsel %vm213_vm5, %v206_v51, %v220_v57  ;;  %v207_v60 = vadd.f32 %v201_v55, %v195_v58 }
  0xf4   :  { %232 = vst [vmem:[%s443_s6 + $0x20] sm:$0xff] %v226_v59 }
  0xf5   :  { %vm214_vm6 = vcmp.gt.f32.partialorder %v207_v60, 0.0  ;;  %v221_v61 = vmul.f32 %v215_v24, %v207_v60 }
  0xf7   :  { %v227_v62 = vsel %vm214_vm6, %v207_v60, %v221_v61 }
  0xf8   :  { %233 = vst [vmem:[%s443_s6 + $0x28] sm:$0x3] %v227_v62 }

// kernel: spex_plus_forward.62
= control target key start
LH: loop header
LB: loop body
LE: loop exit
PB: predicated region body
PF: predicated region fallthrough
CT: control target
= control target key end

     0   :  { %v218_v0 = vmov 0.0   ;;  %vm219_vm0 = vmmov 0   ;;  %s292_s1 = inlined_call_operand.vmem [shape: bf16[128,128], index: 1, kind: input, shape index: {}]   ;;  %s293_s0 = inlined_call_operand.vmem [shape: bf16[14,128], index: 0, kind: input, shape index: {}]   ;;  %s294_s2 = inlined_call_operand.vmem [shape: f32[1,128], index: 2, kind: input, shape index: {}]   ;;  %s295_s3 = inlined_call_operand.vmem [shape: f32[1,128], index: 3, kind: input, shape index: {}]   ;;  %s296_s4 = inlined_call_operand.<no memory space> [shape: f32[1], index: 4, kind: input, shape index: {}]   ;;  %s297_s5 = inlined_call_operand.vmem [shape: f32[14,128], index: 5, kind: output, shape index: {}]  }
   0x1   :  { %187 = vmatprep.subr.bf16.mxu0 %v218_v0  ;;  %v209_v1 = vld [vmem:[%s292_s1 + $0x38] sm:$0xff]   ;;  %203 = vmatprep.mubr.msk.bf16.mxu0 %vm219_vm0, %v218_v0  ;;  %v210_v2 = vld [vmem:[%s292_s1 + $0x30] sm:$0xff]   ;;  %v211_v3 = vld [vmem:[%s292_s1 + $0x28] sm:$0xff]   ;;  %v156_v14 = vstv %s296_s4 }
   0x2   :  { %188 = vmatpush3.bf16.msra.mxu0 %v209_v1  ;;  %v212_v4 = vld [vmem:[%s292_s1 + $0x20] sm:$0xff]   ;;  %v213_v5 = vld [vmem:[%s292_s1 + $0x18] sm:$0xff]   ;;  %v214_v6 = vld [vmem:[%s292_s1 + $0x10] sm:$0xff]  }
   0x3   :  { %189 = vmatprep.subr.bf16.mxu0 %v218_v0  ;;  %v215_v7 = vld [vmem:[%s292_s1 + $0x8] sm:$0xff]   ;;  %v216_v8 = vld [vmem:[%s292_s1] sm:$0xff]  }
   0x4   :  { %v217_v9 = vld [vmem:[%s293_s0] sm:$0x7f]  }
   0x5   :  { %v176_v10 = vld [vmem:[%s294_s2] ss:$0 sm:$0xff] }
   0x6   :  { %190 = vmatpush3.bf16.msra.mxu0 %v210_v2  ;;  %v177_v12 = vld [vmem:[%s295_s3] ss:$0 sm:$0xff] }
   0x7   :  { %191 = vmatprep.subr.bf16.mxu0 %v218_v0 }
   0xa   :  { %192 = vmatpush3.bf16.msra.mxu0 %v211_v3 }
   0xb   :  { %193 = vmatprep.subr.bf16.mxu0 %v218_v0 }
   0xe   :  { %194 = vmatpush3.bf16.msra.mxu0 %v212_v4 }
   0xf   :  { %195 = vmatprep.subr.bf16.mxu0 %v218_v0 }
  0x12   :  { %196 = vmatpush3.bf16.msra.mxu0 %v213_v5 }
  0x13   :  { %197 = vmatprep.subr.bf16.mxu0 %v218_v0 }
  0x16   :  { %198 = vmatpush3.bf16.msra.mxu0 %v214_v6 }
  0x17   :  { %199 = vmatprep.subr.bf16.mxu0 %v218_v0 }
  0x1a   :  { %200 = vmatpush3.bf16.msra.mxu0 %v215_v7 }
  0x1b   :  { %201 = vmatprep.subr.bf16.mxu0 %v218_v0 }
  0x1e   :  { %202 = vmatpush3.bf16.msra.mxu0 %v216_v8 }
  0x21   :  { %204 = vmatmul.mubr.bf16.vlgmr.msra.gmra.mxu0 %v217_v9 }
  0xe1   :  { %v128_v11 = vpop.f32.mrf.mxu0 }
  0xe2   :  { %v142_v13 = vmul.f32 %v176_v10, %v128_v11 }
  0xe3   :  { %v205_v15 = vpop.f32.mrf.mxu0 }
  0xe4   :  { %v151_v16 = vadd.f32 %v177_v12, %v142_v13 }
  0xe5   :  { %v131_v17 = vpop.f32.mrf.mxu0 }
  0xe6   :  { %vm154_vm1 = vcmp.gt.f32.partialorder %v151_v16, 0.0  ;;  %v157_v18 = vmul.f32 %v156_v14, %v151_v16  ;;  %v143_v19 = vmul.f32 %v176_v10, %v131_v17 }
  0xe7   :  { %v206_v20 = vpop.f32.mrf.mxu0 }
  0xe8   :  { %v159_v21 = vsel %vm154_vm1, %v151_v16, %v157_v18  ;;  %v152_v22 = vadd.f32 %v177_v12, %v143_v19 }
  0xe9   :  { %161 = vst [vmem:[%s297_s5] sm:$0xff] %v159_v21 }
  0xea   :  { %vm155_vm2 = vcmp.gt.f32.partialorder %v152_v22, 0.0  ;;  %v158_v23 = vmul.f32 %v156_v14, %v152_v22 }
  0xec   :  { %v160_v24 = vsel %vm155_vm2, %v152_v22, %v158_v23 }
  0xed   :  { %162 = vst [vmem:[%s297_s5 + $0x8] sm:$0x3f] %v160_v24 }

// kernel: spex_plus_forward.63
= control target key start
LH: loop header
LB: loop body
LE: loop exit
PB: predicated region body
PF: predicated region fallthrough
CT: control target
= control target key end

     0   :  { %v225_v0 = vmov 0.0   ;;  %vm226_vm0 = vmmov 0   ;;  %s310_s1 = inlined_call_operand.vmem [shape: bf16[128,128], index: 1, kind: input, shape index: {}]   ;;  %s311_s0 = inlined_call_operand.vmem [shape: bf16[14,128], index: 0, kind: input, shape index: {}]   ;;  %s312_s2 = inlined_call_operand.vmem [shape: f32[1,128], index: 2, kind: input, shape index: {}]   ;;  %s313_s3 = inlined_call_operand.vmem [shape: f32[1,128], index: 3, kind: input, shape index: {}]   ;;  %s314_s4 = inlined_call_operand.vmem [shape: f32[14,128], index: 4, kind: input, shape index: {}]   ;;  %s315_s5 = inlined_call_operand.<no memory space> [shape: f32[1], index: 5, kind: input, shape index: {}]   ;;  %s316_s6 = inlined_call_operand.vmem [shape: f32[14,128], index: 6, kind: output, shape index: {}]  }
   0x1   :  { %194 = vmatprep.subr.bf16.mxu0 %v225_v0  ;;  %v216_v1 = vld [vmem:[%s310_s1 + $0x38] sm:$0xff]   ;;  %210 = vmatprep.mubr.msk.bf16.mxu0 %vm226_vm0, %v225_v0  ;;  %v217_v2 = vld [vmem:[%s310_s1 + $0x30] sm:$0xff]   ;;  %v218_v3 = vld [vmem:[%s310_s1 + $0x28] sm:$0xff]   ;;  %v163_v17 = vstv %s315_s5 }
   0x2   :  { %195 = vmatpush3.bf16.msra.mxu0 %v216_v1  ;;  %v219_v4 = vld [vmem:[%s310_s1 + $0x20] sm:$0xff]   ;;  %v220_v5 = vld [vmem:[%s310_s1 + $0x18] sm:$0xff]   ;;  %v221_v6 = vld [vmem:[%s310_s1 + $0x10] sm:$0xff]  }
   0x3   :  { %196 = vmatprep.subr.bf16.mxu0 %v225_v0  ;;  %v222_v7 = vld [vmem:[%s310_s1 + $0x8] sm:$0xff]   ;;  %v223_v8 = vld [vmem:[%s310_s1] sm:$0xff]  }
   0x4   :  { %v224_v9 = vld [vmem:[%s311_s0] sm:$0x7f]   ;;  %v157_v21 = vld [vmem:[%s314_s4 + $0x8] sm:$0x3f] }
   0x5   :  { %v183_v10 = vld [vmem:[%s312_s2] ss:$0 sm:$0xff] }
   0x6   :  { %197 = vmatpush3.bf16.msra.mxu0 %v217_v2  ;;  %v184_v12 = vld [vmem:[%s313_s3] ss:$0 sm:$0xff] }
   0x7   :  { %198 = vmatprep.subr.bf16.mxu0 %v225_v0  ;;  %v156_v14 = vld [vmem:[%s314_s4] sm:$0xff] }
   0xa   :  { %199 = vmatpush3.bf16.msra.mxu0 %v218_v3 }
   0xb   :  { %200 = vmatprep.subr.bf16.mxu0 %v225_v0 }
   0xe   :  { %201 = vmatpush3.bf16.msra.mxu0 %v219_v4 }
   0xf   :  { %202 = vmatprep.subr.bf16.mxu0 %v225_v0 }
  0x12   :  { %203 = vmatpush3.bf16.msra.mxu0 %v220_v5 }
  0x13   :  { %204 = vmatprep.subr.bf16.mxu0 %v225_v0 }
  0x16   :  { %205 = vmatpush3.bf16.msra.mxu0 %v221_v6 }
  0x17   :  { %206 = vmatprep.subr.bf16.mxu0 %v225_v0 }
  0x1a   :  { %207 = vmatpush3.bf16.msra.mxu0 %v222_v7 }
  0x1b   :  { %208 = vmatprep.subr.bf16.mxu0 %v225_v0 }
  0x1e   :  { %209 = vmatpush3.bf16.msra.mxu0 %v223_v8 }
  0x21   :  { %211 = vmatmul.mubr.bf16.vlgmr.msra.gmra.mxu0 %v224_v9 }
  0xe1   :  { %v131_v11 = vpop.f32.mrf.mxu0 }
  0xe2   :  { %v145_v13 = vmul.f32 %v183_v10, %v131_v11 }
  0xe3   :  { %v212_v15 = vpop.f32.mrf.mxu0 }
  0xe4   :  { %v154_v16 = vadd.f32 %v184_v12, %v145_v13 }
  0xe5   :  { %v134_v18 = vpop.f32.mrf.mxu0 }
  0xe6   :  { %v158_v19 = vadd.f32 %v156_v14, %v154_v16  ;;  %v146_v20 = vmul.f32 %v183_v10, %v134_v18 }
  0xe7   :  { %v213_v22 = vpop.f32.mrf.mxu0 }
  0xe8   :  { %vm161_vm1 = vcmp.gt.f32.partialorder %v158_v19, 0.0  ;;  %v164_v23 = vmul.f32 %v163_v17, %v158_v19  ;;  %v155_v24 = vadd.f32 %v184_v12, %v146_v20 }
  0xea   :  { %v166_v25 = vsel %vm161_vm1, %v158_v19, %v164_v23  ;;  %v159_v26 = vadd.f32 %v157_v21, %v155_v24 }
  0xeb   :  { %168 = vst [vmem:[%s316_s6] sm:$0xff] %v166_v25 }
  0xec   :  { %vm162_vm2 = vcmp.gt.f32.partialorder %v159_v26, 0.0  ;;  %v165_v27 = vmul.f32 %v163_v17, %v159_v26 }
  0xee   :  { %v167_v28 = vsel %vm162_vm2, %v159_v26, %v165_v27 }
  0xef   :  { %169 = vst [vmem:[%s316_s6 + $0x8] sm:$0x3f] %v167_v28 }

// kernel: spex_plus_forward.64
= control target key start
LH: loop header
LB: loop body
LE: loop exit
PB: predicated region body
PF: predicated region fallthrough
CT: control target
= control target key end

     0   :  { %v181_v0 = vmov 0.0   ;;  %vm182_vm0 = vmmov 0   ;;  %vm127_vm1 = vcmask 519168   ;;  %s236_s1 = inlined_call_operand.vmem [shape: bf16[128,64], index: 1, kind: input, shape index: {}]   ;;  %s237_s0 = inlined_call_operand.vmem [shape: bf16[4,128], index: 0, kind: input, shape index: {}]   ;;  %s238_s2 = inlined_call_operand.vmem [shape: f32[1,64], index: 2, kind: input, shape index: {}]   ;;  %s239_s3 = inlined_call_operand.vmem [shape: f32[4,64], index: 3, kind: output, shape index: {}]  }
   0x1   :  { %151 = vmatprep.subr.bf16.mxu0 %v181_v0  ;;  %v173_v1 = vld [vmem:[%s236_s1 + $0x38] sm:$0xff]   ;;  %167 = vmatprep.mubr.msk.bf16.mxu0 %vm182_vm0, %v181_v0  ;;  %v174_v2 = vld [vmem:[%s236_s1 + $0x30] sm:$0xff]   ;;  %v175_v3 = vld [vmem:[%s236_s1 + $0x28] sm:$0xff]  }
   0x2   :  { %152 = vmatpush3.bf16.msra.mxu0 %v173_v1  ;;  %v176_v4 = vld [vmem:[%s236_s1 + $0x20] sm:$0xff]   ;;  %v177_v5 = vld [vmem:[%s236_s1 + $0x18] sm:$0xff]   ;;  %v178_v6 = vld [vmem:[%s236_s1 + $0x10] sm:$0xff]  }
   0x3   :  { %153 = vmatprep.subr.bf16.mxu0 %v181_v0  ;;  %v179_v7 = vld [vmem:[%s236_s1 + $0x8] sm:$0xff]   ;;  %v180_v8 = vld [vmem:[%s236_s1] sm:$0xff]  }
   0x4   :  { %v15_v9 = vld [vmem:[%s237_s0] sm:$0x3] }
   0x5   :  { %v133_v10 = vld [vmem:[%s238_s2] ss:$0 sm:$0xff] }
   0x6   :  { %154 = vmatpush3.bf16.msra.mxu0 %v174_v2 }
   0x7   :  { %155 = vmatprep.subr.bf16.mxu0 %v181_v0 }
   0xa   :  { %156 = vmatpush3.bf16.msra.mxu0 %v175_v3 }
   0xb   :  { %157 = vmatprep.subr.bf16.mxu0 %v181_v0 }
   0xe   :  { %158 = vmatpush3.bf16.msra.mxu0 %v176_v4 }
   0xf   :  { %159 = vmatprep.subr.bf16.mxu0 %v181_v0 }
  0x12   :  { %160 = vmatpush3.bf16.msra.mxu0 %v177_v5 }
  0x13   :  { %161 = vmatprep.subr.bf16.mxu0 %v181_v0 }
  0x16   :  { %162 = vmatpush3.bf16.msra.mxu0 %v178_v6 }
  0x17   :  { %163 = vmatprep.subr.bf16.mxu0 %v181_v0 }
  0x1a   :  { %164 = vmatpush3.bf16.msra.mxu0 %v179_v7 }
  0x1b   :  { %165 = vmatprep.subr.bf16.mxu0 %v181_v0 }
  0x1e   :  { %166 = vmatpush3.bf16.msra.mxu0 %v180_v8 }
  0x21   :  { %168 = vmatmul.mubr.bf16.vlgmr.msra.gmra.mxu0 %v15_v9 }
  0xe1   :  { %v121_v11 = vpop.f32.mrf.mxu0 }
  0xe2   :  { %v122_v12 = vadd.f32 %v133_v10, %v121_v11 }
  0xe3   :  { %v169_v13 = vpop.f32.mrf.mxu0 }
  0xe4   :  { %128 = vst.msk [vmem:[%s239_s3] sm:$0xf] %vm127_vm1, %v122_v12 }
  0xe5   :  { %v124_v14 = vpop.f32.mrf.mxu0 }
  0xe7   :  { %v170_v15 = vpop.f32.mrf.mxu0 }

// kernel: spex_plus_forward.65
= control target key start
LH: loop header
LB: loop body
LE: loop exit
PB: predicated region body
PF: predicated region fallthrough
CT: control target
= control target key end

     0   :  { %s483_s1 = inlined_call_operand.vmem [shape: bf16[128,128], index: 1, kind: input, shape index: {}]   ;;  %s484_s0 = inlined_call_operand.vmem [shape: bf16[126,128], index: 0, kind: input, shape index: {}]   ;;  %s485_s2 = inlined_call_operand.vmem [shape: f32[1,128], index: 2, kind: input, shape index: {}]   ;;  %s486_s3 = inlined_call_operand.vmem [shape: f32[126,128], index: 3, kind: output, shape index: {}]  }
   0x1   :  { %v348_v0 = vld [vmem:[%s483_s1 + $0x38] sm:$0xff]   ;;  %v349_v1 = vld [vmem:[%s483_s1 + $0x30] sm:$0xff]   ;;  %v350_v2 = vld [vmem:[%s483_s1 + $0x28] sm:$0xff]  }
   0x2   :  { %300 = vmatprep.subr.bf16.mxu0 %v348_v0  ;;  %332 = vmatprep.subr.bf16.mxu1 %v348_v0  ;;  %v351_v3 = vld [vmem:[%s483_s1 + $0x20] sm:$0xff]   ;;  %v352_v6 = vld [vmem:[%s483_s1 + $0x18] sm:$0xff]   ;;  %v353_v7 = vld [vmem:[%s483_s1 + $0x10] sm:$0xff]  }
   0x3   :  { %301 = vmatpush3.bf16.msra.mxu0 %v348_v0  ;;  %340 = vmatpush3.bf16.msra.mxu1 %v348_v0  ;;  %v356_v4 = vld [vmem:[%s484_s0] sm:$0xff]   ;;  %v354_v8 = vld [vmem:[%s483_s1 + $0x8] sm:$0xff]   ;;  %v360_v12 = vld [vmem:[%s484_s0 + $0x10] sm:$0xff]  }
   0x4   :  { %302 = vmatprep.subr.bf16.mxu0 %v349_v1  ;;  %333 = vmatprep.subr.bf16.mxu1 %v349_v1  ;;  %v357_v5 = vld [vmem:[%s484_s0 + $0x20] sm:$0xff]   ;;  %v358_v10 = vld [vmem:[%s484_s0 + $0x8] sm:$0xff]   ;;  %v361_v13 = vld [vmem:[%s484_s0 + $0x30] sm:$0xff]  }
   0x5   :  { %316 = vmatprep.mubr.bf16.mxu0 %v356_v4  ;;  %324 = vmatprep.mubr.bf16.mxu1 %v357_v5  ;;  %v355_v9 = vld [vmem:[%s483_s1] sm:$0xff]   ;;  %v359_v11 = vld [vmem:[%s484_s0 + $0x28] sm:$0xff]   ;;  %v362_v14 = vld [vmem:[%s484_s0 + $0x18] sm:$0xff]  }
   0x6   :  { %v363_v15 = vld [vmem:[%s484_s0 + $0x38] sm:$0x7f]   ;;  %v267_v16 = vld [vmem:[%s485_s2] ss:$0 sm:$0xff] }
   0x7   :  { %303 = vmatpush3.bf16.msra.mxu0 %v349_v1  ;;  %341 = vmatpush3.bf16.msra.mxu1 %v349_v1 }
   0x8   :  { %304 = vmatprep.subr.bf16.mxu0 %v350_v2  ;;  %334 = vmatprep.subr.bf16.mxu1 %v350_v2 }
   0xb   :  { %305 = vmatpush3.bf16.msra.mxu0 %v350_v2  ;;  %342 = vmatpush3.bf16.msra.mxu1 %v350_v2 }
   0xc   :  { %306 = vmatprep.subr.bf16.mxu0 %v351_v3  ;;  %335 = vmatprep.subr.bf16.mxu1 %v351_v3 }
   0xf   :  { %307 = vmatpush3.bf16.msra.mxu0 %v351_v3  ;;  %343 = vmatpush3.bf16.msra.mxu1 %v351_v3 }
  0x10   :  { %308 = vmatprep.subr.bf16.mxu0 %v352_v6  ;;  %336 = vmatprep.subr.bf16.mxu1 %v352_v6 }
  0x13   :  { %309 = vmatpush3.bf16.msra.mxu0 %v352_v6  ;;  %344 = vmatpush3.bf16.msra.mxu1 %v352_v6 }
  0x14   :  { %310 = vmatprep.subr.bf16.mxu0 %v353_v7  ;;  %337 = vmatprep.subr.bf16.mxu1 %v353_v7 }
  0x17   :  { %311 = vmatpush3.bf16.msra.mxu0 %v353_v7  ;;  %345 = vmatpush3.bf16.msra.mxu1 %v353_v7 }
  0x18   :  { %312 = vmatprep.subr.bf16.mxu0 %v354_v8  ;;  %338 = vmatprep.subr.bf16.mxu1 %v354_v8 }
  0x1b   :  { %313 = vmatpush3.bf16.msra.mxu0 %v354_v8  ;;  %346 = vmatpush3.bf16.msra.mxu1 %v354_v8 }
  0x1c   :  { %314 = vmatprep.subr.bf16.mxu0 %v355_v9  ;;  %339 = vmatprep.subr.bf16.mxu1 %v355_v9 }
  0x1f   :  { %315 = vmatpush3.bf16.msra.mxu0 %v355_v9  ;;  %347 = vmatpush3.bf16.msra.mxu1 %v355_v9 }
  0x22   :  { %317 = vmatmul.mubr.bf16.vlgmr.msra.gmra.mxu0 %v358_v10  ;;  %325 = vmatmul.mubr.bf16.vlgmr.msra.gmra.mxu1 %v359_v11 }
  0x23   :  { %320 = vmatprep.mubr.bf16.mxu0 %v360_v12  ;;  %328 = vmatprep.mubr.bf16.mxu1 %v361_v13 }
  0x2a   :  { %321 = vmatmul.mubr.bf16.gmra.mxu0 %v362_v14  ;;  %329 = vmatmul.mubr.bf16.gmra.mxu1 %v363_v15 }
  0xe2   :  { %v318_v17 = vpop.f32.mrf.mxu0  ;;  %v326_v18 = vpop.f32.mrf.mxu1 }
  0xe3   :  { %v193_v19 = vadd.f32 %v318_v17, %v267_v16  ;;  %v225_v20 = vadd.f32 %v326_v18, %v267_v16 }
  0xe4   :  { %v184_v21 = vpop.f32.mrf.mxu0  ;;  %v216_v22 = vpop.f32.mrf.mxu1 }
  0xe5   :  { %249 = vst [vmem:[%s486_s3 + $0x10] sm:$0xff] %v193_v19  ;;  %257 = vst [vmem:[%s486_s3 + $0x50] sm:$0xff] %v225_v20  ;;  %v185_v23 = vadd.f32 %v267_v16, %v184_v21  ;;  %v217_v24 = vadd.f32 %v267_v16, %v216_v22 }
  0xe6   :  { %v319_v25 = vpop.f32.mrf.mxu0  ;;  %v327_v26 = vpop.f32.mrf.mxu1 }
  0xe7   :  { %247 = vst [vmem:[%s486_s3] sm:$0xff] %v185_v23  ;;  %255 = vst [vmem:[%s486_s3 + $0x40] sm:$0xff] %v217_v24  ;;  %v196_v27 = vadd.f32 %v319_v25, %v267_v16  ;;  %v228_v28 = vadd.f32 %v327_v26, %v267_v16 }
  0xe8   :  { %v187_v29 = vpop.f32.mrf.mxu0  ;;  %v219_v30 = vpop.f32.mrf.mxu1 }
  0xe9   :  { %250 = vst [vmem:[%s486_s3 + $0x18] sm:$0xff] %v196_v27  ;;  %258 = vst [vmem:[%s486_s3 + $0x58] sm:$0xff] %v228_v28  ;;  %v188_v31 = vadd.f32 %v267_v16, %v187_v29  ;;  %v220_v32 = vadd.f32 %v267_v16, %v219_v30 }
  0xea   :  { %v322_v33 = vpop.f32.mrf.mxu0  ;;  %v330_v34 = vpop.f32.mrf.mxu1 }
  0xeb   :  { %248 = vst [vmem:[%s486_s3 + $0x8] sm:$0xff] %v188_v31  ;;  %256 = vst [vmem:[%s486_s3 + $0x48] sm:$0xff] %v220_v32  ;;  %v209_v35 = vadd.f32 %v322_v33, %v267_v16  ;;  %v241_v36 = vadd.f32 %v330_v34, %v267_v16 }
  0xec   :  { %v200_v37 = vpop.f32.mrf.mxu0  ;;  %v232_v38 = vpop.f32.mrf.mxu1 }
  0xed   :  { %253 = vst [vmem:[%s486_s3 + $0x30] sm:$0xff] %v209_v35  ;;  %261 = vst [vmem:[%s486_s3 + $0x70] sm:$0xff] %v241_v36  ;;  %v201_v39 = vadd.f32 %v267_v16, %v200_v37  ;;  %v233_v40 = vadd.f32 %v267_v16, %v232_v38 }
  0xee   :  { %v323_v41 = vpop.f32.mrf.mxu0  ;;  %v331_v42 = vpop.f32.mrf.mxu1 }
  0xef   :  { %251 = vst [vmem:[%s486_s3 + $0x20] sm:$0xff] %v201_v39  ;;  %259 = vst [vmem:[%s486_s3 + $0x60] sm:$0xff] %v233_v40  ;;  %v212_v43 = vadd.f32 %v323_v41, %v267_v16  ;;  %v244_v44 = vadd.f32 %v331_v42, %v267_v16 }
  0xf0   :  { %v203_v45 = vpop.f32.mrf.mxu0  ;;  %v235_v46 = vpop.f32.mrf.mxu1 }
  0xf1   :  { %254 = vst [vmem:[%s486_s3 + $0x38] sm:$0xff] %v212_v43  ;;  %262 = vst [vmem:[%s486_s3 + $0x78] sm:$0x3f] %v244_v44  ;;  %v204_v47 = vadd.f32 %v267_v16, %v203_v45  ;;  %v236_v48 = vadd.f32 %v267_v16, %v235_v46 }
  0xf3   :  { %252 = vst [vmem:[%s486_s3 + $0x28] sm:$0xff] %v204_v47  ;;  %260 = vst [vmem:[%s486_s3 + $0x68] sm:$0xff] %v236_v48 }

// kernel: spex_plus_forward.66
= control target key start
LH: loop header
LB: loop body
LE: loop exit
PB: predicated region body
PF: predicated region fallthrough
CT: control target
= control target key end

     0   :  { %s462_s17 = smov 0   ;;  %s534_s0 = inlined_call_operand.vmem [shape: f32[2,63,128], index: 0, kind: input, shape index: {}]   ;;  %s535_s1 = inlined_call_operand.vmem [shape: f32[1,128], index: 1, kind: input, shape index: {}]   ;;  %s536_s2 = inlined_call_operand.vmem [shape: f32[1,128], index: 2, kind: input, shape index: {}]   ;;  %s537_s3 = inlined_call_operand.<no memory space> [shape: f32[1], index: 3, kind: input, shape index: {}]   ;;  %s538_s4 = inlined_call_operand.vmem [shape: f32[2,63,128], index: 4, kind: output, shape index: {}]  }
   0x1   :  { %9 = sst [smem:[#allocation2]] %s537_s3 }
   0x2 LB: > { %s395_s18 = sadd.s32 4294967295, %s432_s17   ;;  %p399_p0 = scmp.ge.s32.totalorder %s432_s17, 1  ;;  %s432_s17 = sphi %s462_s17, %s15_s17  }
   0x3   : > { %p163_p1 = scmp.lt.s32.totalorder %s432_s17, 3 }
   0x5   : > { %p164_p2 = pnand %p399_p0, %p163_p1 }
   0x6   : > { %p189_p3 = scmp.lt.s32.totalorder (!%p164_p2), %s395_s18, 1  ;;  %s207_s19 = sld [smem:[#allocation2]] (!%p164_p2) }
   0x7   : > { %167 = sbr.rel (%p164_p2) target bundleno = 317 (0x13d), region = 36 }
   0xc   : > { %s540_s18 = smov (!%p189_p3, %s395_s18), 1  ;;  %v216_v3 = vstv %s207_s19  ;;  %vm239_vm8 = vcmask 1046528  }
   0xd   : > { %s408_s3 = sshll.u32 %s540_s18, 6 }
   0xe   : > { %s193_s22 = scalar_lea.vmem %s534_s0, %s408_s3  ;;  %s198_s11 = scalar_lea.vmem %s538_s4, %s408_s3 }
   0xf   : > { %v199_v0 = vld [vmem:[%s193_s22] sm:$0xff]  ;;  %v200_v1 = vld [vmem:[%s193_s22 + $0x8] sm:$0xff]  ;;  %v201_v2 = vld [vmem:[%s193_s22 + $0x10] sm:$0xff] }
  0x10   : > { %v202_v4 = vld [vmem:[%s193_s22 + $0x18] sm:$0xff]  ;;  %v217_v5 = vmul.f32 %v216_v3, %v199_v0  ;;  %vm208_vm0 = vcmp.gt.f32.partialorder %v199_v0, 0.0  ;;  %vm209_vm1 = vcmp.gt.f32.partialorder %v200_v1, 0.0  ;;  %v218_v6 = vmul.f32 %v216_v3, %v200_v1  ;;  %v203_v7 = vld [vmem:[%s193_s22 + $0x20] sm:$0xff]  ;;  %v204_v10 = vld [vmem:[%s193_s22 + $0x28] sm:$0xff] }
  0x11   : > { %vm210_vm2 = vcmp.gt.f32.partialorder %v201_v2, 0.0  ;;  %v219_v8 = vmul.f32 %v216_v3, %v201_v2  ;;  %v220_v9 = vmul.f32 %v216_v3, %v202_v4  ;;  %vm211_vm3 = vcmp.gt.f32.partialorder %v202_v4, 0.0  ;;  %v206_v13 = vld [vmem:[%s193_s22 + $0x38] sm:$0x7f]  ;;  %v205_v16 = vld [vmem:[%s193_s22 + $0x30] sm:$0xff] }
  0x12   : > { %v478_v11 = vsel %vm208_vm0, %v199_v0, %v217_v5  ;;  %v480_v12 = vsel %vm209_vm1, %v200_v1, %v218_v6  ;;  %v221_v14 = vmul.f32 %v216_v3, %v203_v7  ;;  %vm212_vm4 = vcmp.gt.f32.partialorder %v203_v7, 0.0 }
  0x13   : > { %v482_v15 = vsel %vm210_vm2, %v201_v2, %v219_v8  ;;  %v233_v17 = vadd.f32 %v480_v12, %v478_v11  ;;  %v252_v18 = vmul.f32 %v478_v11, %v478_v11  ;;  %v253_v19 = vmul.f32 %v480_v12, %v480_v12 }
  0x14   : > { %vm213_vm5 = vcmp.gt.f32.partialorder %v204_v10, 0.0  ;;  %v222_v20 = vmul.f32 %v216_v3, %v204_v10  ;;  %v490_v21 = vsel %vm211_vm3, %v202_v4, %v220_v9  ;;  %v254_v22 = vmul.f32 %v482_v15, %v482_v15 }
  0x15   : > { %v224_v23 = vmul.f32 %v216_v3, %v206_v13  ;;  %v234_v24 = vadd.f32 %v233_v17, %v482_v15  ;;  %v255_v25 = vmul.f32 %v490_v21, %v490_v21  ;;  %v260_v26 = vadd.f32 %v253_v19, %v252_v18 }
  0x16   : > { %vm215_vm6 = vcmp.gt.f32.partialorder %v206_v13, 0.0  ;;  %v223_v27 = vmul.f32 %v216_v3, %v205_v16  ;;  %v497_v28 = vsel %vm212_vm4, %v203_v7, %v221_v14  ;;  %vm214_vm7 = vcmp.gt.f32.partialorder %v205_v16, 0.0  ;;  %v404_v7 = vld [vmem:[%s535_s1] ss:$0 sm:$0xff] }
  0x17   : > { %v235_v29 = vadd.f32 %v234_v24, %v490_v21  ;;  %v256_v30 = vmul.f32 %v497_v28, %v497_v28  ;;  %v261_v31 = vadd.f32 %v260_v26, %v254_v22  ;;  %v502_v32 = vsel %vm213_vm5, %v204_v10, %v222_v20  ;;  %v405_v20 = vld [vmem:[%s536_s2] ss:$0 sm:$0xff] }
  0x18   : > { %v504_v33 = vsel %vm215_vm6, %v206_v13, %v224_v23  ;;  %v257_v35 = vmul.f32 %v502_v32, %v502_v32  ;;  %v231_v37 = vsel %vm214_vm7, %v205_v16, %v223_v27 }
  0x19   : > { %v236_v34 = vadd.f32 %v235_v29, %v497_v28  ;;  %v262_v36 = vadd.f32 %v261_v31, %v255_v25  ;;  %v259_v38 = vmul.f32 %v504_v33, %v504_v33  ;;  %v258_v40 = vmul.f32 %v231_v37, %v231_v37 }
  0x1a   : > { %v240_v42 = vsel %vm239_vm8, %v504_v33, 0.0 }
  0x1b   : > { %v237_v39 = vadd.f32 %v236_v34, %v502_v32  ;;  %v263_v41 = vadd.f32 %v262_v36, %v256_v30  ;;  %v266_v45 = vsel %vm239_vm8, %v259_v38, 0.0 }
  0x1d   : > { %v238_v43 = vadd.f32 %v237_v39, %v231_v37  ;;  %v264_v44 = vadd.f32 %v263_v41, %v257_v35 }
  0x1f   : > { %v241_v46 = vadd.f32 %v240_v42, %v238_v43  ;;  %v265_v47 = vadd.f32 %v264_v44, %v258_v40 }
  0x21   : > { %242 = vadd.xlane.f32.xlu0 %v241_v46  ;;  %v267_v48 = vadd.f32 %v266_v45, %v265_v47 }
  0x25   : > { %268 = vadd.xlane.f32.xlu0 %v267_v48 }
  0xaa   : > { %v243_v49 = vpop.xlane.xlu0 %242 }
  0xab   : > { %v244_v50 = vrot.slane %v243_v49, 4 }
  0xad   : > { %v245_v51 = vadd.f32 %v244_v50, %v243_v49 }
  0xae   : > { %v269_v52 = vpop.xlane.xlu0 %268 }
  0xaf   : > { %v246_v53 = vrot.slane %v245_v51, 2  ;;  %v270_v54 = vrot.slane %v269_v52, 4 }
  0xb1   : > { %v271_v55 = vadd.f32 %v270_v54, %v269_v52  ;;  %v247_v56 = vadd.f32 %v246_v53, %v245_v51 }
  0xb3   : > { %v272_v57 = vrot.slane %v271_v55, 2  ;;  %v248_v58 = vrot.slane %v247_v56, 1 }
  0xb5   : > { %v273_v59 = vadd.f32 %v272_v57, %v271_v55  ;;  %v249_v60 = vadd.f32 %v248_v58, %v247_v56 }
  0xb7   : > { %410 = vpush %v249_v60  ;;  %v274_v61 = vrot.slane %v273_v59, 1 }
  0xb9   : > { %v275_v62 = vadd.f32 %v274_v61, %v273_v59 }
  0xbb   : > { %412 = vpush %v275_v62 }
  0xe8   : > { %s411_s23 = spop %410 }
  0xe9   : > { %s251_s24 = smul.f32 0.00012400794, %s411_s23 }
  0xeb   : > { %s278_s25 = smul.f32 %s251_s24, %s251_s24  ;;  %v285_v1 = vstv %s251_s24 }
  0xec   : > { %s413_s26 = spop %412  ;;  %v286_v2 = vsub.f32 %v478_v11, %v285_v1  ;;  %v287_v3 = vsub.f32 %v480_v12, %v285_v1  ;;  %v288_v4 = vsub.f32 %v482_v15, %v285_v1  ;;  %v289_v5 = vsub.f32 %v490_v21, %v285_v1 }
  0xed   : > { %s277_s27 = smul.f32 0.00012400794, %s413_s26  ;;  %v290_v6 = vsub.f32 %v497_v28, %v285_v1  ;;  %v291_v8 = vsub.f32 %v502_v32, %v285_v1  ;;  %v292_v9 = vsub.f32 %v231_v37, %v285_v1  ;;  %v293_v10 = vsub.f32 %v504_v33, %v285_v1 }
  0xee   : > { %v300_v13 = vmul.f32 %v404_v7, %v286_v2  ;;  %v301_v11 = vmul.f32 %v404_v7, %v287_v3  ;;  %v302_v12 = vmul.f32 %v404_v7, %v288_v4  ;;  %v303_v14 = vmul.f32 %v404_v7, %v289_v5 }
  0xef   : > { %s279_s28 = ssub.f32 %s277_s27, %s278_s25  ;;  %v304_v15 = vmul.f32 %v404_v7, %v290_v6  ;;  %v305_v16 = vmul.f32 %v404_v7, %v291_v8  ;;  %v306_v17 = vmul.f32 %v404_v7, %v292_v9  ;;  %v307_v18 = vmul.f32 %v404_v7, %v293_v10 }
  0xf1   : > { %s280_s29 = sadd.f32 1e-05, %s279_s28 }
  0xf3   : > { %v281_v63 = vstv %s280_s29 }
  0xf4   : > { %424 = vrsqrt.f32 %v281_v63 }
 0x101   : > { %v425_v0 = vpop.eup %424 }
 0x102   : > { %414 = vpush %v425_v0 }
 0x133   : > { %s415_s6 = spop %414 }
 0x134   : > { %v308_v19 = vstv %s415_s6 }
 0x135   : > { %v309_v21 = vmul.f32 %v308_v19, %v300_v13  ;;  %v310_v22 = vmul.f32 %v308_v19, %v301_v11  ;;  %v311_v23 = vmul.f32 %v308_v19, %v302_v12  ;;  %v312_v24 = vmul.f32 %v308_v19, %v303_v14 }
 0x136   : > { %v313_v25 = vmul.f32 %v308_v19, %v304_v15  ;;  %v314_v26 = vmul.f32 %v308_v19, %v305_v16  ;;  %v315_v27 = vmul.f32 %v308_v19, %v306_v17  ;;  %v316_v28 = vmul.f32 %v308_v19, %v307_v18 }
 0x137   : > { %v324_v29 = vadd.f32 %v405_v20, %v309_v21  ;;  %v325_v30 = vadd.f32 %v405_v20, %v310_v22  ;;  %v326_v31 = vadd.f32 %v405_v20, %v311_v23  ;;  %v327_v32 = vadd.f32 %v405_v20, %v312_v24 }
 0x138   : > { %v328_v33 = vadd.f32 %v405_v20, %v313_v25  ;;  %v329_v34 = vadd.f32 %v405_v20, %v314_v26  ;;  %v330_v35 = vadd.f32 %v405_v20, %v315_v27  ;;  %v331_v36 = vadd.f32 %v405_v20, %v316_v28 }
 0x139   : > { %332 = vst [vmem:[%s198_s11] sm:$0xff] %v324_v29  ;;  %333 = vst [vmem:[%s198_s11 + $0x8] sm:$0xff] %v325_v30 }
 0x13a   : > { %334 = vst [vmem:[%s198_s11 + $0x10] sm:$0xff] %v326_v31  ;;  %335 = vst [vmem:[%s198_s11 + $0x18] sm:$0xff] %v327_v32 }
 0x13b   : > { %336 = vst [vmem:[%s198_s11 + $0x20] sm:$0xff] %v328_v33  ;;  %337 = vst [vmem:[%s198_s11 + $0x28] sm:$0xff] %v329_v34 }
 0x13c   : > { %338 = vst [vmem:[%s198_s11 + $0x30] sm:$0xff] %v330_v35  ;;  %339 = vst [vmem:[%s198_s11 + $0x38] sm:$0x7f] %v331_v36 }
 0x13d PF: > { %s15_s17 = sadd.s32 1, %s432_s17  }
 0x13e   : > { %p12_p4 = scmp.ge.s32.totalorder %s15_s17, 4  }
 0x140   :  { %14 = sbr.rel (!%p12_p4) target bundleno = 2 (0x2), region = 66 }

// kernel: spex_plus_forward.67
= control target key start
LH: loop header
LB: loop body
LE: loop exit
PB: predicated region body
PF: predicated region fallthrough
CT: control target
= control target key end

     0   :  { %s667_s23 = smov 0   ;;  %s776_s0 = inlined_call_operand.vmem [shape: f32[2,65,128], index: 0, kind: input, shape index: {}]   ;;  %s777_s1 = inlined_call_operand.vmem [shape: f32[3,128], index: 1, kind: input, shape index: {}]   ;;  %s778_s2 = inlined_call_operand.vmem [shape: f32[1,128], index: 2, kind: input, shape index: {}]   ;;  %s779_s3 = inlined_call_operand.<no memory space> [shape: f32[1], index: 3, kind: input, shape index: {}]   ;;  %s780_s4 = inlined_call_operand.vmem [shape: f32[1,128], index: 4, kind: input, shape index: {}]   ;;  %s781_s5 = inlined_call_operand.vmem [shape: f32[1,128], index: 5, kind: input, shape index: {}]   ;;  %s782_s6 = inlined_call_operand.vmem [shape: f32[2,63,128], index: 6, kind: output, shape index: {}]  }
   0x1   :  { %11 = sst [smem:[#allocation2]] %s779_s3 }
   0x2 LB: > { %s587_s24 = sadd.s32 4294967295, %s627_s23   ;;  %p591_p0 = scmp.ge.s32.totalorder %s627_s23, 1  ;;  %s627_s23 = sphi %s667_s23, %s17_s23  }
   0x3   : > { %p213_p1 = scmp.lt.s32.totalorder %s627_s23, 3 }
   0x5   : > { %p214_p2 = pnand %p591_p0, %p213_p1 }
   0x6   : > { %p243_p3 = scmp.lt.s32.totalorder (!%p214_p2), %s587_s24, 1  ;;  %s400_s10 = sld [smem:[#allocation2]] (!%p214_p2) }
   0x7   : > { %217 = sbr.rel (%p214_p2) target bundleno = 339 (0x153), region = 44 }
   0xc   : > { %s784_s24 = smov (!%p243_p3, %s587_s24), 1  ;;  %v596_v0 = vld [vmem:[%s777_s1 + $0x1] ss:$0 sm:$0xff]  ;;  %v595_v1 = vld [vmem:[%s777_s1] ss:$0 sm:$0xff]  ;;  %vm296_vm0 = vcmask 1046528  }
   0xd   : > { %s604_s3 = smul.u32 72, %s784_s24  ;;  %vm351_vm1 = vcmask 1045504   ;;  %v597_v31 = vld [vmem:[%s777_s1 + $0x2] ss:$0 sm:$0xff]  ;;  %s603_s22 = sshll.u32 %s784_s24, 6 }
   0xe   : > { %s252_s24 = scalar_lea.vmem %s782_s6, %s603_s22 }
   0xf   : > { %s684_s29 = scalar_lea.vmem %s776_s0, %s604_s3 }
  0x10   : > { %v253_v2 = vld [vmem:[%s684_s29] sm:$0xff]  ;;  %v254_v3 = vld [vmem:[%s684_s29 + $0x8] sm:$0xff]  ;;  %v255_v4 = vld [vmem:[%s684_s29 + $0x10] sm:$0xff] }
  0x11   : > { %v256_v5 = vld [vmem:[%s684_s29 + $0x18] sm:$0xff]  ;;  %v257_v6 = vld [vmem:[%s684_s29 + $0x20] sm:$0xff]  ;;  %v258_v7 = vld [vmem:[%s684_s29 + $0x28] sm:$0xff]  ;;  %v280_v8 = vmul.f32 %v596_v0, %v253_v2  ;;  %v267_v11 = vmul.f32 %v595_v1, %v253_v2  ;;  %v268_v12 = vmul.f32 %v595_v1, %v254_v3  ;;  %v269_v13 = vmul.f32 %v595_v1, %v255_v4 }
  0x12   : > { %v259_v9 = vld [vmem:[%s684_s29 + $0x30] sm:$0xff]  ;;  %v260_v10 = vld [vmem:[%s684_s29 + $0x38] sm:$0xff]  ;;  %v281_v14 = vmul.f32 %v596_v0, %v254_v3  ;;  %v270_v15 = vmul.f32 %v595_v1, %v256_v5  ;;  %v271_v16 = vmul.f32 %v595_v1, %v257_v6  ;;  %v282_v17 = vmul.f32 %v596_v0, %v255_v4  ;;  %v261_v40 = vld [vmem:[%s684_s29 + $0x40] sm:$0x1] }
  0x13   : > { %v283_v18 = vmul.f32 %v596_v0, %v256_v5  ;;  %v284_v19 = vmul.f32 %v596_v0, %v257_v6  ;;  %v285_v20 = vmul.f32 %v596_v0, %v258_v7  ;;  %v286_v21 = vmul.f32 %v596_v0, %v259_v9 }
  0x14   : > { %v287_v22 = vmul.f32 %v596_v0, %v260_v10  ;;  %v297_v23 = vrot.slane %v280_v8, 1  ;;  %v298_v24 = vrot.slane %v281_v14, 1  ;;  %v300_v25 = vrot.slane %v282_v17, 1  ;;  %v598_v8 = vld [vmem:[%s778_s2] ss:$0 sm:$0xff] }
  0x15   : > { %v302_v26 = vrot.slane %v283_v18, 1  ;;  %v304_v27 = vrot.slane %v284_v19, 1  ;;  %v306_v28 = vrot.slane %v285_v20, 1  ;;  %v308_v29 = vrot.slane %v286_v21, 1 }
  0x16   : > { %v310_v30 = vrot.slane %v287_v22, 1  ;;  %v272_v32 = vmul.f32 %v595_v1, %v258_v7  ;;  %v299_v33 = vsel %vm296_vm0, %v297_v23, %v298_v24  ;;  %v301_v34 = vsel %vm296_vm0, %v298_v24, %v300_v25 }
  0x17   : > { %v303_v35 = vsel %vm296_vm0, %v300_v25, %v302_v26  ;;  %v273_v36 = vmul.f32 %v595_v1, %v259_v9  ;;  %v274_v37 = vmul.f32 %v595_v1, %v260_v10  ;;  %v305_v38 = vsel %vm296_vm0, %v302_v26, %v304_v27 }
  0x18   : > { %v307_v39 = vsel %vm296_vm0, %v304_v27, %v306_v28  ;;  %v309_v41 = vsel %vm296_vm0, %v306_v28, %v308_v29  ;;  %v311_v42 = vsel %vm296_vm0, %v308_v29, %v310_v30  ;;  %v320_v43 = vadd.f32 %v299_v33, %v267_v11 }
  0x19   : > { %v333_v44 = vmul.f32 %v597_v31, %v253_v2  ;;  %v321_v45 = vadd.f32 %v301_v34, %v268_v12  ;;  %v322_v46 = vadd.f32 %v303_v35, %v269_v13  ;;  %v323_v47 = vadd.f32 %v305_v38, %v270_v15 }
  0x1a   : > { %v324_v48 = vadd.f32 %v307_v39, %v271_v16  ;;  %v334_v49 = vmul.f32 %v597_v31, %v254_v3  ;;  %v335_v50 = vmul.f32 %v597_v31, %v255_v4  ;;  %v336_v51 = vmul.f32 %v597_v31, %v256_v5 }
  0x1b   : > { %v337_v52 = vmul.f32 %v597_v31, %v257_v6  ;;  %v338_v53 = vmul.f32 %v597_v31, %v258_v7  ;;  %v339_v54 = vmul.f32 %v597_v31, %v259_v9  ;;  %v340_v55 = vmul.f32 %v597_v31, %v260_v10 }
  0x1c   : > { %v341_v56 = vmul.f32 %v597_v31, %v261_v40  ;;  %v352_v57 = vrot.slane %v333_v44, 2  ;;  %v353_v58 = vrot.slane %v334_v49, 2  ;;  %v355_v59 = vrot.slane %v335_v50, 2 }
  0x1d   : > { %v357_v60 = vrot.slane %v336_v51, 2  ;;  %v359_v61 = vrot.slane %v337_v52, 2  ;;  %v361_v62 = vrot.slane %v338_v53, 2  ;;  %v363_v63 = vrot.slane %v339_v54, 2 }
  0x1e   : > { %v365_v0 = vrot.slane %v340_v55, 2  ;;  %v354_v1 = vsel %vm351_vm1, %v352_v57, %v353_v58  ;;  %v356_v2 = vsel %vm351_vm1, %v353_v58, %v355_v59  ;;  %v367_v4 = vrot.slane %v341_v56, 2 }
  0x1f   : > { %v358_v3 = vsel %vm351_vm1, %v355_v59, %v357_v60  ;;  %v325_v5 = vadd.f32 %v309_v41, %v272_v32  ;;  %v360_v6 = vsel %vm351_vm1, %v357_v60, %v359_v61  ;;  %v362_v7 = vsel %vm351_vm1, %v359_v61, %v361_v62 }
  0x20   : > { %v326_v9 = vadd.f32 %v311_v42, %v273_v36  ;;  %v377_v10 = vadd.f32 %v354_v1, %v320_v43  ;;  %v378_v11 = vadd.f32 %v356_v2, %v321_v45  ;;  %v379_v12 = vadd.f32 %v358_v3, %v322_v46 }
  0x21   : > { %v327_v13 = vadd.f32 %v310_v30, %v274_v37  ;;  %v364_v14 = vsel %vm351_vm1, %v361_v62, %v363_v63  ;;  %v366_v15 = vsel %vm351_vm1, %v363_v63, %v365_v0  ;;  %v380_v16 = vadd.f32 %v360_v6, %v323_v47 }
  0x22   : > { %v368_v17 = vsel %vm351_vm1, %v365_v0, %v367_v4  ;;  %v381_v18 = vadd.f32 %v362_v7, %v324_v48  ;;  %v392_v19 = vadd.f32 %v598_v8, %v377_v10  ;;  %v393_v20 = vadd.f32 %v598_v8, %v378_v11 }
  0x23   : > { %v394_v21 = vadd.f32 %v598_v8, %v379_v12  ;;  %v382_v22 = vadd.f32 %v364_v14, %v325_v5  ;;  %v395_v23 = vadd.f32 %v598_v8, %v380_v16  ;;  %v383_v24 = vadd.f32 %v366_v15, %v326_v9 }
  0x24   : > { %v384_v25 = vadd.f32 %v368_v17, %v327_v13  ;;  %v396_v26 = vadd.f32 %v598_v8, %v381_v18  ;;  %vm401_vm2 = vcmp.gt.f32.partialorder %v392_v19, 0.0  ;;  %vm402_vm3 = vcmp.gt.f32.partialorder %v393_v20, 0.0 }
  0x25   : > { %v409_v27 = vstv %s400_s10  ;;  %vm403_vm4 = vcmp.gt.f32.partialorder %v394_v21, 0.0  ;;  %v397_v31 = vadd.f32 %v598_v8, %v382_v22  ;;  %vm404_vm5 = vcmp.gt.f32.partialorder %v395_v23, 0.0 }
  0x26   : > { %v410_v28 = vmul.f32 %v409_v27, %v392_v19  ;;  %v411_v29 = vmul.f32 %v409_v27, %v393_v20  ;;  %v412_v30 = vmul.f32 %v409_v27, %v394_v21  ;;  %v413_v32 = vmul.f32 %v409_v27, %v395_v23 }
  0x27   : > { %v399_v33 = vadd.f32 %v598_v8, %v384_v25  ;;  %v398_v36 = vadd.f32 %v598_v8, %v383_v24  ;;  %v414_v37 = vmul.f32 %v409_v27, %v396_v26  ;;  %vm405_vm6 = vcmp.gt.f32.partialorder %v396_v26, 0.0 }
  0x28   : > { %v719_v34 = vsel %vm401_vm2, %v392_v19, %v410_v28  ;;  %v721_v35 = vsel %vm402_vm3, %v393_v20, %v411_v29  ;;  %v723_v38 = vsel %vm403_vm4, %v394_v21, %v412_v30  ;;  %vm406_vm7 = vcmp.gt.f32.partialorder %v397_v31, 0.0  ;;  %v599_v29 = vld [vmem:[%s780_s4] ss:$0 sm:$0xff] }
  0x29   : > { %v426_v39 = vadd.f32 %v721_v35, %v719_v34  ;;  %v444_v40 = vmul.f32 %v719_v34, %v719_v34  ;;  %v445_v41 = vmul.f32 %v721_v35, %v721_v35  ;;  %v415_v42 = vmul.f32 %v409_v27, %v397_v31 }
  0x2a   : > { %v731_v43 = vsel %vm404_vm5, %v395_v23, %v413_v32  ;;  %v446_v44 = vmul.f32 %v723_v38, %v723_v38  ;;  %v417_v45 = vmul.f32 %v409_v27, %v399_v33  ;;  %vm408_vm8 = vcmp.gt.f32.partialorder %v399_v33, 0.0 }
  0x2b   : > { %v427_v46 = vadd.f32 %v426_v39, %v723_v38  ;;  %v447_v47 = vmul.f32 %v731_v43, %v731_v43  ;;  %v452_v48 = vadd.f32 %v445_v41, %v444_v40  ;;  %v416_v49 = vmul.f32 %v409_v27, %v398_v36 }
  0x2c   : > { %v738_v50 = vsel %vm405_vm6, %v396_v26, %v414_v37  ;;  %vm407_vm9 = vcmp.gt.f32.partialorder %v398_v36, 0.0  ;;  %v743_v54 = vsel %vm406_vm7, %v397_v31, %v415_v42  ;;  %v745_v55 = vsel %vm408_vm8, %v399_v33, %v417_v45  ;;  %v600_v42 = vld [vmem:[%s781_s5] ss:$0 sm:$0xff] }
  0x2d   : > { %v428_v51 = vadd.f32 %v427_v46, %v731_v43  ;;  %v448_v52 = vmul.f32 %v738_v50, %v738_v50  ;;  %v453_v53 = vadd.f32 %v452_v48, %v446_v44  ;;  %v449_v57 = vmul.f32 %v743_v54, %v743_v54 }
  0x2e   : > { %v424_v59 = vsel %vm407_vm9, %v398_v36, %v416_v49  ;;  %v451_v60 = vmul.f32 %v745_v55, %v745_v55  ;;  %v432_v0 = vsel %vm296_vm0, %v745_v55, 0.0 }
  0x2f   : > { %v429_v56 = vadd.f32 %v428_v51, %v738_v50  ;;  %v454_v58 = vadd.f32 %v453_v53, %v447_v47  ;;  %v450_v62 = vmul.f32 %v424_v59, %v424_v59 }
  0x30   : > { %v458_v3 = vsel %vm296_vm0, %v451_v60, 0.0 }
  0x31   : > { %v430_v61 = vadd.f32 %v429_v56, %v743_v54  ;;  %v455_v63 = vadd.f32 %v454_v58, %v448_v52 }
  0x33   : > { %v431_v1 = vadd.f32 %v430_v61, %v424_v59  ;;  %v456_v2 = vadd.f32 %v455_v63, %v449_v57 }
  0x35   : > { %v433_v4 = vadd.f32 %v432_v0, %v431_v1  ;;  %v457_v5 = vadd.f32 %v456_v2, %v450_v62 }
  0x37   : > { %434 = vadd.xlane.f32.xlu0 %v433_v4  ;;  %v459_v6 = vadd.f32 %v458_v3, %v457_v5 }
  0x3b   : > { %460 = vadd.xlane.f32.xlu0 %v459_v6 }
  0xc0   : > { %v435_v7 = vpop.xlane.xlu0 %434 }
  0xc1   : > { %v436_v8 = vrot.slane %v435_v7, 4 }
  0xc3   : > { %v437_v9 = vadd.f32 %v436_v8, %v435_v7 }
  0xc4   : > { %v461_v10 = vpop.xlane.xlu0 %460 }
  0xc5   : > { %v438_v11 = vrot.slane %v437_v9, 2  ;;  %v462_v12 = vrot.slane %v461_v10, 4 }
  0xc7   : > { %v463_v13 = vadd.f32 %v462_v12, %v461_v10  ;;  %v439_v14 = vadd.f32 %v438_v11, %v437_v9 }
  0xc9   : > { %v464_v15 = vrot.slane %v463_v13, 2  ;;  %v440_v16 = vrot.slane %v439_v14, 1 }
  0xcb   : > { %v465_v17 = vadd.f32 %v464_v15, %v463_v13  ;;  %v441_v18 = vadd.f32 %v440_v16, %v439_v14 }
  0xcd   : > { %605 = vpush %v441_v18  ;;  %v466_v19 = vrot.slane %v465_v17, 1 }
  0xcf   : > { %v467_v20 = vadd.f32 %v466_v19, %v465_v17 }
  0xd1   : > { %607 = vpush %v467_v20 }
  0xfe   : > { %s606_s13 = spop %605 }
  0xff   : > { %s443_s14 = smul.f32 0.00012400794, %s606_s13 }
 0x101   : > { %s470_s15 = smul.f32 %s443_s14, %s443_s14  ;;  %v477_v23 = vstv %s443_s14 }
 0x102   : > { %s608_s16 = spop %607  ;;  %v478_v24 = vsub.f32 %v719_v34, %v477_v23  ;;  %v479_v25 = vsub.f32 %v721_v35, %v477_v23  ;;  %v480_v26 = vsub.f32 %v723_v38, %v477_v23  ;;  %v481_v27 = vsub.f32 %v731_v43, %v477_v23 }
 0x103   : > { %s469_s17 = smul.f32 0.00012400794, %s608_s16  ;;  %v482_v28 = vsub.f32 %v738_v50, %v477_v23  ;;  %v483_v30 = vsub.f32 %v743_v54, %v477_v23  ;;  %v484_v31 = vsub.f32 %v424_v59, %v477_v23  ;;  %v485_v32 = vsub.f32 %v745_v55, %v477_v23 }
 0x104   : > { %v492_v33 = vmul.f32 %v599_v29, %v478_v24  ;;  %v493_v34 = vmul.f32 %v599_v29, %v479_v25  ;;  %v494_v35 = vmul.f32 %v599_v29, %v480_v26  ;;  %v495_v36 = vmul.f32 %v599_v29, %v481_v27 }
 0x105   : > { %s471_s18 = ssub.f32 %s469_s17, %s470_s15  ;;  %v496_v37 = vmul.f32 %v599_v29, %v482_v28  ;;  %v497_v38 = vmul.f32 %v599_v29, %v483_v30  ;;  %v498_v39 = vmul.f32 %v599_v29, %v484_v31  ;;  %v499_v40 = vmul.f32 %v599_v29, %v485_v32 }
 0x107   : > { %s472_s19 = sadd.f32 1e-05, %s471_s18 }
 0x109   : > { %v473_v21 = vstv %s472_s19 }
 0x10a   : > { %619 = vrsqrt.f32 %v473_v21 }
 0x117   : > { %v620_v22 = vpop.eup %619 }
 0x118   : > { %609 = vpush %v620_v22 }
 0x149   : > { %s610_s3 = spop %609 }
 0x14a   : > { %v500_v41 = vstv %s610_s3 }
 0x14b   : > { %v501_v43 = vmul.f32 %v500_v41, %v492_v33  ;;  %v502_v44 = vmul.f32 %v500_v41, %v493_v34  ;;  %v503_v45 = vmul.f32 %v500_v41, %v494_v35  ;;  %v504_v46 = vmul.f32 %v500_v41, %v495_v36 }
 0x14c   : > { %v505_v47 = vmul.f32 %v500_v41, %v496_v37  ;;  %v506_v48 = vmul.f32 %v500_v41, %v497_v38  ;;  %v507_v49 = vmul.f32 %v500_v41, %v498_v39  ;;  %v508_v50 = vmul.f32 %v500_v41, %v499_v40 }
 0x14d   : > { %v516_v51 = vadd.f32 %v600_v42, %v501_v43  ;;  %v517_v52 = vadd.f32 %v600_v42, %v502_v44  ;;  %v518_v53 = vadd.f32 %v600_v42, %v503_v45  ;;  %v519_v54 = vadd.f32 %v600_v42, %v504_v46 }
 0x14e   : > { %v520_v55 = vadd.f32 %v600_v42, %v505_v47  ;;  %v521_v56 = vadd.f32 %v600_v42, %v506_v48  ;;  %v522_v57 = vadd.f32 %v600_v42, %v507_v49  ;;  %v523_v58 = vadd.f32 %v600_v42, %v508_v50 }
 0x14f   : > { %524 = vst [vmem:[%s252_s24] sm:$0xff] %v516_v51  ;;  %525 = vst [vmem:[%s252_s24 + $0x8] sm:$0xff] %v517_v52 }
 0x150   : > { %526 = vst [vmem:[%s252_s24 + $0x10] sm:$0xff] %v518_v53  ;;  %527 = vst [vmem:[%s252_s24 + $0x18] sm:$0xff] %v519_v54 }
 0x151   : > { %528 = vst [vmem:[%s252_s24 + $0x20] sm:$0xff] %v520_v55  ;;  %529 = vst [vmem:[%s252_s24 + $0x28] sm:$0xff] %v521_v56 }
 0x152   : > { %530 = vst [vmem:[%s252_s24 + $0x30] sm:$0xff] %v522_v57  ;;  %531 = vst [vmem:[%s252_s24 + $0x38] sm:$0x7f] %v523_v58 }
 0x153 PF: > { %s17_s23 = sadd.s32 1, %s627_s23  }
 0x154   : > { %p14_p4 = scmp.ge.s32.totalorder %s17_s23, 4  }
 0x156   :  { %16 = sbr.rel (!%p14_p4) target bundleno = 2 (0x2), region = 74 }

// kernel: spex_plus_forward.68
= control target key start
LH: loop header
LB: loop body
LE: loop exit
PB: predicated region body
PF: predicated region fallthrough
CT: control target
= control target key end

     0   :  { %vm282_vm0 = vcmask 523264   ;;  %vm298_vm1 = vcmask 521216   ;;  %s606_s1 = inlined_call_operand.vmem [shape: bf16[128,64], index: 1, kind: input, shape index: {}]   ;;  %s607_s0 = inlined_call_operand.vmem [shape: bf16[126,128], index: 0, kind: input, shape index: {}]   ;;  %s608_s2 = inlined_call_operand.vmem [shape: f32[1,64], index: 2, kind: input, shape index: {}]   ;;  %s609_s3 = inlined_call_operand.vmem [shape: f32[126,64], index: 3, kind: input, shape index: {}]   ;;  %s610_s4 = inlined_call_operand.vmem [shape: f32[126,64], index: 4, kind: output, shape index: {}]  }
   0x1   :  { %v385_v0 = vld [vmem:[%s606_s1 + $0x38] sm:$0xff]   ;;  %v386_v1 = vld [vmem:[%s606_s1 + $0x30] sm:$0xff]   ;;  %v387_v2 = vld [vmem:[%s606_s1 + $0x28] sm:$0xff]  }
   0x2   :  { %337 = vmatprep.subr.bf16.mxu0 %v385_v0  ;;  %369 = vmatprep.subr.bf16.mxu1 %v385_v0  ;;  %v388_v3 = vld [vmem:[%s606_s1 + $0x20] sm:$0xff]   ;;  %v389_v6 = vld [vmem:[%s606_s1 + $0x18] sm:$0xff]   ;;  %v390_v7 = vld [vmem:[%s606_s1 + $0x10] sm:$0xff]  }
   0x3   :  { %338 = vmatpush3.bf16.msra.mxu0 %v385_v0  ;;  %377 = vmatpush3.bf16.msra.mxu1 %v385_v0  ;;  %v393_v4 = vld [vmem:[%s607_s0] sm:$0xff]   ;;  %v391_v8 = vld [vmem:[%s606_s1 + $0x8] sm:$0xff]   ;;  %v397_v12 = vld [vmem:[%s607_s0 + $0x10] sm:$0xff]  }
   0x4   :  { %339 = vmatprep.subr.bf16.mxu0 %v386_v1  ;;  %370 = vmatprep.subr.bf16.mxu1 %v386_v1  ;;  %v394_v5 = vld [vmem:[%s607_s0 + $0x20] sm:$0xff]   ;;  %v395_v10 = vld [vmem:[%s607_s0 + $0x8] sm:$0xff]   ;;  %v398_v13 = vld [vmem:[%s607_s0 + $0x30] sm:$0xff]  }
   0x5   :  { %353 = vmatprep.mubr.bf16.mxu0 %v393_v4  ;;  %361 = vmatprep.mubr.bf16.mxu1 %v394_v5  ;;  %v392_v9 = vld [vmem:[%s606_s1] sm:$0xff]   ;;  %v396_v11 = vld [vmem:[%s607_s0 + $0x28] sm:$0xff]   ;;  %v399_v14 = vld [vmem:[%s607_s0 + $0x18] sm:$0xff]  }
   0x6   :  { %v400_v15 = vld [vmem:[%s607_s0 + $0x38] sm:$0x7f]   ;;  %v477_v16 = vld [vmem:[%s608_s2] ss:$0 sm:$0xff]  ;;  %v252_v18 = vld [vmem:[%s609_s3 + $0x10] sm:$0xff] }
   0x7   :  { %340 = vmatpush3.bf16.msra.mxu0 %v386_v1  ;;  %378 = vmatpush3.bf16.msra.mxu1 %v386_v1  ;;  %v260_v20 = vld [vmem:[%s609_s3 + $0x50] sm:$0xff]  ;;  %v250_v24 = vld [vmem:[%s609_s3] sm:$0xff]  ;;  %v253_v32 = vld [vmem:[%s609_s3 + $0x18] sm:$0xff] }
   0x8   :  { %341 = vmatprep.subr.bf16.mxu0 %v387_v2  ;;  %371 = vmatprep.subr.bf16.mxu1 %v387_v2  ;;  %v258_v26 = vld [vmem:[%s609_s3 + $0x40] sm:$0xff]  ;;  %v261_v34 = vld [vmem:[%s609_s3 + $0x58] sm:$0xff]  ;;  %v251_v40 = vld [vmem:[%s609_s3 + $0x8] sm:$0xff] }
   0x9   :  { %v259_v42 = vld [vmem:[%s609_s3 + $0x48] sm:$0xff]  ;;  %v256_v48 = vld [vmem:[%s609_s3 + $0x30] sm:$0xff]  ;;  %v254_v56 = vld [vmem:[%s609_s3 + $0x20] sm:$0xff] }
   0xa   :  { %v264_v50 = vld [vmem:[%s609_s3 + $0x70] sm:$0xff]  ;;  %v262_v58 = vld [vmem:[%s609_s3 + $0x60] sm:$0xff]  ;;  %v257_v0 = vld [vmem:[%s609_s3 + $0x38] sm:$0xff] }
   0xb   :  { %342 = vmatpush3.bf16.msra.mxu0 %v387_v2  ;;  %379 = vmatpush3.bf16.msra.mxu1 %v387_v2  ;;  %v265_v2 = vld [vmem:[%s609_s3 + $0x78] sm:$0x3f] }
   0xc   :  { %343 = vmatprep.subr.bf16.mxu0 %v388_v3  ;;  %372 = vmatprep.subr.bf16.mxu1 %v388_v3 }
   0xf   :  { %344 = vmatpush3.bf16.msra.mxu0 %v388_v3  ;;  %380 = vmatpush3.bf16.msra.mxu1 %v388_v3 }
  0x10   :  { %345 = vmatprep.subr.bf16.mxu0 %v389_v6  ;;  %373 = vmatprep.subr.bf16.mxu1 %v389_v6 }
  0x13   :  { %346 = vmatpush3.bf16.msra.mxu0 %v389_v6  ;;  %381 = vmatpush3.bf16.msra.mxu1 %v389_v6 }
  0x14   :  { %347 = vmatprep.subr.bf16.mxu0 %v390_v7  ;;  %374 = vmatprep.subr.bf16.mxu1 %v390_v7 }
  0x17   :  { %348 = vmatpush3.bf16.msra.mxu0 %v390_v7  ;;  %382 = vmatpush3.bf16.msra.mxu1 %v390_v7 }
  0x18   :  { %349 = vmatprep.subr.bf16.mxu0 %v391_v8  ;;  %375 = vmatprep.subr.bf16.mxu1 %v391_v8 }
  0x1b   :  { %350 = vmatpush3.bf16.msra.mxu0 %v391_v8  ;;  %383 = vmatpush3.bf16.msra.mxu1 %v391_v8  ;;  %v255_v8 = vld [vmem:[%s609_s3 + $0x28] sm:$0xff] }
  0x1c   :  { %351 = vmatprep.subr.bf16.mxu0 %v392_v9  ;;  %376 = vmatprep.subr.bf16.mxu1 %v392_v9 }
  0x1f   :  { %352 = vmatpush3.bf16.msra.mxu0 %v392_v9  ;;  %384 = vmatpush3.bf16.msra.mxu1 %v392_v9 }
  0x22   :  { %354 = vmatmul.mubr.bf16.vlgmr.msra.gmra.mxu0 %v395_v10  ;;  %362 = vmatmul.mubr.bf16.vlgmr.msra.gmra.mxu1 %v396_v11  ;;  %v263_v10 = vld [vmem:[%s609_s3 + $0x68] sm:$0xff] }
  0x23   :  { %357 = vmatprep.mubr.bf16.mxu0 %v397_v12  ;;  %365 = vmatprep.mubr.bf16.mxu1 %v398_v13 }
  0x2a   :  { %358 = vmatmul.mubr.bf16.gmra.mxu0 %v399_v14  ;;  %366 = vmatmul.mubr.bf16.gmra.mxu1 %v400_v15 }
  0xe2   :  { %v355_v17 = vpop.f32.mrf.mxu0  ;;  %v363_v19 = vpop.f32.mrf.mxu1 }
  0xe3   :  { %v196_v21 = vadd.f32 %v355_v17, %v477_v16  ;;  %v228_v22 = vadd.f32 %v363_v19, %v477_v16 }
  0xe4   :  { %v187_v23 = vpop.f32.mrf.mxu0  ;;  %v219_v25 = vpop.f32.mrf.mxu1 }
  0xe5   :  { %v268_v27 = vadd.f32 %v252_v18, %v196_v21  ;;  %v276_v28 = vadd.f32 %v260_v20, %v228_v22  ;;  %v188_v29 = vadd.f32 %v477_v16, %v187_v23  ;;  %v220_v30 = vadd.f32 %v477_v16, %v219_v25 }
  0xe6   :  { %v356_v31 = vpop.f32.mrf.mxu0  ;;  %v364_v33 = vpop.f32.mrf.mxu1 }
  0xe7   :  { %285 = vst.msk [vmem:[%s610_s4 + $0x10] sm:$0xff] %vm282_vm0, %v268_v27  ;;  %293 = vst.msk [vmem:[%s610_s4 + $0x50] sm:$0xff] %vm282_vm0, %v276_v28  ;;  %v266_v35 = vadd.f32 %v250_v24, %v188_v29  ;;  %v274_v36 = vadd.f32 %v258_v26, %v220_v30  ;;  %v199_v37 = vadd.f32 %v356_v31, %v477_v16 }
  0xe8   :  { %v231_v38 = vadd.f32 %v364_v33, %v477_v16  ;;  %v190_v39 = vpop.f32.mrf.mxu0  ;;  %v222_v41 = vpop.f32.mrf.mxu1 }
  0xe9   :  { %283 = vst.msk [vmem:[%s610_s4] sm:$0xff] %vm282_vm0, %v266_v35  ;;  %291 = vst.msk [vmem:[%s610_s4 + $0x40] sm:$0xff] %vm282_vm0, %v274_v36  ;;  %v269_v43 = vadd.f32 %v253_v32, %v199_v37  ;;  %v191_v45 = vadd.f32 %v477_v16, %v190_v39  ;;  %v223_v46 = vadd.f32 %v477_v16, %v222_v41 }
  0xea   :  { %v277_v44 = vadd.f32 %v261_v34, %v231_v38  ;;  %v359_v47 = vpop.f32.mrf.mxu0  ;;  %v367_v49 = vpop.f32.mrf.mxu1 }
  0xeb   :  { %286 = vst.msk [vmem:[%s610_s4 + $0x18] sm:$0xff] %vm282_vm0, %v269_v43  ;;  %v267_v51 = vadd.f32 %v251_v40, %v191_v45  ;;  %v275_v52 = vadd.f32 %v259_v42, %v223_v46  ;;  %v212_v53 = vadd.f32 %v359_v47, %v477_v16  ;;  %v244_v54 = vadd.f32 %v367_v49, %v477_v16 }
  0xec   :  { %294 = vst.msk [vmem:[%s610_s4 + $0x58] sm:$0xff] %vm282_vm0, %v277_v44  ;;  %v203_v55 = vpop.f32.mrf.mxu0  ;;  %v235_v57 = vpop.f32.mrf.mxu1 }
  0xed   :  { %284 = vst.msk [vmem:[%s610_s4 + $0x8] sm:$0xff] %vm282_vm0, %v267_v51  ;;  %292 = vst.msk [vmem:[%s610_s4 + $0x48] sm:$0xff] %vm282_vm0, %v275_v52  ;;  %v272_v59 = vadd.f32 %v256_v48, %v212_v53  ;;  %v280_v60 = vadd.f32 %v264_v50, %v244_v54  ;;  %v204_v61 = vadd.f32 %v477_v16, %v203_v55 }
  0xee   :  { %v236_v62 = vadd.f32 %v477_v16, %v235_v57  ;;  %v360_v63 = vpop.f32.mrf.mxu0  ;;  %v368_v1 = vpop.f32.mrf.mxu1 }
  0xef   :  { %289 = vst.msk [vmem:[%s610_s4 + $0x30] sm:$0xff] %vm282_vm0, %v272_v59  ;;  %297 = vst.msk [vmem:[%s610_s4 + $0x70] sm:$0xff] %vm282_vm0, %v280_v60  ;;  %v270_v3 = vadd.f32 %v254_v56, %v204_v61  ;;  %v215_v5 = vadd.f32 %v360_v63, %v477_v16  ;;  %v247_v6 = vadd.f32 %v368_v1, %v477_v16 }
  0xf0   :  { %v278_v4 = vadd.f32 %v262_v58, %v236_v62  ;;  %v206_v7 = vpop.f32.mrf.mxu0  ;;  %v238_v9 = vpop.f32.mrf.mxu1 }
  0xf1   :  { %287 = vst.msk [vmem:[%s610_s4 + $0x20] sm:$0xff] %vm282_vm0, %v270_v3  ;;  %v273_v11 = vadd.f32 %v257_v0, %v215_v5  ;;  %v281_v12 = vadd.f32 %v265_v2, %v247_v6  ;;  %v207_v13 = vadd.f32 %v477_v16, %v206_v7  ;;  %v239_v14 = vadd.f32 %v477_v16, %v238_v9 }
  0xf2   :  { %295 = vst.msk [vmem:[%s610_s4 + $0x60] sm:$0xff] %vm282_vm0, %v278_v4 }
  0xf3   :  { %290 = vst.msk [vmem:[%s610_s4 + $0x38] sm:$0xff] %vm282_vm0, %v273_v11  ;;  %v271_v15 = vadd.f32 %v255_v8, %v207_v13  ;;  %v279_v17 = vadd.f32 %v263_v10, %v239_v14 }
  0xf4   :  { %299 = vst.msk [vmem:[%s610_s4 + $0x78] sm:$0x3f] %vm298_vm1, %v281_v12 }
  0xf5   :  { %288 = vst.msk [vmem:[%s610_s4 + $0x28] sm:$0xff] %vm282_vm0, %v271_v15  ;;  %296 = vst.msk [vmem:[%s610_s4 + $0x68] sm:$0xff] %vm282_vm0, %v279_v17 }

// kernel: spex_plus_forward.69
= control target key start
LH: loop header
LB: loop body
LE: loop exit
PB: predicated region body
PF: predicated region fallthrough
CT: control target
= control target key end

     0   :  { %vm110_vm0 = vcmask 523264   ;;  %s444_s1 = inlined_call_operand.vmem [shape: bf16[64,128], index: 1, kind: input, shape index: {}]   ;;  %s445_s0 = inlined_call_operand.vmem [shape: bf16[126,64], index: 0, kind: input, shape index: {}]   ;;  %s446_s2 = inlined_call_operand.vmem [shape: f32[1,128], index: 2, kind: input, shape index: {}]   ;;  %s447_s3 = inlined_call_operand.vmem [shape: f32[126,128], index: 3, kind: output, shape index: {}]  }
   0x1   :  { %v317_v0 = vld [vmem:[%s444_s1 + $0x18] sm:$0xff]   ;;  %v318_v1 = vld [vmem:[%s444_s1 + $0x10] sm:$0xff]   ;;  %v319_v2 = vld [vmem:[%s444_s1 + $0x8] sm:$0xff]  }
   0x2   :  { %285 = vmatprep.subr.bf16.mxu0 %v317_v0  ;;  %309 = vmatprep.subr.bf16.mxu1 %v317_v0  ;;  %v321_v3 = vld [vmem:[%s445_s0] sm:$0xff]   ;;  %v323_v6 = vld [vmem:[%s445_s0 + $0x8] sm:$0xff]   ;;  %v325_v8 = vld [vmem:[%s445_s0 + $0x10] sm:$0xff]  }
   0x3   :  { %286 = vmatpush3.bf16.msra.mxu0 %v317_v0  ;;  %313 = vmatpush3.bf16.msra.mxu1 %v317_v0  ;;  %v322_v4 = vld [vmem:[%s445_s0 + $0x20] sm:$0xff]   ;;  %v324_v7 = vld [vmem:[%s445_s0 + $0x28] sm:$0xff]   ;;  %v326_v9 = vld [vmem:[%s445_s0 + $0x30] sm:$0xff]  }
   0x4   :  { %287 = vmatprep.subr.bf16.mxu0 %v318_v1  ;;  %310 = vmatprep.subr.bf16.mxu1 %v318_v1  ;;  %v320_v5 = vld [vmem:[%s444_s1] sm:$0xff]   ;;  %v327_v10 = vld [vmem:[%s445_s0 + $0x18] sm:$0xff]  }
   0x5   :  { %293 = vmatprep.mubr.msk.bf16.mxu0 %vm110_vm0, %v321_v3  ;;  %301 = vmatprep.mubr.msk.bf16.mxu1 %vm110_vm0, %v322_v4  ;;  %v328_v11 = vld [vmem:[%s445_s0 + $0x38] sm:$0x7f]   ;;  %v252_v12 = vld [vmem:[%s446_s2] ss:$0 sm:$0xff] }
   0x7   :  { %288 = vmatpush3.bf16.msra.mxu0 %v318_v1  ;;  %314 = vmatpush3.bf16.msra.mxu1 %v318_v1 }
   0x8   :  { %289 = vmatprep.subr.bf16.mxu0 %v319_v2  ;;  %311 = vmatprep.subr.bf16.mxu1 %v319_v2 }
   0xb   :  { %290 = vmatpush3.bf16.msra.mxu0 %v319_v2  ;;  %315 = vmatpush3.bf16.msra.mxu1 %v319_v2 }
   0xc   :  { %291 = vmatprep.subr.bf16.mxu0 %v320_v5  ;;  %312 = vmatprep.subr.bf16.mxu1 %v320_v5 }
   0xf   :  { %292 = vmatpush3.bf16.msra.mxu0 %v320_v5  ;;  %316 = vmatpush3.bf16.msra.mxu1 %v320_v5 }
  0x12   :  { %294 = vmatmul.mubr.msk.bf16.vlgmr.msra.gmra.mxu0 %vm110_vm0, %v323_v6  ;;  %302 = vmatmul.mubr.msk.bf16.vlgmr.msra.gmra.mxu1 %vm110_vm0, %v324_v7 }
  0x13   :  { %297 = vmatprep.mubr.msk.bf16.mxu0 %vm110_vm0, %v325_v8  ;;  %305 = vmatprep.mubr.msk.bf16.mxu1 %vm110_vm0, %v326_v9 }
  0x1a   :  { %298 = vmatmul.mubr.msk.bf16.gmra.mxu0 %vm110_vm0, %v327_v10  ;;  %306 = vmatmul.mubr.msk.bf16.gmra.mxu1 %vm110_vm0, %v328_v11 }
  0xd2   :  { %v295_v13 = vpop.f32.mrf.mxu0  ;;  %v303_v14 = vpop.f32.mrf.mxu1 }
  0xd3   :  { %v178_v15 = vadd.f32 %v295_v13, %v252_v12  ;;  %v210_v16 = vadd.f32 %v303_v14, %v252_v12 }
  0xd4   :  { %v169_v17 = vpop.f32.mrf.mxu0  ;;  %v201_v18 = vpop.f32.mrf.mxu1 }
  0xd5   :  { %234 = vst [vmem:[%s447_s3 + $0x10] sm:$0xff] %v178_v15  ;;  %242 = vst [vmem:[%s447_s3 + $0x50] sm:$0xff] %v210_v16  ;;  %v170_v19 = vadd.f32 %v252_v12, %v169_v17  ;;  %v202_v20 = vadd.f32 %v252_v12, %v201_v18 }
  0xd6   :  { %v296_v21 = vpop.f32.mrf.mxu0  ;;  %v304_v22 = vpop.f32.mrf.mxu1 }
  0xd7   :  { %232 = vst [vmem:[%s447_s3] sm:$0xff] %v170_v19  ;;  %240 = vst [vmem:[%s447_s3 + $0x40] sm:$0xff] %v202_v20  ;;  %v181_v23 = vadd.f32 %v296_v21, %v252_v12  ;;  %v213_v24 = vadd.f32 %v304_v22, %v252_v12 }
  0xd8   :  { %v172_v25 = vpop.f32.mrf.mxu0  ;;  %v204_v26 = vpop.f32.mrf.mxu1 }
  0xd9   :  { %235 = vst [vmem:[%s447_s3 + $0x18] sm:$0xff] %v181_v23  ;;  %243 = vst [vmem:[%s447_s3 + $0x58] sm:$0xff] %v213_v24  ;;  %v173_v27 = vadd.f32 %v252_v12, %v172_v25  ;;  %v205_v28 = vadd.f32 %v252_v12, %v204_v26 }
  0xda   :  { %v299_v29 = vpop.f32.mrf.mxu0  ;;  %v307_v30 = vpop.f32.mrf.mxu1 }
  0xdb   :  { %233 = vst [vmem:[%s447_s3 + $0x8] sm:$0xff] %v173_v27  ;;  %241 = vst [vmem:[%s447_s3 + $0x48] sm:$0xff] %v205_v28  ;;  %v194_v31 = vadd.f32 %v299_v29, %v252_v12  ;;  %v226_v32 = vadd.f32 %v307_v30, %v252_v12 }
  0xdc   :  { %v185_v33 = vpop.f32.mrf.mxu0  ;;  %v217_v34 = vpop.f32.mrf.mxu1 }
  0xdd   :  { %238 = vst [vmem:[%s447_s3 + $0x30] sm:$0xff] %v194_v31  ;;  %246 = vst [vmem:[%s447_s3 + $0x70] sm:$0xff] %v226_v32  ;;  %v186_v35 = vadd.f32 %v252_v12, %v185_v33  ;;  %v218_v36 = vadd.f32 %v252_v12, %v217_v34 }
  0xde   :  { %v300_v37 = vpop.f32.mrf.mxu0  ;;  %v308_v38 = vpop.f32.mrf.mxu1 }
  0xdf   :  { %236 = vst [vmem:[%s447_s3 + $0x20] sm:$0xff] %v186_v35  ;;  %244 = vst [vmem:[%s447_s3 + $0x60] sm:$0xff] %v218_v36  ;;  %v197_v39 = vadd.f32 %v300_v37, %v252_v12  ;;  %v229_v40 = vadd.f32 %v308_v38, %v252_v12 }
  0xe0   :  { %v188_v41 = vpop.f32.mrf.mxu0  ;;  %v220_v42 = vpop.f32.mrf.mxu1 }
  0xe1   :  { %239 = vst [vmem:[%s447_s3 + $0x38] sm:$0xff] %v197_v39  ;;  %247 = vst [vmem:[%s447_s3 + $0x78] sm:$0x3f] %v229_v40  ;;  %v189_v43 = vadd.f32 %v252_v12, %v188_v41  ;;  %v221_v44 = vadd.f32 %v252_v12, %v220_v42 }
  0xe3   :  { %237 = vst [vmem:[%s447_s3 + $0x28] sm:$0xff] %v189_v43  ;;  %245 = vst [vmem:[%s447_s3 + $0x68] sm:$0xff] %v221_v44 }

// kernel: spex_plus_forward.71
= control target key start
LH: loop header
LB: loop body
LE: loop exit
PB: predicated region body
PF: predicated region fallthrough
CT: control target
= control target key end

     0   :  { %s672_s23 = smov 0   ;;  %s769_s0 = inlined_call_operand.vmem [shape: f32[2,67,128], index: 0, kind: input, shape index: {}]   ;;  %s770_s1 = inlined_call_operand.vmem [shape: f32[3,128], index: 1, kind: input, shape index: {}]   ;;  %s771_s2 = inlined_call_operand.vmem [shape: f32[1,128], index: 2, kind: input, shape index: {}]   ;;  %s772_s3 = inlined_call_operand.<no memory space> [shape: f32[1], index: 3, kind: input, shape index: {}]   ;;  %s773_s4 = inlined_call_operand.vmem [shape: f32[1,128], index: 4, kind: input, shape index: {}]   ;;  %s774_s5 = inlined_call_operand.vmem [shape: f32[1,128], index: 5, kind: input, shape index: {}]   ;;  %s775_s6 = inlined_call_operand.vmem [shape: f32[2,63,128], index: 6, kind: output, shape index: {}]  }
   0x1   :  { %11 = sst [smem:[#allocation2]] %s772_s3 }
   0x2 LB: > { %s592_s24 = sadd.s32 4294967295, %s632_s23   ;;  %p596_p0 = scmp.ge.s32.totalorder %s632_s23, 1  ;;  %s632_s23 = sphi %s672_s23, %s17_s23  }
   0x3   : > { %p213_p1 = scmp.lt.s32.totalorder %s632_s23, 3 }
   0x5   : > { %p214_p2 = pnand %p596_p0, %p213_p1 }
   0x6   : > { %p243_p3 = scmp.lt.s32.totalorder (!%p214_p2), %s592_s24, 1  ;;  %s404_s10 = sld [smem:[#allocation2]] (!%p214_p2) }
   0x7   : > { %217 = sbr.rel (%p214_p2) target bundleno = 339 (0x153), region = 44 }
   0xc   : > { %s777_s24 = smov (!%p243_p3, %s592_s24), 1  ;;  %v601_v0 = vld [vmem:[%s770_s1 + $0x1] ss:$0 sm:$0xff]  ;;  %v600_v1 = vld [vmem:[%s770_s1] ss:$0 sm:$0xff]  ;;  %vm298_vm0 = vcmask 1045504  }
   0xd   : > { %s609_s3 = smul.u32 72, %s777_s24  ;;  %vm355_vm1 = vcmask 1043456   ;;  %v602_v40 = vld [vmem:[%s770_s1 + $0x2] ss:$0 sm:$0xff]  ;;  %vm436_vm10 = vcmask 1046528   ;;  %s608_s22 = sshll.u32 %s777_s24, 6 }
   0xe   : > { %s252_s24 = scalar_lea.vmem %s775_s6, %s608_s22 }
   0xf   : > { %s247_s29 = scalar_lea.vmem %s769_s0, %s609_s3 }
  0x10   : > { %v253_v2 = vld [vmem:[%s247_s29] sm:$0xff]  ;;  %v254_v3 = vld [vmem:[%s247_s29 + $0x8] sm:$0xff]  ;;  %v255_v4 = vld [vmem:[%s247_s29 + $0x10] sm:$0xff] }
  0x11   : > { %v256_v5 = vld [vmem:[%s247_s29 + $0x18] sm:$0xff]  ;;  %v257_v6 = vld [vmem:[%s247_s29 + $0x20] sm:$0xff]  ;;  %v258_v7 = vld [vmem:[%s247_s29 + $0x28] sm:$0xff]  ;;  %v280_v8 = vmul.f32 %v601_v0, %v253_v2  ;;  %v267_v12 = vmul.f32 %v600_v1, %v253_v2  ;;  %v268_v13 = vmul.f32 %v600_v1, %v254_v3  ;;  %v269_v14 = vmul.f32 %v600_v1, %v255_v4 }
  0x12   : > { %v259_v9 = vld [vmem:[%s247_s29 + $0x30] sm:$0xff]  ;;  %v260_v10 = vld [vmem:[%s247_s29 + $0x38] sm:$0xff]  ;;  %v261_v11 = vld [vmem:[%s247_s29 + $0x40] sm:$0x7]  ;;  %v281_v15 = vmul.f32 %v601_v0, %v254_v3  ;;  %v270_v16 = vmul.f32 %v600_v1, %v256_v5  ;;  %v271_v17 = vmul.f32 %v600_v1, %v257_v6  ;;  %v282_v18 = vmul.f32 %v601_v0, %v255_v4 }
  0x13   : > { %v283_v19 = vmul.f32 %v601_v0, %v256_v5  ;;  %v284_v20 = vmul.f32 %v601_v0, %v257_v6  ;;  %v285_v21 = vmul.f32 %v601_v0, %v258_v7  ;;  %v286_v22 = vmul.f32 %v601_v0, %v259_v9 }
  0x14   : > { %v287_v23 = vmul.f32 %v601_v0, %v260_v10  ;;  %v288_v24 = vmul.f32 %v601_v0, %v261_v11  ;;  %v299_v25 = vrot.slane %v280_v8, 2  ;;  %v300_v26 = vrot.slane %v281_v15, 2 }
  0x15   : > { %v302_v27 = vrot.slane %v282_v18, 2  ;;  %v304_v28 = vrot.slane %v283_v19, 2  ;;  %v306_v29 = vrot.slane %v284_v20, 2  ;;  %v308_v30 = vrot.slane %v285_v21, 2 }
  0x16   : > { %v310_v31 = vrot.slane %v286_v22, 2  ;;  %v301_v32 = vsel %vm298_vm0, %v299_v25, %v300_v26  ;;  %v312_v34 = vrot.slane %v287_v23, 2  ;;  %v314_v35 = vrot.slane %v288_v24, 2 }
  0x17   : > { %v303_v33 = vsel %vm298_vm0, %v300_v26, %v302_v27  ;;  %v272_v36 = vmul.f32 %v600_v1, %v258_v7  ;;  %v305_v37 = vsel %vm298_vm0, %v302_v27, %v304_v28  ;;  %v307_v38 = vsel %vm298_vm0, %v304_v28, %v306_v29 }
  0x18   : > { %v309_v39 = vsel %vm298_vm0, %v306_v29, %v308_v30  ;;  %v273_v41 = vmul.f32 %v600_v1, %v259_v9  ;;  %v274_v42 = vmul.f32 %v600_v1, %v260_v10  ;;  %v311_v43 = vsel %vm298_vm0, %v308_v30, %v310_v31 }
  0x19   : > { %v313_v44 = vsel %vm298_vm0, %v310_v31, %v312_v34  ;;  %v315_v45 = vsel %vm298_vm0, %v312_v34, %v314_v35  ;;  %v324_v46 = vadd.f32 %v301_v32, %v267_v12  ;;  %v325_v47 = vadd.f32 %v303_v33, %v268_v13 }
  0x1a   : > { %v326_v48 = vadd.f32 %v305_v37, %v269_v14  ;;  %v327_v49 = vadd.f32 %v307_v38, %v270_v16  ;;  %v328_v50 = vadd.f32 %v309_v39, %v271_v17  ;;  %v337_v51 = vmul.f32 %v602_v40, %v253_v2 }
  0x1b   : > { %v338_v52 = vmul.f32 %v602_v40, %v254_v3  ;;  %v339_v53 = vmul.f32 %v602_v40, %v255_v4  ;;  %v340_v54 = vmul.f32 %v602_v40, %v256_v5  ;;  %v341_v55 = vmul.f32 %v602_v40, %v257_v6 }
  0x1c   : > { %v342_v56 = vmul.f32 %v602_v40, %v258_v7  ;;  %v343_v57 = vmul.f32 %v602_v40, %v259_v9  ;;  %v344_v58 = vmul.f32 %v602_v40, %v260_v10  ;;  %v345_v59 = vmul.f32 %v602_v40, %v261_v11  ;;  %v603_v7 = vld [vmem:[%s771_s2] ss:$0 sm:$0xff] }
  0x1d   : > { %v356_v60 = vrot.slane %v337_v51, 4  ;;  %v357_v61 = vrot.slane %v338_v52, 4  ;;  %v359_v62 = vrot.slane %v339_v53, 4  ;;  %v361_v63 = vrot.slane %v340_v54, 4 }
  0x1e   : > { %v363_v0 = vrot.slane %v341_v55, 4  ;;  %v365_v1 = vrot.slane %v342_v56, 4  ;;  %v367_v8 = vrot.slane %v343_v57, 4  ;;  %v369_v12 = vrot.slane %v344_v58, 4 }
  0x1f   : > { %v371_v13 = vrot.slane %v345_v59, 4  ;;  %v358_v14 = vsel %vm355_vm1, %v356_v60, %v357_v61  ;;  %v360_v2 = vsel %vm355_vm1, %v357_v61, %v359_v62  ;;  %v362_v3 = vsel %vm355_vm1, %v359_v62, %v361_v63 }
  0x20   : > { %v364_v4 = vsel %vm355_vm1, %v361_v63, %v363_v0  ;;  %v329_v5 = vadd.f32 %v311_v43, %v272_v36  ;;  %v366_v6 = vsel %vm355_vm1, %v363_v0, %v365_v1  ;;  %v381_v9 = vadd.f32 %v358_v14, %v324_v46 }
  0x21   : > { %v382_v10 = vadd.f32 %v360_v2, %v325_v47  ;;  %v383_v11 = vadd.f32 %v362_v3, %v326_v48  ;;  %v384_v15 = vadd.f32 %v364_v4, %v327_v49  ;;  %v330_v16 = vadd.f32 %v313_v44, %v273_v41 }
  0x22   : > { %v331_v17 = vadd.f32 %v315_v45, %v274_v42  ;;  %v368_v18 = vsel %vm355_vm1, %v365_v1, %v367_v8  ;;  %v370_v19 = vsel %vm355_vm1, %v367_v8, %v369_v12  ;;  %v372_v20 = vsel %vm355_vm1, %v369_v12, %v371_v13 }
  0x23   : > { %v385_v21 = vadd.f32 %v366_v6, %v328_v50  ;;  %v396_v22 = vadd.f32 %v603_v7, %v381_v9  ;;  %v397_v23 = vadd.f32 %v603_v7, %v382_v10  ;;  %v398_v24 = vadd.f32 %v603_v7, %v383_v11 }
  0x24   : > { %v386_v25 = vadd.f32 %v368_v18, %v329_v5  ;;  %v399_v26 = vadd.f32 %v603_v7, %v384_v15  ;;  %v387_v27 = vadd.f32 %v370_v19, %v330_v16  ;;  %v388_v28 = vadd.f32 %v372_v20, %v331_v17 }
  0x25   : > { %v400_v29 = vadd.f32 %v603_v7, %v385_v21  ;;  %vm405_vm2 = vcmp.gt.f32.partialorder %v396_v22, 0.0  ;;  %vm406_vm3 = vcmp.gt.f32.partialorder %v397_v23, 0.0  ;;  %v413_v30 = vstv %s404_s10 }
  0x26   : > { %vm407_vm4 = vcmp.gt.f32.partialorder %v398_v24, 0.0  ;;  %v414_v31 = vmul.f32 %v413_v30, %v396_v22  ;;  %v415_v32 = vmul.f32 %v413_v30, %v397_v23  ;;  %v416_v33 = vmul.f32 %v413_v30, %v398_v24 }
  0x27   : > { %v401_v34 = vadd.f32 %v603_v7, %v386_v25  ;;  %v417_v35 = vmul.f32 %v413_v30, %v399_v26  ;;  %v403_v36 = vadd.f32 %v603_v7, %v388_v28  ;;  %vm408_vm5 = vcmp.gt.f32.partialorder %v399_v26, 0.0 }
  0x28   : > { %v714_v37 = vsel %vm405_vm2, %v396_v22, %v414_v31  ;;  %v716_v38 = vsel %vm406_vm3, %v397_v23, %v415_v32  ;;  %v402_v39 = vadd.f32 %v603_v7, %v387_v27  ;;  %v418_v40 = vmul.f32 %v413_v30, %v400_v29  ;;  %v604_v32 = vld [vmem:[%s773_s4] ss:$0 sm:$0xff] }
  0x29   : > { %v718_v41 = vsel %vm407_vm4, %v398_v24, %v416_v33  ;;  %vm409_vm6 = vcmp.gt.f32.partialorder %v400_v29, 0.0  ;;  %v430_v42 = vadd.f32 %v716_v38, %v714_v37  ;;  %v449_v43 = vmul.f32 %v714_v37, %v714_v37 }
  0x2a   : > { %v450_v44 = vmul.f32 %v716_v38, %v716_v38  ;;  %vm410_vm7 = vcmp.gt.f32.partialorder %v401_v34, 0.0  ;;  %v419_v45 = vmul.f32 %v413_v30, %v401_v34  ;;  %v726_v46 = vsel %vm408_vm5, %v399_v26, %v417_v35 }
  0x2b   : > { %v451_v47 = vmul.f32 %v718_v41, %v718_v41  ;;  %v421_v48 = vmul.f32 %v413_v30, %v403_v36  ;;  %v431_v49 = vadd.f32 %v430_v42, %v718_v41  ;;  %v452_v50 = vmul.f32 %v726_v46, %v726_v46 }
  0x2c   : > { %v457_v51 = vadd.f32 %v450_v44, %v449_v43  ;;  %vm412_vm8 = vcmp.gt.f32.partialorder %v403_v36, 0.0  ;;  %v420_v52 = vmul.f32 %v413_v30, %v402_v39  ;;  %v733_v53 = vsel %vm409_vm6, %v400_v29, %v418_v40 }
  0x2d   : > { %vm411_vm9 = vcmp.gt.f32.partialorder %v402_v39, 0.0  ;;  %v432_v54 = vadd.f32 %v431_v49, %v726_v46  ;;  %v453_v55 = vmul.f32 %v733_v53, %v733_v53  ;;  %v738_v57 = vsel %vm410_vm7, %v401_v34, %v419_v45  ;;  %v605_v45 = vld [vmem:[%s774_s5] ss:$0 sm:$0xff] }
  0x2e   : > { %v458_v56 = vadd.f32 %v457_v51, %v451_v47  ;;  %v740_v58 = vsel %vm412_vm8, %v403_v36, %v421_v48  ;;  %v454_v60 = vmul.f32 %v738_v57, %v738_v57  ;;  %v428_v62 = vsel %vm411_vm9, %v402_v39, %v420_v52 }
  0x2f   : > { %v433_v59 = vadd.f32 %v432_v54, %v733_v53  ;;  %v456_v63 = vmul.f32 %v740_v58, %v740_v58  ;;  %v455_v1 = vmul.f32 %v428_v62, %v428_v62  ;;  %v437_v12 = vsel %vm436_vm10, %v740_v58, 0.0 }
  0x30   : > { %v459_v61 = vadd.f32 %v458_v56, %v452_v50 }
  0x31   : > { %v434_v0 = vadd.f32 %v433_v59, %v738_v57  ;;  %v463_v2 = vsel %vm436_vm10, %v456_v63, 0.0 }
  0x32   : > { %v460_v8 = vadd.f32 %v459_v61, %v453_v55 }
  0x33   : > { %v435_v13 = vadd.f32 %v434_v0, %v428_v62 }
  0x34   : > { %v461_v14 = vadd.f32 %v460_v8, %v454_v60 }
  0x35   : > { %v438_v3 = vadd.f32 %v437_v12, %v435_v13 }
  0x36   : > { %v462_v4 = vadd.f32 %v461_v14, %v455_v1 }
  0x37   : > { %439 = vadd.xlane.f32.xlu0 %v438_v3 }
  0x38   : > { %v464_v5 = vadd.f32 %v463_v2, %v462_v4 }
  0x3b   : > { %465 = vadd.xlane.f32.xlu0 %v464_v5 }
  0xc0   : > { %v440_v6 = vpop.xlane.xlu0 %439 }
  0xc1   : > { %v441_v7 = vrot.slane %v440_v6, 4 }
  0xc3   : > { %v442_v9 = vadd.f32 %v441_v7, %v440_v6 }
  0xc4   : > { %v466_v10 = vpop.xlane.xlu0 %465 }
  0xc5   : > { %v443_v11 = vrot.slane %v442_v9, 2  ;;  %v467_v15 = vrot.slane %v466_v10, 4 }
  0xc7   : > { %v468_v16 = vadd.f32 %v467_v15, %v466_v10  ;;  %v444_v17 = vadd.f32 %v443_v11, %v442_v9 }
  0xc9   : > { %v469_v18 = vrot.slane %v468_v16, 2  ;;  %v445_v19 = vrot.slane %v444_v17, 1 }
  0xcb   : > { %v470_v20 = vadd.f32 %v469_v18, %v468_v16  ;;  %v446_v21 = vadd.f32 %v445_v19, %v444_v17 }
  0xcd   : > { %610 = vpush %v446_v21  ;;  %v471_v22 = vrot.slane %v470_v20, 1 }
  0xcf   : > { %v472_v23 = vadd.f32 %v471_v22, %v470_v20 }
  0xd1   : > { %612 = vpush %v472_v23 }
  0xfe   : > { %s611_s13 = spop %610 }
  0xff   : > { %s448_s14 = smul.f32 0.00012400794, %s611_s13 }
 0x101   : > { %s475_s15 = smul.f32 %s448_s14, %s448_s14  ;;  %v482_v26 = vstv %s448_s14 }
 0x102   : > { %s613_s16 = spop %612  ;;  %v483_v27 = vsub.f32 %v714_v37, %v482_v26  ;;  %v484_v28 = vsub.f32 %v716_v38, %v482_v26  ;;  %v485_v29 = vsub.f32 %v718_v41, %v482_v26  ;;  %v486_v30 = vsub.f32 %v726_v46, %v482_v26 }
 0x103   : > { %s474_s17 = smul.f32 0.00012400794, %s613_s16  ;;  %v487_v31 = vsub.f32 %v733_v53, %v482_v26  ;;  %v488_v33 = vsub.f32 %v738_v57, %v482_v26  ;;  %v489_v34 = vsub.f32 %v428_v62, %v482_v26  ;;  %v490_v35 = vsub.f32 %v740_v58, %v482_v26 }
 0x104   : > { %v497_v36 = vmul.f32 %v604_v32, %v483_v27  ;;  %v498_v37 = vmul.f32 %v604_v32, %v484_v28  ;;  %v499_v38 = vmul.f32 %v604_v32, %v485_v29  ;;  %v500_v39 = vmul.f32 %v604_v32, %v486_v30 }
 0x105   : > { %s476_s18 = ssub.f32 %s474_s17, %s475_s15  ;;  %v501_v40 = vmul.f32 %v604_v32, %v487_v31  ;;  %v502_v41 = vmul.f32 %v604_v32, %v488_v33  ;;  %v503_v42 = vmul.f32 %v604_v32, %v489_v34  ;;  %v504_v43 = vmul.f32 %v604_v32, %v490_v35 }
 0x107   : > { %s477_s19 = sadd.f32 1e-05, %s476_s18 }
 0x109   : > { %v478_v24 = vstv %s477_s19 }
 0x10a   : > { %624 = vrsqrt.f32 %v478_v24 }
 0x117   : > { %v625_v25 = vpop.eup %624 }
 0x118   : > { %614 = vpush %v625_v25 }
 0x149   : > { %s615_s3 = spop %614 }
 0x14a   : > { %v505_v44 = vstv %s615_s3 }
 0x14b   : > { %v506_v46 = vmul.f32 %v505_v44, %v497_v36  ;;  %v507_v47 = vmul.f32 %v505_v44, %v498_v37  ;;  %v508_v48 = vmul.f32 %v505_v44, %v499_v38  ;;  %v509_v49 = vmul.f32 %v505_v44, %v500_v39 }
 0x14c   : > { %v510_v50 = vmul.f32 %v505_v44, %v501_v40  ;;  %v511_v51 = vmul.f32 %v505_v44, %v502_v41  ;;  %v512_v52 = vmul.f32 %v505_v44, %v503_v42  ;;  %v513_v53 = vmul.f32 %v505_v44, %v504_v43 }
 0x14d   : > { %v521_v54 = vadd.f32 %v605_v45, %v506_v46  ;;  %v522_v55 = vadd.f32 %v605_v45, %v507_v47  ;;  %v523_v56 = vadd.f32 %v605_v45, %v508_v48  ;;  %v524_v57 = vadd.f32 %v605_v45, %v509_v49 }
 0x14e   : > { %v525_v58 = vadd.f32 %v605_v45, %v510_v50  ;;  %v526_v59 = vadd.f32 %v605_v45, %v511_v51  ;;  %v527_v60 = vadd.f32 %v605_v45, %v512_v52  ;;  %v528_v61 = vadd.f32 %v605_v45, %v513_v53 }
 0x14f   : > { %529 = vst [vmem:[%s252_s24] sm:$0xff] %v521_v54  ;;  %530 = vst [vmem:[%s252_s24 + $0x8] sm:$0xff] %v522_v55 }
 0x150   : > { %531 = vst [vmem:[%s252_s24 + $0x10] sm:$0xff] %v523_v56  ;;  %532 = vst [vmem:[%s252_s24 + $0x18] sm:$0xff] %v524_v57 }
 0x151   : > { %533 = vst [vmem:[%s252_s24 + $0x20] sm:$0xff] %v525_v58  ;;  %534 = vst [vmem:[%s252_s24 + $0x28] sm:$0xff] %v526_v59 }
 0x152   : > { %535 = vst [vmem:[%s252_s24 + $0x30] sm:$0xff] %v527_v60  ;;  %536 = vst [vmem:[%s252_s24 + $0x38] sm:$0x7f] %v528_v61 }
 0x153 PF: > { %s17_s23 = sadd.s32 1, %s632_s23  }
 0x154   : > { %p14_p4 = scmp.ge.s32.totalorder %s17_s23, 4  }
 0x156   :  { %16 = sbr.rel (!%p14_p4) target bundleno = 2 (0x2), region = 74 }

// kernel: spex_plus_forward.97
= control target key start
LH: loop header
LB: loop body
LE: loop exit
PB: predicated region body
PF: predicated region fallthrough
CT: control target
= control target key end

     0   :  { %v458_v1 = vmov 0   ;;  %vm134_vm0 = vcmask 523264   ;;  %v44_v17 = vlaneseq  ;;  %vm399_vm1 = vcmask 521216   ;;  %s786_s1 = inlined_call_operand.vmem [shape: bf16[64,192], index: 1, kind: input, shape index: {}]   ;;  %s787_s0 = inlined_call_operand.vmem [shape: bf16[126,64], index: 0, kind: input, shape index: {}]   ;;  %s788_s2 = inlined_call_operand.vmem [shape: f32[1,192], index: 2, kind: input, shape index: {}]   ;;  %s789_s3 = inlined_call_operand.vmem [shape: f32[126,192], index: 3, kind: input, shape index: {}]   ;;  %s790_s4 = inlined_call_operand.vmem [shape: f32[126,192], index: 4, kind: output, shape index: {}]  }
   0x1   :  { %v438_v0 = vld [vmem:[%s786_s1 + $0x34] ss:$8 sps:$4 sm:$0xff]   ;;  %191 = vmatprep.mubr.bf16.mxu0 %v458_v1  ;;  %231 = vmatprep.mubr.bf16.mxu1 %v458_v1  ;;  %v440_v2 = vld [vmem:[%s786_s1 + $0x30] ss:$8 sps:$4 sm:$0xff]   ;;  %v441_v3 = vld [vmem:[%s786_s1 + $0x24] ss:$8 sps:$4 sm:$0xff]  }
   0x2   :  { %167 = vmatprep.subr.bf16.mxu0 %v438_v0  ;;  %429 = vmatprep.subr.bf16.mxu1 %v438_v0  ;;  %v443_v4 = vld [vmem:[%s786_s1 + $0x20] ss:$8 sps:$4 sm:$0xff]   ;;  %v444_v5 = vld [vmem:[%s786_s1 + $0x14] ss:$8 sps:$4 sm:$0xff]   ;;  %v446_v6 = vld [vmem:[%s786_s1 + $0x10] ss:$8 sps:$4 sm:$0xff]  }
   0x3   :  { %168 = vmatpush1.bf16.msra.mxu0 %v440_v2  ;;  %433 = vmatpush1.bf16.msra.mxu1 %v440_v2  ;;  %v447_v7 = vld [vmem:[%s786_s1 + $0x4] ss:$8 sps:$4 sm:$0xff]   ;;  %v449_v8 = vld [vmem:[%s786_s1] ss:$8 sps:$4 sm:$0xff]   ;;  %v454_v13 = vld [vmem:[%s787_s0 + $0x10] sm:$0xff]   ;;  %v45_v18 = vshrl.u32 %v44_v17, 7 }
   0x4   :  { %169 = vmatprep.subr.bf16.mxu0 %v441_v3  ;;  %430 = vmatprep.subr.bf16.mxu1 %v441_v3  ;;  %v450_v9 = vld [vmem:[%s787_s0] sm:$0xff]   ;;  %v452_v11 = vld [vmem:[%s787_s0 + $0x8] sm:$0xff]   ;;  %v455_v14 = vld [vmem:[%s787_s0 + $0x30] sm:$0xff]  }
   0x5   :  { %v451_v10 = vld [vmem:[%s787_s0 + $0x20] sm:$0xff]   ;;  %v453_v12 = vld [vmem:[%s787_s0 + $0x28] sm:$0xff]   ;;  %v456_v15 = vld [vmem:[%s787_s0 + $0x18] sm:$0xff]   ;;  %v46_v19 = vsub.s32 0, %v45_v18  ;;  %v50_v21 = vsub.s32 1, %v45_v18 }
   0x6   :  { %v457_v16 = vld [vmem:[%s787_s0 + $0x38] sm:$0x7f]   ;;  %v42_v20 = vld [vmem:[%s788_s2] sm:$0x3]  ;;  %v305_v36 = vld [vmem:[%s789_s3 + $0x8] sm:$0xff] }
   0x7   :  { %170 = vmatpush1.bf16.msra.mxu0 %v443_v4  ;;  %434 = vmatpush1.bf16.msra.mxu1 %v443_v4  ;;  %v543_v22 = vrot.slane %v42_v20, %v46_v19  ;;  %v545_v23 = vrot.slane %v42_v20, %v50_v21  ;;  %v304_v28 = vld [vmem:[%s789_s3] sm:$0xff]  ;;  %v321_v37 = vld [vmem:[%s789_s3 + $0x88] sm:$0xff]  ;;  %v306_v50 = vld [vmem:[%s789_s3 + $0x10] sm:$0xff] }
   0x8   :  { %171 = vmatprep.subr.bf16.mxu0 %v444_v5  ;;  %431 = vmatprep.subr.bf16.mxu1 %v444_v5  ;;  %v320_v29 = vld [vmem:[%s789_s3 + $0x80] sm:$0xff]  ;;  %v322_v51 = vld [vmem:[%s789_s3 + $0x90] sm:$0xff]  ;;  %v307_v56 = vld [vmem:[%s789_s3 + $0x18] sm:$0xff] }
   0x9   :  { %v323_v57 = vld [vmem:[%s789_s3 + $0x98] sm:$0xff]  ;;  %v308_v2 = vld [vmem:[%s789_s3 + $0x20] sm:$0xff]  ;;  %v325_v17 = vld [vmem:[%s789_s3 + $0xa8] sm:$0xff] }
   0xa   :  { %v324_v3 = vld [vmem:[%s789_s3 + $0xa0] sm:$0xff] }
   0xb   :  { %172 = vmatpush1.bf16.msra.mxu0 %v446_v6  ;;  %435 = vmatpush1.bf16.msra.mxu1 %v446_v6 }
   0xc   :  { %173 = vmatprep.subr.bf16.mxu0 %v447_v7  ;;  %432 = vmatprep.subr.bf16.mxu1 %v447_v7 }
   0xf   :  { %174 = vmatpush1.bf16.msra.mxu0 %v449_v8  ;;  %436 = vmatpush1.bf16.msra.mxu1 %v449_v8 }
  0x12   :  { %421 = vmatmul.mubr.msk.bf16.vlgmr.msra.gmra.mxu0 %vm134_vm0, %v450_v9  ;;  %425 = vmatmul.mubr.msk.bf16.vlgmr.msra.gmra.mxu1 %vm134_vm0, %v451_v10 }
  0x13   :  { %201 = vmatprep.mubr.bf16.mxu0 %v458_v1  ;;  %241 = vmatprep.mubr.bf16.mxu1 %v458_v1 }
  0x1a   :  { %422 = vmatmul.mubr.msk.bf16.gmra.mxu0 %vm134_vm0, %v452_v11  ;;  %426 = vmatmul.mubr.msk.bf16.gmra.mxu1 %vm134_vm0, %v453_v12 }
  0x1b   :  { %211 = vmatprep.mubr.bf16.mxu0 %v458_v1  ;;  %251 = vmatprep.mubr.bf16.mxu1 %v458_v1 }
  0x22   :  { %423 = vmatmul.mubr.msk.bf16.gmra.mxu0 %vm134_vm0, %v454_v13  ;;  %427 = vmatmul.mubr.msk.bf16.gmra.mxu1 %vm134_vm0, %v455_v14 }
  0x23   :  { %221 = vmatprep.mubr.bf16.mxu0 %v458_v1  ;;  %261 = vmatprep.mubr.bf16.mxu1 %v458_v1 }
  0x2a   :  { %424 = vmatmul.mubr.msk.bf16.gmra.mxu0 %vm134_vm0, %v456_v15  ;;  %428 = vmatmul.mubr.msk.bf16.gmra.mxu1 %vm134_vm0, %v457_v16  ;;  %v309_v16 = vld [vmem:[%s789_s3 + $0x28] sm:$0xff] }
  0xd2   :  { %v193_v24 = vpop.f32.mrf.mxu0  ;;  %v233_v25 = vpop.f32.mrf.mxu1 }
  0xd3   :  { %v194_v26 = vadd.f32 %v193_v24, %v543_v22  ;;  %v234_v27 = vadd.f32 %v233_v25, %v543_v22  ;;  %v310_v24 = vld [vmem:[%s789_s3 + $0x30] sm:$0xff] }
  0xd4   :  { %v195_v30 = vpop.f32.mrf.mxu0  ;;  %v235_v31 = vpop.f32.mrf.mxu1  ;;  %v326_v25 = vld [vmem:[%s789_s3 + $0xb0] sm:$0xff] }
  0xd5   :  { %v272_v32 = vmax.f32 %v194_v26, 0.0  ;;  %v288_v33 = vmax.f32 %v234_v27, 0.0  ;;  %v196_v34 = vadd.f32 %v195_v30, %v545_v23  ;;  %v236_v35 = vadd.f32 %v235_v31, %v545_v23 }
  0xd6   :  { %v197_v38 = vpop.f32.mrf.mxu0  ;;  %v237_v39 = vpop.f32.mrf.mxu1 }
  0xd7   :  { %v336_v40 = vmul.f32 %v304_v28, %v272_v32  ;;  %v352_v41 = vmul.f32 %v320_v29, %v288_v33  ;;  %v273_v42 = vmax.f32 %v196_v34, 0.0  ;;  %v289_v43 = vmax.f32 %v236_v35, 0.0  ;;  %v311_v34 = vld [vmem:[%s789_s3 + $0x38] sm:$0xff] }
  0xd8   :  { %v198_v44 = vadd.f32 %v197_v38, %v543_v22  ;;  %v238_v45 = vadd.f32 %v237_v39, %v543_v22  ;;  %v199_v46 = vpop.f32.mrf.mxu0  ;;  %v239_v47 = vpop.f32.mrf.mxu1  ;;  %v327_v35 = vld [vmem:[%s789_s3 + $0xb8] sm:$0xff] }
  0xd9   :  { %368 = vst [vmem:[%s790_s4] sm:$0xff] %v336_v40  ;;  %384 = vst [vmem:[%s790_s4 + $0x80] sm:$0xff] %v352_v41  ;;  %v337_v48 = vmul.f32 %v305_v36, %v273_v42  ;;  %v353_v49 = vmul.f32 %v321_v37, %v289_v43  ;;  %v200_v52 = vadd.f32 %v199_v46, %v545_v23 }
  0xda   :  { %v240_v53 = vadd.f32 %v239_v47, %v545_v23  ;;  %v274_v54 = vmax.f32 %v198_v44, 0.0  ;;  %v290_v55 = vmax.f32 %v238_v45, 0.0  ;;  %v203_v58 = vpop.f32.mrf.mxu0  ;;  %v243_v59 = vpop.f32.mrf.mxu1 }
  0xdb   :  { %369 = vst.msk [vmem:[%s790_s4 + $0x8] sm:$0xff] %vm134_vm0, %v337_v48  ;;  %385 = vst.msk [vmem:[%s790_s4 + $0x88] sm:$0xff] %vm134_vm0, %v353_v49  ;;  %v275_v60 = vmax.f32 %v200_v52, 0.0  ;;  %v204_v62 = vadd.f32 %v203_v58, %v543_v22  ;;  %v244_v63 = vadd.f32 %v243_v59, %v543_v22  ;;  %v312_v48 = vld [vmem:[%s789_s3 + $0x40] sm:$0xff] }
  0xdc   :  { %v291_v61 = vmax.f32 %v240_v53, 0.0  ;;  %v338_v0 = vmul.f32 %v306_v50, %v274_v54  ;;  %v354_v1 = vmul.f32 %v322_v51, %v290_v55  ;;  %v205_v4 = vpop.f32.mrf.mxu0  ;;  %v245_v5 = vpop.f32.mrf.mxu1  ;;  %v328_v49 = vld [vmem:[%s789_s3 + $0xc0] sm:$0xff]  ;;  %v313_v54 = vld [vmem:[%s789_s3 + $0x48] sm:$0xff] }
  0xdd   :  { %v339_v6 = vmul.f32 %v307_v56, %v275_v60  ;;  %v276_v8 = vmax.f32 %v204_v62, 0.0  ;;  %v292_v9 = vmax.f32 %v244_v63, 0.0  ;;  %v206_v10 = vadd.f32 %v205_v4, %v545_v23  ;;  %v329_v55 = vld [vmem:[%s789_s3 + $0xc8] sm:$0xff] }
  0xde   :  { %v355_v7 = vmul.f32 %v323_v57, %v291_v61  ;;  %370 = vst [vmem:[%s790_s4 + $0x10] sm:$0xff] %v338_v0  ;;  %386 = vst [vmem:[%s790_s4 + $0x90] sm:$0xff] %v354_v1  ;;  %v246_v11 = vadd.f32 %v245_v5, %v545_v23  ;;  %v207_v12 = vpop.f32.mrf.mxu0  ;;  %v247_v13 = vpop.f32.mrf.mxu1  ;;  %v314_v0 = vld [vmem:[%s789_s3 + $0x50] sm:$0xff] }
  0xdf   :  { %371 = vst.msk [vmem:[%s790_s4 + $0x18] sm:$0xff] %vm134_vm0, %v339_v6  ;;  %v340_v14 = vmul.f32 %v308_v2, %v276_v8  ;;  %v356_v15 = vmul.f32 %v324_v3, %v292_v9  ;;  %v208_v18 = vadd.f32 %v207_v12, %v543_v22  ;;  %v248_v19 = vadd.f32 %v247_v13, %v543_v22  ;;  %v330_v1 = vld [vmem:[%s789_s3 + $0xd0] sm:$0xff] }
  0xe0   :  { %387 = vst.msk [vmem:[%s790_s4 + $0x98] sm:$0xff] %vm134_vm0, %v355_v7  ;;  %v277_v20 = vmax.f32 %v206_v10, 0.0  ;;  %v293_v21 = vmax.f32 %v246_v11, 0.0  ;;  %v209_v26 = vpop.f32.mrf.mxu0  ;;  %v249_v27 = vpop.f32.mrf.mxu1 }
  0xe1   :  { %372 = vst [vmem:[%s790_s4 + $0x20] sm:$0xff] %v340_v14  ;;  %388 = vst [vmem:[%s790_s4 + $0xa0] sm:$0xff] %v356_v15  ;;  %v278_v28 = vmax.f32 %v208_v18, 0.0  ;;  %v294_v29 = vmax.f32 %v248_v19, 0.0  ;;  %v210_v30 = vadd.f32 %v209_v26, %v545_v23  ;;  %v250_v31 = vadd.f32 %v249_v27, %v545_v23  ;;  %v315_v14 = vld [vmem:[%s789_s3 + $0x58] sm:$0xff] }
  0xe2   :  { %v341_v32 = vmul.f32 %v309_v16, %v277_v20  ;;  %v357_v33 = vmul.f32 %v325_v17, %v293_v21  ;;  %v213_v36 = vpop.f32.mrf.mxu0  ;;  %v253_v37 = vpop.f32.mrf.mxu1  ;;  %v331_v15 = vld [vmem:[%s789_s3 + $0xd8] sm:$0xff]  ;;  %v316_v20 = vld [vmem:[%s789_s3 + $0x60] sm:$0xff] }
  0xe3   :  { %v342_v38 = vmul.f32 %v310_v24, %v278_v28  ;;  %v358_v39 = vmul.f32 %v326_v25, %v294_v29  ;;  %v279_v40 = vmax.f32 %v210_v30, 0.0  ;;  %v295_v41 = vmax.f32 %v250_v31, 0.0  ;;  %v332_v21 = vld [vmem:[%s789_s3 + $0xe0] sm:$0xff] }
  0xe4   :  { %373 = vst.msk [vmem:[%s790_s4 + $0x28] sm:$0xff] %vm134_vm0, %v341_v32  ;;  %389 = vst.msk [vmem:[%s790_s4 + $0xa8] sm:$0xff] %vm134_vm0, %v357_v33  ;;  %v214_v42 = vadd.f32 %v213_v36, %v543_v22  ;;  %v254_v43 = vadd.f32 %v253_v37, %v543_v22  ;;  %v215_v44 = vpop.f32.mrf.mxu0  ;;  %v255_v45 = vpop.f32.mrf.mxu1  ;;  %v317_v32 = vld [vmem:[%s789_s3 + $0x68] sm:$0xff] }
  0xe5   :  { %374 = vst [vmem:[%s790_s4 + $0x30] sm:$0xff] %v342_v38  ;;  %390 = vst [vmem:[%s790_s4 + $0xb0] sm:$0xff] %v358_v39  ;;  %v343_v46 = vmul.f32 %v311_v34, %v279_v40  ;;  %v359_v47 = vmul.f32 %v327_v35, %v295_v41  ;;  %v216_v50 = vadd.f32 %v215_v44, %v545_v23  ;;  %v333_v33 = vld [vmem:[%s789_s3 + $0xe8] sm:$0xff] }
  0xe6   :  { %v256_v51 = vadd.f32 %v255_v45, %v545_v23  ;;  %v280_v52 = vmax.f32 %v214_v42, 0.0  ;;  %v296_v53 = vmax.f32 %v254_v43, 0.0  ;;  %v217_v56 = vpop.f32.mrf.mxu0  ;;  %v257_v57 = vpop.f32.mrf.mxu1 }
  0xe7   :  { %375 = vst.msk [vmem:[%s790_s4 + $0x38] sm:$0xff] %vm134_vm0, %v343_v46  ;;  %391 = vst.msk [vmem:[%s790_s4 + $0xb8] sm:$0xff] %vm134_vm0, %v359_v47  ;;  %v281_v58 = vmax.f32 %v216_v50, 0.0  ;;  %v218_v60 = vadd.f32 %v217_v56, %v543_v22  ;;  %v258_v61 = vadd.f32 %v257_v57, %v543_v22  ;;  %v318_v46 = vld [vmem:[%s789_s3 + $0x70] sm:$0xff] }
  0xe8   :  { %v297_v59 = vmax.f32 %v256_v51, 0.0  ;;  %v344_v62 = vmul.f32 %v312_v48, %v280_v52  ;;  %v360_v63 = vmul.f32 %v328_v49, %v296_v53  ;;  %v219_v2 = vpop.f32.mrf.mxu0  ;;  %v259_v3 = vpop.f32.mrf.mxu1  ;;  %v319_v51 = vld [vmem:[%s789_s3 + $0x78] sm:$0xff] }
  0xe9   :  { %v345_v4 = vmul.f32 %v313_v54, %v281_v58  ;;  %v282_v6 = vmax.f32 %v218_v60, 0.0  ;;  %v298_v7 = vmax.f32 %v258_v61, 0.0  ;;  %v220_v8 = vadd.f32 %v219_v2, %v545_v23  ;;  %v335_v52 = vld [vmem:[%s789_s3 + $0xf8] sm:$0x3f] }
  0xea   :  { %v361_v5 = vmul.f32 %v329_v55, %v297_v59  ;;  %376 = vst [vmem:[%s790_s4 + $0x40] sm:$0xff] %v344_v62  ;;  %392 = vst [vmem:[%s790_s4 + $0xc0] sm:$0xff] %v360_v63  ;;  %v260_v9 = vadd.f32 %v259_v3, %v545_v23  ;;  %v223_v10 = vpop.f32.mrf.mxu0  ;;  %v263_v11 = vpop.f32.mrf.mxu1 }
  0xeb   :  { %377 = vst.msk [vmem:[%s790_s4 + $0x48] sm:$0xff] %vm134_vm0, %v345_v4  ;;  %v346_v12 = vmul.f32 %v314_v0, %v282_v6  ;;  %v362_v13 = vmul.f32 %v330_v1, %v298_v7  ;;  %v224_v16 = vadd.f32 %v223_v10, %v543_v22  ;;  %v264_v17 = vadd.f32 %v263_v11, %v543_v22 }
  0xec   :  { %393 = vst.msk [vmem:[%s790_s4 + $0xc8] sm:$0xff] %vm134_vm0, %v361_v5  ;;  %v283_v18 = vmax.f32 %v220_v8, 0.0  ;;  %v299_v19 = vmax.f32 %v260_v9, 0.0  ;;  %v225_v24 = vpop.f32.mrf.mxu0  ;;  %v265_v25 = vpop.f32.mrf.mxu1 }
  0xed   :  { %378 = vst [vmem:[%s790_s4 + $0x50] sm:$0xff] %v346_v12  ;;  %394 = vst [vmem:[%s790_s4 + $0xd0] sm:$0xff] %v362_v13  ;;  %v284_v26 = vmax.f32 %v224_v16, 0.0  ;;  %v300_v27 = vmax.f32 %v264_v17, 0.0  ;;  %v226_v28 = vadd.f32 %v225_v24, %v545_v23  ;;  %v266_v29 = vadd.f32 %v265_v25, %v545_v23 }
  0xee   :  { %v347_v30 = vmul.f32 %v315_v14, %v283_v18  ;;  %v363_v31 = vmul.f32 %v331_v15, %v299_v19  ;;  %v227_v34 = vpop.f32.mrf.mxu0  ;;  %v267_v35 = vpop.f32.mrf.mxu1 }
  0xef   :  { %v348_v36 = vmul.f32 %v316_v20, %v284_v26  ;;  %v364_v37 = vmul.f32 %v332_v21, %v300_v27  ;;  %v285_v38 = vmax.f32 %v226_v28, 0.0  ;;  %v301_v39 = vmax.f32 %v266_v29, 0.0 }
  0xf0   :  { %379 = vst.msk [vmem:[%s790_s4 + $0x58] sm:$0xff] %vm134_vm0, %v347_v30  ;;  %395 = vst.msk [vmem:[%s790_s4 + $0xd8] sm:$0xff] %vm134_vm0, %v363_v31  ;;  %v228_v40 = vadd.f32 %v227_v34, %v543_v22  ;;  %v268_v41 = vadd.f32 %v267_v35, %v543_v22  ;;  %v229_v42 = vpop.f32.mrf.mxu0  ;;  %v269_v43 = vpop.f32.mrf.mxu1  ;;  %v334_v22 = vld [vmem:[%s789_s3 + $0xf0] sm:$0x3f] }
  0xf1   :  { %380 = vst [vmem:[%s790_s4 + $0x60] sm:$0xff] %v348_v36  ;;  %396 = vst [vmem:[%s790_s4 + $0xe0] sm:$0xff] %v364_v37  ;;  %v349_v44 = vmul.f32 %v317_v32, %v285_v38  ;;  %v365_v45 = vmul.f32 %v333_v33, %v301_v39  ;;  %v230_v47 = vadd.f32 %v229_v42, %v545_v23 }
  0xf2   :  { %v270_v48 = vadd.f32 %v269_v43, %v545_v23  ;;  %v286_v49 = vmax.f32 %v228_v40, 0.0  ;;  %v302_v50 = vmax.f32 %v268_v41, 0.0 }
  0xf3   :  { %381 = vst.msk [vmem:[%s790_s4 + $0x68] sm:$0xff] %vm134_vm0, %v349_v44  ;;  %397 = vst.msk [vmem:[%s790_s4 + $0xe8] sm:$0xff] %vm134_vm0, %v365_v45  ;;  %v287_v23 = vmax.f32 %v230_v47, 0.0 }
  0xf4   :  { %v303_v53 = vmax.f32 %v270_v48, 0.0  ;;  %v350_v54 = vmul.f32 %v318_v46, %v286_v49  ;;  %v366_v55 = vmul.f32 %v334_v22, %v302_v50 }
  0xf5   :  { %v351_v56 = vmul.f32 %v319_v51, %v287_v23 }
  0xf6   :  { %v367_v57 = vmul.f32 %v335_v52, %v303_v53  ;;  %382 = vst [vmem:[%s790_s4 + $0x70] sm:$0xff] %v350_v54  ;;  %398 = vst [vmem:[%s790_s4 + $0xf0] sm:$0x3f] %v366_v55 }
  0xf7   :  { %383 = vst.msk [vmem:[%s790_s4 + $0x78] sm:$0xff] %vm134_vm0, %v351_v56 }
  0xf8   :  { %400 = vst.msk [vmem:[%s790_s4 + $0xf8] sm:$0x3f] %vm399_vm1, %v367_v57 }

// kernel: spex_plus_forward.100
= control target key start
LH: loop header
LB: loop body
LE: loop exit
PB: predicated region body
PF: predicated region fallthrough
CT: control target
= control target key end

     0   :  { %vm100_vm0 = vcmask 523264   ;;  %vm222_vm1 = vcmask 130048   ;;  %vm238_vm2 = vcmask 128000   ;;  %s442_s1 = inlined_call_operand.vmem [shape: bf16[64,16], index: 1, kind: input, shape index: {}]   ;;  %s443_s0 = inlined_call_operand.vmem [shape: bf16[126,64], index: 0, kind: input, shape index: {}]   ;;  %s444_s2 = inlined_call_operand.vmem [shape: f32[126,16], index: 2, kind: output, shape index: {}]  }
   0x1   :  { %v308_v0 = vld [vmem:[%s442_s1 + $0x18] sm:$0xff]   ;;  %v309_v1 = vld [vmem:[%s442_s1 + $0x10] sm:$0xff]   ;;  %v310_v2 = vld [vmem:[%s442_s1 + $0x8] sm:$0xff]  }
   0x2   :  { %276 = vmatprep.subr.bf16.mxu0 %v308_v0  ;;  %300 = vmatprep.subr.bf16.mxu1 %v308_v0  ;;  %v312_v3 = vld [vmem:[%s443_s0] sm:$0xff]   ;;  %v314_v6 = vld [vmem:[%s443_s0 + $0x8] sm:$0xff]   ;;  %v316_v8 = vld [vmem:[%s443_s0 + $0x10] sm:$0xff]  }
   0x3   :  { %277 = vmatpush3.bf16.msra.mxu0 %v308_v0  ;;  %304 = vmatpush3.bf16.msra.mxu1 %v308_v0  ;;  %v313_v4 = vld [vmem:[%s443_s0 + $0x20] sm:$0xff]   ;;  %v315_v7 = vld [vmem:[%s443_s0 + $0x28] sm:$0xff]   ;;  %v317_v9 = vld [vmem:[%s443_s0 + $0x30] sm:$0xff]  }
   0x4   :  { %278 = vmatprep.subr.bf16.mxu0 %v309_v1  ;;  %301 = vmatprep.subr.bf16.mxu1 %v309_v1  ;;  %v311_v5 = vld [vmem:[%s442_s1] sm:$0xff]   ;;  %v318_v10 = vld [vmem:[%s443_s0 + $0x18] sm:$0xff]  }
   0x5   :  { %284 = vmatprep.mubr.msk.bf16.mxu0 %vm100_vm0, %v312_v3  ;;  %292 = vmatprep.mubr.msk.bf16.mxu1 %vm100_vm0, %v313_v4  ;;  %v319_v11 = vld [vmem:[%s443_s0 + $0x38] sm:$0x7f]  }
   0x7   :  { %279 = vmatpush3.bf16.msra.mxu0 %v309_v1  ;;  %305 = vmatpush3.bf16.msra.mxu1 %v309_v1 }
   0x8   :  { %280 = vmatprep.subr.bf16.mxu0 %v310_v2  ;;  %302 = vmatprep.subr.bf16.mxu1 %v310_v2 }
   0xb   :  { %281 = vmatpush3.bf16.msra.mxu0 %v310_v2  ;;  %306 = vmatpush3.bf16.msra.mxu1 %v310_v2 }
   0xc   :  { %282 = vmatprep.subr.bf16.mxu0 %v311_v5  ;;  %303 = vmatprep.subr.bf16.mxu1 %v311_v5 }
   0xf   :  { %283 = vmatpush3.bf16.msra.mxu0 %v311_v5  ;;  %307 = vmatpush3.bf16.msra.mxu1 %v311_v5 }
  0x12   :  { %285 = vmatmul.mubr.msk.bf16.vlgmr.msra.gmra.mxu0 %vm100_vm0, %v314_v6  ;;  %293 = vmatmul.mubr.msk.bf16.vlgmr.msra.gmra.mxu1 %vm100_vm0, %v315_v7 }
  0x13   :  { %288 = vmatprep.mubr.msk.bf16.mxu0 %vm100_vm0, %v316_v8  ;;  %296 = vmatprep.mubr.msk.bf16.mxu1 %vm100_vm0, %v317_v9 }
  0x1a   :  { %289 = vmatmul.mubr.msk.bf16.gmra.mxu0 %vm100_vm0, %v318_v10  ;;  %297 = vmatmul.mubr.msk.bf16.gmra.mxu1 %vm100_vm0, %v319_v11 }
  0xd2   :  { %v286_v12 = vpop.f32.mrf.mxu0  ;;  %v294_v13 = vpop.f32.mrf.mxu1 }
  0xd3   :  { %225 = vst.msk [vmem:[%s444_s2 + $0x10] sm:$0xff] %vm222_vm1, %v286_v12  ;;  %233 = vst.msk [vmem:[%s444_s2 + $0x50] sm:$0xff] %vm222_vm1, %v294_v13 }
  0xd4   :  { %v159_v14 = vpop.f32.mrf.mxu0  ;;  %v191_v15 = vpop.f32.mrf.mxu1 }
  0xd5   :  { %223 = vst.msk [vmem:[%s444_s2] sm:$0xff] %vm222_vm1, %v159_v14  ;;  %231 = vst.msk [vmem:[%s444_s2 + $0x40] sm:$0xff] %vm222_vm1, %v191_v15 }
  0xd6   :  { %v287_v16 = vpop.f32.mrf.mxu0  ;;  %v295_v17 = vpop.f32.mrf.mxu1 }
  0xd7   :  { %226 = vst.msk [vmem:[%s444_s2 + $0x18] sm:$0xff] %vm222_vm1, %v287_v16  ;;  %234 = vst.msk [vmem:[%s444_s2 + $0x58] sm:$0xff] %vm222_vm1, %v295_v17 }
  0xd8   :  { %v162_v18 = vpop.f32.mrf.mxu0  ;;  %v194_v19 = vpop.f32.mrf.mxu1 }
  0xd9   :  { %224 = vst.msk [vmem:[%s444_s2 + $0x8] sm:$0xff] %vm222_vm1, %v162_v18  ;;  %232 = vst.msk [vmem:[%s444_s2 + $0x48] sm:$0xff] %vm222_vm1, %v194_v19 }
  0xda   :  { %v290_v20 = vpop.f32.mrf.mxu0  ;;  %v298_v21 = vpop.f32.mrf.mxu1 }
  0xdb   :  { %229 = vst.msk [vmem:[%s444_s2 + $0x30] sm:$0xff] %vm222_vm1, %v290_v20  ;;  %237 = vst.msk [vmem:[%s444_s2 + $0x70] sm:$0xff] %vm222_vm1, %v298_v21 }
  0xdc   :  { %v175_v22 = vpop.f32.mrf.mxu0  ;;  %v207_v23 = vpop.f32.mrf.mxu1 }
  0xdd   :  { %227 = vst.msk [vmem:[%s444_s2 + $0x20] sm:$0xff] %vm222_vm1, %v175_v22  ;;  %235 = vst.msk [vmem:[%s444_s2 + $0x60] sm:$0xff] %vm222_vm1, %v207_v23 }
  0xde   :  { %v291_v24 = vpop.f32.mrf.mxu0  ;;  %v299_v25 = vpop.f32.mrf.mxu1 }
  0xdf   :  { %230 = vst.msk [vmem:[%s444_s2 + $0x38] sm:$0xff] %vm222_vm1, %v291_v24 }
  0xe0   :  { %239 = vst.msk [vmem:[%s444_s2 + $0x78] sm:$0x3f] %vm238_vm2, %v299_v25  ;;  %v178_v26 = vpop.f32.mrf.mxu0  ;;  %v210_v27 = vpop.f32.mrf.mxu1 }
  0xe1   :  { %228 = vst.msk [vmem:[%s444_s2 + $0x28] sm:$0xff] %vm222_vm1, %v178_v26  ;;  %236 = vst.msk [vmem:[%s444_s2 + $0x68] sm:$0xff] %vm222_vm1, %v210_v27 }

// kernel: spex_plus_forward.99
= control target key start
LH: loop header
LB: loop body
LE: loop exit
PB: predicated region body
PF: predicated region fallthrough
CT: control target
= control target key end

     0   :  { %vm100_vm0 = vcmask 523264   ;;  %vm222_vm1 = vcmask 64512   ;;  %vm238_vm2 = vcmask 62464   ;;  %s442_s1 = inlined_call_operand.vmem [shape: bf16[64,8], index: 1, kind: input, shape index: {}]   ;;  %s443_s0 = inlined_call_operand.vmem [shape: bf16[126,64], index: 0, kind: input, shape index: {}]   ;;  %s444_s2 = inlined_call_operand.vmem [shape: f32[126,8], index: 2, kind: output, shape index: {}]  }
   0x1   :  { %v308_v0 = vld [vmem:[%s442_s1 + $0x18] sm:$0xff]   ;;  %v309_v1 = vld [vmem:[%s442_s1 + $0x10] sm:$0xff]   ;;  %v310_v2 = vld [vmem:[%s442_s1 + $0x8] sm:$0xff]  }
   0x2   :  { %276 = vmatprep.subr.bf16.mxu0 %v308_v0  ;;  %300 = vmatprep.subr.bf16.mxu1 %v308_v0  ;;  %v312_v3 = vld [vmem:[%s443_s0] sm:$0xff]   ;;  %v314_v6 = vld [vmem:[%s443_s0 + $0x8] sm:$0xff]   ;;  %v316_v8 = vld [vmem:[%s443_s0 + $0x10] sm:$0xff]  }
   0x3   :  { %277 = vmatpush3.bf16.msra.mxu0 %v308_v0  ;;  %304 = vmatpush3.bf16.msra.mxu1 %v308_v0  ;;  %v313_v4 = vld [vmem:[%s443_s0 + $0x20] sm:$0xff]   ;;  %v315_v7 = vld [vmem:[%s443_s0 + $0x28] sm:$0xff]   ;;  %v317_v9 = vld [vmem:[%s443_s0 + $0x30] sm:$0xff]  }
   0x4   :  { %278 = vmatprep.subr.bf16.mxu0 %v309_v1  ;;  %301 = vmatprep.subr.bf16.mxu1 %v309_v1  ;;  %v311_v5 = vld [vmem:[%s442_s1] sm:$0xff]   ;;  %v318_v10 = vld [vmem:[%s443_s0 + $0x18] sm:$0xff]  }
   0x5   :  { %284 = vmatprep.mubr.msk.bf16.mxu0 %vm100_vm0, %v312_v3  ;;  %292 = vmatprep.mubr.msk.bf16.mxu1 %vm100_vm0, %v313_v4  ;;  %v319_v11 = vld [vmem:[%s443_s0 + $0x38] sm:$0x7f]  }
   0x7   :  { %279 = vmatpush3.bf16.msra.mxu0 %v309_v1  ;;  %305 = vmatpush3.bf16.msra.mxu1 %v309_v1 }
   0x8   :  { %280 = vmatprep.subr.bf16.mxu0 %v310_v2  ;;  %302 = vmatprep.subr.bf16.mxu1 %v310_v2 }
   0xb   :  { %281 = vmatpush3.bf16.msra.mxu0 %v310_v2  ;;  %306 = vmatpush3.bf16.msra.mxu1 %v310_v2 }
   0xc   :  { %282 = vmatprep.subr.bf16.mxu0 %v311_v5  ;;  %303 = vmatprep.subr.bf16.mxu1 %v311_v5 }
   0xf   :  { %283 = vmatpush3.bf16.msra.mxu0 %v311_v5  ;;  %307 = vmatpush3.bf16.msra.mxu1 %v311_v5 }
  0x12   :  { %285 = vmatmul.mubr.msk.bf16.vlgmr.msra.gmra.mxu0 %vm100_vm0, %v314_v6  ;;  %293 = vmatmul.mubr.msk.bf16.vlgmr.msra.gmra.mxu1 %vm100_vm0, %v315_v7 }
  0x13   :  { %288 = vmatprep.mubr.msk.bf16.mxu0 %vm100_vm0, %v316_v8  ;;  %296 = vmatprep.mubr.msk.bf16.mxu1 %vm100_vm0, %v317_v9 }
  0x1a   :  { %289 = vmatmul.mubr.msk.bf16.gmra.mxu0 %vm100_vm0, %v318_v10  ;;  %297 = vmatmul.mubr.msk.bf16.gmra.mxu1 %vm100_vm0, %v319_v11 }
  0xd2   :  { %v286_v12 = vpop.f32.mrf.mxu0  ;;  %v294_v13 = vpop.f32.mrf.mxu1 }
  0xd3   :  { %225 = vst.msk [vmem:[%s444_s2 + $0x10] sm:$0xff] %vm222_vm1, %v286_v12  ;;  %233 = vst.msk [vmem:[%s444_s2 + $0x50] sm:$0xff] %vm222_vm1, %v294_v13 }
  0xd4   :  { %v159_v14 = vpop.f32.mrf.mxu0  ;;  %v191_v15 = vpop.f32.mrf.mxu1 }
  0xd5   :  { %223 = vst.msk [vmem:[%s444_s2] sm:$0xff] %vm222_vm1, %v159_v14  ;;  %231 = vst.msk [vmem:[%s444_s2 + $0x40] sm:$0xff] %vm222_vm1, %v191_v15 }
  0xd6   :  { %v287_v16 = vpop.f32.mrf.mxu0  ;;  %v295_v17 = vpop.f32.mrf.mxu1 }
  0xd7   :  { %226 = vst.msk [vmem:[%s444_s2 + $0x18] sm:$0xff] %vm222_vm1, %v287_v16  ;;  %234 = vst.msk [vmem:[%s444_s2 + $0x58] sm:$0xff] %vm222_vm1, %v295_v17 }
  0xd8   :  { %v162_v18 = vpop.f32.mrf.mxu0  ;;  %v194_v19 = vpop.f32.mrf.mxu1 }
  0xd9   :  { %224 = vst.msk [vmem:[%s444_s2 + $0x8] sm:$0xff] %vm222_vm1, %v162_v18  ;;  %232 = vst.msk [vmem:[%s444_s2 + $0x48] sm:$0xff] %vm222_vm1, %v194_v19 }
  0xda   :  { %v290_v20 = vpop.f32.mrf.mxu0  ;;  %v298_v21 = vpop.f32.mrf.mxu1 }
  0xdb   :  { %229 = vst.msk [vmem:[%s444_s2 + $0x30] sm:$0xff] %vm222_vm1, %v290_v20  ;;  %237 = vst.msk [vmem:[%s444_s2 + $0x70] sm:$0xff] %vm222_vm1, %v298_v21 }
  0xdc   :  { %v175_v22 = vpop.f32.mrf.mxu0  ;;  %v207_v23 = vpop.f32.mrf.mxu1 }
  0xdd   :  { %227 = vst.msk [vmem:[%s444_s2 + $0x20] sm:$0xff] %vm222_vm1, %v175_v22  ;;  %235 = vst.msk [vmem:[%s444_s2 + $0x60] sm:$0xff] %vm222_vm1, %v207_v23 }
  0xde   :  { %v291_v24 = vpop.f32.mrf.mxu0  ;;  %v299_v25 = vpop.f32.mrf.mxu1 }
  0xdf   :  { %230 = vst.msk [vmem:[%s444_s2 + $0x38] sm:$0xff] %vm222_vm1, %v291_v24 }
  0xe0   :  { %239 = vst.msk [vmem:[%s444_s2 + $0x78] sm:$0x3f] %vm238_vm2, %v299_v25  ;;  %v178_v26 = vpop.f32.mrf.mxu0  ;;  %v210_v27 = vpop.f32.mrf.mxu1 }
  0xe1   :  { %228 = vst.msk [vmem:[%s444_s2 + $0x28] sm:$0xff] %vm222_vm1, %v178_v26  ;;  %236 = vst.msk [vmem:[%s444_s2 + $0x68] sm:$0xff] %vm222_vm1, %v210_v27 }

// kernel: spex_plus_forward.98
= control target key start
LH: loop header
LB: loop body
LE: loop exit
PB: predicated region body
PF: predicated region fallthrough
CT: control target
= control target key end

     0   :  { %vm100_vm0 = vcmask 523264   ;;  %vm222_vm1 = vcmask 31744   ;;  %vm238_vm2 = vcmask 29696   ;;  %s442_s1 = inlined_call_operand.vmem [shape: bf16[64,4], index: 1, kind: input, shape index: {}]   ;;  %s443_s0 = inlined_call_operand.vmem [shape: bf16[126,64], index: 0, kind: input, shape index: {}]   ;;  %s444_s2 = inlined_call_operand.vmem [shape: f32[126,4], index: 2, kind: output, shape index: {}]  }
   0x1   :  { %v308_v0 = vld [vmem:[%s442_s1 + $0x18] sm:$0xff]   ;;  %v309_v1 = vld [vmem:[%s442_s1 + $0x10] sm:$0xff]   ;;  %v310_v2 = vld [vmem:[%s442_s1 + $0x8] sm:$0xff]  }
   0x2   :  { %276 = vmatprep.subr.bf16.mxu0 %v308_v0  ;;  %300 = vmatprep.subr.bf16.mxu1 %v308_v0  ;;  %v312_v3 = vld [vmem:[%s443_s0] sm:$0xff]   ;;  %v314_v6 = vld [vmem:[%s443_s0 + $0x8] sm:$0xff]   ;;  %v316_v8 = vld [vmem:[%s443_s0 + $0x10] sm:$0xff]  }
   0x3   :  { %277 = vmatpush3.bf16.msra.mxu0 %v308_v0  ;;  %304 = vmatpush3.bf16.msra.mxu1 %v308_v0  ;;  %v313_v4 = vld [vmem:[%s443_s0 + $0x20] sm:$0xff]   ;;  %v315_v7 = vld [vmem:[%s443_s0 + $0x28] sm:$0xff]   ;;  %v317_v9 = vld [vmem:[%s443_s0 + $0x30] sm:$0xff]  }
   0x4   :  { %278 = vmatprep.subr.bf16.mxu0 %v309_v1  ;;  %301 = vmatprep.subr.bf16.mxu1 %v309_v1  ;;  %v311_v5 = vld [vmem:[%s442_s1] sm:$0xff]   ;;  %v318_v10 = vld [vmem:[%s443_s0 + $0x18] sm:$0xff]  }
   0x5   :  { %284 = vmatprep.mubr.msk.bf16.mxu0 %vm100_vm0, %v312_v3  ;;  %292 = vmatprep.mubr.msk.bf16.mxu1 %vm100_vm0, %v313_v4  ;;  %v319_v11 = vld [vmem:[%s443_s0 + $0x38] sm:$0x7f]  }
   0x7   :  { %279 = vmatpush3.bf16.msra.mxu0 %v309_v1  ;;  %305 = vmatpush3.bf16.msra.mxu1 %v309_v1 }
   0x8   :  { %280 = vmatprep.subr.bf16.mxu0 %v310_v2  ;;  %302 = vmatprep.subr.bf16.mxu1 %v310_v2 }
   0xb   :  { %281 = vmatpush3.bf16.msra.mxu0 %v310_v2  ;;  %306 = vmatpush3.bf16.msra.mxu1 %v310_v2 }
   0xc   :  { %282 = vmatprep.subr.bf16.mxu0 %v311_v5  ;;  %303 = vmatprep.subr.bf16.mxu1 %v311_v5 }
   0xf   :  { %283 = vmatpush3.bf16.msra.mxu0 %v311_v5  ;;  %307 = vmatpush3.bf16.msra.mxu1 %v311_v5 }
  0x12   :  { %285 = vmatmul.mubr.msk.bf16.vlgmr.msra.gmra.mxu0 %vm100_vm0, %v314_v6  ;;  %293 = vmatmul.mubr.msk.bf16.vlgmr.msra.gmra.mxu1 %vm100_vm0, %v315_v7 }
  0x13   :  { %288 = vmatprep.mubr.msk.bf16.mxu0 %vm100_vm0, %v316_v8  ;;  %296 = vmatprep.mubr.msk.bf16.mxu1 %vm100_vm0, %v317_v9 }
  0x1a   :  { %289 = vmatmul.mubr.msk.bf16.gmra.mxu0 %vm100_vm0, %v318_v10  ;;  %297 = vmatmul.mubr.msk.bf16.gmra.mxu1 %vm100_vm0, %v319_v11 }
  0xd2   :  { %v286_v12 = vpop.f32.mrf.mxu0  ;;  %v294_v13 = vpop.f32.mrf.mxu1 }
  0xd3   :  { %225 = vst.msk [vmem:[%s444_s2 + $0x10] sm:$0xff] %vm222_vm1, %v286_v12  ;;  %233 = vst.msk [vmem:[%s444_s2 + $0x50] sm:$0xff] %vm222_vm1, %v294_v13 }
  0xd4   :  { %v159_v14 = vpop.f32.mrf.mxu0  ;;  %v191_v15 = vpop.f32.mrf.mxu1 }
  0xd5   :  { %223 = vst.msk [vmem:[%s444_s2] sm:$0xff] %vm222_vm1, %v159_v14  ;;  %231 = vst.msk [vmem:[%s444_s2 + $0x40] sm:$0xff] %vm222_vm1, %v191_v15 }
  0xd6   :  { %v287_v16 = vpop.f32.mrf.mxu0  ;;  %v295_v17 = vpop.f32.mrf.mxu1 }
  0xd7   :  { %226 = vst.msk [vmem:[%s444_s2 + $0x18] sm:$0xff] %vm222_vm1, %v287_v16  ;;  %234 = vst.msk [vmem:[%s444_s2 + $0x58] sm:$0xff] %vm222_vm1, %v295_v17 }
  0xd8   :  { %v162_v18 = vpop.f32.mrf.mxu0  ;;  %v194_v19 = vpop.f32.mrf.mxu1 }
  0xd9   :  { %224 = vst.msk [vmem:[%s444_s2 + $0x8] sm:$0xff] %vm222_vm1, %v162_v18  ;;  %232 = vst.msk [vmem:[%s444_s2 + $0x48] sm:$0xff] %vm222_vm1, %v194_v19 }
  0xda   :  { %v290_v20 = vpop.f32.mrf.mxu0  ;;  %v298_v21 = vpop.f32.mrf.mxu1 }
  0xdb   :  { %229 = vst.msk [vmem:[%s444_s2 + $0x30] sm:$0xff] %vm222_vm1, %v290_v20  ;;  %237 = vst.msk [vmem:[%s444_s2 + $0x70] sm:$0xff] %vm222_vm1, %v298_v21 }
  0xdc   :  { %v175_v22 = vpop.f32.mrf.mxu0  ;;  %v207_v23 = vpop.f32.mrf.mxu1 }
  0xdd   :  { %227 = vst.msk [vmem:[%s444_s2 + $0x20] sm:$0xff] %vm222_vm1, %v175_v22  ;;  %235 = vst.msk [vmem:[%s444_s2 + $0x60] sm:$0xff] %vm222_vm1, %v207_v23 }
  0xde   :  { %v291_v24 = vpop.f32.mrf.mxu0  ;;  %v299_v25 = vpop.f32.mrf.mxu1 }
  0xdf   :  { %230 = vst.msk [vmem:[%s444_s2 + $0x38] sm:$0xff] %vm222_vm1, %v291_v24 }
  0xe0   :  { %239 = vst.msk [vmem:[%s444_s2 + $0x78] sm:$0x3f] %vm238_vm2, %v299_v25  ;;  %v178_v26 = vpop.f32.mrf.mxu0  ;;  %v210_v27 = vpop.f32.mrf.mxu1 }
  0xe1   :  { %228 = vst.msk [vmem:[%s444_s2 + $0x28] sm:$0xff] %vm222_vm1, %v178_v26  ;;  %236 = vst.msk [vmem:[%s444_s2 + $0x68] sm:$0xff] %vm222_vm1, %v210_v27 }

// kernel: spex_plus_forward.101
= control target key start
LH: loop header
LB: loop body
LE: loop exit
PB: predicated region body
PF: predicated region fallthrough
CT: control target
= control target key end

     0   :  { %v168_v1 = vmov 0.0   ;;  %vm169_vm0 = vmmov 0   ;;  %s212_s0 = inlined_call_operand.vmem [shape: bf16[2,64], index: 0, kind: input, shape index: {}]   ;;  %s213_s1 = inlined_call_operand.vmem [shape: bf16[64,16], index: 1, kind: input, shape index: {}]   ;;  %s214_s2 = inlined_call_operand.vmem [shape: f32[1,16], index: 2, kind: input, shape index: {}]   ;;  %s215_s3 = inlined_call_operand.hbm [shape: f32[2,16], index: 3, kind: output, shape index: {}]  }
   0x1   :  { %v142_v0 = vld [vmem:[%s213_s1 + $0x18] sm:$0xff]   ;;  %127 = vmatprep.subr.bf16.mxu0 %v168_v1  ;;  %v143_v2 = vld [vmem:[%s213_s1 + $0x10] sm:$0xff]   ;;  %135 = vmatprep.mubr.msk.bf16.mxu0 %vm169_vm0, %v168_v1 }
   0x2   :  { %128 = vmatpush3.bf16.msra.mxu0 %v142_v0 }
   0x3   :  { %129 = vmatprep.subr.bf16.mxu0 %v168_v1 }
   0x4   :  { %8 = vsyncpa [#allocation3], 0  ;;  %v144_v3 = vld [vmem:[%s213_s1 + $0x8] sm:$0xff]   ;;  %v145_v4 = vld [vmem:[%s213_s1] sm:$0xff]   ;;  %vm56_vm1 = vcmask 523264   ;;  %s170_s24 = smov [#allocation2]  }
   0x5   :  { %v16_v5 = vld [vmem:[%s212_s0] sm:$0x1]  ;;  %s108_s25 = sshll.u32 %s170_s24, 4  ;;  %vm100_vm2 = vcmask 123904   ;;  %s109_s25 = int_to_ptr.vmem [resolvable:$true] %s108_s25 }
   0x6   :  { %130 = vmatpush3.bf16.msra.mxu0 %v143_v2  ;;  %v116_v6 = vld [vmem:[%s214_s2] ss:$0 sm:$0xff]  ;;  %s146_s1 = scalar_lea.vmem %s109_s25, 32  ;;  %p151_p1 = scmp.lt.s32.totalorder %s109_s25, %s109_s25 }
   0x7   :  { %131 = vmatprep.subr.bf16.mxu0 %v168_v1  ;;  %p147_p0 = scmp.ne.s32.totalorder %s109_s25, %s146_s1  ;;  %p152_p2 = scmp.lt.s32.totalorder %s146_s1, %s146_s1 }
   0x9   :  { %p153_p3 = por %p152_p2, %p151_p1 }
   0xa   :  { %132 = vmatpush3.bf16.msra.mxu0 %v144_v3 }
   0xb   :  { %133 = vmatprep.subr.bf16.mxu0 %v168_v1  ;;  %p154_p4 = pnand %p153_p3, %p147_p0 }
   0xe   :  { %134 = vmatpush3.bf16.msra.mxu0 %v145_v4 }
  0x11   :  { %136 = vmatmul.mubr.msk.bf16.vlgmr.msra.gmra.mxu0 %vm56_vm1, %v16_v5 }
  0xd1   :  { %v94_v7 = vpop.f32.mrf.mxu0 }
  0xd2   :  { %v95_v8 = vadd.f32 %v116_v6, %v94_v7 }
  0xd3   :  { %v137_v9 = vpop.f32.mrf.mxu0 }
  0xd4   :  { %101 = vst.msk [vmem:[#allocation2] sm:$0x3] %vm100_vm2, %v95_v8 }
  0xd5   :  { %v97_v10 = vpop.f32.mrf.mxu0 }
  0xd6   :  { %157 = shalt.err (!%p154_p4)
}
  0xd7   :  { %111 = dma.vmem_to_hbm [thread:$0]  %s109_s25, 32, %s215_s3, [#allocation3]   ;;  %v138_v11 = vpop.f32.mrf.mxu0 }
  0xd8   :  { %166 = dma.done.wait [#allocation3], 32  }
  0xd9   :  { %167 = vsyncadd [#allocation3], 4294967264 }
  0xda   :  { %115 = vsyncpa [#allocation3], 1 }

</bundles_post_ra>
